<compile_context>
chip_gen: v5e
topology: v5e:2x2
jax: 0.10.0
libtpu: 0.0.40
codegen_flags: <defaults>
</compile_context>

<pallas_src>
import jax
import jax.numpy as jnp
from jax.experimental import pallas as pl
from jax.experimental.pallas import tpu as pltpu

H_IN = 28                 # input spatial size implied by fc1 (9216 = 64*12*12)
KW = 3                    # conv kernel size
C1, C2 = 32, 64
H1 = H_IN - 2             # 26 after conv1 (3x3, stride 1, valid)
H2 = H1 - 2               # 24 after conv2
HP = H2 // 2              # 12 after max_pool2d(2)
FEAT = C2 * HP * HP       # 9216
HID = 128
NCLS = 10
NPAD = 128                # fc2 / log_softmax computed in a 128-lane padded slab
BN_EPS = 1e-5

C1_LANES = H1 * C1        # 832  conv1 output lanes  (w * 32 + cin)
W1T_K = KW * H_IN         # 84   conv1 Toeplitz contraction dim
W2T_K = 6 * C1            # 192  conv2 banded-block contraction dim
W2T_N = 4 * C2            # 256  conv2 banded-block output lanes
NGRP = H2 // 4            # 6    conv2 output-column groups (4 columns each)
POOL_LANES = 2 * C2       # 128  lanes after W-pooling (2 pooled cols x 64 ch)
ROW_FEAT = HP * C2        # 768  pooled features per output row

B_CONV_MAX = 32                    # max images per fused grid step
VMEM_LIMIT = 48 * 1024 * 1024      # >32 MiB default, still <= v7x's 64 MiB


def _convnet_kernel(x_ref, w1t_ref, b1t_ref, w2t_ref, b2t_ref,
                    wf1_ref, bf1_ref, wf2_ref, bf2_ref, o_ref):
    # x_ref:   (B, 28, 28) bf16
    # w1t_ref: (84, 832) bf16 banded conv1 weight     b1t_ref: (1, 832) f32
    # w2t_ref: (3, 192, 256) bf16 banded conv2 blocks b2t_ref: (1, 256) f32
    # wf1_ref: (12, 768, 128) bf16 fc1 (BN folded)    bf1_ref: (1, 128) f32
    # wf2_ref: (128, 128) bf16 zero-padded fc2        bf2_ref: (1, 128) f32 (-1e30 pads)
    # o_ref:   (B, 1, 128) f32 log-softmax slab (cols >= 10 are junk)
    B = x_ref.shape[0]
    xb = x_ref[...]                                            # (B, 28, 28)

    # ---- conv1 + ReLU: one banded ("Toeplitz") MXU matmul, W kept in lanes.
    lhs1 = jnp.concatenate(
        [xb[:, dy:dy + H1, :].reshape(B * H1, H_IN) for dy in range(KW)],
        axis=1)                                                # (B*26, 84)
    acc1 = jnp.dot(lhs1, w1t_ref[...], preferred_element_type=jnp.float32)
    c1 = jnp.maximum(acc1 + b1t_ref[...], 0.0).astype(jnp.bfloat16)
    c1 = c1.reshape(B, H1, C1_LANES)                           # lanes = w*32 + cin

    # ---- conv2 + ReLU + 2x2 max-pool, in 6 groups of 4 output columns.
    phs = []
    for g in range(NGRP):
        acc2 = jnp.zeros((B * H2, W2T_N), jnp.float32)
        for dy in range(KW):
            lhs2 = c1[:, dy:dy + H2,
                      4 * C1 * g:4 * C1 * g + W2T_K].reshape(B * H2, W2T_K)
            acc2 = acc2 + jnp.dot(lhs2, w2t_ref[dy],
                                  preferred_element_type=jnp.float32)
        a = jnp.maximum(acc2 + b2t_ref[...], 0.0)              # (B*24, 256)
        # W-pool: weight columns were permuted so pooling partners are exactly
        # 128 lanes apart -> one aligned lane-slice max, no relayout.
        pw = jnp.maximum(a[:, :POOL_LANES], a[:, POOL_LANES:])  # (B*24, 128)
        # H-pool over output-row pairs (dropout1 is identity in eval mode).
        ph = jnp.max(pw.reshape(B, HP, 2, POOL_LANES), axis=2)  # (B, 12, 128)
        phs.append(ph.astype(jnp.bfloat16))

    pooled = jnp.concatenate(phs, axis=2)                      # (B, 12, 768)

    # ---- fc1 (+ folded BatchNorm) against the VMEM-resident bf16 weight,
    #      accumulated row-by-row so no sublane->lane feature reshape is needed.
    h_acc = jnp.zeros((B, HID), jnp.float32)
    for r in range(HP):
        h_acc = h_acc + jnp.dot(pooled[:, r, :], wf1_ref[r],
                                preferred_element_type=jnp.float32)
    h = jnp.maximum(h_acc + bf1_ref[...], 0.0)                 # ReLU; dropout2 = id

    # ---- fc2 + log_softmax in the 128-lane padded slab (pad bias -1e30, f32).
    logits = jnp.dot(h.astype(jnp.bfloat16), wf2_ref[...],
                     preferred_element_type=jnp.float32) + bf2_ref[...]
    m = jnp.max(logits, axis=1, keepdims=True)
    z = logits - m
    lse = jnp.log(jnp.sum(jnp.exp(z), axis=1, keepdims=True))
    o_ref[...] = (z - lse)[:, None, :]


def _batch_tile(n):
    """Largest power-of-two tile <= B_CONV_MAX that still gives >= 2 grid steps
    when n >= 2 (keeps both v7x TensorCores busy for small batches)."""
    t = B_CONV_MAX
    while t > 1 and t * 2 > n:
        t //= 2
    return t


def convnet_forward(x_nchw, prep):
    N = x_nchw.shape[0]
    x = x_nchw[:, 0, :, :].astype(jnp.bfloat16)                # Cin == 1 -> (N,28,28)
    t = _batch_tile(N)
    n_pad = ((N + t - 1) // t) * t
    if n_pad != N:
        x = jnp.pad(x, ((0, n_pad - N), (0, 0), (0, 0)))

    out = pl.pallas_call(
        _convnet_kernel,
        out_shape=jax.ShapeDtypeStruct((n_pad, 1, NPAD), jnp.float32),
        grid=(n_pad // t,),
        in_specs=[
            pl.BlockSpec((t, H_IN, H_IN), lambda i: (i, 0, 0)),
            pl.BlockSpec((W1T_K, C1_LANES), lambda i: (0, 0)),
            pl.BlockSpec((1, C1_LANES), lambda i: (0, 0)),
            pl.BlockSpec((KW, W2T_K, W2T_N), lambda i: (0, 0, 0)),
            pl.BlockSpec((1, W2T_N), lambda i: (0, 0)),
            pl.BlockSpec((HP, ROW_FEAT, HID), lambda i: (0, 0, 0)),
            pl.BlockSpec((1, HID), lambda i: (0, 0)),
            pl.BlockSpec((HID, NPAD), lambda i: (0, 0)),
            pl.BlockSpec((1, NPAD), lambda i: (0, 0)),
        ],
        out_specs=pl.BlockSpec((t, 1, NPAD), lambda i: (i, 0, 0)),
        compiler_params=pltpu.CompilerParams(
            dimension_semantics=("parallel",),
            vmem_limit_bytes=VMEM_LIMIT),
    )(x, prep["w1t"], prep["b1t"], prep["w2t"], prep["b2t"],
      prep["wf1"], prep["bf1"], prep["wf2"], prep["bf2"])

    return out[:N, 0, :NCLS]


def init_params(key):
    # Torch-equivalent parameter layout (fc1 rows ordered for NCHW flatten).
    ks = jax.random.split(key, 8)
    f32 = jnp.float32
    return {
        "w_conv1": 0.2 * jax.random.normal(ks[0], (KW, KW, C1), f32),
        "b_conv1": 0.1 * jax.random.normal(ks[1], (1, C1), f32),
        "w_conv2": 0.05 * jax.random.normal(ks[2], (KW, KW, C1, C2), f32),
        "b_conv2": 0.1 * jax.random.normal(ks[3], (1, C2), f32),
        "w_fc1": 0.02 * jax.random.normal(ks[4], (FEAT, HID), f32),
        "b_fc1": 0.05 * jax.random.normal(ks[5], (1, HID), f32),
        "w_fc2": 0.1 * jax.random.normal(ks[6], (HID, NCLS), f32),
        "b_fc2": 0.05 * jax.random.normal(ks[7], (1, NCLS), f32),
        # BatchNorm1d(128) defaults: gamma=1, beta=0, running mean=0, var=1
        "bn_gamma": jnp.ones((1, HID), f32),
        "bn_beta": jnp.zeros((1, HID), f32),
        "bn_mean": jnp.zeros((1, HID), f32),
        "bn_var": jnp.ones((1, HID), f32),
    }


def prepare_params(params):
    """One-time weight prep (all layout work lives here, not in the kernel):
      * conv1/conv2 are rewritten as banded ("Toeplitz") matrices so both
        convolutions run on the MXU with the W axis kept in the lane dim,
      * conv2's output columns are permuted so 2x2 max-pool partners are 128
        lanes apart (pooling becomes one aligned lane-slice max),
      * eval-mode BatchNorm1d is folded into fc1 (per-column scale + bias),
      * fc1 rows are permuted from PyTorch's NCHW flatten order to the
        kernel's pooled-feature order and split into 12 per-row blocks,
      * fc2 is zero-padded to 128 lanes (pad bias -1e30, kept f32),
      * every MXU operand is cast to bf16."""
    f32 = jnp.float32
    bf16 = jnp.bfloat16

    # conv1 Toeplitz: rows = dy*28 + win, cols = w*32 + cout.
    w1 = params["w_conv1"].astype(f32)                          # (3, 3, 32)
    win = jnp.arange(H_IN)[:, None]
    wout = jnp.arange(H1)[None, :]
    d1 = win - wout                                             # (28, 26)
    m1 = ((d1 >= 0) & (d1 < KW)).astype(f32)
    w1t = w1[:, jnp.clip(d1, 0, KW - 1), :] * m1[None, :, :, None]
    w1t = w1t.reshape(W1T_K, C1_LANES).astype(bf16)             # (84, 832)
    b1t = jnp.tile(params["b_conv1"].reshape(1, C1).astype(f32), (1, H1))

    # conv2 banded blocks (per dy): rows = j*32 + cin (j = local input col
    # 0..5), cols = wl_in*128 + wl_half*64 + cout with local output column
    # wl = 2*wl_half + wl_in  (the pool-partner lane permutation).
    w2 = params["w_conv2"].astype(f32)                          # (3, 3, 32, 64)
    j = jnp.arange(6)[:, None, None]
    wl_in = jnp.arange(2)[None, :, None]
    wl_half = jnp.arange(2)[None, None, :]
    d2 = j - (2 * wl_half + wl_in)                              # (6, 2, 2)
    m2 = ((d2 >= 0) & (d2 < KW)).astype(f32)
    w2g = w2[:, jnp.clip(d2, 0, KW - 1), :, :] * m2[None, :, :, :, None, None]
    w2t = jnp.transpose(w2g, (0, 1, 4, 2, 3, 5)).reshape(KW, W2T_K, W2T_N)
    w2t = w2t.astype(bf16)                                      # (3, 192, 256)
    b2t = jnp.tile(params["b_conv2"].reshape(1, C2).astype(f32), (1, 4))

    # fc1 with BatchNorm folded; rows permuted from the NCHW flatten order to
    # the kernel's (pooled_row, pooled_col, channel) order, split per row.
    s = params["bn_gamma"].astype(f32) * jax.lax.rsqrt(
        params["bn_var"].astype(f32) + BN_EPS)                  # (1, 128)
    bn_shift = params["bn_beta"].astype(f32) - params["bn_mean"].astype(f32) * s
    i2 = jnp.arange(HP)[:, None, None]
    wp = jnp.arange(HP)[None, :, None]
    co = jnp.arange(C2)[None, None, :]
    rows = (co * (HP * HP) + i2 * HP + wp).reshape(-1)          # NCHW flat index
    wf1 = (params["w_fc1"].astype(f32)[rows] * s).reshape(HP, ROW_FEAT, HID)
    wf1 = wf1.astype(bf16)                                      # (12, 768, 128)
    bf1 = params["b_fc1"].astype(f32) * s + bn_shift            # (1, 128)

    # fc2 padded to 128 lanes; pad bias is a large negative kept in f32.
    wf2 = jnp.zeros((HID, NPAD), f32).at[:, :NCLS].set(
        params["w_fc2"].astype(f32)).astype(bf16)
    bf2 = jnp.full((1, NPAD), -1e30, f32).at[:, :NCLS].set(
        params["b_fc2"].astype(f32))

    return {"w1t": w1t, "b1t": b1t, "w2t": w2t, "b2t": b2t,
            "wf1": wf1, "bf1": bf1, "wf2": wf2, "bf2": bf2}


def convnet_reference(x_nchw, params):
    """Plain-JAX eval-mode reference of the PyTorch ConvNet forward pass."""
    x = x_nchw.astype(jnp.float32)
    w1 = jnp.transpose(params["w_conv1"], (2, 0, 1))[:, None]   # (32,1,3,3) OIHW
    y = jax.lax.conv_general_dilated(x, w1, (1, 1), "VALID",
                                     dimension_numbers=("NCHW", "OIHW", "NCHW"))
    y = jax.nn.relu(y + params["b_conv1"].reshape(1, C1, 1, 1))
    w2 = jnp.transpose(params["w_conv2"], (3, 2, 0, 1))         # (64,32,3,3) OIHW
    y = jax.lax.conv_general_dilated(y, w2, (1, 1), "VALID",
                                     dimension_numbers=("NCHW", "OIHW", "NCHW"))
    y = jax.nn.relu(y + params["b_conv2"].reshape(1, C2, 1, 1))
    y = y.reshape(y.shape[0], C2, HP, 2, HP, 2).max(axis=(3, 5))
    f = y.reshape(y.shape[0], FEAT)                             # NCHW flatten
    h = f @ params["w_fc1"] + params["b_fc1"]
    s = params["bn_gamma"] * jax.lax.rsqrt(params["bn_var"] + BN_EPS)
    h = (h - params["bn_mean"]) * s + params["bn_beta"]
    h = jax.nn.relu(h)
    logits = h @ params["w_fc2"] + params["b_fc2"]
    return jax.nn.log_softmax(logits, axis=1)


if __name__ == "__main__":
    key = jax.random.PRNGKey(0)
    pkey, xkey = jax.random.split(key)
    params = init_params(pkey)
    prep = prepare_params(params)

    x = jax.random.normal(xkey, (2, 1, H_IN, H_IN), jnp.float32)  # NCHW

    fwd = jax.jit(lambda inp: convnet_forward(inp, prep))
    out = fwd(x)
    jax.block_until_ready(out)

    ref = convnet_reference(x, params)

    assert out.shape == (2, NCLS), out.shape
    assert bool(jnp.all(jnp.isfinite(out)))
    # log_softmax rows exponentiate to probability distributions.
    assert bool(jnp.allclose(jnp.exp(out).sum(axis=1), 1.0, atol=1e-4))
    # bf16 matmul operands -> loose tolerance vs. the f32 reference.
    assert bool(jnp.max(jnp.abs(out - ref)) < 0.3), float(jnp.max(jnp.abs(out - ref)))
    print("KERNEL_OK")
</pallas_src>

<mosaic_0001>
module attributes {stable_mosaic.version = 11 : i64} {
  func.func @_convnet_kernel(%arg0: i32, %arg1: memref<1x28x28xbf16, #tpu.memory_space<vmem>>, %arg2: memref<84x832xbf16, #tpu.memory_space<vmem>>, %arg3: memref<1x832xf32, #tpu.memory_space<vmem>>, %arg4: memref<3x192x256xbf16, #tpu.memory_space<vmem>>, %arg5: memref<1x256xf32, #tpu.memory_space<vmem>>, %arg6: memref<12x768x128xbf16, #tpu.memory_space<vmem>>, %arg7: memref<1x128xf32, #tpu.memory_space<vmem>>, %arg8: memref<128x128xbf16, #tpu.memory_space<vmem>>, %arg9: memref<1x128xf32, #tpu.memory_space<vmem>>, %arg10: memref<1x1x128xf32, #tpu.memory_space<vmem>>) attributes {dimension_semantics = [#tpu.dimension_semantics<parallel>], iteration_bounds = array<i64: 2>, scalar_prefetch = 0 : i64, scratch_operands = 0 : i64, tpu.core_type = #tpu.core_type<tc>, window_params = [{transform_indices = @transform_0, window_bounds = array<i64: 1, 28, 28>}, {pipeline_mode = #tpu.pipeline_mode<synchronous>, transform_indices = @transform_1, window_bounds = array<i64: 84, 832>}, {pipeline_mode = #tpu.pipeline_mode<synchronous>, transform_indices = @transform_2, window_bounds = array<i64: 1, 832>}, {pipeline_mode = #tpu.pipeline_mode<synchronous>, transform_indices = @transform_3, window_bounds = array<i64: 3, 192, 256>}, {pipeline_mode = #tpu.pipeline_mode<synchronous>, transform_indices = @transform_4, window_bounds = array<i64: 1, 256>}, {pipeline_mode = #tpu.pipeline_mode<synchronous>, transform_indices = @transform_5, window_bounds = array<i64: 12, 768, 128>}, {pipeline_mode = #tpu.pipeline_mode<synchronous>, transform_indices = @transform_6, window_bounds = array<i64: 1, 128>}, {pipeline_mode = #tpu.pipeline_mode<synchronous>, transform_indices = @transform_7, window_bounds = array<i64: 128, 128>}, {pipeline_mode = #tpu.pipeline_mode<synchronous>, transform_indices = @transform_8, window_bounds = array<i64: 1, 128>}, {transform_indices = @transform_9, window_bounds = array<i64: 1, 1, 128>}]} {
    %c0 = arith.constant 0 : index
    %c0_0 = arith.constant 0 : index
    %c0_1 = arith.constant 0 : index
    %0 = vector.load %arg1[%c0, %c0_0, %c0_1] : memref<1x28x28xbf16, #tpu.memory_space<vmem>>, vector<1x28x28xbf16>
    %1 = vector.extract_strided_slice %0 {offsets = [0, 0, 0], sizes = [1, 26, 28], strides = [1, 1, 1]} : vector<1x28x28xbf16> to vector<1x26x28xbf16>
    %2 = vector.shape_cast %1 : vector<1x26x28xbf16> to vector<26x28xbf16>
    %3 = vector.extract_strided_slice %0 {offsets = [0, 1, 0], sizes = [1, 26, 28], strides = [1, 1, 1]} : vector<1x28x28xbf16> to vector<1x26x28xbf16>
    %4 = vector.shape_cast %3 : vector<1x26x28xbf16> to vector<26x28xbf16>
    %5 = vector.extract_strided_slice %0 {offsets = [0, 2, 0], sizes = [1, 26, 28], strides = [1, 1, 1]} : vector<1x28x28xbf16> to vector<1x26x28xbf16>
    %6 = vector.shape_cast %5 : vector<1x26x28xbf16> to vector<26x28xbf16>
    %7 = tpu.concatenate %2, %4, %6 in 1 : vector<26x28xbf16>, vector<26x28xbf16>, vector<26x28xbf16> -> vector<26x84xbf16>
    %c0_2 = arith.constant 0 : index
    %c0_3 = arith.constant 0 : index
    %8 = vector.load %arg2[%c0_2, %c0_3] : memref<84x832xbf16, #tpu.memory_space<vmem>>, vector<84x832xbf16>
    %cst = arith.constant dense<0.000000e+00> : vector<26x832xf32>
    %9 = tpu.matmul %7, %8, %cst {dimension_numbers = #tpu.dot_dimension_numbers<[1], [0], [0], [1], [0, 0, 1, 1], [], []>} : vector<26x84xbf16>, vector<84x832xbf16>, vector<26x832xf32> -> vector<26x832xf32>
    %c0_4 = arith.constant 0 : index
    %c0_5 = arith.constant 0 : index
    %10 = vector.load %arg3[%c0_4, %c0_5] : memref<1x832xf32, #tpu.memory_space<vmem>>, vector<1x832xf32>
    %11 = vector.broadcast %10 : vector<1x832xf32> to vector<26x832xf32>
    %12 = arith.addf %9, %11 : vector<26x832xf32>
    %cst_6 = arith.constant 0.000000e+00 : f32
    %13 = vector.broadcast %cst_6 : f32 to vector<26x832xf32>
    %14 = arith.maximumf %12, %13 : vector<26x832xf32>
    %15 = arith.truncf %14 : vector<26x832xf32> to vector<26x832xbf16>
    %16 = vector.shape_cast %15 : vector<26x832xbf16> to vector<1x26x832xbf16>
    %cst_7 = arith.constant 0.000000e+00 : f32
    %17 = vector.broadcast %cst_7 : f32 to vector<24x256xf32>
    %18 = vector.extract_strided_slice %16 {offsets = [0, 0, 0], sizes = [1, 24, 192], strides = [1, 1, 1]} : vector<1x26x832xbf16> to vector<1x24x192xbf16>
    %19 = vector.shape_cast %18 : vector<1x24x192xbf16> to vector<24x192xbf16>
    %c0_8 = arith.constant 0 : index
    %c0_9 = arith.constant 0 : index
    %c0_10 = arith.constant 0 : index
    %20 = vector.load %arg4[%c0_8, %c0_9, %c0_10] : memref<3x192x256xbf16, #tpu.memory_space<vmem>>, vector<1x192x256xbf16>
    %21 = vector.shape_cast %20 : vector<1x192x256xbf16> to vector<192x256xbf16>
    %cst_11 = arith.constant dense<0.000000e+00> : vector<24x256xf32>
    %22 = tpu.matmul %19, %21, %cst_11 {dimension_numbers = #tpu.dot_dimension_numbers<[1], [0], [0], [1], [0, 0, 1, 1], [], []>} : vector<24x192xbf16>, vector<192x256xbf16>, vector<24x256xf32> -> vector<24x256xf32>
    %23 = arith.addf %17, %22 : vector<24x256xf32>
    %24 = vector.extract_strided_slice %16 {offsets = [0, 1, 0], sizes = [1, 24, 192], strides = [1, 1, 1]} : vector<1x26x832xbf16> to vector<1x24x192xbf16>
    %25 = vector.shape_cast %24 : vector<1x24x192xbf16> to vector<24x192xbf16>
    %c1 = arith.constant 1 : index
    %c0_12 = arith.constant 0 : index
    %c0_13 = arith.constant 0 : index
    %26 = vector.load %arg4[%c1, %c0_12, %c0_13] : memref<3x192x256xbf16, #tpu.memory_space<vmem>>, vector<1x192x256xbf16>
    %27 = vector.shape_cast %26 : vector<1x192x256xbf16> to vector<192x256xbf16>
    %cst_14 = arith.constant dense<0.000000e+00> : vector<24x256xf32>
    %28 = tpu.matmul %25, %27, %cst_14 {dimension_numbers = #tpu.dot_dimension_numbers<[1], [0], [0], [1], [0, 0, 1, 1], [], []>} : vector<24x192xbf16>, vector<192x256xbf16>, vector<24x256xf32> -> vector<24x256xf32>
    %29 = arith.addf %23, %28 : vector<24x256xf32>
    %30 = vector.extract_strided_slice %16 {offsets = [0, 2, 0], sizes = [1, 24, 192], strides = [1, 1, 1]} : vector<1x26x832xbf16> to vector<1x24x192xbf16>
    %31 = vector.shape_cast %30 : vector<1x24x192xbf16> to vector<24x192xbf16>
    %c2 = arith.constant 2 : index
    %c0_15 = arith.constant 0 : index
    %c0_16 = arith.constant 0 : index
    %32 = vector.load %arg4[%c2, %c0_15, %c0_16] : memref<3x192x256xbf16, #tpu.memory_space<vmem>>, vector<1x192x256xbf16>
    %33 = vector.shape_cast %32 : vector<1x192x256xbf16> to vector<192x256xbf16>
    %cst_17 = arith.constant dense<0.000000e+00> : vector<24x256xf32>
    %34 = tpu.matmul %31, %33, %cst_17 {dimension_numbers = #tpu.dot_dimension_numbers<[1], [0], [0], [1], [0, 0, 1, 1], [], []>} : vector<24x192xbf16>, vector<192x256xbf16>, vector<24x256xf32> -> vector<24x256xf32>
    %35 = arith.addf %29, %34 : vector<24x256xf32>
    %c0_18 = arith.constant 0 : index
    %c0_19 = arith.constant 0 : index
    %36 = vector.load %arg5[%c0_18, %c0_19] : memref<1x256xf32, #tpu.memory_space<vmem>>, vector<1x256xf32>
    %37 = vector.broadcast %36 : vector<1x256xf32> to vector<24x256xf32>
    %38 = arith.addf %35, %37 : vector<24x256xf32>
    %cst_20 = arith.constant 0.000000e+00 : f32
    %39 = vector.broadcast %cst_20 : f32 to vector<24x256xf32>
    %40 = arith.maximumf %38, %39 : vector<24x256xf32>
    %41 = vector.extract_strided_slice %40 {offsets = [0, 0], sizes = [24, 128], strides = [1, 1]} : vector<24x256xf32> to vector<24x128xf32>
    %42 = vector.extract_strided_slice %40 {offsets = [0, 128], sizes = [24, 128], strides = [1, 1]} : vector<24x256xf32> to vector<24x128xf32>
    %43 = arith.maximumf %41, %42 : vector<24x128xf32>
    %44 = vector.shape_cast %43 : vector<24x128xf32> to vector<1x12x2x128xf32>
    %cst_21 = arith.constant dense<0xFF800000> : vector<1x12x128xf32>
    %45 = vector.multi_reduction <maximumf>, %44, %cst_21 [2] : vector<1x12x2x128xf32> to vector<1x12x128xf32>
    %46 = arith.truncf %45 : vector<1x12x128xf32> to vector<1x12x128xbf16>
    %cst_22 = arith.constant 0.000000e+00 : f32
    %47 = vector.broadcast %cst_22 : f32 to vector<24x256xf32>
    %48 = vector.extract_strided_slice %16 {offsets = [0, 0, 128], sizes = [1, 24, 192], strides = [1, 1, 1]} : vector<1x26x832xbf16> to vector<1x24x192xbf16>
    %49 = vector.shape_cast %48 : vector<1x24x192xbf16> to vector<24x192xbf16>
    %c0_23 = arith.constant 0 : index
    %c0_24 = arith.constant 0 : index
    %c0_25 = arith.constant 0 : index
    %50 = vector.load %arg4[%c0_23, %c0_24, %c0_25] : memref<3x192x256xbf16, #tpu.memory_space<vmem>>, vector<1x192x256xbf16>
    %51 = vector.shape_cast %50 : vector<1x192x256xbf16> to vector<192x256xbf16>
    %cst_26 = arith.constant dense<0.000000e+00> : vector<24x256xf32>
    %52 = tpu.matmul %49, %51, %cst_26 {dimension_numbers = #tpu.dot_dimension_numbers<[1], [0], [0], [1], [0, 0, 1, 1], [], []>} : vector<24x192xbf16>, vector<192x256xbf16>, vector<24x256xf32> -> vector<24x256xf32>
    %53 = arith.addf %47, %52 : vector<24x256xf32>
    %54 = vector.extract_strided_slice %16 {offsets = [0, 1, 128], sizes = [1, 24, 192], strides = [1, 1, 1]} : vector<1x26x832xbf16> to vector<1x24x192xbf16>
    %55 = vector.shape_cast %54 : vector<1x24x192xbf16> to vector<24x192xbf16>
    %c1_27 = arith.constant 1 : index
    %c0_28 = arith.constant 0 : index
    %c0_29 = arith.constant 0 : index
    %56 = vector.load %arg4[%c1_27, %c0_28, %c0_29] : memref<3x192x256xbf16, #tpu.memory_space<vmem>>, vector<1x192x256xbf16>
    %57 = vector.shape_cast %56 : vector<1x192x256xbf16> to vector<192x256xbf16>
    %cst_30 = arith.constant dense<0.000000e+00> : vector<24x256xf32>
    %58 = tpu.matmul %55, %57, %cst_30 {dimension_numbers = #tpu.dot_dimension_numbers<[1], [0], [0], [1], [0, 0, 1, 1], [], []>} : vector<24x192xbf16>, vector<192x256xbf16>, vector<24x256xf32> -> vector<24x256xf32>
    %59 = arith.addf %53, %58 : vector<24x256xf32>
    %60 = vector.extract_strided_slice %16 {offsets = [0, 2, 128], sizes = [1, 24, 192], strides = [1, 1, 1]} : vector<1x26x832xbf16> to vector<1x24x192xbf16>
    %61 = vector.shape_cast %60 : vector<1x24x192xbf16> to vector<24x192xbf16>
    %c2_31 = arith.constant 2 : index
    %c0_32 = arith.constant 0 : index
    %c0_33 = arith.constant 0 : index
    %62 = vector.load %arg4[%c2_31, %c0_32, %c0_33] : memref<3x192x256xbf16, #tpu.memory_space<vmem>>, vector<1x192x256xbf16>
    %63 = vector.shape_cast %62 : vector<1x192x256xbf16> to vector<192x256xbf16>
    %cst_34 = arith.constant dense<0.000000e+00> : vector<24x256xf32>
    %64 = tpu.matmul %61, %63, %cst_34 {dimension_numbers = #tpu.dot_dimension_numbers<[1], [0], [0], [1], [0, 0, 1, 1], [], []>} : vector<24x192xbf16>, vector<192x256xbf16>, vector<24x256xf32> -> vector<24x256xf32>
    %65 = arith.addf %59, %64 : vector<24x256xf32>
    %c0_35 = arith.constant 0 : index
    %c0_36 = arith.constant 0 : index
    %66 = vector.load %arg5[%c0_35, %c0_36] : memref<1x256xf32, #tpu.memory_space<vmem>>, vector<1x256xf32>
    %67 = vector.broadcast %66 : vector<1x256xf32> to vector<24x256xf32>
    %68 = arith.addf %65, %67 : vector<24x256xf32>
    %cst_37 = arith.constant 0.000000e+00 : f32
    %69 = vector.broadcast %cst_37 : f32 to vector<24x256xf32>
    %70 = arith.maximumf %68, %69 : vector<24x256xf32>
    %71 = vector.extract_strided_slice %70 {offsets = [0, 0], sizes = [24, 128], strides = [1, 1]} : vector<24x256xf32> to vector<24x128xf32>
    %72 = vector.extract_strided_slice %70 {offsets = [0, 128], sizes = [24, 128], strides = [1, 1]} : vector<24x256xf32> to vector<24x128xf32>
    %73 = arith.maximumf %71, %72 : vector<24x128xf32>
    %74 = vector.shape_cast %73 : vector<24x128xf32> to vector<1x12x2x128xf32>
    %cst_38 = arith.constant dense<0xFF800000> : vector<1x12x128xf32>
    %75 = vector.multi_reduction <maximumf>, %74, %cst_38 [2] : vector<1x12x2x128xf32> to vector<1x12x128xf32>
    %76 = arith.truncf %75 : vector<1x12x128xf32> to vector<1x12x128xbf16>
    %cst_39 = arith.constant 0.000000e+00 : f32
    %77 = vector.broadcast %cst_39 : f32 to vector<24x256xf32>
    %78 = vector.extract_strided_slice %16 {offsets = [0, 0, 256], sizes = [1, 24, 192], strides = [1, 1, 1]} : vector<1x26x832xbf16> to vector<1x24x192xbf16>
    %79 = vector.shape_cast %78 : vector<1x24x192xbf16> to vector<24x192xbf16>
    %c0_40 = arith.constant 0 : index
    %c0_41 = arith.constant 0 : index
    %c0_42 = arith.constant 0 : index
    %80 = vector.load %arg4[%c0_40, %c0_41, %c0_42] : memref<3x192x256xbf16, #tpu.memory_space<vmem>>, vector<1x192x256xbf16>
    %81 = vector.shape_cast %80 : vector<1x192x256xbf16> to vector<192x256xbf16>
    %cst_43 = arith.constant dense<0.000000e+00> : vector<24x256xf32>
    %82 = tpu.matmul %79, %81, %cst_43 {dimension_numbers = #tpu.dot_dimension_numbers<[1], [0], [0], [1], [0, 0, 1, 1], [], []>} : vector<24x192xbf16>, vector<192x256xbf16>, vector<24x256xf32> -> vector<24x256xf32>
    %83 = arith.addf %77, %82 : vector<24x256xf32>
    %84 = vector.extract_strided_slice %16 {offsets = [0, 1, 256], sizes = [1, 24, 192], strides = [1, 1, 1]} : vector<1x26x832xbf16> to vector<1x24x192xbf16>
    %85 = vector.shape_cast %84 : vector<1x24x192xbf16> to vector<24x192xbf16>
    %c1_44 = arith.constant 1 : index
    %c0_45 = arith.constant 0 : index
    %c0_46 = arith.constant 0 : index
    %86 = vector.load %arg4[%c1_44, %c0_45, %c0_46] : memref<3x192x256xbf16, #tpu.memory_space<vmem>>, vector<1x192x256xbf16>
    %87 = vector.shape_cast %86 : vector<1x192x256xbf16> to vector<192x256xbf16>
    %cst_47 = arith.constant dense<0.000000e+00> : vector<24x256xf32>
    %88 = tpu.matmul %85, %87, %cst_47 {dimension_numbers = #tpu.dot_dimension_numbers<[1], [0], [0], [1], [0, 0, 1, 1], [], []>} : vector<24x192xbf16>, vector<192x256xbf16>, vector<24x256xf32> -> vector<24x256xf32>
    %89 = arith.addf %83, %88 : vector<24x256xf32>
    %90 = vector.extract_strided_slice %16 {offsets = [0, 2, 256], sizes = [1, 24, 192], strides = [1, 1, 1]} : vector<1x26x832xbf16> to vector<1x24x192xbf16>
    %91 = vector.shape_cast %90 : vector<1x24x192xbf16> to vector<24x192xbf16>
    %c2_48 = arith.constant 2 : index
    %c0_49 = arith.constant 0 : index
    %c0_50 = arith.constant 0 : index
    %92 = vector.load %arg4[%c2_48, %c0_49, %c0_50] : memref<3x192x256xbf16, #tpu.memory_space<vmem>>, vector<1x192x256xbf16>
    %93 = vector.shape_cast %92 : vector<1x192x256xbf16> to vector<192x256xbf16>
    %cst_51 = arith.constant dense<0.000000e+00> : vector<24x256xf32>
    %94 = tpu.matmul %91, %93, %cst_51 {dimension_numbers = #tpu.dot_dimension_numbers<[1], [0], [0], [1], [0, 0, 1, 1], [], []>} : vector<24x192xbf16>, vector<192x256xbf16>, vector<24x256xf32> -> vector<24x256xf32>
    %95 = arith.addf %89, %94 : vector<24x256xf32>
    %c0_52 = arith.constant 0 : index
    %c0_53 = arith.constant 0 : index
    %96 = vector.load %arg5[%c0_52, %c0_53] : memref<1x256xf32, #tpu.memory_space<vmem>>, vector<1x256xf32>
    %97 = vector.broadcast %96 : vector<1x256xf32> to vector<24x256xf32>
    %98 = arith.addf %95, %97 : vector<24x256xf32>
    %cst_54 = arith.constant 0.000000e+00 : f32
    %99 = vector.broadcast %cst_54 : f32 to vector<24x256xf32>
    %100 = arith.maximumf %98, %99 : vector<24x256xf32>
    %101 = vector.extract_strided_slice %100 {offsets = [0, 0], sizes = [24, 128], strides = [1, 1]} : vector<24x256xf32> to vector<24x128xf32>
    %102 = vector.extract_strided_slice %100 {offsets = [0, 128], sizes = [24, 128], strides = [1, 1]} : vector<24x256xf32> to vector<24x128xf32>
    %103 = arith.maximumf %101, %102 : vector<24x128xf32>
    %104 = vector.shape_cast %103 : vector<24x128xf32> to vector<1x12x2x128xf32>
    %cst_55 = arith.constant dense<0xFF800000> : vector<1x12x128xf32>
    %105 = vector.multi_reduction <maximumf>, %104, %cst_55 [2] : vector<1x12x2x128xf32> to vector<1x12x128xf32>
    %106 = arith.truncf %105 : vector<1x12x128xf32> to vector<1x12x128xbf16>
    %cst_56 = arith.constant 0.000000e+00 : f32
    %107 = vector.broadcast %cst_56 : f32 to vector<24x256xf32>
    %108 = vector.extract_strided_slice %16 {offsets = [0, 0, 384], sizes = [1, 24, 192], strides = [1, 1, 1]} : vector<1x26x832xbf16> to vector<1x24x192xbf16>
    %109 = vector.shape_cast %108 : vector<1x24x192xbf16> to vector<24x192xbf16>
    %c0_57 = arith.constant 0 : index
    %c0_58 = arith.constant 0 : index
    %c0_59 = arith.constant 0 : index
    %110 = vector.load %arg4[%c0_57, %c0_58, %c0_59] : memref<3x192x256xbf16, #tpu.memory_space<vmem>>, vector<1x192x256xbf16>
    %111 = vector.shape_cast %110 : vector<1x192x256xbf16> to vector<192x256xbf16>
    %cst_60 = arith.constant dense<0.000000e+00> : vector<24x256xf32>
    %112 = tpu.matmul %109, %111, %cst_60 {dimension_numbers = #tpu.dot_dimension_numbers<[1], [0], [0], [1], [0, 0, 1, 1], [], []>} : vector<24x192xbf16>, vector<192x256xbf16>, vector<24x256xf32> -> vector<24x256xf32>
    %113 = arith.addf %107, %112 : vector<24x256xf32>
    %114 = vector.extract_strided_slice %16 {offsets = [0, 1, 384], sizes = [1, 24, 192], strides = [1, 1, 1]} : vector<1x26x832xbf16> to vector<1x24x192xbf16>
    %115 = vector.shape_cast %114 : vector<1x24x192xbf16> to vector<24x192xbf16>
    %c1_61 = arith.constant 1 : index
    %c0_62 = arith.constant 0 : index
    %c0_63 = arith.constant 0 : index
    %116 = vector.load %arg4[%c1_61, %c0_62, %c0_63] : memref<3x192x256xbf16, #tpu.memory_space<vmem>>, vector<1x192x256xbf16>
    %117 = vector.shape_cast %116 : vector<1x192x256xbf16> to vector<192x256xbf16>
    %cst_64 = arith.constant dense<0.000000e+00> : vector<24x256xf32>
    %118 = tpu.matmul %115, %117, %cst_64 {dimension_numbers = #tpu.dot_dimension_numbers<[1], [0], [0], [1], [0, 0, 1, 1], [], []>} : vector<24x192xbf16>, vector<192x256xbf16>, vector<24x256xf32> -> vector<24x256xf32>
    %119 = arith.addf %113, %118 : vector<24x256xf32>
    %120 = vector.extract_strided_slice %16 {offsets = [0, 2, 384], sizes = [1, 24, 192], strides = [1, 1, 1]} : vector<1x26x832xbf16> to vector<1x24x192xbf16>
    %121 = vector.shape_cast %120 : vector<1x24x192xbf16> to vector<24x192xbf16>
    %c2_65 = arith.constant 2 : index
    %c0_66 = arith.constant 0 : index
    %c0_67 = arith.constant 0 : index
    %122 = vector.load %arg4[%c2_65, %c0_66, %c0_67] : memref<3x192x256xbf16, #tpu.memory_space<vmem>>, vector<1x192x256xbf16>
    %123 = vector.shape_cast %122 : vector<1x192x256xbf16> to vector<192x256xbf16>
    %cst_68 = arith.constant dense<0.000000e+00> : vector<24x256xf32>
    %124 = tpu.matmul %121, %123, %cst_68 {dimension_numbers = #tpu.dot_dimension_numbers<[1], [0], [0], [1], [0, 0, 1, 1], [], []>} : vector<24x192xbf16>, vector<192x256xbf16>, vector<24x256xf32> -> vector<24x256xf32>
    %125 = arith.addf %119, %124 : vector<24x256xf32>
    %c0_69 = arith.constant 0 : index
    %c0_70 = arith.constant 0 : index
    %126 = vector.load %arg5[%c0_69, %c0_70] : memref<1x256xf32, #tpu.memory_space<vmem>>, vector<1x256xf32>
    %127 = vector.broadcast %126 : vector<1x256xf32> to vector<24x256xf32>
    %128 = arith.addf %125, %127 : vector<24x256xf32>
    %cst_71 = arith.constant 0.000000e+00 : f32
    %129 = vector.broadcast %cst_71 : f32 to vector<24x256xf32>
    %130 = arith.maximumf %128, %129 : vector<24x256xf32>
    %131 = vector.extract_strided_slice %130 {offsets = [0, 0], sizes = [24, 128], strides = [1, 1]} : vector<24x256xf32> to vector<24x128xf32>
    %132 = vector.extract_strided_slice %130 {offsets = [0, 128], sizes = [24, 128], strides = [1, 1]} : vector<24x256xf32> to vector<24x128xf32>
    %133 = arith.maximumf %131, %132 : vector<24x128xf32>
    %134 = vector.shape_cast %133 : vector<24x128xf32> to vector<1x12x2x128xf32>
    %cst_72 = arith.constant dense<0xFF800000> : vector<1x12x128xf32>
    %135 = vector.multi_reduction <maximumf>, %134, %cst_72 [2] : vector<1x12x2x128xf32> to vector<1x12x128xf32>
    %136 = arith.truncf %135 : vector<1x12x128xf32> to vector<1x12x128xbf16>
    %cst_73 = arith.constant 0.000000e+00 : f32
    %137 = vector.broadcast %cst_73 : f32 to vector<24x256xf32>
    %138 = vector.extract_strided_slice %16 {offsets = [0, 0, 512], sizes = [1, 24, 192], strides = [1, 1, 1]} : vector<1x26x832xbf16> to vector<1x24x192xbf16>
    %139 = vector.shape_cast %138 : vector<1x24x192xbf16> to vector<24x192xbf16>
    %c0_74 = arith.constant 0 : index
    %c0_75 = arith.constant 0 : index
    %c0_76 = arith.constant 0 : index
    %140 = vector.load %arg4[%c0_74, %c0_75, %c0_76] : memref<3x192x256xbf16, #tpu.memory_space<vmem>>, vector<1x192x256xbf16>
    %141 = vector.shape_cast %140 : vector<1x192x256xbf16> to vector<192x256xbf16>
    %cst_77 = arith.constant dense<0.000000e+00> : vector<24x256xf32>
    %142 = tpu.matmul %139, %141, %cst_77 {dimension_numbers = #tpu.dot_dimension_numbers<[1], [0], [0], [1], [0, 0, 1, 1], [], []>} : vector<24x192xbf16>, vector<192x256xbf16>, vector<24x256xf32> -> vector<24x256xf32>
    %143 = arith.addf %137, %142 : vector<24x256xf32>
    %144 = vector.extract_strided_slice %16 {offsets = [0, 1, 512], sizes = [1, 24, 192], strides = [1, 1, 1]} : vector<1x26x832xbf16> to vector<1x24x192xbf16>
    %145 = vector.shape_cast %144 : vector<1x24x192xbf16> to vector<24x192xbf16>
    %c1_78 = arith.constant 1 : index
    %c0_79 = arith.constant 0 : index
    %c0_80 = arith.constant 0 : index
    %146 = vector.load %arg4[%c1_78, %c0_79, %c0_80] : memref<3x192x256xbf16, #tpu.memory_space<vmem>>, vector<1x192x256xbf16>
    %147 = vector.shape_cast %146 : vector<1x192x256xbf16> to vector<192x256xbf16>
    %cst_81 = arith.constant dense<0.000000e+00> : vector<24x256xf32>
    %148 = tpu.matmul %145, %147, %cst_81 {dimension_numbers = #tpu.dot_dimension_numbers<[1], [0], [0], [1], [0, 0, 1, 1], [], []>} : vector<24x192xbf16>, vector<192x256xbf16>, vector<24x256xf32> -> vector<24x256xf32>
    %149 = arith.addf %143, %148 : vector<24x256xf32>
    %150 = vector.extract_strided_slice %16 {offsets = [0, 2, 512], sizes = [1, 24, 192], strides = [1, 1, 1]} : vector<1x26x832xbf16> to vector<1x24x192xbf16>
    %151 = vector.shape_cast %150 : vector<1x24x192xbf16> to vector<24x192xbf16>
    %c2_82 = arith.constant 2 : index
    %c0_83 = arith.constant 0 : index
    %c0_84 = arith.constant 0 : index
    %152 = vector.load %arg4[%c2_82, %c0_83, %c0_84] : memref<3x192x256xbf16, #tpu.memory_space<vmem>>, vector<1x192x256xbf16>
    %153 = vector.shape_cast %152 : vector<1x192x256xbf16> to vector<192x256xbf16>
    %cst_85 = arith.constant dense<0.000000e+00> : vector<24x256xf32>
    %154 = tpu.matmul %151, %153, %cst_85 {dimension_numbers = #tpu.dot_dimension_numbers<[1], [0], [0], [1], [0, 0, 1, 1], [], []>} : vector<24x192xbf16>, vector<192x256xbf16>, vector<24x256xf32> -> vector<24x256xf32>
    %155 = arith.addf %149, %154 : vector<24x256xf32>
    %c0_86 = arith.constant 0 : index
    %c0_87 = arith.constant 0 : index
    %156 = vector.load %arg5[%c0_86, %c0_87] : memref<1x256xf32, #tpu.memory_space<vmem>>, vector<1x256xf32>
    %157 = vector.broadcast %156 : vector<1x256xf32> to vector<24x256xf32>
    %158 = arith.addf %155, %157 : vector<24x256xf32>
    %cst_88 = arith.constant 0.000000e+00 : f32
    %159 = vector.broadcast %cst_88 : f32 to vector<24x256xf32>
    %160 = arith.maximumf %158, %159 : vector<24x256xf32>
    %161 = vector.extract_strided_slice %160 {offsets = [0, 0], sizes = [24, 128], strides = [1, 1]} : vector<24x256xf32> to vector<24x128xf32>
    %162 = vector.extract_strided_slice %160 {offsets = [0, 128], sizes = [24, 128], strides = [1, 1]} : vector<24x256xf32> to vector<24x128xf32>
    %163 = arith.maximumf %161, %162 : vector<24x128xf32>
    %164 = vector.shape_cast %163 : vector<24x128xf32> to vector<1x12x2x128xf32>
    %cst_89 = arith.constant dense<0xFF800000> : vector<1x12x128xf32>
    %165 = vector.multi_reduction <maximumf>, %164, %cst_89 [2] : vector<1x12x2x128xf32> to vector<1x12x128xf32>
    %166 = arith.truncf %165 : vector<1x12x128xf32> to vector<1x12x128xbf16>
    %cst_90 = arith.constant 0.000000e+00 : f32
    %167 = vector.broadcast %cst_90 : f32 to vector<24x256xf32>
    %168 = vector.extract_strided_slice %16 {offsets = [0, 0, 640], sizes = [1, 24, 192], strides = [1, 1, 1]} : vector<1x26x832xbf16> to vector<1x24x192xbf16>
    %169 = vector.shape_cast %168 : vector<1x24x192xbf16> to vector<24x192xbf16>
    %c0_91 = arith.constant 0 : index
    %c0_92 = arith.constant 0 : index
    %c0_93 = arith.constant 0 : index
    %170 = vector.load %arg4[%c0_91, %c0_92, %c0_93] : memref<3x192x256xbf16, #tpu.memory_space<vmem>>, vector<1x192x256xbf16>
    %171 = vector.shape_cast %170 : vector<1x192x256xbf16> to vector<192x256xbf16>
    %cst_94 = arith.constant dense<0.000000e+00> : vector<24x256xf32>
    %172 = tpu.matmul %169, %171, %cst_94 {dimension_numbers = #tpu.dot_dimension_numbers<[1], [0], [0], [1], [0, 0, 1, 1], [], []>} : vector<24x192xbf16>, vector<192x256xbf16>, vector<24x256xf32> -> vector<24x256xf32>
    %173 = arith.addf %167, %172 : vector<24x256xf32>
    %174 = vector.extract_strided_slice %16 {offsets = [0, 1, 640], sizes = [1, 24, 192], strides = [1, 1, 1]} : vector<1x26x832xbf16> to vector<1x24x192xbf16>
    %175 = vector.shape_cast %174 : vector<1x24x192xbf16> to vector<24x192xbf16>
    %c1_95 = arith.constant 1 : index
    %c0_96 = arith.constant 0 : index
    %c0_97 = arith.constant 0 : index
    %176 = vector.load %arg4[%c1_95, %c0_96, %c0_97] : memref<3x192x256xbf16, #tpu.memory_space<vmem>>, vector<1x192x256xbf16>
    %177 = vector.shape_cast %176 : vector<1x192x256xbf16> to vector<192x256xbf16>
    %cst_98 = arith.constant dense<0.000000e+00> : vector<24x256xf32>
    %178 = tpu.matmul %175, %177, %cst_98 {dimension_numbers = #tpu.dot_dimension_numbers<[1], [0], [0], [1], [0, 0, 1, 1], [], []>} : vector<24x192xbf16>, vector<192x256xbf16>, vector<24x256xf32> -> vector<24x256xf32>
    %179 = arith.addf %173, %178 : vector<24x256xf32>
    %180 = vector.extract_strided_slice %16 {offsets = [0, 2, 640], sizes = [1, 24, 192], strides = [1, 1, 1]} : vector<1x26x832xbf16> to vector<1x24x192xbf16>
    %181 = vector.shape_cast %180 : vector<1x24x192xbf16> to vector<24x192xbf16>
    %c2_99 = arith.constant 2 : index
    %c0_100 = arith.constant 0 : index
    %c0_101 = arith.constant 0 : index
    %182 = vector.load %arg4[%c2_99, %c0_100, %c0_101] : memref<3x192x256xbf16, #tpu.memory_space<vmem>>, vector<1x192x256xbf16>
    %183 = vector.shape_cast %182 : vector<1x192x256xbf16> to vector<192x256xbf16>
    %cst_102 = arith.constant dense<0.000000e+00> : vector<24x256xf32>
    %184 = tpu.matmul %181, %183, %cst_102 {dimension_numbers = #tpu.dot_dimension_numbers<[1], [0], [0], [1], [0, 0, 1, 1], [], []>} : vector<24x192xbf16>, vector<192x256xbf16>, vector<24x256xf32> -> vector<24x256xf32>
    %185 = arith.addf %179, %184 : vector<24x256xf32>
    %c0_103 = arith.constant 0 : index
    %c0_104 = arith.constant 0 : index
    %186 = vector.load %arg5[%c0_103, %c0_104] : memref<1x256xf32, #tpu.memory_space<vmem>>, vector<1x256xf32>
    %187 = vector.broadcast %186 : vector<1x256xf32> to vector<24x256xf32>
    %188 = arith.addf %185, %187 : vector<24x256xf32>
    %cst_105 = arith.constant 0.000000e+00 : f32
    %189 = vector.broadcast %cst_105 : f32 to vector<24x256xf32>
    %190 = arith.maximumf %188, %189 : vector<24x256xf32>
    %191 = vector.extract_strided_slice %190 {offsets = [0, 0], sizes = [24, 128], strides = [1, 1]} : vector<24x256xf32> to vector<24x128xf32>
    %192 = vector.extract_strided_slice %190 {offsets = [0, 128], sizes = [24, 128], strides = [1, 1]} : vector<24x256xf32> to vector<24x128xf32>
    %193 = arith.maximumf %191, %192 : vector<24x128xf32>
    %194 = vector.shape_cast %193 : vector<24x128xf32> to vector<1x12x2x128xf32>
    %cst_106 = arith.constant dense<0xFF800000> : vector<1x12x128xf32>
    %195 = vector.multi_reduction <maximumf>, %194, %cst_106 [2] : vector<1x12x2x128xf32> to vector<1x12x128xf32>
    %196 = arith.truncf %195 : vector<1x12x128xf32> to vector<1x12x128xbf16>
    %197 = tpu.concatenate %46, %76, %106, %136, %166, %196 in 2 : vector<1x12x128xbf16>, vector<1x12x128xbf16>, vector<1x12x128xbf16>, vector<1x12x128xbf16>, vector<1x12x128xbf16>, vector<1x12x128xbf16> -> vector<1x12x768xbf16>
    %cst_107 = arith.constant 0.000000e+00 : f32
    %198 = vector.broadcast %cst_107 : f32 to vector<1x128xf32>
    %199 = vector.extract_strided_slice %197 {offsets = [0, 0, 0], sizes = [1, 1, 768], strides = [1, 1, 1]} : vector<1x12x768xbf16> to vector<1x1x768xbf16>
    %200 = vector.shape_cast %199 : vector<1x1x768xbf16> to vector<1x768xbf16>
    %c0_108 = arith.constant 0 : index
    %c0_109 = arith.constant 0 : index
    %c0_110 = arith.constant 0 : index
    %201 = vector.load %arg6[%c0_108, %c0_109, %c0_110] : memref<12x768x128xbf16, #tpu.memory_space<vmem>>, vector<1x768x128xbf16>
    %202 = vector.shape_cast %201 : vector<1x768x128xbf16> to vector<768x128xbf16>
    %cst_111 = arith.constant dense<0.000000e+00> : vector<1x128xf32>
    %203 = tpu.matmul %200, %202, %cst_111 {dimension_numbers = #tpu.dot_dimension_numbers<[1], [0], [0], [1], [0, 0, 1, 1], [], []>} : vector<1x768xbf16>, vector<768x128xbf16>, vector<1x128xf32> -> vector<1x128xf32>
    %204 = arith.addf %198, %203 : vector<1x128xf32>
    %205 = vector.extract_strided_slice %197 {offsets = [0, 1, 0], sizes = [1, 1, 768], strides = [1, 1, 1]} : vector<1x12x768xbf16> to vector<1x1x768xbf16>
    %206 = vector.shape_cast %205 : vector<1x1x768xbf16> to vector<1x768xbf16>
    %c1_112 = arith.constant 1 : index
    %c0_113 = arith.constant 0 : index
    %c0_114 = arith.constant 0 : index
    %207 = vector.load %arg6[%c1_112, %c0_113, %c0_114] : memref<12x768x128xbf16, #tpu.memory_space<vmem>>, vector<1x768x128xbf16>
    %208 = vector.shape_cast %207 : vector<1x768x128xbf16> to vector<768x128xbf16>
    %cst_115 = arith.constant dense<0.000000e+00> : vector<1x128xf32>
    %209 = tpu.matmul %206, %208, %cst_115 {dimension_numbers = #tpu.dot_dimension_numbers<[1], [0], [0], [1], [0, 0, 1, 1], [], []>} : vector<1x768xbf16>, vector<768x128xbf16>, vector<1x128xf32> -> vector<1x128xf32>
    %210 = arith.addf %204, %209 : vector<1x128xf32>
    %211 = vector.extract_strided_slice %197 {offsets = [0, 2, 0], sizes = [1, 1, 768], strides = [1, 1, 1]} : vector<1x12x768xbf16> to vector<1x1x768xbf16>
    %212 = vector.shape_cast %211 : vector<1x1x768xbf16> to vector<1x768xbf16>
    %c2_116 = arith.constant 2 : index
    %c0_117 = arith.constant 0 : index
    %c0_118 = arith.constant 0 : index
    %213 = vector.load %arg6[%c2_116, %c0_117, %c0_118] : memref<12x768x128xbf16, #tpu.memory_space<vmem>>, vector<1x768x128xbf16>
    %214 = vector.shape_cast %213 : vector<1x768x128xbf16> to vector<768x128xbf16>
    %cst_119 = arith.constant dense<0.000000e+00> : vector<1x128xf32>
    %215 = tpu.matmul %212, %214, %cst_119 {dimension_numbers = #tpu.dot_dimension_numbers<[1], [0], [0], [1], [0, 0, 1, 1], [], []>} : vector<1x768xbf16>, vector<768x128xbf16>, vector<1x128xf32> -> vector<1x128xf32>
    %216 = arith.addf %210, %215 : vector<1x128xf32>
    %217 = vector.extract_strided_slice %197 {offsets = [0, 3, 0], sizes = [1, 1, 768], strides = [1, 1, 1]} : vector<1x12x768xbf16> to vector<1x1x768xbf16>
    %218 = vector.shape_cast %217 : vector<1x1x768xbf16> to vector<1x768xbf16>
    %c3 = arith.constant 3 : index
    %c0_120 = arith.constant 0 : index
    %c0_121 = arith.constant 0 : index
    %219 = vector.load %arg6[%c3, %c0_120, %c0_121] : memref<12x768x128xbf16, #tpu.memory_space<vmem>>, vector<1x768x128xbf16>
    %220 = vector.shape_cast %219 : vector<1x768x128xbf16> to vector<768x128xbf16>
    %cst_122 = arith.constant dense<0.000000e+00> : vector<1x128xf32>
    %221 = tpu.matmul %218, %220, %cst_122 {dimension_numbers = #tpu.dot_dimension_numbers<[1], [0], [0], [1], [0, 0, 1, 1], [], []>} : vector<1x768xbf16>, vector<768x128xbf16>, vector<1x128xf32> -> vector<1x128xf32>
    %222 = arith.addf %216, %221 : vector<1x128xf32>
    %223 = vector.extract_strided_slice %197 {offsets = [0, 4, 0], sizes = [1, 1, 768], strides = [1, 1, 1]} : vector<1x12x768xbf16> to vector<1x1x768xbf16>
    %224 = vector.shape_cast %223 : vector<1x1x768xbf16> to vector<1x768xbf16>
    %c4 = arith.constant 4 : index
    %c0_123 = arith.constant 0 : index
    %c0_124 = arith.constant 0 : index
    %225 = vector.load %arg6[%c4, %c0_123, %c0_124] : memref<12x768x128xbf16, #tpu.memory_space<vmem>>, vector<1x768x128xbf16>
    %226 = vector.shape_cast %225 : vector<1x768x128xbf16> to vector<768x128xbf16>
    %cst_125 = arith.constant dense<0.000000e+00> : vector<1x128xf32>
    %227 = tpu.matmul %224, %226, %cst_125 {dimension_numbers = #tpu.dot_dimension_numbers<[1], [0], [0], [1], [0, 0, 1, 1], [], []>} : vector<1x768xbf16>, vector<768x128xbf16>, vector<1x128xf32> -> vector<1x128xf32>
    %228 = arith.addf %222, %227 : vector<1x128xf32>
    %229 = vector.extract_strided_slice %197 {offsets = [0, 5, 0], sizes = [1, 1, 768], strides = [1, 1, 1]} : vector<1x12x768xbf16> to vector<1x1x768xbf16>
    %230 = vector.shape_cast %229 : vector<1x1x768xbf16> to vector<1x768xbf16>
    %c5 = arith.constant 5 : index
    %c0_126 = arith.constant 0 : index
    %c0_127 = arith.constant 0 : index
    %231 = vector.load %arg6[%c5, %c0_126, %c0_127] : memref<12x768x128xbf16, #tpu.memory_space<vmem>>, vector<1x768x128xbf16>
    %232 = vector.shape_cast %231 : vector<1x768x128xbf16> to vector<768x128xbf16>
    %cst_128 = arith.constant dense<0.000000e+00> : vector<1x128xf32>
    %233 = tpu.matmul %230, %232, %cst_128 {dimension_numbers = #tpu.dot_dimension_numbers<[1], [0], [0], [1], [0, 0, 1, 1], [], []>} : vector<1x768xbf16>, vector<768x128xbf16>, vector<1x128xf32> -> vector<1x128xf32>
    %234 = arith.addf %228, %233 : vector<1x128xf32>
    %235 = vector.extract_strided_slice %197 {offsets = [0, 6, 0], sizes = [1, 1, 768], strides = [1, 1, 1]} : vector<1x12x768xbf16> to vector<1x1x768xbf16>
    %236 = vector.shape_cast %235 : vector<1x1x768xbf16> to vector<1x768xbf16>
    %c6 = arith.constant 6 : index
    %c0_129 = arith.constant 0 : index
    %c0_130 = arith.constant 0 : index
    %237 = vector.load %arg6[%c6, %c0_129, %c0_130] : memref<12x768x128xbf16, #tpu.memory_space<vmem>>, vector<1x768x128xbf16>
    %238 = vector.shape_cast %237 : vector<1x768x128xbf16> to vector<768x128xbf16>
    %cst_131 = arith.constant dense<0.000000e+00> : vector<1x128xf32>
    %239 = tpu.matmul %236, %238, %cst_131 {dimension_numbers = #tpu.dot_dimension_numbers<[1], [0], [0], [1], [0, 0, 1, 1], [], []>} : vector<1x768xbf16>, vector<768x128xbf16>, vector<1x128xf32> -> vector<1x128xf32>
    %240 = arith.addf %234, %239 : vector<1x128xf32>
    %241 = vector.extract_strided_slice %197 {offsets = [0, 7, 0], sizes = [1, 1, 768], strides = [1, 1, 1]} : vector<1x12x768xbf16> to vector<1x1x768xbf16>
    %242 = vector.shape_cast %241 : vector<1x1x768xbf16> to vector<1x768xbf16>
    %c7 = arith.constant 7 : index
    %c0_132 = arith.constant 0 : index
    %c0_133 = arith.constant 0 : index
    %243 = vector.load %arg6[%c7, %c0_132, %c0_133] : memref<12x768x128xbf16, #tpu.memory_space<vmem>>, vector<1x768x128xbf16>
    %244 = vector.shape_cast %243 : vector<1x768x128xbf16> to vector<768x128xbf16>
    %cst_134 = arith.constant dense<0.000000e+00> : vector<1x128xf32>
    %245 = tpu.matmul %242, %244, %cst_134 {dimension_numbers = #tpu.dot_dimension_numbers<[1], [0], [0], [1], [0, 0, 1, 1], [], []>} : vector<1x768xbf16>, vector<768x128xbf16>, vector<1x128xf32> -> vector<1x128xf32>
    %246 = arith.addf %240, %245 : vector<1x128xf32>
    %247 = vector.extract_strided_slice %197 {offsets = [0, 8, 0], sizes = [1, 1, 768], strides = [1, 1, 1]} : vector<1x12x768xbf16> to vector<1x1x768xbf16>
    %248 = vector.shape_cast %247 : vector<1x1x768xbf16> to vector<1x768xbf16>
    %c8 = arith.constant 8 : index
    %c0_135 = arith.constant 0 : index
    %c0_136 = arith.constant 0 : index
    %249 = vector.load %arg6[%c8, %c0_135, %c0_136] : memref<12x768x128xbf16, #tpu.memory_space<vmem>>, vector<1x768x128xbf16>
    %250 = vector.shape_cast %249 : vector<1x768x128xbf16> to vector<768x128xbf16>
    %cst_137 = arith.constant dense<0.000000e+00> : vector<1x128xf32>
    %251 = tpu.matmul %248, %250, %cst_137 {dimension_numbers = #tpu.dot_dimension_numbers<[1], [0], [0], [1], [0, 0, 1, 1], [], []>} : vector<1x768xbf16>, vector<768x128xbf16>, vector<1x128xf32> -> vector<1x128xf32>
    %252 = arith.addf %246, %251 : vector<1x128xf32>
    %253 = vector.extract_strided_slice %197 {offsets = [0, 9, 0], sizes = [1, 1, 768], strides = [1, 1, 1]} : vector<1x12x768xbf16> to vector<1x1x768xbf16>
    %254 = vector.shape_cast %253 : vector<1x1x768xbf16> to vector<1x768xbf16>
    %c9 = arith.constant 9 : index
    %c0_138 = arith.constant 0 : index
    %c0_139 = arith.constant 0 : index
    %255 = vector.load %arg6[%c9, %c0_138, %c0_139] : memref<12x768x128xbf16, #tpu.memory_space<vmem>>, vector<1x768x128xbf16>
    %256 = vector.shape_cast %255 : vector<1x768x128xbf16> to vector<768x128xbf16>
    %cst_140 = arith.constant dense<0.000000e+00> : vector<1x128xf32>
    %257 = tpu.matmul %254, %256, %cst_140 {dimension_numbers = #tpu.dot_dimension_numbers<[1], [0], [0], [1], [0, 0, 1, 1], [], []>} : vector<1x768xbf16>, vector<768x128xbf16>, vector<1x128xf32> -> vector<1x128xf32>
    %258 = arith.addf %252, %257 : vector<1x128xf32>
    %259 = vector.extract_strided_slice %197 {offsets = [0, 10, 0], sizes = [1, 1, 768], strides = [1, 1, 1]} : vector<1x12x768xbf16> to vector<1x1x768xbf16>
    %260 = vector.shape_cast %259 : vector<1x1x768xbf16> to vector<1x768xbf16>
    %c10 = arith.constant 10 : index
    %c0_141 = arith.constant 0 : index
    %c0_142 = arith.constant 0 : index
    %261 = vector.load %arg6[%c10, %c0_141, %c0_142] : memref<12x768x128xbf16, #tpu.memory_space<vmem>>, vector<1x768x128xbf16>
    %262 = vector.shape_cast %261 : vector<1x768x128xbf16> to vector<768x128xbf16>
    %cst_143 = arith.constant dense<0.000000e+00> : vector<1x128xf32>
    %263 = tpu.matmul %260, %262, %cst_143 {dimension_numbers = #tpu.dot_dimension_numbers<[1], [0], [0], [1], [0, 0, 1, 1], [], []>} : vector<1x768xbf16>, vector<768x128xbf16>, vector<1x128xf32> -> vector<1x128xf32>
    %264 = arith.addf %258, %263 : vector<1x128xf32>
    %265 = vector.extract_strided_slice %197 {offsets = [0, 11, 0], sizes = [1, 1, 768], strides = [1, 1, 1]} : vector<1x12x768xbf16> to vector<1x1x768xbf16>
    %266 = vector.shape_cast %265 : vector<1x1x768xbf16> to vector<1x768xbf16>
    %c11 = arith.constant 11 : index
    %c0_144 = arith.constant 0 : index
    %c0_145 = arith.constant 0 : index
    %267 = vector.load %arg6[%c11, %c0_144, %c0_145] : memref<12x768x128xbf16, #tpu.memory_space<vmem>>, vector<1x768x128xbf16>
    %268 = vector.shape_cast %267 : vector<1x768x128xbf16> to vector<768x128xbf16>
    %cst_146 = arith.constant dense<0.000000e+00> : vector<1x128xf32>
    %269 = tpu.matmul %266, %268, %cst_146 {dimension_numbers = #tpu.dot_dimension_numbers<[1], [0], [0], [1], [0, 0, 1, 1], [], []>} : vector<1x768xbf16>, vector<768x128xbf16>, vector<1x128xf32> -> vector<1x128xf32>
    %270 = arith.addf %264, %269 : vector<1x128xf32>
    %c0_147 = arith.constant 0 : index
    %c0_148 = arith.constant 0 : index
    %271 = vector.load %arg7[%c0_147, %c0_148] : memref<1x128xf32, #tpu.memory_space<vmem>>, vector<1x128xf32>
    %272 = arith.addf %270, %271 : vector<1x128xf32>
    %cst_149 = arith.constant 0.000000e+00 : f32
    %273 = vector.broadcast %cst_149 : f32 to vector<1x128xf32>
    %274 = arith.maximumf %272, %273 : vector<1x128xf32>
    %275 = arith.truncf %274 : vector<1x128xf32> to vector<1x128xbf16>
    %c0_150 = arith.constant 0 : index
    %c0_151 = arith.constant 0 : index
    %276 = vector.load %arg8[%c0_150, %c0_151] : memref<128x128xbf16, #tpu.memory_space<vmem>>, vector<128x128xbf16>
    %cst_152 = arith.constant dense<0.000000e+00> : vector<1x128xf32>
    %277 = tpu.matmul %275, %276, %cst_152 {dimension_numbers = #tpu.dot_dimension_numbers<[1], [0], [0], [1], [0, 0, 1, 1], [], []>} : vector<1x128xbf16>, vector<128x128xbf16>, vector<1x128xf32> -> vector<1x128xf32>
    %c0_153 = arith.constant 0 : index
    %c0_154 = arith.constant 0 : index
    %278 = vector.load %arg9[%c0_153, %c0_154] : memref<1x128xf32, #tpu.memory_space<vmem>>, vector<1x128xf32>
    %279 = arith.addf %277, %278 : vector<1x128xf32>
    %cst_155 = arith.constant dense<0xFF800000> : vector<1xf32>
    %280 = vector.multi_reduction <maximumf>, %279, %cst_155 [1] : vector<1x128xf32> to vector<1xf32>
    %281 = vector.shape_cast %280 : vector<1xf32> to vector<1x1xf32>
    %282 = vector.broadcast %281 : vector<1x1xf32> to vector<1x128xf32>
    %283 = arith.subf %279, %282 : vector<1x128xf32>
    %284 = math.exp %283 : vector<1x128xf32>
    %cst_156 = arith.constant dense<0.000000e+00> : vector<1xf32>
    %285 = vector.multi_reduction <add>, %284, %cst_156 [1] : vector<1x128xf32> to vector<1xf32>
    %286 = vector.shape_cast %285 : vector<1xf32> to vector<1x1xf32>
    %287 = math.log %286 : vector<1x1xf32>
    %288 = vector.broadcast %287 : vector<1x1xf32> to vector<1x128xf32>
    %289 = arith.subf %283, %288 : vector<1x128xf32>
    %290 = vector.shape_cast %289 : vector<1x128xf32> to vector<1x1x128xf32>
    %c0_157 = arith.constant 0 : index
    %c0_158 = arith.constant 0 : index
    %c0_159 = arith.constant 0 : index
    %291 = vector.load %arg10[%c0_157, %c0_158, %c0_159] : memref<1x1x128xf32, #tpu.memory_space<vmem>>, vector<1x1x128xf32>
    tpu.vector_store %arg10[%c0_157, %c0_158, %c0_159], %290 {strides = array<i32>} : memref<1x1x128xf32, #tpu.memory_space<vmem>>, vector<1x1x128xf32>,
    return
  }
  func.func @transform_0(%arg0: i32) -> (i32, i32, i32) {
    %c0_i32 = arith.constant 0 : i32
    %c0_i32_0 = arith.constant 0 : i32
    %c0_i32_1 = arith.constant 0 : i32
    return %arg0, %c0_i32, %c0_i32_0 : i32, i32, i32
  }
  func.func @transform_1(%arg0: i32) -> (i32, i32) {
    %c0_i32 = arith.constant 0 : i32
    %c0_i32_0 = arith.constant 0 : i32
    %c0_i32_1 = arith.constant 0 : i32
    return %c0_i32, %c0_i32_0 : i32, i32
  }
  func.func @transform_2(%arg0: i32) -> (i32, i32) {
    %c0_i32 = arith.constant 0 : i32
    %c0_i32_0 = arith.constant 0 : i32
    %c0_i32_1 = arith.constant 0 : i32
    return %c0_i32, %c0_i32_0 : i32, i32
  }
  func.func @transform_3(%arg0: i32) -> (i32, i32, i32) {
    %c0_i32 = arith.constant 0 : i32
    %c0_i32_0 = arith.constant 0 : i32
    %c0_i32_1 = arith.constant 0 : i32
    %c0_i32_2 = arith.constant 0 : i32
    return %c0_i32, %c0_i32_0, %c0_i32_1 : i32, i32, i32
  }
  func.func @transform_4(%arg0: i32) -> (i32, i32) {
    %c0_i32 = arith.constant 0 : i32
    %c0_i32_0 = arith.constant 0 : i32
    %c0_i32_1 = arith.constant 0 : i32
    return %c0_i32, %c0_i32_0 : i32, i32
  }
  func.func @transform_5(%arg0: i32) -> (i32, i32, i32) {
    %c0_i32 = arith.constant 0 : i32
    %c0_i32_0 = arith.constant 0 : i32
    %c0_i32_1 = arith.constant 0 : i32
    %c0_i32_2 = arith.constant 0 : i32
    return %c0_i32, %c0_i32_0, %c0_i32_1 : i32, i32, i32
  }
  func.func @transform_6(%arg0: i32) -> (i32, i32) {
    %c0_i32 = arith.constant 0 : i32
    %c0_i32_0 = arith.constant 0 : i32
    %c0_i32_1 = arith.constant 0 : i32
    return %c0_i32, %c0_i32_0 : i32, i32
  }
  func.func @transform_7(%arg0: i32) -> (i32, i32) {
    %c0_i32 = arith.constant 0 : i32
    %c0_i32_0 = arith.constant 0 : i32
    %c0_i32_1 = arith.constant 0 : i32
    return %c0_i32, %c0_i32_0 : i32, i32
  }
  func.func @transform_8(%arg0: i32) -> (i32, i32) {
    %c0_i32 = arith.constant 0 : i32
    %c0_i32_0 = arith.constant 0 : i32
    %c0_i32_1 = arith.constant 0 : i32
    return %c0_i32, %c0_i32_0 : i32, i32
  }
  func.func @transform_9(%arg0: i32) -> (i32, i32, i32) {
    %c0_i32 = arith.constant 0 : i32
    %c0_i32_0 = arith.constant 0 : i32
    %c0_i32_1 = arith.constant 0 : i32
    return %arg0, %c0_i32, %c0_i32_0 : i32, i32, i32
  }
}

</mosaic_0001>

<bundles_post_ra>
// kernel: _lambda_.1
= control target key start
LH: loop header
LB: loop body
LE: loop exit
PB: predicated region body
PF: predicated region fallthrough
CT: control target
= control target key end

     0   :  { %s16323_s0 = inlined_call_operand.vmem [shape: bf16[2,28,28], index: 0, kind: input, shape index: {}]   ;;  %s16324_s1 = inlined_call_operand.hbm [shape: bf16[84,832], index: 1, kind: input, shape index: {}]   ;;  %s16325_s2 = inlined_call_operand.hbm [shape: f32[1,832], index: 2, kind: input, shape index: {}]   ;;  %s16326_s3 = inlined_call_operand.hbm [shape: bf16[3,192,256], index: 3, kind: input, shape index: {}]   ;;  %s16327_s4 = inlined_call_operand.hbm [shape: f32[1,256], index: 4, kind: input, shape index: {}]   ;;  %s16328_s5 = inlined_call_operand.hbm [shape: bf16[12,768,128], index: 5, kind: input, shape index: {}]   ;;  %s16329_s6 = inlined_call_operand.hbm [shape: f32[1,128], index: 6, kind: input, shape index: {}]   ;;  %s16330_s7 = inlined_call_operand.hbm [shape: bf16[128,128], index: 7, kind: input, shape index: {}]   ;;  %s16331_s8 = inlined_call_operand.hbm [shape: f32[1,128], index: 8, kind: input, shape index: {}]   ;;  %s16332_s9 = inlined_call_operand.hbm [shape: f32[2,1,128], index: 9, kind: output, shape index: {}]  }
   0x1   :  { %16512 = sst [smem:[#allocation115_spill]] %s16324_s1 }
   0x2   :  { %16513 = sst [smem:[#allocation116_spill]] %s16325_s2 }
   0x3   :  { %16514 = sst [smem:[#allocation117_spill]] %s16326_s3 }
   0x4   :  { %16515 = sst [smem:[#allocation118_spill]] %s16327_s4 }
   0x5   :  { %16516 = sst [smem:[#allocation119_spill]] %s16328_s5 }
   0x6   :  { %14 = vsyncpa [#allocation3], 0 }
   0x7   :  { %15 = vsyncpa [#allocation6], 0 }
   0x8   :  { %16 = vsyncpa [#allocation9], 0 }
   0x9   :  { %17 = vsyncpa [#allocation12], 0 }
   0xa   :  { %18 = vsyncpa [#allocation15], 0 }
   0xb   :  { %19 = vsyncpa [#allocation4], 0 }
   0xc   :  { %21 = vsyncpa [#allocation4 + $0x1], 0  ;;  %s14363_s30 = smov 0   ;;  %s14365_s10 = smov 0  }
   0xd   :  { %s14367_s11 = smov 0   ;;  %s14369_s12 = smov 0  }
   0xe LB: > { %s14384_s13 = sadd.s32 4294967295, %s14295_s12   ;;  %s10265_s14 = sadd.s32 4294967294, %s14295_s12   ;;  %s14295_s12 = sphi %s14369_s12, %s16858_s12   ;;  %s14291_s11 = sphi %s14367_s11, %s16857_s11   ;;  %s14287_s10 = sphi %s14365_s10, %s16856_s10   ;;  %s14283_s30 = sphi %s14363_s30, %s16855_s30  }
   0xf   : > { %s14388_s15 = sadd.s32 1, %s14295_s12   ;;  %s228_s16 = sadd.s32 1, %s14291_s11 }
  0x10   : > { %s225_s17 = ssub.s32 %s14295_s12, %s14388_s15  ;;  %p238_p0 = scmp.ne.s32.totalorder %s14291_s11, %s14287_s10 }
  0x11   : > { %p226_p1 = scmp.eq.s32.totalorder %s225_s17, 0  ;;  %p239_p2 = scmp.eq.s32.totalorder %s14384_s13, 1 }
  0x12   : > { %p244_p3 = scmp.ne.s32.totalorder %s14287_s10, %s14283_s30  ;;  %p245_p4 = scmp.eq.s32.totalorder %s10265_s14, 1 }
  0x13   : > { %s14399_s18 = scalar_select %p226_p1, %s14291_s11, %s228_s16  }
  0x14   : > { %p14401_p5 = por %p239_p2, %p238_p0  ;;  %p14405_p6 = por %p245_p4, %p244_p3 }
  0x15   : > { %16517 = sst [smem:[#allocation23_spill]] %s14399_s18  ;;  %p10266_p7 = scmp.ge.s32.totalorder %s14295_s12, 1 }
  0x16   : > { %p252_p8 = scmp.lt.s32.totalorder %s14295_s12, 3  ;;  %p13904_p9 = scmp.eq.s32.totalorder %s14384_s13, 0 }
  0x17   : > { %s16521_s2 = sld [smem:[#allocation116_spill]]  ;;  %s14297_s25 = smov [#allocation5]  }
  0x18   : > { %p14412_p10 = pnand %p10266_p7, %p252_p8  ;;  %s280_s26 = sshll.u32 %s14297_s25, 4  ;;  %s281_s26 = int_to_ptr.vmem [resolvable:$true] %s280_s26 }
  0x19   : > { %s16522_s4 = sld [smem:[#allocation118_spill]]  ;;  %s330_s22 = sshll.u32 %s16329_s6, 4  ;;  %s331_s22 = int_to_ptr.hbm [resolvable:$true] %s330_s22 }
  0x1a   : > { %p13875_p11 = pneg %p14412_p10  ;;  %s14298_s23 = smov [#allocation8]  }
  0x1b   : > { %s306_s25 = sshll.u32 %s14298_s23, 4  ;;  %s16524_s1 = sld [smem:[#allocation115_spill]]  ;;  %s307_s25 = int_to_ptr.vmem [resolvable:$true] %s306_s25 }
  0x1c   : > { %p14426_p12 = pnand %p13904_p9, %p13875_p11  ;;  %s14300_s16 = smov [#allocation2]  }
  0x1d   : > { %s278_s24 = sshll.u32 %s16521_s2, 4  ;;  %s265_s17 = sshll.u32 %s14300_s16, 4  ;;  %s279_s24 = int_to_ptr.hbm [resolvable:$true] %s278_s24  ;;  %s266_s17 = int_to_ptr.vmem [resolvable:$true] %s265_s17 }
  0x1e   : > { %13881 = dma.hbm_to_vmem [thread:$0]  (!%p14426_p12), %s279_s24, 112, %s281_s26, [#allocation6]  }
  0x1f   : > { %s304_s29 = sshll.u32 %s16522_s4, 4  ;;  %s14299_s4 = smov [#allocation11]   ;;  %s305_s29 = int_to_ptr.hbm [resolvable:$true] %s304_s29 }
  0x20   : > { %13887 = dma.hbm_to_vmem [thread:$0]  (!%p14426_p12), %s305_s29, 32, %s307_s25, [#allocation9]  }
  0x21   : > { %s263_s2 = sshll.u32 %s16524_s1, 4  ;;  %s332_s18 = sshll.u32 %s14299_s4, 4  ;;  %s264_s2 = int_to_ptr.hbm [resolvable:$true] %s263_s2  ;;  %s333_s18 = int_to_ptr.vmem [resolvable:$true] %s332_s18 }
  0x22   : > { %13893 = dma.hbm_to_vmem [thread:$0]  (!%p14426_p12), %s331_s22, 16, %s333_s18, [#allocation12]  }
  0x23   : > { %s14301_s23 = smov 448   ;;  %s14302_s24 = smov 28  }
  0x24   : > { %13878 = dma.hbm_to_vmem [thread:$0]  (!%p14426_p12), %s264_s2, 4928, %s266_s17, [#allocation3], %s14301_s23, %s14301_s23, %s14302_s24  }
  0x25   : > { %s16525_s3 = sld [smem:[#allocation117_spill]]  ;;  %s14303_s27 = smov [#allocation7]  }
  0x26   : > { %s291_s4 = sshll.u32 %s14303_s27, 4  ;;  %s16526_s5 = sld [smem:[#allocation119_spill]]  ;;  %s292_s4 = int_to_ptr.vmem [resolvable:$true] %s291_s4 }
  0x27   : > { %s14304_s22 = smov 128   ;;  %s14305_s16 = smov 8  }
  0x28   : > { %s14306_s2 = smov [#allocation10]   ;;  %s14307_s23 = smov 64  }
  0x29   : > { %s317_s17 = sshll.u32 %s14306_s2, 4  ;;  %s14308_s24 = smov 4   ;;  %s318_s17 = int_to_ptr.vmem [resolvable:$true] %s317_s17 }
  0x2a   : > { %s341_s27 = sshll.u32 %s16330_s7, 4  ;;  %s14309_s1 = smov [#allocation13]   ;;  %s342_s27 = int_to_ptr.hbm [resolvable:$true] %s341_s27 }
  0x2b   : > { %s289_s25 = sshll.u32 %s16525_s3, 4  ;;  %s343_s28 = sshll.u32 %s14309_s1, 4  ;;  %s290_s25 = int_to_ptr.hbm [resolvable:$true] %s289_s25  ;;  %s344_s28 = int_to_ptr.vmem [resolvable:$true] %s343_s28 }
  0x2c   : > { %s315_s18 = sshll.u32 %s16526_s5, 4  ;;  %s316_s18 = int_to_ptr.hbm [resolvable:$true] %s315_s18 }
  0x2d   : > { %13884 = dma.hbm_to_vmem [thread:$0]  (!%p14426_p12), %s290_s25, 9216, %s292_s4, [#allocation6], %s14304_s22, %s14304_s22, %s14305_s16  }
  0x2e   : > { %13890 = dma.hbm_to_vmem [thread:$0]  (!%p14426_p12), %s316_s18, 73728, %s318_s17, [#allocation9], %s14307_s23, %s14307_s23, %s14308_s24  }
  0x2f   : > { %s356_s25 = sshll.u32 %s16331_s8, 4  ;;  %s14310_s4 = smov [#allocation14]   ;;  %s357_s25 = int_to_ptr.hbm [resolvable:$true] %s356_s25 }
  0x30   : > { %13896 = dma.hbm_to_vmem [thread:$0]  (!%p14426_p12), %s342_s27, 1024, %s344_s28, [#allocation12], %s14307_s23, %s14307_s23, %s14308_s24  }
  0x31   : > { %s358_s22 = sshll.u32 %s14310_s4, 4  ;;  %379 = sbr.rel (%p14412_p10) target bundleno = 2131 (0x853), region = 56  ;;  %s359_s22 = int_to_ptr.vmem [resolvable:$true] %s358_s22 }
  0x32   : > { %13899 = dma.hbm_to_vmem [thread:$0]  (!%p14426_p12), %s357_s25, 16, %s359_s22, [#allocation15]  }
  0x36   : > { %14258 = dma.done.wait (%p13904_p9), [#allocation3], 4928  }
  0x37   : > { %14260 = vsyncadd (%p13904_p9), [#allocation3], 4294962368 }
  0x38   : > { %14262 = dma.done.wait (%p13904_p9), [#allocation6], 9328  }
  0x39   : > { %14264 = vsyncadd (%p13904_p9), [#allocation6], 4294957968 }
  0x3a   : > { %14266 = dma.done.wait (%p13904_p9), [#allocation9], 73760  }
  0x3b   : > { %14268 = vsyncadd (%p13904_p9), [#allocation9], 4294893536 }
  0x3c   : > { %14270 = dma.done.wait (%p13904_p9), [#allocation12], 1040  }
  0x3d   : > { %14272 = vsyncadd (%p13904_p9), [#allocation12], 4294966256 }
  0x3e   : > { %14274 = dma.done.wait (%p13904_p9), [#allocation15], 16  }
  0x3f   : > { %14276 = vsyncadd (%p13904_p9), [#allocation15], 4294967280  ;;  %p450_p13 = scmp.lt.s32.totalorder %s14384_s13, 1  ;;  %v548_v4 = vld [vmem:[#allocation2 + $0x118] sm:$0x33]  ;;  %vm771_vm1 = vcmask 1041408   ;;  %s10127_s26 = scalar_lea.hbm %s16332_s9, %s14384_s13 }
  0x40   : > { %v549_v5 = vld [vmem:[#allocation2 + $0x120] sm:$0x33]  ;;  %vm470_vm0 = vsmask.f32 7424  ;;  %v682_v8 = vunpack.c.l.b16 %v548_v4  ;;  %v683_v11 = vunpack.c.h.b16 %v548_v4  ;;  %v13181_v17 = vld [vmem:[#allocation2 + $0xf8] sm:$0xf0] }
  0x41   : > { %s451_s3 = scalar_select %p450_p13, %s14384_s13, 1  ;;  %v684_v14 = vunpack.c.l.b16 %v549_v5  ;;  %v685_v15 = vunpack.c.h.b16 %v549_v5  ;;  %v10409_v16 = vld [vmem:[#allocation2 + $0xe0] sm:$0xf]  ;;  %v13178_v20 = vld [vmem:[#allocation2 + $0xe4] sm:$0xf]  ;;  %vm490_vm2 = vcmask 1046528  }
  0x42   : > { %v724_v13 = vpack.c.b16 %v682_v8, %v682_v8  ;;  %v725_v19 = vpack.c.b16 %v683_v11, %v683_v11  ;;  %v10411_v21 = vld [vmem:[#allocation2 + $0xfc] sm:$0xf0]  ;;  %v10417_v26 = vld [vmem:[#allocation2 + $0xe8] sm:$0xf]  ;;  %v13182_v27 = vld [vmem:[#allocation2 + $0x100] sm:$0xf0]  ;;  %v10410_v30 = vor.u32 %v13181_v17, %v10409_v16 }
  0x43   : > { %s13147_s5 = sshll.u32 %s451_s3, 4  ;;  %v726_v24 = vpack.c.b16 %v684_v14, %v684_v14  ;;  %v727_v25 = vpack.c.b16 %v685_v15, %v685_v15  ;;  %v13179_v31 = vld [vmem:[#allocation2 + $0xec] sm:$0xf]  ;;  %v10419_v32 = vld [vmem:[#allocation2 + $0x104] sm:$0xf0]  ;;  %v10414_v36 = vor.u32 %v13178_v20, %v10411_v21  ;;  %s14311_s16 = smov 28   ;;  %v10418_v43 = vor.u32 %v13182_v27, %v10417_v26 }
  0x44   : > { %s454_s18 = scalar_lea.vmem %s16323_s0, %s13147_s5  ;;  %v773_v23 = vsel %vm771_vm1, %v724_v13, 0  ;;  %v776_v29 = vsel %vm771_vm1, %v725_v19, 0  ;;  %v10381_v37 = vld [vmem:[#allocation2 + $0xa8] sm:$0xf]  ;;  %v13174_v38 = vld [vmem:[#allocation2 + $0xc0] sm:$0xf0]  ;;  %v10422_v44 = vor.u32 %v13179_v31, %v10419_v32 }
  0x45   : > { %v14491_v0 = vld [vmem:[%s454_s18] sm:$0xff]  ;;  %v10293_v1 = vld [vmem:[%s454_s18 + $0x8] sm:$0xf]  ;;  %v13149_v2 = vld [vmem:[%s454_s18 + $0x8] sm:$0x30]  ;;  %795 = vmatpush.bf16.msra.mxu0 %v773_v23  ;;  %814 = vmatpush.bf16.msra.mxu1 %v776_v29  ;;  %v779_v34 = vsel %vm771_vm1, %v726_v24, 0  ;;  %v10382_v46 = vor.u32 %v13174_v38, %v10381_v37 }
  0x46   : > { %v14493_v3 = vor.u32 %v13149_v2, %v10293_v1  ;;  %v472_v6 = vshrl.u32 %v14491_v0, 16  ;;  %v474_v7 = vshll.u32 %v14491_v0, 16  ;;  %v782_v35 = vsel %vm771_vm1, %v727_v25, 0  ;;  %v13171_v39 = vld [vmem:[#allocation2 + $0xac] sm:$0xf]  ;;  %833 = vmatpush.bf16.msra.mxu2 %v779_v34  ;;  %s14312_s2 = smov 56  }
  0x47   : > { %v10383_v40 = vld [vmem:[#allocation2 + $0xc4] sm:$0xf0]  ;;  %v491_v41 = vrot.slane %v14491_v0, 1  ;;  %852 = vmatpush.bf16.msra.mxu3 %v782_v35  ;;  %v10389_v45 = vld [vmem:[#allocation2 + $0xb0] sm:$0xf]  ;;  %vm498_vm3 = vcmask 228352  }
  0x48   : > { %v479_v9 = vshll.u32 %v14493_v3, 16  ;;  %v483_v10 = vshrl.u32 %v14493_v3, 16  ;;  %v476_v12 = vrot.slane %v474_v7, 1  ;;  %v492_v42 = vrot.slane %v14493_v3, 1  ;;  %v13175_v47 = vld [vmem:[#allocation2 + $0xc8] sm:$0xf0] }
  0x49   : > { %796 = vmatpush.bf16.msra.mxu0 %v10410_v30  ;;  %v13172_v48 = vld [vmem:[#allocation2 + $0xb4] sm:$0xf]  ;;  %v10391_v49 = vld [vmem:[#allocation2 + $0xcc] sm:$0xf0]  ;;  %815 = vmatpush.bf16.msra.mxu1 %v10414_v36  ;;  %v10386_v50 = vor.u32 %v13171_v39, %v10383_v40  ;;  %v13167_v52 = vld [vmem:[#allocation2 + $0x88] sm:$0xf0]  ;;  %v10390_v56 = vor.u32 %v13175_v47, %v10389_v45 }
  0x4a   : > { %v481_v18 = vrot.slane %v479_v9, 1  ;;  %v477_v22 = vor.u32 %v476_v12, %v472_v6  ;;  %v10353_v51 = vld [vmem:[#allocation2 + $0x70] sm:$0xf]  ;;  %v13164_v53 = vld [vmem:[#allocation2 + $0x74] sm:$0xf]  ;;  %v493_v55 = vsel %vm490_vm2, %v491_v41, %v492_v42  ;;  %834 = vmatpush.bf16.msra.mxu2 %v10418_v43  ;;  %v10394_v57 = vor.u32 %v13172_v48, %v10391_v49  ;;  %s448_s17 = sand.u32 1, %s14287_s10  }
  0x4b   : > { %v10355_v54 = vld [vmem:[#allocation2 + $0x8c] sm:$0xf0]  ;;  %853 = vmatpush.bf16.msra.mxu3 %v10422_v44  ;;  %v10361_v58 = vld [vmem:[#allocation2 + $0x78] sm:$0xf]  ;;  %v10354_v59 = vor.u32 %v13167_v52, %v10353_v51  ;;  %v13168_v60 = vld [vmem:[#allocation2 + $0x90] sm:$0xf0] }
  0x4c   : > { %v485_v28 = vor.u32 %v483_v10, %v481_v18  ;;  %v482_v33 = vsel %vm470_vm0, %v477_v22, %v481_v18  ;;  %v13165_v61 = vld [vmem:[#allocation2 + $0x7c] sm:$0xf]  ;;  %v10363_v62 = vld [vmem:[#allocation2 + $0x94] sm:$0xf0]  ;;  %v10358_v63 = vor.u32 %v13164_v53, %v10355_v54  ;;  %v10362_v1 = vor.u32 %v13168_v60, %v10361_v58  ;;  %v13160_v5 = vld [vmem:[#allocation2 + $0x50] sm:$0xf0] }
  0x4d   : > { %486 = vrot.lane.b32.xlu0 %v482_v33, %s14311_s16  ;;  %797 = vmatpush.bf16.msra.mxu0 %v10382_v46  ;;  %v10366_v2 = vor.u32 %v13165_v61, %v10363_v62  ;;  %v10325_v4 = vld [vmem:[#allocation2 + $0x38] sm:$0xf]  ;;  %v13157_v6 = vld [vmem:[#allocation2 + $0x3c] sm:$0xf]  ;;  %v10333_v9 = vld [vmem:[#allocation2 + $0x40] sm:$0xf] }
  0x4e   : > { %488 = vrot.lane.b32.xlu1 %v485_v28, %s14311_s16  ;;  %816 = vmatpush.bf16.msra.mxu1 %v10386_v50  ;;  %v10326_v7 = vor.u32 %v13160_v5, %v10325_v4  ;;  %v10327_v8 = vld [vmem:[#allocation2 + $0x54] sm:$0xf0]  ;;  %v13161_v10 = vld [vmem:[#allocation2 + $0x58] sm:$0xf0]  ;;  %v13158_v13 = vld [vmem:[#allocation2 + $0x44] sm:$0xf] }
  0x4f   : > { %835 = vmatpush.bf16.msra.mxu2 %v10390_v56  ;;  %854 = vmatpush.bf16.msra.mxu3 %v10394_v57  ;;  %v10330_v11 = vor.u32 %v13157_v6, %v10327_v8  ;;  %v10334_v12 = vor.u32 %v13161_v10, %v10333_v9  ;;  %v10335_v14 = vld [vmem:[#allocation2 + $0x5c] sm:$0xf0]  ;;  %v13153_v17 = vld [vmem:[#allocation2 + $0x18] sm:$0xf0]  ;;  %v13150_v18 = vld [vmem:[#allocation2 + $0x4] sm:$0xf] }
  0x50   : > { %v10297_v15 = vld [vmem:[#allocation2] sm:$0xf]  ;;  %v10338_v16 = vor.u32 %v13158_v13, %v10335_v14  ;;  %v10305_v22 = vld [vmem:[#allocation2 + $0x8] sm:$0xf]  ;;  %v13154_v23 = vld [vmem:[#allocation2 + $0x20] sm:$0xf0] }
  0x51   : > { %798 = vmatpush.bf16.msra.mxu0 %v10354_v59  ;;  %v10299_v19 = vld [vmem:[#allocation2 + $0x1c] sm:$0xf0]  ;;  %v10298_v20 = vor.u32 %v13153_v17, %v10297_v15  ;;  %v13151_v24 = vld [vmem:[#allocation2 + $0xc] sm:$0xf]  ;;  %v10306_v25 = vor.u32 %v13154_v23, %v10305_v22  ;;  %v10307_v26 = vld [vmem:[#allocation2 + $0x24] sm:$0xf0] }
  0x52   : > { %817 = vmatpush.bf16.msra.mxu1 %v10358_v63  ;;  %v10302_v21 = vor.u32 %v13150_v18, %v10299_v19  ;;  %v10310_v27 = vor.u32 %v13151_v24, %v10307_v26  ;;  %v550_v28 = vld [vmem:[#allocation2 + $0x128] sm:$0x33]  ;;  %v551_v29 = vld [vmem:[#allocation2 + $0x130] sm:$0x3]  ;;  %v13180_v38 = vld [vmem:[#allocation2 + $0xf4] sm:$0xf] }
  0x53   : > { %836 = vmatpush.bf16.msra.mxu2 %v10362_v1  ;;  %855 = vmatpush.bf16.msra.mxu3 %v10366_v2  ;;  %v686_v30 = vunpack.c.l.b16 %v550_v28  ;;  %v687_v31 = vunpack.c.h.b16 %v550_v28  ;;  %v688_v32 = vunpack.c.l.b16 %v551_v29  ;;  %v10425_v33 = vld [vmem:[#allocation2 + $0xf0] sm:$0xf]  ;;  %v13183_v37 = vld [vmem:[#allocation2 + $0x108] sm:$0xf0]  ;;  %v10433_v40 = vld [vmem:[#allocation2 + $0xf8] sm:$0xf] }
  0x54   : > { %v10427_v39 = vld [vmem:[#allocation2 + $0x10c] sm:$0xf0]  ;;  %v13184_v41 = vld [vmem:[#allocation2 + $0x110] sm:$0xf0]  ;;  %v10426_v45 = vor.u32 %v13183_v37, %v10425_v33  ;;  %v10397_v48 = vld [vmem:[#allocation2 + $0xb8] sm:$0xf] }
  0x55   : > { %494 = vrot.lane.b32.xlu0 %v493_v55, %s14312_s2  ;;  %799 = vmatpush.bf16.msra.mxu0 %v10326_v7  ;;  %v728_v34 = vpack.c.b16 %v686_v30, %v686_v30  ;;  %v729_v35 = vpack.c.b16 %v687_v31, %v687_v31  ;;  %v730_v36 = vpack.c.b16 %v688_v32, %v688_v32  ;;  %v13176_v49 = vld [vmem:[#allocation2 + $0xd0] sm:$0xf0]  ;;  %v13173_v50 = vld [vmem:[#allocation2 + $0xbc] sm:$0xf]  ;;  %v10399_v52 = vld [vmem:[#allocation2 + $0xd4] sm:$0xf0] }
  0x56   : > { %496 = vrot.lane.b32.xlu1 %v492_v42, %s14312_s2  ;;  %818 = vmatpush.bf16.msra.mxu1 %v10330_v11  ;;  %v10430_v46 = vor.u32 %v13180_v38, %v10427_v39  ;;  %v10434_v47 = vor.u32 %v13184_v41, %v10433_v40  ;;  %v10398_v51 = vor.u32 %v13176_v49, %v10397_v48  ;;  %v10405_v53 = vld [vmem:[#allocation2 + $0xc0] sm:$0xf]  ;;  %v13177_v54 = vld [vmem:[#allocation2 + $0xd8] sm:$0xf0]  ;;  %v13166_v59 = vld [vmem:[#allocation2 + $0x84] sm:$0xf] }
  0x57   : > { %837 = vmatpush.bf16.msra.mxu2 %v10334_v12  ;;  %856 = vmatpush.bf16.msra.mxu3 %v10338_v16  ;;  %v785_v42 = vsel %vm771_vm1, %v728_v34, 0  ;;  %v788_v43 = vsel %vm771_vm1, %v729_v35, 0  ;;  %v791_v44 = vsel %vm771_vm1, %v730_v36, 0  ;;  %v10402_v55 = vor.u32 %v13173_v50, %v10399_v52  ;;  %v10369_v57 = vld [vmem:[#allocation2 + $0x80] sm:$0xf]  ;;  %s449_s29 = scalar_lea.vmem [#allocation16], %s448_s17 }
  0x58   : > { %v10406_v56 = vor.u32 %v13177_v54, %v10405_v53  ;;  %v13169_v58 = vld [vmem:[#allocation2 + $0x98] sm:$0xf0]  ;;  %v10371_v61 = vld [vmem:[#allocation2 + $0x9c] sm:$0xf0]  ;;  %v10377_v62 = vld [vmem:[#allocation2 + $0x88] sm:$0xf] }
  0x59   : > { %800 = vmatpush.bf16.msra.mxu0 %v10298_v20  ;;  %v10370_v60 = vor.u32 %v13169_v58, %v10369_v57  ;;  %v13170_v63 = vld [vmem:[#allocation2 + $0xa0] sm:$0xf0]  ;;  %v10374_v1 = vor.u32 %v13166_v59, %v10371_v61  ;;  %v10341_v4 = vld [vmem:[#allocation2 + $0x48] sm:$0xf]  ;;  %v13159_v6 = vld [vmem:[#allocation2 + $0x4c] sm:$0xf] }
  0x5a   : > { %819 = vmatpush.bf16.msra.mxu1 %v10302_v21  ;;  %v10378_v2 = vor.u32 %v13170_v63, %v10377_v62  ;;  %v13162_v5 = vld [vmem:[#allocation2 + $0x60] sm:$0xf0]  ;;  %v10343_v7 = vld [vmem:[#allocation2 + $0x64] sm:$0xf0]  ;;  %v10349_v8 = vld [vmem:[#allocation2 + $0x50] sm:$0xf] }
  0x5b   : > { %838 = vmatpush.bf16.msra.mxu2 %v10306_v25  ;;  %857 = vmatpush.bf16.msra.mxu3 %v10310_v27  ;;  %v13163_v9 = vld [vmem:[#allocation2 + $0x68] sm:$0xf0]  ;;  %v10342_v11 = vor.u32 %v13162_v5, %v10341_v4  ;;  %v10346_v12 = vor.u32 %v13159_v6, %v10343_v7  ;;  %v10313_v14 = vld [vmem:[#allocation2 + $0x10] sm:$0xf]  ;;  %v13152_v16 = vld [vmem:[#allocation2 + $0x14] sm:$0xf] }
  0x5c   : > { %v10350_v13 = vor.u32 %v13163_v9, %v10349_v8  ;;  %v13155_v15 = vld [vmem:[#allocation2 + $0x28] sm:$0xf0]  ;;  %v10315_v17 = vld [vmem:[#allocation2 + $0x2c] sm:$0xf0]  ;;  %v10321_v18 = vld [vmem:[#allocation2 + $0x18] sm:$0xf] }
  0x5d   : > { %871 = vmatpush.bf16.msrb.mxu0 %v785_v42  ;;  %v13156_v19 = vld [vmem:[#allocation2 + $0x30] sm:$0xf0]  ;;  %v10314_v20 = vor.u32 %v13155_v15, %v10313_v14  ;;  %v10318_v21 = vor.u32 %v13152_v16, %v10315_v17  ;;  %vm503_vm4 = vcmask 457728   ;;  %vm766_vm5 = vcmask 687104   ;;  %v13223_v30 = vld [vmem:[#allocation7 + $0x134] sm:$0xf] }
  0x5e   : > { %890 = vmatpush.bf16.msrb.mxu1 %v788_v43  ;;  %v10322_v22 = vor.u32 %v13156_v19, %v10321_v18  ;;  %v10509_v32 = vld [vmem:[#allocation7 + $0x138] sm:$0xf0]  ;;  %v10499_v34 = vld [vmem:[#allocation7 + $0x120] sm:$0xf]  ;;  %v13222_v35 = vld [vmem:[#allocation7 + $0x124] sm:$0xf0] }
  0x5f   : > { %909 = vmatpush.bf16.msrb.mxu2 %v791_v44  ;;  %v14530_v33 = vor.u32 %v13223_v30, %v10509_v32  ;;  %v13221_v36 = vld [vmem:[#allocation7 + $0x124] sm:$0xf]  ;;  %v14534_v37 = vor.u32 %v13222_v35, %v10499_v34  ;;  %v10501_v38 = vld [vmem:[#allocation7 + $0x128] sm:$0xf0]  ;;  %v10491_v40 = vld [vmem:[#allocation7 + $0x110] sm:$0xf] }
  0x60   : > { %v14536_v39 = vor.u32 %v13221_v36, %v10501_v38  ;;  %v13220_v41 = vld [vmem:[#allocation7 + $0x114] sm:$0xf0]  ;;  %v13219_v42 = vld [vmem:[#allocation7 + $0x114] sm:$0xf]  ;;  %v10493_v44 = vld [vmem:[#allocation7 + $0x118] sm:$0xf0] }
  0x61   : > { %872 = vmatpush.bf16.msrb.mxu0 %v10426_v45  ;;  %16527 = vst [vmem:[#allocation24_spill] sm:$0xff] %v14530_v33  ;;  %v14540_v43 = vor.u32 %v13220_v41, %v10491_v40  ;;  %v14542_v45 = vor.u32 %v13219_v42, %v10493_v44  ;;  %v13217_v48 = vld [vmem:[#allocation7 + $0x104] sm:$0xf]  ;;  %v10485_v50 = vld [vmem:[#allocation7 + $0x108] sm:$0xf0]  ;;  %vm1851_vm6 = vcmask 1043456  }
  0x62   : > { %891 = vmatpush.bf16.msrb.mxu1 %v10430_v46  ;;  %16528 = vst [vmem:[#allocation25_spill] sm:$0xff] %v14534_v37  ;;  %v10483_v46 = vld [vmem:[#allocation7 + $0x100] sm:$0xf]  ;;  %v10475_v52 = vld [vmem:[#allocation7 + $0xf0] sm:$0xf]  ;;  %vm1187_vm7 = vcmask 523264  }
  0x63   : > { %910 = vmatpush.bf16.msrb.mxu2 %v10434_v47  ;;  %16529 = vst [vmem:[#allocation26_spill] sm:$0xff] %v14536_v39  ;;  %v13218_v47 = vld [vmem:[#allocation7 + $0x104] sm:$0xf0]  ;;  %v13216_v53 = vld [vmem:[#allocation7 + $0xf4] sm:$0xf0]  ;;  %vm4054_vm8 = vcmask 1041409  }
  0x64   : > { %16530 = vst [vmem:[#allocation27_spill] sm:$0xff] %v14540_v43  ;;  %v14546_v49 = vor.u32 %v13218_v47, %v10483_v46  ;;  %v10539_v54 = vld [vmem:[#allocation7 + $0x170] sm:$0xf]  ;;  %v13215_v57 = vld [vmem:[#allocation7 + $0xf4] sm:$0xf]  ;;  %vm4056_vm9 = vcmask 1042434  }
  0x65   : > { %873 = vmatpush.bf16.msrb.mxu0 %v10398_v51  ;;  %16531 = vst [vmem:[#allocation28_spill] sm:$0xff] %v14542_v45  ;;  %v14548_v51 = vor.u32 %v13217_v48, %v10485_v50  ;;  %v10477_v58 = vld [vmem:[#allocation7 + $0xf8] sm:$0xf0]  ;;  %v13231_v61 = vld [vmem:[#allocation7 + $0x174] sm:$0xf]  ;;  %vm4058_vm10 = vcmask 1043459  }
  0x66   : > { %892 = vmatpush.bf16.msrb.mxu1 %v10402_v55  ;;  %v14552_v55 = vor.u32 %v13216_v53, %v10475_v52  ;;  %v10541_v62 = vld [vmem:[#allocation7 + $0x178] sm:$0xf0]  ;;  %v13214_v4 = vld [vmem:[#allocation7 + $0xe4] sm:$0xf0]  ;;  %v10531_v5 = vld [vmem:[#allocation7 + $0x160] sm:$0xf] }
  0x67   : > { %911 = vmatpush.bf16.msrb.mxu2 %v10406_v56  ;;  %v13232_v56 = vld [vmem:[#allocation7 + $0x174] sm:$0xf0]  ;;  %v13230_v7 = vld [vmem:[#allocation7 + $0x164] sm:$0xf0]  ;;  %v13213_v8 = vld [vmem:[#allocation7 + $0xe4] sm:$0xf] }
  0x68   : > { %16532 = vst [vmem:[#allocation29_spill] sm:$0xff] %v14552_v55  ;;  %v14554_v59 = vor.u32 %v13232_v56, %v10539_v54  ;;  %v14558_v63 = vld [vmem:[#allocation5] sm:$0x7f]  ;;  %v10469_v9 = vld [vmem:[#allocation7 + $0xe8] sm:$0xf0]  ;;  %vm4060_vm11 = vcmask 1044484  }
  0x69   : > { %874 = vmatpush.bf16.msrb.mxu0 %v10370_v60  ;;  %v14556_v60 = vor.u32 %v13215_v57, %v10477_v58  ;;  %v14573_v14 = vperm.slane %v14558_v63, 0  ;;  %v14576_v16 = vperm.slane %v14558_v63, 1  ;;  %v10459_v19 = vld [vmem:[#allocation7 + $0xd0] sm:$0xf]  ;;  %v10451_v35 = vld [vmem:[#allocation7 + $0xc0] sm:$0xf] }
  0x6a   : > { %893 = vmatpush.bf16.msrb.mxu1 %v10374_v1  ;;  %v14561_v1 = vor.u32 %v13231_v61, %v10541_v62  ;;  %v13210_v36 = vld [vmem:[#allocation7 + $0xc4] sm:$0xf0]  ;;  %v10515_v38 = vld [vmem:[#allocation7 + $0x140] sm:$0xf]  ;;  %v13209_v42 = vld [vmem:[#allocation7 + $0xc4] sm:$0xf] }
  0x6b   : > { %912 = vmatpush.bf16.msrb.mxu2 %v10378_v2  ;;  %16533 = vst [vmem:[#allocation30_spill] sm:$0xff] %v14556_v60  ;;  %v10467_v2 = vld [vmem:[#allocation7 + $0xe0] sm:$0xf]  ;;  %v14603_v40 = vor.u32 %v13210_v36, %v10451_v35  ;;  %v13226_v41 = vld [vmem:[#allocation7 + $0x144] sm:$0xf0]  ;;  %vm4062_vm12 = vcmask 1045509  }
  0x6c   : > { %v14566_v6 = vor.u32 %v13214_v4, %v10467_v2  ;;  %v10453_v44 = vld [vmem:[#allocation7 + $0xc8] sm:$0xf0]  ;;  %v14606_v48 = vor.u32 %v13226_v41, %v10515_v38  ;;  %v13225_v50 = vld [vmem:[#allocation7 + $0x144] sm:$0xf]  ;;  %vm4064_vm13 = vcmask 1046534   ;;  %vm4066_vm14 = vcmask 1047559  }
  0x6d   : > { %875 = vmatpush.bf16.msrb.mxu0 %v10342_v11  ;;  %v14570_v11 = vor.u32 %v13213_v8, %v10469_v9  ;;  %16541 = vst [vmem:[#allocation38_spill] sm:$0xff] %v14603_v40  ;;  %v10517_v52 = vld [vmem:[#allocation7 + $0x148] sm:$0xf0]  ;;  %v14611_v58 = vor.u32 %v13209_v42, %v10453_v44  ;;  %v14634_v44 = vperm.slane %v14558_v63, 5  ;;  %vm10104_vm15 = vcmask 1040384   ;;  %s10129_s27 = sshll.u32 %s449_s29, 4  ;;  %s10130_s27 = int_to_ptr.vmem [resolvable:$true] %s10129_s27 }
  0x6e   : > { %894 = vmatpush.bf16.msrb.mxu1 %v10346_v12  ;;  %16534 = vst [vmem:[#allocation31_spill] sm:$0xff] %v14566_v6  ;;  %v13229_v12 = vld [vmem:[#allocation7 + $0x164] sm:$0xf]  ;;  %v14613_v61 = vor.u32 %v13225_v50, %v10517_v52  ;;  %s10131_s1 = sshll.u32 %s10127_s26, 4  ;;  %s10119_s28 = scalar_lea.sflag [#allocation4], %s448_s17  ;;  %s10132_s1 = int_to_ptr.hbm [resolvable:$true] %s10131_s1 }
  0x6f   : > { %913 = vmatpush.bf16.msrb.mxu2 %v10350_v13  ;;  %16536 = vst [vmem:[#allocation33_spill] sm:$0xff] %v14570_v11  ;;  %v10533_v13 = vld [vmem:[#allocation7 + $0x168] sm:$0xf0]  ;;  %s14227_s25 = sshra.s32 %s10132_s1, 4  ;;  %s14233_s13 = scalar_lea.hbm %s16332_s9, 2  ;;  %s14228_s25 = int_to_ptr.hbm [resolvable:$true] %s14227_s25 }
  0x70   : > { %v14579_v18 = vor.u32 %v13229_v12, %v10533_v13  ;;  %16542 = vst [vmem:[#allocation39_spill] sm:$0xff] %v14611_v58  ;;  %s14229_s4 = scalar_lea.hbm %s14228_s25, 1  ;;  %p14234_p3 = scmp.lt.s32.totalorder %s14228_s25, %s16332_s9 }
  0x71   : > { %876 = vmatpush.bf16.msrb.mxu0 %v10314_v20  ;;  %v13212_v20 = vld [vmem:[#allocation7 + $0xd4] sm:$0xf0]  ;;  %p14230_p0 = scmp.ne.s32.totalorder %s14228_s25, %s14229_s4  ;;  %p14235_p4 = scmp.lt.s32.totalorder %s14233_s13, %s14229_s4 }
  0x72   : > { %895 = vmatpush.bf16.msrb.mxu1 %v10318_v21  ;;  %16537 = vst [vmem:[#allocation34_spill] sm:$0xff] %v14579_v18  ;;  %v10523_v21 = vld [vmem:[#allocation7 + $0x150] sm:$0xf] }
  0x73   : > { %914 = vmatpush.bf16.msrb.mxu2 %v10322_v22  ;;  %v14584_v22 = vor.u32 %v13212_v20, %v10459_v19  ;;  %v13199_v19 = vld [vmem:[#allocation7 + $0x74] sm:$0xf]  ;;  %p14231_p1 = pnand %p14230_p0, %p14401_p5  ;;  %p14236_p7 = por %p14235_p4, %p14234_p3 }
  0x75   : > { %16538 = vst [vmem:[#allocation35_spill] sm:$0xff] %v14584_v22  ;;  %p14232_p2 = pneg %p14231_p1 }
  0x77   : > { %p14237_p8 = pnand %p14236_p7, %p14232_p2 }
  0xbf   : > { %v487_v10 = vpop.permute.xlu0 %486 }
  0xc0   : > { %v500_v23 = vsel %vm498_vm3, %v14491_v0, %v487_v10  ;;  %v489_v26 = vpop.permute.xlu1 %488  ;;  %v10507_v0 = vld [vmem:[#allocation7 + $0x130] sm:$0xf]  ;;  %v14568_v10 = vor.u32 %v13230_v7, %v10531_v5 }
  0xc1   : > { %v502_v27 = vsel %vm498_vm3, %v14493_v3, %v489_v26  ;;  %v13224_v3 = vld [vmem:[#allocation7 + $0x134] sm:$0xf0]  ;;  %v10461_v26 = vld [vmem:[#allocation7 + $0xd8] sm:$0xf0] }
  0xc2   : > { %v14528_v31 = vor.u32 %v13224_v3, %v10507_v0  ;;  %16535 = vst [vmem:[#allocation32_spill] sm:$0xff] %v14568_v10  ;;  %v10525_v3 = vld [vmem:[#allocation7 + $0x158] sm:$0xf0] }
  0xc4   : > { %1194 = vmatpush.bf16.msrb.mxu3 %v14528_v31 }
  0xc7   : > { %v495_v24 = vpop.permute.xlu0 %494 }
  0xc8   : > { %v505_v25 = vsel %vm503_vm4, %v500_v23, %v495_v24  ;;  %v497_v28 = vpop.permute.xlu1 %496  ;;  %1195 = vmatpush.bf16.msrb.mxu3 %v14534_v37  ;;  %v13228_v23 = vld [vmem:[#allocation7 + $0x154] sm:$0xf0]  ;;  %v13211_v24 = vld [vmem:[#allocation7 + $0xd4] sm:$0xf] }
  0xc9   : > { %10435 = vmatmul.msk.bf16.vlgmr.msra.gmra.mxu0 %vm766_vm5, %v505_v25  ;;  %10437 = vmatmul.msk.bf16.vlgmr.msra.gmra.mxu1 %vm766_vm5, %v505_v25  ;;  %v507_v29 = vsel %vm503_vm4, %v502_v27, %v497_v28  ;;  %v13227_v27 = vld [vmem:[#allocation7 + $0x154] sm:$0xf]  ;;  %v14589_v28 = vperm.slane %v14558_v63, 2  ;;  %v14595_v0 = vor.u32 %v13211_v24, %v10461_v26  ;;  %v10609_v24 = vld [vmem:[#allocation7 + $0x78] sm:$0xf0] }
  0xca   : > { %10439 = vmatmul.msk.bf16.vlgmr.msra.gmra.mxu2 %vm766_vm5, %v505_v25  ;;  %10441 = vmatmul.msk.bf16.vlgmr.msra.gmra.mxu3 %vm766_vm5, %v505_v25  ;;  %v14600_v34 = vor.u32 %v13227_v27, %v10525_v3  ;;  %v14624_v26 = vor.u32 %v13199_v19, %v10609_v24  ;;  %v10591_v24 = vld [vmem:[#allocation7 + $0x50] sm:$0xf] }
  0xcb   : > { %1230 = vmatpush.bf16.msra.mxu1 %v14530_v33  ;;  %1216 = vmatpush.bf16.msra.mxu0 %v14554_v59  ;;  %16539 = vst [vmem:[#allocation36_spill] sm:$0xff] %v14595_v0 }
  0xcc   : > { %1196 = vmatpush.bf16.msrb.mxu3 %v14540_v43  ;;  %1252 = vmatpush.bf16.msra.mxu2 %v14561_v1  ;;  %16540 = vst [vmem:[#allocation37_spill] sm:$0xff] %v14600_v34 }
  0xcd   : > { %16544 = vst [vmem:[#allocation41_spill] sm:$0xff] %v14624_v26 }
  0xcf   : > { %1231 = vmatpush.bf16.msra.mxu1 %v14536_v39  ;;  %1217 = vmatpush.bf16.msra.mxu0 %v14568_v10 }
  0xd0   : > { %1197 = vmatpush.bf16.msrb.mxu3 %v14546_v49  ;;  %1253 = vmatpush.bf16.msra.mxu2 %v14579_v18 }
  0xd3   : > { %1232 = vmatpush.bf16.msra.mxu1 %v14542_v45 }
  0xd4   : > { %1198 = vmatpush.bf16.msrb.mxu3 %v14552_v55  ;;  %1254 = vmatpush.bf16.msra.mxu2 %v14600_v34 }
  0xd7   : > { %1233 = vmatpush.bf16.msra.mxu1 %v14548_v51 }
  0xd8   : > { %1199 = vmatpush.bf16.msrb.mxu3 %v14566_v6  ;;  %1255 = vmatpush.bf16.msra.mxu2 %v14613_v61  ;;  %v10617_v6 = vld [vmem:[#allocation7 + $0x88] sm:$0xf0] }
  0xd9   : > { %10436 = vmatmul.msk.bf16.gmra.mxu0 %vm766_vm5, %v507_v29  ;;  %10438 = vmatmul.msk.bf16.gmra.mxu1 %vm766_vm5, %v507_v29 }
  0xda   : > { %10440 = vmatmul.msk.bf16.gmra.mxu2 %vm766_vm5, %v507_v29  ;;  %10442 = vmatmul.msk.bf16.gmra.mxu3 %vm766_vm5, %v507_v29 }
  0xdb   : > { %1234 = vmatpush.bf16.msra.mxu1 %v14556_v60 }
  0xdc   : > { %1200 = vmatpush.bf16.msrb.mxu3 %v14584_v22 }
  0xdf   : > { %1235 = vmatpush.bf16.msra.mxu1 %v14570_v11 }
  0xe0   : > { %1201 = vmatpush.bf16.msrb.mxu3 %v14603_v40 }
  0xe3   : > { %1236 = vmatpush.bf16.msra.mxu1 %v14595_v0 }
  0xe7   : > { %1237 = vmatpush.bf16.msra.mxu1 %v14611_v58 }
  0xe9   : > { %10443 = vmatmul.msk.bf16.vlgmr.msrb.gmra.mxu0 %vm766_vm5, %v505_v25  ;;  %10445 = vmatmul.msk.bf16.vlgmr.msrb.gmra.mxu1 %vm766_vm5, %v505_v25 }
  0xea   : > { %10447 = vmatmul.msk.bf16.vlgmr.msrb.gmra.mxu2 %vm766_vm5, %v505_v25  ;;  %v14586_v25 = vor.u32 %v13228_v23, %v10523_v21 }
  0xeb   : > { %1431 = vmatpush.bf16.msrb.mxu1 %v14624_v26 }
  0xec   : > { %1218 = vmatpush.bf16.msra.mxu0 %v14586_v25 }
  0xf0   : > { %1219 = vmatpush.bf16.msra.mxu0 %v14606_v48 }
  0xf9   : > { %10444 = vmatmul.msk.bf16.gmra.mxu0 %vm766_vm5, %v507_v29  ;;  %10446 = vmatmul.msk.bf16.gmra.mxu1 %vm766_vm5, %v507_v29 }
  0xfa   : > { %10448 = vmatmul.msk.bf16.gmra.mxu2 %vm766_vm5, %v507_v29  ;;  %v14592_v29 = vperm.slane %v14558_v63, 3 }
 0x146   : > { %v802_v15 = vpop.f32.mrf.mxu0  ;;  %v821_v17 = vpop.f32.mrf.mxu1 }
 0x147   : > { %v803_v30 = vadd.f32 %v802_v15, %v14573_v14  ;;  %v822_v32 = vadd.f32 %v821_v17, %v14576_v16  ;;  %v10607_v15 = vld [vmem:[#allocation7 + $0x70] sm:$0xf]  ;;  %v13200_v17 = vld [vmem:[#allocation7 + $0x74] sm:$0xf0] }
 0x148   : > { %v14622_v23 = vor.u32 %v13200_v17, %v10607_v15 }
 0x149   : > { %v926_v62 = vmax.f32 %v803_v30, 0.0  ;;  %v927_v2 = vmax.f32 %v822_v32, 0.0  ;;  %v14627_v32 = vperm.slane %v14558_v63, 4 }
 0x14a   : > { %16543 = vst [vmem:[#allocation40_spill] sm:$0xff] %v14622_v23  ;;  %1395 = vmatpush.bf16.msra.mxu3 %v14622_v23 }
 0x14b   : > { %v954_v20 = vpack.c.bf16 %v927_v2, %v926_v62 }
 0x14d   : > { %v840_v46 = vpop.f32.mrf.mxu2  ;;  %v859_v47 = vpop.f32.mrf.mxu3  ;;  %v1845_v50 = vrot.slane %v954_v20, 4 }
 0x14e   : > { %v841_v53 = vadd.f32 %v840_v46, %v14589_v28  ;;  %v860_v54 = vadd.f32 %v859_v47, %v14592_v29  ;;  %v804_v56 = vpop.f32.mrf.mxu0  ;;  %v823_v57 = vpop.f32.mrf.mxu1  ;;  %v1023_v46 = vunpack.c.l.b16 %v954_v20  ;;  %v1024_v47 = vunpack.c.h.b16 %v954_v20 }
 0x14f   : > { %v805_v4 = vadd.f32 %v804_v56, %v14573_v14  ;;  %v824_v5 = vadd.f32 %v823_v57, %v14576_v16 }
 0x150   : > { %v928_v7 = vmax.f32 %v841_v53, 0.0  ;;  %v929_v8 = vmax.f32 %v860_v54, 0.0  ;;  %v10599_v53 = vld [vmem:[#allocation7 + $0x60] sm:$0xf]  ;;  %v13198_v54 = vld [vmem:[#allocation7 + $0x64] sm:$0xf0] }
 0x151   : > { %v933_v9 = vmax.f32 %v805_v4, 0.0  ;;  %v934_v12 = vmax.f32 %v824_v5, 0.0  ;;  %v13197_v4 = vld [vmem:[#allocation7 + $0x64] sm:$0xf]  ;;  %v10601_v5 = vld [vmem:[#allocation7 + $0x68] sm:$0xf0]  ;;  %v14651_v20 = vor.u32 %v13198_v54, %v10599_v53 }
 0x152   : > { %v14620_v13 = vpack.c.bf16 %v929_v8, %v928_v7 }
 0x153   : > { %v958_v21 = vpack.c.bf16 %v934_v12, %v933_v9  ;;  %v14644_v12 = vperm.slane %v14558_v63, 6  ;;  %16545 = vst [vmem:[#allocation42_spill] sm:$0xff] %v14651_v20  ;;  %v10593_v63 = vld [vmem:[#allocation7 + $0x58] sm:$0xf0]  ;;  %1396 = vmatpush.bf16.msra.mxu3 %v14651_v20  ;;  %v13194_v20 = vld [vmem:[#allocation7 + $0x44] sm:$0xf0] }
 0x154   : > { %v16333_v35 = vrot.slane %v14620_v13, 4  ;;  %v2286_v7 = vunpack.c.l.b16 %v14620_v13  ;;  %v2287_v8 = vunpack.c.h.b16 %v14620_v13 }
 0x155   : > { %v1025_v27 = vunpack.c.l.b16 %v958_v21  ;;  %v842_v3 = vpop.f32.mrf.mxu2  ;;  %v861_v30 = vpop.f32.mrf.mxu3  ;;  %v1026_v52 = vunpack.c.h.b16 %v958_v21  ;;  %v1847_v17 = vrot.slane %v958_v21, 4 }
 0x156   : > { %v843_v36 = vadd.f32 %v842_v3, %v14589_v28  ;;  %v862_v38 = vadd.f32 %v861_v30, %v14592_v29  ;;  %v807_v41 = vpop.f32.mrf.mxu0  ;;  %v826_v42 = vpop.f32.mrf.mxu1  ;;  %v1852_v15 = vsel %vm1851_vm6, %v1845_v50, %v16333_v35  ;;  %v13196_v3 = vld [vmem:[#allocation7 + $0x54] sm:$0xf0]  ;;  %v10583_v35 = vld [vmem:[#allocation7 + $0x40] sm:$0xf] }
 0x157   : > { %v808_v62 = vadd.f32 %v807_v41, %v14573_v14  ;;  %v827_v2 = vadd.f32 %v826_v42, %v14576_v16  ;;  %v14641_v9 = vpack.c.b16 %v1025_v27, %v1023_v46  ;;  %v14653_v30 = vpack.c.b16 %v1026_v52, %v1024_v47  ;;  %v13195_v41 = vld [vmem:[#allocation7 + $0x54] sm:$0xf]  ;;  %v13193_v52 = vld [vmem:[#allocation7 + $0x44] sm:$0xf] }
 0x158   : > { %v935_v56 = vmax.f32 %v843_v36, 0.0  ;;  %v936_v57 = vmax.f32 %v862_v38, 0.0  ;;  %v14655_v27 = vor.u32 %v13197_v4, %v10601_v5  ;;  %v14661_v50 = vor.u32 %v13196_v3, %v10591_v24 }
 0x159   : > { %v940_v36 = vmax.f32 %v808_v62, 0.0  ;;  %v941_v38 = vmax.f32 %v827_v2, 0.0  ;;  %v1859_v53 = vunpack.c.l.b16 %v1852_v15  ;;  %v1860_v62 = vunpack.c.h.b16 %v1852_v15  ;;  %v10585_v15 = vld [vmem:[#allocation7 + $0x48] sm:$0xf0] }
 0x15a   : > { %v14649_v19 = vpack.c.bf16 %v936_v57, %v935_v56  ;;  %16546 = vst [vmem:[#allocation43_spill] sm:$0xff] %v14655_v27  ;;  %v1038_v56 = vshll.u32 %v14641_v9, 16  ;;  %1432 = vmatpush.bf16.msrb.mxu1 %v14655_v27  ;;  %v14666_v57 = vor.u32 %v13195_v41, %v10593_v63  ;;  %v1050_v41 = vshll.u32 %v14653_v30, 16  ;;  %1397 = vmatpush.bf16.msra.mxu3 %v14661_v50 }
 0x15b   : > { %16547 = vst [vmem:[#allocation44_spill] sm:$0xff] %v14661_v50  ;;  %v14675_v23 = vpack.c.bf16 %v941_v38, %v940_v36  ;;  %v14688_v36 = vor.u32 %v13194_v20, %v10583_v35  ;;  %v14690_v38 = vor.u32 %v13193_v52, %v10585_v15  ;;  %v13191_v20 = vld [vmem:[#allocation7 + $0x34] sm:$0xf] }
 0x15c   : > { %v16342_v42 = vrot.slane %v14649_v19, 4  ;;  %v2288_v46 = vunpack.c.l.b16 %v14649_v19  ;;  %v2289_v21 = vunpack.c.h.b16 %v14649_v19  ;;  %16548 = vst [vmem:[#allocation45_spill] sm:$0xff] %v14666_v57 }
 0x15d   : > { %v845_v54 = vpop.f32.mrf.mxu2  ;;  %v864_v47 = vpop.f32.mrf.mxu3  ;;  %16553 = vst [vmem:[#allocation50_spill] sm:$0xff] %v14688_v36 }
 0x15e   : > { %v1853_v2 = vsel %vm1851_vm6, %v1847_v17, %v16342_v42  ;;  %v14671_v4 = vpack.c.b16 %v2288_v46, %v2286_v7  ;;  %v14673_v5 = vpack.c.b16 %v2289_v21, %v2287_v8  ;;  %v809_v24 = vpop.f32.mrf.mxu0  ;;  %v828_v3 = vpop.f32.mrf.mxu1  ;;  %v846_v63 = vadd.f32 %v845_v54, %v14589_v28  ;;  %1433 = vmatpush.bf16.msrb.mxu1 %v14666_v57 }
 0x15f   : > { %v1861_v26 = vunpack.c.l.b16 %v1853_v2  ;;  %v1862_v58 = vunpack.c.h.b16 %v1853_v2  ;;  %v865_v17 = vadd.f32 %v864_v47, %v14592_v29  ;;  %v810_v7 = vadd.f32 %v809_v24, %v14573_v14  ;;  %16554 = vst [vmem:[#allocation51_spill] sm:$0xff] %v14690_v38  ;;  %v13192_v14 = vld [vmem:[#allocation7 + $0x34] sm:$0xf0]  ;;  %v10639_v24 = vld [vmem:[#allocation7 + $0xb0] sm:$0xf]  ;;  %1398 = vmatpush.bf16.msra.mxu3 %v14688_v36 }
 0x160   : > { %16549 = vst [vmem:[#allocation46_spill] sm:$0xff] %v14671_v4  ;;  %v829_v8 = vadd.f32 %v828_v3, %v14576_v16  ;;  %v942_v2 = vmax.f32 %v846_v63, 0.0  ;;  %v13208_v16 = vld [vmem:[#allocation7 + $0xb4] sm:$0xf0]  ;;  %v14702_v63 = vrot.slane %v1038_v56, 1 }
 0x161   : > { %16550 = vst [vmem:[#allocation47_spill] sm:$0xff] %v14673_v5  ;;  %v14683_v46 = vpack.c.b16 %v1861_v26, %v1859_v53  ;;  %v14685_v21 = vpack.c.b16 %v1862_v58, %v1860_v62  ;;  %v943_v54 = vmax.f32 %v865_v17, 0.0  ;;  %v947_v42 = vmax.f32 %v810_v7, 0.0  ;;  %v10575_v5 = vld [vmem:[#allocation7 + $0x30] sm:$0xf] }
 0x162   : > { %v948_v47 = vmax.f32 %v829_v8, 0.0  ;;  %v14696_v58 = vor.u32 %v13192_v14, %v10575_v5  ;;  %v14698_v35 = vor.u32 %v13208_v16, %v10639_v24  ;;  %v10577_v53 = vld [vmem:[#allocation7 + $0x38] sm:$0xf0]  ;;  %v14704_v17 = vrot.slane %v1050_v41, 1  ;;  %1434 = vmatpush.bf16.msrb.mxu1 %v14690_v38  ;;  %v13190_v5 = vld [vmem:[#allocation7 + $0x24] sm:$0xf0] }
 0x163   : > { %16551 = vst [vmem:[#allocation48_spill] sm:$0xff] %v14683_v46  ;;  %v14700_v52 = vpack.c.bf16 %v943_v54, %v942_v2  ;;  %v14710_v7 = vunpack.c.l.b16 %v14675_v23  ;;  %v13207_v54 = vld [vmem:[#allocation7 + $0xb4] sm:$0xf]  ;;  %v14717_v41 = vunpack.c.h.b16 %v14675_v23  ;;  %v10631_v56 = vld [vmem:[#allocation7 + $0xa0] sm:$0xf] }
 0x164   : > { %16552 = vst [vmem:[#allocation49_spill] sm:$0xff] %v14685_v21  ;;  %v14692_v3 = vpack.c.bf16 %v948_v47, %v947_v42  ;;  %v14707_v42 = vor.u32 %v13191_v20, %v10577_v53  ;;  %1417 = vmatpush.bf16.msrb.mxu0 %v14698_v35  ;;  %v10641_v20 = vld [vmem:[#allocation7 + $0xb8] sm:$0xf0]  ;;  %v10567_v53 = vld [vmem:[#allocation7 + $0x20] sm:$0xf]  ;;  %1399 = vmatpush.bf16.msra.mxu3 %v14696_v58 }
 0x165   : > { %16555 = vst [vmem:[#allocation52_spill] sm:$0xff] %v14696_v58  ;;  %v847_v62 = vpop.f32.mrf.mxu2  ;;  %v866_v15 = vpop.f32.mrf.mxu3  ;;  %v13206_v46 = vld [vmem:[#allocation7 + $0xa4] sm:$0xf0]  ;;  %v13189_v38 = vld [vmem:[#allocation7 + $0x24] sm:$0xf]  ;;  %v14735_v50 = vunpack.c.l.b16 %v14700_v52  ;;  %v14738_v36 = vunpack.c.h.b16 %v14700_v52 }
 0x166   : > { %16556 = vst [vmem:[#allocation53_spill] sm:$0xff] %v14698_v35  ;;  %v1029_v8 = vunpack.c.l.b16 %v14692_v3  ;;  %v878_v47 = vpop.f32.mrf.mxu0  ;;  %v897_v2 = vpop.f32.mrf.mxu1  ;;  %v1030_v14 = vunpack.c.h.b16 %v14692_v3  ;;  %v848_v24 = vadd.f32 %v847_v62, %v14589_v28  ;;  %v867_v16 = vadd.f32 %v866_v15, %v14592_v29  ;;  %1435 = vmatpush.bf16.msrb.mxu1 %v14707_v42  ;;  %v10569_v62 = vld [vmem:[#allocation7 + $0x28] sm:$0xf0]  ;;  %v13205_v15 = vld [vmem:[#allocation7 + $0xa4] sm:$0xf] }
 0x167   : > { %16557 = vst [vmem:[#allocation54_spill] sm:$0xff] %v14707_v42  ;;  %v879_v4 = vadd.f32 %v878_v47, %v14627_v32  ;;  %v898_v21 = vadd.f32 %v897_v2, %v14634_v44  ;;  %v10633_v58 = vld [vmem:[#allocation7 + $0xa8] sm:$0xf0]  ;;  %v1856_v42 = vrot.slane %v14692_v3, 4  ;;  %v14752_v35 = vor.u32 %v13206_v46, %v10631_v56  ;;  %v10559_v56 = vld [vmem:[#allocation7 + $0x10] sm:$0xf] }
 0x168   : > { %v14723_v26 = vpack.c.b16 %v1029_v8, %v14710_v7  ;;  %v14730_v28 = vpack.c.b16 %v1030_v14, %v14717_v41  ;;  %v949_v29 = vmax.f32 %v848_v24, 0.0  ;;  %v950_v8 = vmax.f32 %v867_v16, 0.0  ;;  %16558 = vst [vmem:[#allocation55_spill] sm:$0xff] %v14735_v50 }
 0x169   : > { %v930_v47 = vmax.f32 %v879_v4, 0.0  ;;  %v931_v57 = vmax.f32 %v898_v21, 0.0  ;;  %16559 = vst [vmem:[#allocation56_spill] sm:$0xff] %v14738_v36  ;;  %v14741_v24 = vor.u32 %v13207_v54, %v10641_v20  ;;  %v14748_v4 = vor.u32 %v13190_v5, %v10567_v53  ;;  %1418 = vmatpush.bf16.msrb.mxu0 %v14752_v35 }
 0x16a   : > { %v1043_v2 = vshll.u32 %v14723_v26, 16  ;;  %v1055_v14 = vshll.u32 %v14730_v28, 16  ;;  %v14744_v27 = vpack.c.bf16 %v950_v8, %v949_v29  ;;  %16562 = vst [vmem:[#allocation59_spill] sm:$0xff] %v14752_v35  ;;  %v14754_v0 = vor.u32 %v13189_v38, %v10569_v62  ;;  %v13188_v62 = vld [vmem:[#allocation7 + $0x14] sm:$0xf0] }
 0x16b   : > { %16560 = vst [vmem:[#allocation57_spill] sm:$0xff] %v14741_v24  ;;  %v14746_v16 = vpack.c.bf16 %v931_v57, %v930_v47  ;;  %1453 = vmatpush.bf16.msrb.mxu2 %v14741_v24  ;;  %v14756_v22 = vor.u32 %v13205_v15, %v10633_v58  ;;  %1400 = vmatpush.bf16.msra.mxu3 %v14748_v4  ;;  %v10623_v15 = vld [vmem:[#allocation7 + $0x90] sm:$0xf]  ;;  %v13204_v8 = vld [vmem:[#allocation7 + $0x94] sm:$0xf0] }
 0x16c   : > { %16561 = vst [vmem:[#allocation58_spill] sm:$0xff] %v14748_v4  ;;  %v2292_v54 = vunpack.c.l.b16 %v14744_v27  ;;  %v2293_v3 = vunpack.c.h.b16 %v14744_v27  ;;  %v14761_v53 = vrot.slane %v1043_v2, 1  ;;  %v14767_v58 = vrot.slane %v1055_v14, 1  ;;  %1436 = vmatpush.bf16.msrb.mxu1 %v14754_v0  ;;  %v13187_v29 = vld [vmem:[#allocation7 + $0x14] sm:$0xf] }
 0x16d   : > { %v916_v21 = vpop.f32.mrf.mxu2  ;;  %16563 = vst [vmem:[#allocation60_spill] sm:$0xff] %v14754_v0  ;;  %v16377_v57 = vrot.slane %v14746_v16, 4  ;;  %v10561_v0 = vld [vmem:[#allocation7 + $0x18] sm:$0xf0]  ;;  %v13203_v4 = vld [vmem:[#allocation7 + $0x94] sm:$0xf]  ;;  %v14805_v11 = vor.u32 %v13188_v62, %v10559_v56 }
 0x16e   : > { %16564 = vst [vmem:[#allocation61_spill] sm:$0xff] %v14756_v22  ;;  %v880_v20 = vpop.f32.mrf.mxu0  ;;  %v899_v5 = vpop.f32.mrf.mxu1  ;;  %v917_v46 = vadd.f32 %v916_v21, %v14644_v12  ;;  %v14772_v47 = vpack.c.b16 %v2292_v54, %v14735_v50  ;;  %v14775_v2 = vpack.c.b16 %v2293_v3, %v14738_v36  ;;  %v16567_v21 = vrot.slane %v14620_v13, 4  ;;  %v10625_v3 = vld [vmem:[#allocation7 + $0x98] sm:$0xf0]  ;;  %v10551_v36 = vld [vmem:[#allocation7] sm:$0xf] }
 0x16f   : > { %v881_v38 = vadd.f32 %v880_v20, %v14627_v32  ;;  %v16568_v20 = vshrl.u32 %v14641_v9, 16  ;;  %v16569_v54 = vshrl.u32 %v14653_v30, 16  ;;  %1454 = vmatpush.bf16.msrb.mxu2 %v14756_v22  ;;  %v16570_v35 = vrot.slane %v14744_v27, 4  ;;  %16571 = vst [vmem:[#allocation64_spill] sm:$0xff] %v14805_v11  ;;  %1401 = vmatpush.bf16.msra.mxu3 %v14805_v11 }
 0x170   : > { %16565 = vst [vmem:[#allocation62_spill] sm:$0xff] %v14772_v47  ;;  %v14782_v14 = vsel %vm1851_vm6, %v16567_v21, %v16377_v57  ;;  %v932_v13 = vmax.f32 %v917_v46, 0.0  ;;  %v900_v21 = vadd.f32 %v899_v5, %v14634_v44  ;;  %v13185_v5 = vld [vmem:[#allocation7 + $0x4] sm:$0xf]  ;;  %v14809_v55 = vor.u32 %v13187_v29, %v10561_v0 }
 0x171   : > { %16566 = vst [vmem:[#allocation63_spill] sm:$0xff] %v14775_v2  ;;  %v1041_v40 = vor.u32 %v14702_v63, %v16568_v20  ;;  %v1053_v50 = vor.u32 %v14704_v17, %v16569_v54  ;;  %v13186_v2 = vld [vmem:[#allocation7 + $0x4] sm:$0xf0]  ;;  %v937_v47 = vmax.f32 %v881_v38, 0.0  ;;  %v10615_v63 = vld [vmem:[#allocation7 + $0x80] sm:$0xf]  ;;  %v14797_v24 = vsel %vm1851_vm6, %v1856_v42, %v16570_v35 }
 0x172   : > { %v13202_v20 = vld [vmem:[#allocation7 + $0x84] sm:$0xf0]  ;;  %v3152_v17 = vunpack.c.l.b16 %v14746_v16  ;;  %v10553_v38 = vld [vmem:[#allocation7 + $0x8] sm:$0xf0]  ;;  %v957_v22 = vpack.c.bf16 %v932_v13, %v932_v13  ;;  %v14807_v35 = vor.u32 %v13204_v8, %v10623_v15  ;;  %v13201_v42 = vld [vmem:[#allocation7 + $0x84] sm:$0xf]  ;;  %v3153_v0 = vunpack.c.h.b16 %v14746_v16  ;;  %1437 = vmatpush.bf16.msrb.mxu1 %v14809_v55 }
 0x173   : > { %v1046_v57 = vsel %vm470_vm0, %v1041_v40, %v14761_v53  ;;  %v1058_v54 = vsel %vm470_vm0, %v1053_v50, %v14767_v58  ;;  %v938_v40 = vmax.f32 %v900_v21, 0.0  ;;  %16573 = vst [vmem:[#allocation66_spill] sm:$0xff] %v14809_v55  ;;  %v14811_v50 = vor.u32 %v13203_v4, %v10625_v3  ;;  %v10707_v3 = vld [vmem:[#allocation7 + $0x1f0] sm:$0xf]  ;;  %v13246_v55 = vld [vmem:[#allocation7 + $0x1e4] sm:$0xf0] }
 0x174   : > { %1202 = vmatmul.bf16.vlgmr.msrb.gmra.mxu3 %v1046_v57  ;;  %1238 = vmatmul.bf16.vlgmr.msra.gmra.mxu1 %v1046_v57  ;;  %16572 = vst [vmem:[#allocation65_spill] sm:$0xff] %v14807_v35  ;;  %v14813_v57 = vor.u32 %v13186_v2, %v10551_v36  ;;  %v14815_v46 = vor.u32 %v13202_v20, %v10615_v63  ;;  %v3582_v13 = vrot.slane %v957_v22, 4  ;;  %v13248_v63 = vld [vmem:[#allocation7 + $0x1f4] sm:$0xf0]  ;;  %v2725_v20 = vunpack.c.l.b16 %v14782_v14 }
 0x175   : > { %10545 = vmatmul.msk.bf16.vlgmr.msra.gmra.mxu0 %vm1187_vm7, %v1058_v54  ;;  %10547 = vmatmul.msk.bf16.vlgmr.msra.gmra.mxu2 %vm1187_vm7, %v1058_v54  ;;  %v918_v60 = vpop.f32.mrf.mxu2  ;;  %16574 = vst [vmem:[#allocation67_spill] sm:$0xff] %v14811_v50  ;;  %v14817_v21 = vpack.c.bf16 %v938_v40, %v937_v47  ;;  %v14822_v15 = vor.u32 %v13185_v5, %v10553_v38  ;;  %v2726_v5 = vunpack.c.h.b16 %v14782_v14  ;;  %v13247_v40 = vld [vmem:[#allocation7 + $0x1f4] sm:$0xf] }
 0x176   : > { %16575 = vst [vmem:[#allocation68_spill] sm:$0xff] %v14813_v57  ;;  %v919_v54 = vadd.f32 %v918_v60, %v14644_v12  ;;  %v883_v56 = vpop.f32.mrf.mxu0  ;;  %v902_v62 = vpop.f32.mrf.mxu1  ;;  %1419 = vmatpush.bf16.msrb.mxu0 %v14807_v35  ;;  %1455 = vmatpush.bf16.msrb.mxu2 %v14811_v50  ;;  %v14829_v22 = vor.u32 %v13201_v42, %v10617_v6  ;;  %v16579_v60 = vrot.slane %v14746_v16, 4  ;;  %v10709_v42 = vld [vmem:[#allocation7 + $0x1f8] sm:$0xf0]  ;;  %v16580_v16 = vrot.slane %v14649_v19, 4 }
 0x177   : > { %16576 = vst [vmem:[#allocation69_spill] sm:$0xff] %v14815_v46  ;;  %v884_v36 = vadd.f32 %v883_v56, %v14627_v32  ;;  %v903_v4 = vadd.f32 %v902_v62, %v14634_v44  ;;  %v2717_v8 = vrot.slane %v14817_v21, 4  ;;  %v3154_v47 = vunpack.c.l.b16 %v14817_v21  ;;  %1402 = vmatpush.bf16.msra.mxu3 %v14813_v57  ;;  %1438 = vmatpush.bf16.msrb.mxu1 %v14822_v15 }
 0x178   : > { %16577 = vst [vmem:[#allocation70_spill] sm:$0xff] %v14822_v15  ;;  %v14834_v29 = vsel %vm1851_vm6, %v16579_v60, %v3582_v13  ;;  %v3155_v2 = vunpack.c.h.b16 %v14817_v21  ;;  %v939_v38 = vmax.f32 %v919_v54, 0.0  ;;  %v10699_v21 = vld [vmem:[#allocation7 + $0x1e0] sm:$0xf]  ;;  %v14852_v19 = vor.u32 %v13248_v63, %v10707_v3 }
 0x179   : > { %16578 = vst [vmem:[#allocation71_spill] sm:$0xff] %v14829_v22  ;;  %v944_v6 = vmax.f32 %v884_v36, 0.0  ;;  %v2720_v13 = vsel %vm1851_vm6, %v16580_v16, %v2717_v8  ;;  %v14844_v56 = vpack.c.b16 %v3154_v47, %v3152_v17  ;;  %v945_v60 = vmax.f32 %v903_v4, 0.0  ;;  %v13245_v17 = vld [vmem:[#allocation7 + $0x1e4] sm:$0xf] }
 0x17a   : > { %v14846_v62 = vpack.c.b16 %v3155_v2, %v3153_v0  ;;  %1420 = vmatpush.bf16.msrb.mxu0 %v14815_v46  ;;  %v2727_v14 = vunpack.c.l.b16 %v2720_v13  ;;  %v2728_v54 = vunpack.c.h.b16 %v2720_v13  ;;  %v961_v36 = vpack.c.bf16 %v939_v38, %v939_v38  ;;  %1456 = vmatpush.bf16.msrb.mxu2 %v14829_v22  ;;  %16583 = vst [vmem:[#allocation74_spill] sm:$0xff] %v14852_v19  ;;  %v10701_v47 = vld [vmem:[#allocation7 + $0x1e8] sm:$0xf0] }
 0x17b   : > { %16581 = vst [vmem:[#allocation72_spill] sm:$0xff] %v14844_v56  ;;  %v14854_v0 = vpack.c.bf16 %v945_v60, %v944_v6  ;;  %v16584_v4 = vshrl.u32 %v14723_v26, 16  ;;  %v14859_v16 = vor.u32 %v13247_v40, %v10709_v42  ;;  %1626 = vmatpush.bf16.msrb.mxu3 %v14852_v19  ;;  %v14869_v63 = vor.u32 %v13246_v55, %v10699_v21 }
 0x17c   : > { %16582 = vst [vmem:[#allocation73_spill] sm:$0xff] %v14846_v62  ;;  %v14862_v62 = vrot.slane %v14723_v26, 1  ;;  %v14864_v38 = vpack.c.b16 %v2727_v14, %v2725_v20  ;;  %v14866_v13 = vpack.c.b16 %v2728_v54, %v2726_v5  ;;  %v3583_v56 = vrot.slane %v961_v36, 4  ;;  %v10691_v20 = vld [vmem:[#allocation7 + $0x1d0] sm:$0xf] }
 0x17d   : > { %v1061_v2 = vor.u32 %v16584_v4, %v14761_v53  ;;  %16585 = vst [vmem:[#allocation75_spill] sm:$0xff] %v14859_v16  ;;  %v921_v3 = vpop.f32.mrf.mxu2  ;;  %v3591_v6 = vunpack.c.l.b16 %v14834_v29  ;;  %v2718_v60 = vrot.slane %v14854_v0, 4  ;;  %1662 = vmatpush.bf16.msra.mxu1 %v14859_v16  ;;  %v14875_v26 = vor.u32 %v13245_v17, %v10701_v47  ;;  %v13244_v5 = vld [vmem:[#allocation7 + $0x1d4] sm:$0xf0]  ;;  %v13243_v36 = vld [vmem:[#allocation7 + $0x1d4] sm:$0xf] }
 0x17e   : > { %16586 = vst [vmem:[#allocation76_spill] sm:$0xff] %v14864_v38  ;;  %v922_v53 = vadd.f32 %v921_v3, %v14644_v12  ;;  %v885_v40 = vpop.f32.mrf.mxu0  ;;  %v904_v42 = vpop.f32.mrf.mxu1  ;;  %v3592_v14 = vunpack.c.h.b16 %v14834_v29  ;;  %v3586_v54 = vsel %vm1851_vm6, %v2717_v8, %v3583_v56  ;;  %v10693_v4 = vld [vmem:[#allocation7 + $0x1d8] sm:$0xf0]  ;;  %v16590_v38 = vrot.slane %v14700_v52, 4  ;;  %v13242_v56 = vld [vmem:[#allocation7 + $0x1c4] sm:$0xf0] }
 0x17f   : > { %16587 = vst [vmem:[#allocation77_spill] sm:$0xff] %v14866_v13  ;;  %v886_v55 = vadd.f32 %v885_v40, %v14627_v32  ;;  %v905_v21 = vadd.f32 %v904_v42, %v14634_v44  ;;  %v3593_v13 = vunpack.c.l.b16 %v3586_v54  ;;  %v3594_v3 = vunpack.c.h.b16 %v3586_v54  ;;  %1627 = vmatpush.bf16.msrb.mxu3 %v14869_v63  ;;  %v10683_v44 = vld [vmem:[#allocation7 + $0x1c0] sm:$0xf] }
 0x180   : > { %16588 = vst [vmem:[#allocation78_spill] sm:$0xff] %v14869_v63  ;;  %v14884_v16 = vsel %vm1851_vm6, %v16590_v38, %v2718_v60  ;;  %v946_v17 = vmax.f32 %v922_v53, 0.0  ;;  %v16591_v29 = vshrl.u32 %v14730_v28, 16  ;;  %v14890_v32 = vor.u32 %v13244_v5, %v10691_v20  ;;  %v10739_v53 = vld [vmem:[#allocation7 + $0x230] sm:$0xf] }
 0x181   : > { %16589 = vst [vmem:[#allocation79_spill] sm:$0xff] %v14875_v26  ;;  %v951_v47 = vmax.f32 %v886_v55, 0.0  ;;  %v952_v19 = vmax.f32 %v905_v21, 0.0  ;;  %v14892_v40 = vpack.c.b16 %v3593_v13, %v3591_v6  ;;  %v14894_v42 = vpack.c.b16 %v3594_v3, %v3592_v14  ;;  %1663 = vmatpush.bf16.msra.mxu1 %v14875_v26  ;;  %v13241_v6 = vld [vmem:[#allocation7 + $0x1c4] sm:$0xf] }
 0x182   : > { %v1064_v8 = vor.u32 %v16591_v29, %v14767_v58  ;;  %16592 = vst [vmem:[#allocation80_spill] sm:$0xff] %v14890_v32  ;;  %v965_v54 = vpack.c.bf16 %v946_v17, %v946_v17  ;;  %v14897_v38 = vor.u32 %v13243_v36, %v10693_v4  ;;  %v16596_v55 = vrot.slane %v14700_v52, 4  ;;  %v10685_v14 = vld [vmem:[#allocation7 + $0x1c8] sm:$0xf0]  ;;  %v13256_v36 = vld [vmem:[#allocation7 + $0x234] sm:$0xf0] }
 0x183   : > { %16593 = vst [vmem:[#allocation81_spill] sm:$0xff] %v14892_v40  ;;  %v16597_v58 = vrot.slane %v14675_v23, 4  ;;  %v1865_v20 = vunpack.c.l.b16 %v14797_v24  ;;  %v14906_v5 = vunpack.c.l.b16 %v14854_v0  ;;  %v14908_v13 = vpack.c.bf16 %v952_v19, %v951_v47  ;;  %v13255_v3 = vld [vmem:[#allocation7 + $0x234] sm:$0xf]  ;;  %v10741_v17 = vld [vmem:[#allocation7 + $0x238] sm:$0xf0]  ;;  %1628 = vmatpush.bf16.msrb.mxu3 %v14890_v32 }
 0x184   : > { %16594 = vst [vmem:[#allocation82_spill] sm:$0xff] %v14894_v42  ;;  %1207 = vmatmul.bf16.gmra.mxu3 %v1061_v2  ;;  %1243 = vmatmul.bf16.gmra.mxu1 %v1061_v2  ;;  %v3584_v4 = vrot.slane %v965_v54, 4  ;;  %v14912_v23 = vor.u32 %v13242_v56, %v10683_v44  ;;  %v14914_v52 = vor.u32 %v13256_v36, %v10739_v53  ;;  %v16601_v19 = vrot.slane %v14641_v9, 1  ;;  %v13240_v44 = vld [vmem:[#allocation7 + $0x1b4] sm:$0xf0] }
 0x185   : > { %16595 = vst [vmem:[#allocation83_spill] sm:$0xff] %v14897_v38  ;;  %v1854_v21 = vsel %vm1851_vm6, %v16597_v58, %v16596_v55  ;;  %10546 = vmatmul.msk.bf16.gmra.mxu0 %vm1187_vm7, %v1064_v8  ;;  %10548 = vmatmul.msk.bf16.gmra.mxu2 %vm1187_vm7, %v1064_v8  ;;  %v2723_v2 = vrot.slane %v14908_v13, 4  ;;  %v3158_v29 = vunpack.c.l.b16 %v14908_v13  ;;  %v3159_v54 = vunpack.c.h.b16 %v14908_v13  ;;  %v923_v55 = vpop.f32.mrf.mxu2  ;;  %v10675_v8 = vld [vmem:[#allocation7 + $0x1b0] sm:$0xf]  ;;  %v13239_v13 = vld [vmem:[#allocation7 + $0x1b4] sm:$0xf] }
 0x186   : > { %16598 = vst [vmem:[#allocation84_spill] sm:$0xff] %v14906_v5  ;;  %v14920_v47 = vsel %vm490_vm2, %v16601_v19, %v14862_v62  ;;  %v14926_v56 = vor.u32 %v13255_v3, %v10741_v17  ;;  %v14929_v53 = vunpack.c.h.b16 %v14854_v0  ;;  %v3587_v58 = vsel %vm1851_vm6, %v2718_v60, %v3584_v4  ;;  %1664 = vmatpush.bf16.msra.mxu1 %v14897_v38  ;;  %v10731_v42 = vld [vmem:[#allocation7 + $0x220] sm:$0xf]  ;;  %v13254_v40 = vld [vmem:[#allocation7 + $0x224] sm:$0xf0] }
 0x187   : > { %16599 = vst [vmem:[#allocation85_spill] sm:$0xff] %v14912_v23  ;;  %v924_v36 = vadd.f32 %v923_v55, %v14644_v12  ;;  %v14934_v19 = vor.u32 %v13241_v6, %v10685_v14  ;;  %1648 = vmatpush.bf16.msra.mxu0 %v14914_v52  ;;  %v14937_v32 = vunpack.c.l.b16 %v1854_v21  ;;  %v1866_v3 = vunpack.c.h.b16 %v14797_v24  ;;  %v10677_v60 = vld [vmem:[#allocation7 + $0x1b8] sm:$0xf0]  ;;  %v13253_v6 = vld [vmem:[#allocation7 + $0x224] sm:$0xf]  ;;  %1629 = vmatpush.bf16.msrb.mxu3 %v14912_v23 }
 0x188   : > { %16600 = vst [vmem:[#allocation86_spill] sm:$0xff] %v14914_v52  ;;  %v16606_v0 = vrot.slane %v14744_v27, 4  ;;  %v14946_v12 = vpack.c.b16 %v3158_v29, %v14906_v5  ;;  %1684 = vmatpush.bf16.msra.mxu2 %v14926_v56  ;;  %v10733_v14 = vld [vmem:[#allocation7 + $0x228] sm:$0xf0]  ;;  %v14950_v4 = vunpack.c.h.b16 %v14884_v16  ;;  %v14954_v24 = vpack.c.b16 %v3159_v54, %v14929_v53  ;;  %v10723_v26 = vld [vmem:[#allocation7 + $0x210] sm:$0xf] }
 0x189   : > { %16602 = vst [vmem:[#allocation87_spill] sm:$0xff] %v14926_v56  ;;  %v953_v27 = vmax.f32 %v924_v36, 0.0  ;;  %v14956_v38 = vunpack.c.h.b16 %v1854_v21  ;;  %v14959_v29 = vor.u32 %v13240_v44, %v10675_v8  ;;  %v14961_v5 = vor.u32 %v13254_v40, %v10731_v42  ;;  %v13252_v63 = vld [vmem:[#allocation7 + $0x214] sm:$0xf0]  ;;  %v13238_v21 = vld [vmem:[#allocation7 + $0x1a4] sm:$0xf0] }
 0x18a   : > { %16603 = vst [vmem:[#allocation88_spill] sm:$0xff] %v14929_v53  ;;  %v14943_v17 = vsel %vm1851_vm6, %v16606_v0, %v2723_v2  ;;  %v10667_v0 = vld [vmem:[#allocation7 + $0x1a0] sm:$0xf]  ;;  %1665 = vmatpush.bf16.msra.mxu1 %v14934_v19  ;;  %v14969_v54 = vor.u32 %v13239_v13, %v10677_v60  ;;  %v13251_v36 = vld [vmem:[#allocation7 + $0x214] sm:$0xf]  ;;  %v14972_v8 = vpack.c.b16 %v1865_v20, %v14937_v32  ;;  %v1495_v60 = vrot.slane %v14653_v30, 1 }
 0x18b   : > { %16604 = vst [vmem:[#allocation89_spill] sm:$0xff] %v14934_v19  ;;  %v2732_v55 = vunpack.c.h.b16 %v14943_v17  ;;  %v969_v15 = vpack.c.bf16 %v953_v27, %v953_v27  ;;  %v10725_v53 = vld [vmem:[#allocation7 + $0x218] sm:$0xf0]  ;;  %1649 = vmatpush.bf16.msra.mxu0 %v14961_v5  ;;  %v13237_v40 = vld [vmem:[#allocation7 + $0x1a4] sm:$0xf]  ;;  %v14976_v44 = vor.u32 %v13252_v63, %v10723_v26  ;;  %1630 = vmatpush.bf16.msrb.mxu3 %v14959_v29 }
 0x18c   : > { %16605 = vst [vmem:[#allocation90_spill] sm:$0xff] %v14937_v32  ;;  %v10669_v42 = vld [vmem:[#allocation7 + $0x1a8] sm:$0xf0]  ;;  %v14988_v20 = vor.u32 %v13238_v21, %v10667_v0  ;;  %v10659_v27 = vld [vmem:[#allocation7 + $0x190] sm:$0xf] }
 0x18d   : > { %16607 = vst [vmem:[#allocation91_spill] sm:$0xff] %v14946_v12  ;;  %v14963_v12 = vor.u32 %v13253_v6, %v10733_v14  ;;  %v14966_v56 = vpack.c.b16 %v2732_v55, %v14950_v4  ;;  %v14978_v6 = vor.u32 %v13251_v36, %v10725_v53  ;;  %v14981_v14 = vpack.c.b16 %v1866_v3, %v14956_v38  ;;  %v13235_v53 = vld [vmem:[#allocation7 + $0x194] sm:$0xf]  ;;  %v10715_v3 = vld [vmem:[#allocation7 + $0x200] sm:$0xf] }
 0x18e   : > { %16608 = vst [vmem:[#allocation92_spill] sm:$0xff] %v14950_v4  ;;  %v3589_v13 = vrot.slane %v969_v15, 4  ;;  %v14985_v55 = vrot.slane %v14730_v28, 1  ;;  %1666 = vmatpush.bf16.msra.mxu1 %v14969_v54  ;;  %v14992_v26 = vor.u32 %v13237_v40, %v10669_v42  ;;  %v13250_v15 = vld [vmem:[#allocation7 + $0x204] sm:$0xf0]  ;;  %v14998_v28 = vunpack.c.l.b16 %v3587_v58 }
 0x18f   : > { %16609 = vst [vmem:[#allocation93_spill] sm:$0xff] %v14954_v24  ;;  %1685 = vmatpush.bf16.msra.mxu2 %v14963_v12  ;;  %v13236_v24 = vld [vmem:[#allocation7 + $0x194] sm:$0xf0]  ;;  %v15000_v4 = vunpack.c.h.b16 %v3587_v58  ;;  %1650 = vmatpush.bf16.msra.mxu0 %v14976_v44  ;;  %v13249_v40 = vld [vmem:[#allocation7 + $0x204] sm:$0xf]  ;;  %v15013_v58 = vor.u32 %v13250_v15, %v10715_v3  ;;  %v16636_v15 = vld [vmem:[#allocation36_spill] sm:$0xff] }
 0x190   : > { %16610 = vst [vmem:[#allocation94_spill] sm:$0xff] %v14956_v38  ;;  %v3590_v63 = vsel %vm1851_vm6, %v2723_v2, %v3589_v13  ;;  %v14996_v36 = vsel %vm490_vm2, %v1495_v60, %v14985_v55  ;;  %v10661_v2 = vld [vmem:[#allocation7 + $0x198] sm:$0xf0]  ;;  %v10717_v42 = vld [vmem:[#allocation7 + $0x208] sm:$0xf0]  ;;  %1631 = vmatpush.bf16.msrb.mxu3 %v14988_v20  ;;  %v15011_v60 = vor.u32 %v13236_v24, %v10659_v27  ;;  %v16635_v3 = vld [vmem:[#allocation35_spill] sm:$0xff] }
 0x191   : > { %16611 = vst [vmem:[#allocation95_spill] sm:$0xff] %v14959_v29  ;;  %v3597_v0 = vunpack.c.l.b16 %v3590_v63  ;;  %v3598_v21 = vunpack.c.h.b16 %v3590_v63  ;;  %v15016_v63 = vor.u32 %v13235_v53, %v10661_v2  ;;  %v10651_v38 = vld [vmem:[#allocation7 + $0x180] sm:$0xf]  ;;  %v13234_v32 = vld [vmem:[#allocation7 + $0x184] sm:$0xf0]  ;;  %v16634_v53 = vld [vmem:[#allocation33_spill] sm:$0xff] }
 0x192   : > { %16612 = vst [vmem:[#allocation96_spill] sm:$0xff] %v14961_v5  ;;  %1667 = vmatpush.bf16.msra.mxu1 %v14992_v26  ;;  %v15027_v24 = vor.u32 %v13234_v32, %v10651_v38  ;;  %v15050_v32 = vunpack.c.l.b16 %v14884_v16  ;;  %v1267_v38 = vpack.c.b16 %v14717_v41, %v14717_v41  ;;  %v16632_v41 = vld [vmem:[#allocation30_spill] sm:$0xff]  ;;  %v16633_v16 = vld [vmem:[#allocation31_spill] sm:$0xff]  ;;  %v16637_v2 = vld [vmem:[#allocation53_spill] sm:$0xff] }
 0x193   : > { %16613 = vst [vmem:[#allocation97_spill] sm:$0xff] %v14963_v12  ;;  %1686 = vmatpush.bf16.msra.mxu2 %v14978_v6  ;;  %v15005_v13 = vpack.c.b16 %v3597_v0, %v14998_v28  ;;  %v13233_v0 = vld [vmem:[#allocation7 + $0x184] sm:$0xf]  ;;  %1651 = vmatpush.bf16.msra.mxu0 %v15013_v58 }
 0x194   : > { %16614 = vst [vmem:[#allocation98_spill] sm:$0xff] %v14966_v56  ;;  %v15008_v56 = vpack.c.b16 %v3598_v21, %v15000_v4  ;;  %1403 = vmatmul.bf16.vlgmr.msra.gmra.mxu3 %v14641_v9  ;;  %1439 = vmatmul.bf16.vlgmr.msrb.gmra.mxu1 %v14641_v9  ;;  %v10653_v21 = vld [vmem:[#allocation7 + $0x188] sm:$0xf0]  ;;  %v2731_v9 = vunpack.c.l.b16 %v14943_v17 }
 0x195   : > { %16615 = vst [vmem:[#allocation99_spill] sm:$0xff] %v14969_v54  ;;  %v15018_v54 = vor.u32 %v13249_v40, %v10717_v42  ;;  %10645 = vmatmul.msk.bf16.vlgmr.msrb.gmra.mxu0 %vm1187_vm7, %v14653_v30  ;;  %10647 = vmatmul.msk.bf16.vlgmr.msrb.gmra.mxu2 %vm1187_vm7, %v14653_v30  ;;  %v15031_v27 = vor.u32 %v13233_v0, %v10653_v21  ;;  %v16638_v40 = vld [vmem:[#allocation38_spill] sm:$0xff]  ;;  %v16639_v42 = vld [vmem:[#allocation57_spill] sm:$0xff]  ;;  %v16640_v0 = vld [vmem:[#allocation40_spill] sm:$0xff] }
 0x196   : > { %16616 = vst [vmem:[#allocation100_spill] sm:$0xff] %v14976_v44  ;;  %1632 = vmatpush.bf16.msrb.mxu3 %v15011_v60  ;;  %1668 = vmatpush.bf16.msra.mxu1 %v15016_v63  ;;  %v1266_v30 = vpack.c.b16 %v14710_v7, %v14710_v7  ;;  %v15058_v17 = vpack.c.b16 %v2731_v9, %v15050_v32  ;;  %v16631_v7 = vld [vmem:[#allocation29_spill] sm:$0xff]  ;;  %v16641_v21 = vld [vmem:[#allocation39_spill] sm:$0xff] }
 0x197   : > { %16617 = vst [vmem:[#allocation101_spill] sm:$0xff] %v14978_v6  ;;  %1687 = vmatpush.bf16.msra.mxu2 %v15018_v54  ;;  %1931 = vmatpush.bf16.msrb.mxu0 %v14554_v59  ;;  %v16642_v9 = vld [vmem:[#allocation59_spill] sm:$0xff] }
 0x198   : > { %16618 = vst [vmem:[#allocation102_spill] sm:$0xff] %v14988_v20 }
 0x199   : > { %16619 = vst [vmem:[#allocation103_spill] sm:$0xff] %v14992_v26 }
 0x19a   : > { %16620 = vst [vmem:[#allocation104_spill] sm:$0xff] %v14998_v28  ;;  %1633 = vmatpush.bf16.msrb.mxu3 %v15027_v24  ;;  %1669 = vmatpush.bf16.msra.mxu1 %v15031_v27  ;;  %v16648_v28 = vld [vmem:[#allocation45_spill] sm:$0xff] }
 0x19b   : > { %16621 = vst [vmem:[#allocation105_spill] sm:$0xff] %v15000_v4  ;;  %1967 = vmatpush.bf16.msrb.mxu2 %v14561_v1  ;;  %1932 = vmatpush.bf16.msrb.mxu0 %v14568_v10  ;;  %v16647_v4 = vld [vmem:[#allocation44_spill] sm:$0xff] }
 0x19c   : > { %16622 = vst [vmem:[#allocation106_spill] sm:$0xff] %v15005_v13  ;;  %v16650_v13 = vld [vmem:[#allocation51_spill] sm:$0xff] }
 0x19d   : > { %16623 = vst [vmem:[#allocation107_spill] sm:$0xff] %v15008_v56  ;;  %v16649_v56 = vld [vmem:[#allocation50_spill] sm:$0xff] }
 0x19e   : > { %16624 = vst [vmem:[#allocation108_spill] sm:$0xff] %v15011_v60  ;;  %1909 = vmatpush.bf16.msra.mxu3 %v14528_v31  ;;  %1945 = vmatpush.bf16.msrb.mxu1 %v14530_v33 }
 0x19f   : > { %16625 = vst [vmem:[#allocation109_spill] sm:$0xff] %v15013_v58  ;;  %1968 = vmatpush.bf16.msrb.mxu2 %v14579_v18  ;;  %1933 = vmatpush.bf16.msrb.mxu0 %v14586_v25 }
 0x1a0   : > { %16626 = vst [vmem:[#allocation110_spill] sm:$0xff] %v15016_v63 }
 0x1a1   : > { %16627 = vst [vmem:[#allocation111_spill] sm:$0xff] %v15018_v54 }
 0x1a2   : > { %16628 = vst [vmem:[#allocation112_spill] sm:$0xff] %v15027_v24  ;;  %1910 = vmatpush.bf16.msra.mxu3 %v14534_v37  ;;  %1946 = vmatpush.bf16.msrb.mxu1 %v14536_v39 }
 0x1a3   : > { %1969 = vmatpush.bf16.msrb.mxu2 %v14600_v34  ;;  %16629 = vst [vmem:[#allocation113_spill] sm:$0xff] %v15050_v32  ;;  %1934 = vmatpush.bf16.msrb.mxu0 %v14606_v48  ;;  %v16651_v32 = vld [vmem:[#allocation48_spill] sm:$0xff] }
 0x1a4   : > { %1408 = vmatmul.bf16.gmra.mxu3 %v1266_v30  ;;  %1444 = vmatmul.bf16.gmra.mxu1 %v1266_v30  ;;  %16630 = vst [vmem:[#allocation114_spill] sm:$0xff] %v15058_v17  ;;  %v16644_v30 = vld [vmem:[#allocation61_spill] sm:$0xff]  ;;  %v1874_v17 = vshll.u32 %v16651_v32, 16 }
 0x1a5   : > { %10646 = vmatmul.msk.bf16.gmra.mxu0 %vm1187_vm7, %v1267_v38  ;;  %10648 = vmatmul.msk.bf16.gmra.mxu2 %vm1187_vm7, %v1267_v38  ;;  %v16645_v38 = vld [vmem:[#allocation42_spill] sm:$0xff] }
 0x1a6   : > { %1911 = vmatpush.bf16.msra.mxu3 %v14540_v43  ;;  %1947 = vmatpush.bf16.msrb.mxu1 %v14542_v45 }
 0x1a7   : > { %1970 = vmatpush.bf16.msrb.mxu2 %v14613_v61 }
 0x1aa   : > { %1912 = vmatpush.bf16.msra.mxu3 %v14546_v49  ;;  %1948 = vmatpush.bf16.msrb.mxu1 %v14548_v51 }
 0x1ae   : > { %1913 = vmatpush.bf16.msra.mxu3 %v16631_v7  ;;  %1949 = vmatpush.bf16.msrb.mxu1 %v16632_v41 }
 0x1b2   : > { %1914 = vmatpush.bf16.msra.mxu3 %v16633_v16  ;;  %1950 = vmatpush.bf16.msrb.mxu1 %v16634_v53 }
 0x1b4   : > { %1634 = vmatmul.bf16.vlgmr.msrb.gmra.mxu3 %v14920_v47  ;;  %1670 = vmatmul.bf16.vlgmr.msra.gmra.mxu1 %v14920_v47  ;;  %v16643_v47 = vld [vmem:[#allocation41_spill] sm:$0xff] }
 0x1b5   : > { %10745 = vmatmul.msk.bf16.vlgmr.msra.gmra.mxu0 %vm1187_vm7, %v14996_v36  ;;  %10747 = vmatmul.msk.bf16.vlgmr.msra.gmra.mxu2 %vm1187_vm7, %v14996_v36  ;;  %v16646_v36 = vld [vmem:[#allocation43_spill] sm:$0xff] }
 0x1b6   : > { %1915 = vmatpush.bf16.msra.mxu3 %v16635_v3  ;;  %1951 = vmatpush.bf16.msrb.mxu1 %v16636_v15 }
 0x1b7   : > { %2012 = vmatpush.bf16.msra.mxu0 %v16637_v2  ;;  %2048 = vmatpush.bf16.msra.mxu2 %v16639_v42  ;;  %v16657_v2 = vld [vmem:[#allocation66_spill] sm:$0xff] }
 0x1ba   : > { %1916 = vmatpush.bf16.msra.mxu3 %v16638_v40  ;;  %1952 = vmatpush.bf16.msrb.mxu1 %v16641_v21 }
 0x1bb   : > { %2013 = vmatpush.bf16.msra.mxu0 %v16642_v9  ;;  %2049 = vmatpush.bf16.msra.mxu2 %v16644_v30  ;;  %v16655_v9 = vld [vmem:[#allocation58_spill] sm:$0xff] }
 0x1be   : > { %1990 = vmatpush.bf16.msrb.mxu3 %v16640_v0  ;;  %2026 = vmatpush.bf16.msra.mxu1 %v16643_v47 }
 0x1bf   : > { %2014 = vmatpush.bf16.msra.mxu0 %v14807_v35  ;;  %2050 = vmatpush.bf16.msra.mxu2 %v14811_v50  ;;  %v16653_v35 = vld [vmem:[#allocation52_spill] sm:$0xff] }
 0x1c2   : > { %1991 = vmatpush.bf16.msrb.mxu3 %v16645_v38  ;;  %2027 = vmatpush.bf16.msra.mxu1 %v16646_v36 }
 0x1c3   : > { %2015 = vmatpush.bf16.msra.mxu0 %v14815_v46  ;;  %2051 = vmatpush.bf16.msra.mxu2 %v14829_v22  ;;  %v16652_v46 = vld [vmem:[#allocation49_spill] sm:$0xff]  ;;  %v1879_v22 = vshll.u32 %v14972_v8, 16 }
 0x1c4   : > { %1639 = vmatmul.bf16.gmra.mxu3 %v14862_v62  ;;  %1675 = vmatmul.bf16.gmra.mxu1 %v14862_v62  ;;  %v1886_v50 = vshll.u32 %v16652_v46, 16  ;;  %v1891_v62 = vshll.u32 %v14981_v14, 16  ;;  %v1884_v36 = vshrl.u32 %v16652_v46, 16 }
 0x1c5   : > { %10746 = vmatmul.msk.bf16.gmra.mxu0 %vm1187_vm7, %v14985_v55  ;;  %10748 = vmatmul.msk.bf16.gmra.mxu2 %vm1187_vm7, %v14985_v55  ;;  %v1872_v55 = vshrl.u32 %v16651_v32, 16 }
 0x1c6   : > { %1992 = vmatpush.bf16.msrb.mxu3 %v16647_v4  ;;  %2028 = vmatpush.bf16.msra.mxu1 %v16648_v28  ;;  %v16654_v28 = vld [vmem:[#allocation54_spill] sm:$0xff]  ;;  %v1876_v4 = vrot.slane %v1874_v17, 1  ;;  %v1888_v30 = vrot.slane %v1886_v50, 1  ;;  %v1893_v38 = vrot.slane %v1891_v62, 1  ;;  %v16660_v17 = vld [vmem:[#allocation75_spill] sm:$0xff] }
 0x1c7   : > { %v16665_v62 = vld [vmem:[#allocation83_spill] sm:$0xff] }
 0x1c8   : > { %v1877_v42 = vor.u32 %v1876_v4, %v1872_v55  ;;  %v16659_v4 = vld [vmem:[#allocation74_spill] sm:$0xff]  ;;  %v1898_v55 = vshrl.u32 %v14981_v14, 16 }
 0x1ca   : > { %1993 = vmatpush.bf16.msrb.mxu3 %v16649_v56  ;;  %2029 = vmatpush.bf16.msra.mxu1 %v16650_v13  ;;  %v1881_v56 = vrot.slane %v1879_v22, 1  ;;  %v16656_v13 = vld [vmem:[#allocation60_spill] sm:$0xff]  ;;  %v16658_v22 = vld [vmem:[#allocation70_spill] sm:$0xff] }
 0x1ce   : > { %1994 = vmatpush.bf16.msrb.mxu3 %v16653_v35  ;;  %2030 = vmatpush.bf16.msra.mxu1 %v16654_v28  ;;  %v1889_v35 = vor.u32 %v1888_v30, %v1884_v36  ;;  %v1882_v28 = vsel %vm470_vm0, %v1877_v42, %v1881_v56  ;;  %v16661_v42 = vld [vmem:[#allocation87_spill] sm:$0xff]  ;;  %v16664_v30 = vld [vmem:[#allocation80_spill] sm:$0xff]  ;;  %v1895_v36 = vshrl.u32 %v14972_v8, 16 }
 0x1d0   : > { %v1894_v50 = vsel %vm470_vm0, %v1889_v35, %v1893_v38  ;;  %v16662_v35 = vld [vmem:[#allocation78_spill] sm:$0xff] }
 0x1d2   : > { %1995 = vmatpush.bf16.msrb.mxu3 %v16655_v9  ;;  %2031 = vmatpush.bf16.msra.mxu1 %v16656_v13 }
 0x1d4   : > { %1917 = vmatmul.bf16.vlgmr.msra.gmra.mxu3 %v1882_v28  ;;  %1953 = vmatmul.bf16.vlgmr.msrb.gmra.mxu1 %v1882_v28  ;;  %v16663_v28 = vld [vmem:[#allocation79_spill] sm:$0xff] }
 0x1d5   : > { %10749 = vmatmul.msk.bf16.vlgmr.msrb.gmra.mxu0 %vm1187_vm7, %v1894_v50  ;;  %10751 = vmatmul.msk.bf16.vlgmr.msrb.gmra.mxu2 %vm1187_vm7, %v1894_v50  ;;  %v1897_v50 = vor.u32 %v1895_v36, %v1881_v56 }
 0x1d6   : > { %1996 = vmatpush.bf16.msrb.mxu3 %v14805_v11  ;;  %2032 = vmatpush.bf16.msra.mxu1 %v16657_v2 }
 0x1d7   : > { %2098 = vmatpush.bf16.msrb.mxu0 %v14914_v52  ;;  %2134 = vmatpush.bf16.msrb.mxu2 %v16661_v42 }
 0x1da   : > { %1997 = vmatpush.bf16.msrb.mxu3 %v14813_v57  ;;  %2033 = vmatpush.bf16.msra.mxu1 %v16658_v22 }
 0x1db   : > { %2099 = vmatpush.bf16.msrb.mxu0 %v14961_v5  ;;  %2135 = vmatpush.bf16.msrb.mxu2 %v14963_v12  ;;  %v1900_v5 = vor.u32 %v1898_v55, %v1893_v38 }
 0x1de   : > { %2076 = vmatpush.bf16.msra.mxu3 %v16659_v4  ;;  %2112 = vmatpush.bf16.msrb.mxu1 %v16660_v17 }
 0x1df   : > { %2100 = vmatpush.bf16.msrb.mxu0 %v14976_v44  ;;  %2136 = vmatpush.bf16.msrb.mxu2 %v14978_v6  ;;  %v16666_v6 = vld [vmem:[#allocation99_spill] sm:$0xff] }
 0x1e2   : > { %2077 = vmatpush.bf16.msra.mxu3 %v16662_v35  ;;  %2113 = vmatpush.bf16.msrb.mxu1 %v16663_v28 }
 0x1e3   : > { %2101 = vmatpush.bf16.msrb.mxu0 %v15013_v58  ;;  %2137 = vmatpush.bf16.msrb.mxu2 %v15018_v54 }
 0x1e4   : > { %1922 = vmatmul.bf16.gmra.mxu3 %v1897_v50  ;;  %1958 = vmatmul.bf16.gmra.mxu1 %v1897_v50 }
 0x1e5   : > { %10750 = vmatmul.msk.bf16.gmra.mxu0 %vm1187_vm7, %v1900_v5  ;;  %10752 = vmatmul.msk.bf16.gmra.mxu2 %vm1187_vm7, %v1900_v5 }
 0x1e6   : > { %2078 = vmatpush.bf16.msra.mxu3 %v16664_v30  ;;  %2114 = vmatpush.bf16.msrb.mxu1 %v16665_v62 }
 0x1ea   : > { %2079 = vmatpush.bf16.msra.mxu3 %v14912_v23  ;;  %2115 = vmatpush.bf16.msrb.mxu1 %v14934_v19 }
 0x1ee   : > { %2080 = vmatpush.bf16.msra.mxu3 %v14959_v29  ;;  %2116 = vmatpush.bf16.msrb.mxu1 %v16666_v6 }
 0x1f1   : > { %v1239_v56 = vpop.f32.mrf.mxu1 }
 0x1f2   : > { %2081 = vmatpush.bf16.msra.mxu3 %v14988_v20  ;;  %2117 = vmatpush.bf16.msrb.mxu1 %v14992_v26  ;;  %v1221_v38 = vpop.f32.mrf.mxu0 }
 0x1f4   : > { %1998 = vmatmul.bf16.vlgmr.msrb.gmra.mxu3 %v16651_v32  ;;  %2034 = vmatmul.bf16.vlgmr.msra.gmra.mxu1 %v16651_v32 }
 0x1f5   : > { %10753 = vmatmul.msk.bf16.vlgmr.msra.gmra.mxu0 %vm1187_vm7, %v16652_v46  ;;  %10755 = vmatmul.msk.bf16.vlgmr.msra.gmra.mxu2 %vm1187_vm7, %v16652_v46 }
 0x1f6   : > { %2082 = vmatpush.bf16.msra.mxu3 %v15011_v60  ;;  %2118 = vmatpush.bf16.msrb.mxu1 %v15016_v63 }
 0x1f7   : > { %v1203_v5 = vpop.f32.mrf.mxu3  ;;  %2358 = vmatpush.bf16.msra.mxu0 %v14554_v59  ;;  %2394 = vmatpush.bf16.msra.mxu2 %v14561_v1 }
 0x1f8   : > { %v15156_v36 = vadd.f32 %v1221_v38, %v1203_v5  ;;  %v1257_v55 = vpop.f32.mrf.mxu2 }
 0x1f9   : > { %v1258_v50 = vadd.f32 %v1257_v55, %v1239_v56 }
 0x1fa   : > { %2083 = vmatpush.bf16.msra.mxu3 %v15027_v24  ;;  %2119 = vmatpush.bf16.msrb.mxu1 %v15031_v27  ;;  %v1241_v24 = vpop.f32.mrf.mxu1  ;;  %v1223_v63 = vpop.f32.mrf.mxu0 }
 0x1fb   : > { %2359 = vmatpush.bf16.msra.mxu0 %v14568_v10  ;;  %2395 = vmatpush.bf16.msra.mxu2 %v14579_v18  ;;  %v16668_v18 = vld [vmem:[#allocation94_spill] sm:$0xff] }
 0x1fe   : > { %2336 = vmatpush.bf16.msrb.mxu3 %v14528_v31  ;;  %2372 = vmatpush.bf16.msra.mxu1 %v14530_v33 }
 0x1ff   : > { %v1205_v33 = vpop.f32.mrf.mxu3  ;;  %2360 = vmatpush.bf16.msra.mxu0 %v14586_v25  ;;  %2396 = vmatpush.bf16.msra.mxu2 %v14600_v34 }
 0x200   : > { %v15166_v38 = vadd.f32 %v1223_v63, %v1205_v33  ;;  %v1259_v56 = vpop.f32.mrf.mxu2 }
 0x201   : > { %v1260_v5 = vadd.f32 %v1259_v56, %v1241_v24 }
 0x202   : > { %2337 = vmatpush.bf16.msrb.mxu3 %v14534_v37  ;;  %2373 = vmatpush.bf16.msra.mxu1 %v14536_v39  ;;  %v1244_v55 = vpop.f32.mrf.mxu1  ;;  %v1226_v37 = vpop.f32.mrf.mxu0  ;;  %v16667_v39 = vld [vmem:[#allocation90_spill] sm:$0xff] }
 0x203   : > { %v1981_v10 = vpack.c.b16 %v16667_v39, %v16667_v39  ;;  %2361 = vmatpush.bf16.msra.mxu0 %v14606_v48  ;;  %2397 = vmatpush.bf16.msra.mxu2 %v14613_v61 }
 0x205   : > { %2003 = vmatmul.bf16.gmra.mxu3 %v1981_v10  ;;  %2039 = vmatmul.bf16.gmra.mxu1 %v1981_v10  ;;  %v2063_v10 = vrot.slane %v14972_v8, 1 }
 0x206   : > { %2338 = vmatpush.bf16.msrb.mxu3 %v14540_v43  ;;  %2374 = vmatpush.bf16.msra.mxu1 %v14542_v45  ;;  %v1982_v43 = vpack.c.b16 %v16668_v18, %v16668_v18 }
 0x207   : > { %v1208_v33 = vpop.f32.mrf.mxu3 }
 0x208   : > { %10754 = vmatmul.msk.bf16.gmra.mxu0 %vm1187_vm7, %v1982_v43  ;;  %10756 = vmatmul.msk.bf16.gmra.mxu2 %vm1187_vm7, %v1982_v43  ;;  %v15181_v39 = vadd.f32 %v1226_v37, %v1208_v33  ;;  %v1262_v18 = vpop.f32.mrf.mxu2  ;;  %v2062_v33 = vrot.slane %v16651_v32, 1  ;;  %v16670_v32 = vld [vmem:[#allocation57_spill] sm:$0xff] }
 0x209   : > { %v1263_v63 = vadd.f32 %v1262_v18, %v1244_v55 }
 0x20a   : > { %2339 = vmatpush.bf16.msrb.mxu3 %v14546_v49  ;;  %2375 = vmatpush.bf16.msra.mxu1 %v14548_v51  ;;  %v1246_v24 = vpop.f32.mrf.mxu1  ;;  %v1228_v56 = vpop.f32.mrf.mxu0 }
 0x20b   : > { %v2065_v24 = vrot.slane %v16652_v46, 1  ;;  %v2064_v56 = vsel %vm490_vm2, %v2062_v33, %v2063_v10  ;;  %v16669_v46 = vld [vmem:[#allocation53_spill] sm:$0xff] }
 0x20e   : > { %2340 = vmatpush.bf16.msrb.mxu3 %v16631_v7  ;;  %2376 = vmatpush.bf16.msra.mxu1 %v16632_v41  ;;  %v2066_v41 = vrot.slane %v14981_v14, 1 }
 0x20f   : > { %v1210_v43 = vpop.f32.mrf.mxu3 }
 0x210   : > { %v1264_v7 = vpop.f32.mrf.mxu2  ;;  %v2067_v8 = vsel %vm490_vm2, %v2065_v24, %v2066_v41 }
 0x212   : > { %2341 = vmatpush.bf16.msrb.mxu3 %v16633_v16  ;;  %2377 = vmatpush.bf16.msra.mxu1 %v16634_v53  ;;  %v1440_v37 = vpop.f32.mrf.mxu1  ;;  %v1422_v55 = vpop.f32.mrf.mxu0 }
 0x213   : > { %v1441_v18 = vadd.f32 %v1440_v37, %v1258_v50 }
 0x215   : > { %2084 = vmatmul.bf16.vlgmr.msra.gmra.mxu3 %v2064_v56  ;;  %2120 = vmatmul.bf16.vlgmr.msrb.gmra.mxu1 %v2064_v56 }
 0x216   : > { %2342 = vmatpush.bf16.msrb.mxu3 %v16635_v3  ;;  %2378 = vmatpush.bf16.msra.mxu1 %v16636_v15 }
 0x217   : > { %v1404_v14 = vpop.f32.mrf.mxu3 }
 0x218   : > { %10757 = vmatmul.msk.bf16.vlgmr.msrb.gmra.mxu0 %vm1187_vm7, %v2067_v8  ;;  %10759 = vmatmul.msk.bf16.vlgmr.msrb.gmra.mxu2 %vm1187_vm7, %v2067_v8  ;;  %v1405_v7 = vadd.f32 %v1404_v14, %v15156_v36  ;;  %v1458_v50 = vpop.f32.mrf.mxu2  ;;  %v16671_v8 = vld [vmem:[#allocation42_spill] sm:$0xff]  ;;  %v16678_v14 = vld [vmem:[#allocation67_spill] sm:$0xff] }
 0x219   : > { %2439 = vmatpush.bf16.msrb.mxu0 %v16669_v46  ;;  %2475 = vmatpush.bf16.msrb.mxu2 %v16670_v32  ;;  %v15202_v43 = vadd.f32 %v1458_v50, %v1441_v18  ;;  %v16675_v46 = vld [vmem:[#allocation44_spill] sm:$0xff]  ;;  %v16676_v32 = vld [vmem:[#allocation45_spill] sm:$0xff] }
 0x21a   : > { %2343 = vmatpush.bf16.msrb.mxu3 %v16638_v40  ;;  %2379 = vmatpush.bf16.msra.mxu1 %v16641_v21  ;;  %v1442_v37 = vpop.f32.mrf.mxu1  ;;  %v15204_v33 = vadd.f32 %v1422_v55, %v1405_v7  ;;  %v1424_v24 = vpop.f32.mrf.mxu0  ;;  %v16674_v21 = vld [vmem:[#allocation61_spill] sm:$0xff] }
 0x21b   : > { %v1443_v56 = vadd.f32 %v1442_v37, %v1260_v5  ;;  %v16677_v18 = vld [vmem:[#allocation65_spill] sm:$0xff] }
 0x21d   : > { %2476 = vmatpush.bf16.msrb.mxu2 %v16674_v21  ;;  %v16679_v21 = vld [vmem:[#allocation50_spill] sm:$0xff] }
 0x21e   : > { %2417 = vmatpush.bf16.msra.mxu3 %v16640_v0  ;;  %2453 = vmatpush.bf16.msrb.mxu1 %v16643_v47  ;;  %v16672_v0 = vld [vmem:[#allocation43_spill] sm:$0xff] }
 0x21f   : > { %v16673_v47 = vld [vmem:[#allocation59_spill] sm:$0xff]  ;;  %v1406_v36 = vpop.f32.mrf.mxu3 }
 0x220   : > { %2440 = vmatpush.bf16.msrb.mxu0 %v16673_v47  ;;  %v1407_v55 = vadd.f32 %v1406_v36, %v15166_v38  ;;  %v1460_v5 = vpop.f32.mrf.mxu2  ;;  %v16683_v38 = vld [vmem:[#allocation52_spill] sm:$0xff] }
 0x221   : > { %2477 = vmatpush.bf16.msrb.mxu2 %v16678_v14  ;;  %v15215_v7 = vadd.f32 %v1460_v5, %v1443_v56 }
 0x222   : > { %2418 = vmatpush.bf16.msra.mxu3 %v16671_v8  ;;  %2454 = vmatpush.bf16.msrb.mxu1 %v16672_v0  ;;  %v1445_v50 = vpop.f32.mrf.mxu1  ;;  %v15217_v37 = vadd.f32 %v1424_v24, %v1407_v55  ;;  %v1427_v47 = vpop.f32.mrf.mxu0  ;;  %v16682_v0 = vld [vmem:[#allocation71_spill] sm:$0xff]  ;;  %v16684_v24 = vld [vmem:[#allocation54_spill] sm:$0xff] }
 0x223   : > { %v1446_v8 = vadd.f32 %v1445_v50, %v1263_v63  ;;  %v16685_v50 = vld [vmem:[#allocation46_spill] sm:$0xff] }
 0x224   : > { %2441 = vmatpush.bf16.msrb.mxu0 %v16677_v18 }
 0x225   : > { %2478 = vmatpush.bf16.msrb.mxu2 %v16682_v0  ;;  %2089 = vmatmul.bf16.gmra.mxu3 %v2063_v10 }
 0x226   : > { %2419 = vmatpush.bf16.msra.mxu3 %v16675_v46  ;;  %2455 = vmatpush.bf16.msrb.mxu1 %v16676_v32  ;;  %v16680_v46 = vld [vmem:[#allocation51_spill] sm:$0xff]  ;;  %v16681_v32 = vld [vmem:[#allocation69_spill] sm:$0xff] }
 0x227   : > { %2125 = vmatmul.bf16.gmra.mxu1 %v2063_v10  ;;  %v1409_v56 = vpop.f32.mrf.mxu3 }
 0x228   : > { %2442 = vmatpush.bf16.msrb.mxu0 %v16681_v32  ;;  %10760 = vmatmul.msk.bf16.gmra.mxu2 %vm1187_vm7, %v2066_v41  ;;  %v1410_v63 = vadd.f32 %v1409_v56, %v15181_v39  ;;  %v1463_v36 = vpop.f32.mrf.mxu2  ;;  %v2301_v32 = vshll.u32 %v16685_v50, 16 }
 0x229   : > { %10758 = vmatmul.msk.bf16.gmra.mxu0 %vm1187_vm7, %v2066_v41  ;;  %v15228_v55 = vadd.f32 %v1463_v36, %v1446_v8  ;;  %v16687_v41 = vld [vmem:[#allocation62_spill] sm:$0xff] }
 0x22a   : > { %2420 = vmatpush.bf16.msra.mxu3 %v16679_v21  ;;  %2456 = vmatpush.bf16.msrb.mxu1 %v16680_v46  ;;  %v1447_v5 = vpop.f32.mrf.mxu1  ;;  %v15231_v0 = vadd.f32 %v1427_v47, %v1410_v63  ;;  %v1429_v10 = vpop.f32.mrf.mxu0  ;;  %v16686_v21 = vld [vmem:[#allocation47_spill] sm:$0xff]  ;;  %v2303_v39 = vrot.slane %v2301_v32, 1  ;;  %v2299_v47 = vshrl.u32 %v16685_v50, 16 }
 0x22b   : > { %v2313_v46 = vshll.u32 %v16686_v21, 16  ;;  %v2311_v5 = vshrl.u32 %v16686_v21, 16 }
 0x22d   : > { %v2315_v56 = vrot.slane %v2313_v46, 1 }
 0x22e   : > { %2421 = vmatpush.bf16.msra.mxu3 %v16683_v38  ;;  %2457 = vmatpush.bf16.msrb.mxu1 %v16684_v24  ;;  %v2306_v38 = vshll.u32 %v16687_v41, 16  ;;  %v16688_v24 = vld [vmem:[#allocation63_spill] sm:$0xff] }
 0x22f   : > { %v2318_v14 = vshll.u32 %v16688_v24, 16  ;;  %v1411_v8 = vpop.f32.mrf.mxu3  ;;  %v2316_v40 = vor.u32 %v2315_v56, %v2311_v5 }
 0x230   : > { %v2308_v63 = vrot.slane %v2306_v38, 1  ;;  %v1465_v36 = vpop.f32.mrf.mxu2  ;;  %v1704_v38 = vld [vmem:[#allocation8] sm:$0x3] }
 0x231   : > { %v2320_v10 = vrot.slane %v2318_v14, 1  ;;  %v15254_v8 = vperm.slane %v1704_v38, 1 }
 0x232   : > { %2422 = vmatpush.bf16.msra.mxu3 %v16655_v9  ;;  %2458 = vmatpush.bf16.msrb.mxu1 %v16656_v13  ;;  %v1671_v9 = vpop.f32.mrf.mxu1  ;;  %v2304_v13 = vor.u32 %v2303_v39, %v2299_v47  ;;  %v1653_v18 = vpop.f32.mrf.mxu0 }
 0x233   : > { %v2321_v32 = vsel %vm470_vm0, %v2316_v40, %v2320_v10 }
 0x234   : > { %v2309_v46 = vsel %vm470_vm0, %v2304_v13, %v2308_v63  ;;  %v15252_v13 = vperm.slane %v1704_v38, 0 }
 0x235   : > { %2344 = vmatmul.bf16.vlgmr.msrb.gmra.mxu3 %v2309_v46 }
 0x236   : > { %2423 = vmatpush.bf16.msra.mxu3 %v14805_v11  ;;  %2459 = vmatpush.bf16.msrb.mxu1 %v16657_v2 }
 0x237   : > { %2380 = vmatmul.bf16.vlgmr.msra.gmra.mxu1 %v2309_v46  ;;  %v1635_v14 = vpop.f32.mrf.mxu3 }
 0x238   : > { %10763 = vmatmul.msk.bf16.vlgmr.msra.gmra.mxu2 %vm1187_vm7, %v2321_v32  ;;  %v1654_v39 = vadd.f32 %v1653_v18, %v1635_v14  ;;  %v1689_v56 = vpop.f32.mrf.mxu2 }
 0x239   : > { %10761 = vmatmul.msk.bf16.vlgmr.msra.gmra.mxu0 %vm1187_vm7, %v2321_v32  ;;  %2561 = vmatpush.bf16.msra.mxu2 %v16661_v42  ;;  %v1690_v40 = vadd.f32 %v1689_v56, %v1671_v9  ;;  %v16689_v32 = vld [vmem:[#allocation96_spill] sm:$0xff] }
 0x23a   : > { %2424 = vmatpush.bf16.msra.mxu3 %v14813_v57  ;;  %2460 = vmatpush.bf16.msrb.mxu1 %v16658_v22  ;;  %v1698_v47 = vadd.f32 %v1654_v39, %v15204_v33  ;;  %v1655_v5 = vpop.f32.mrf.mxu0  ;;  %v1673_v46 = vpop.f32.mrf.mxu1 }
 0x23b   : > { %2525 = vmatpush.bf16.msra.mxu0 %v14914_v52  ;;  %v1699_v36 = vadd.f32 %v1690_v40, %v15202_v43  ;;  %v16690_v43 = vld [vmem:[#allocation101_spill] sm:$0xff]  ;;  %v2322_v40 = vshrl.u32 %v16687_v41, 16 }
 0x23c   : > { %v1710_v18 = vadd.f32 %v15252_v13, %v1698_v47 }
 0x23d   : > { %2562 = vmatpush.bf16.msra.mxu2 %v14963_v12  ;;  %v1711_v9 = vadd.f32 %v15254_v8, %v1699_v36  ;;  %v2325_v12 = vshrl.u32 %v16688_v24, 16 }
 0x23e   : > { %2503 = vmatpush.bf16.msrb.mxu3 %v16659_v4  ;;  %2539 = vmatpush.bf16.msra.mxu1 %v16660_v17  ;;  %v1716_v38 = vmax.f32 %v1710_v18, 0.0  ;;  %v2324_v18 = vor.u32 %v2322_v40, %v2308_v63 }
 0x23f   : > { %2526 = vmatpush.bf16.msra.mxu0 %v16689_v32  ;;  %v1717_v33 = vmax.f32 %v1711_v9, 0.0  ;;  %v1637_v14 = vpop.f32.mrf.mxu3 }
 0x240   : > { %v1656_v39 = vadd.f32 %v1655_v5, %v1637_v14  ;;  %v1691_v56 = vpop.f32.mrf.mxu2 }
 0x241   : > { %2563 = vmatpush.bf16.msra.mxu2 %v16690_v43  ;;  %v1722_v47 = vmax.f32 %v1716_v38, %v1717_v33  ;;  %v1692_v32 = vadd.f32 %v1691_v56, %v1673_v46 }
 0x242   : > { %2504 = vmatpush.bf16.msrb.mxu3 %v16662_v35  ;;  %2540 = vmatpush.bf16.msra.mxu1 %v16663_v28  ;;  %v1700_v36 = vadd.f32 %v1656_v39, %v15217_v37  ;;  %v1658_v38 = vpop.f32.mrf.mxu0  ;;  %v1676_v33 = vpop.f32.mrf.mxu1  ;;  %v16694_v35 = vld [vmem:[#allocation112_spill] sm:$0xff] }
 0x243   : > { %2527 = vmatpush.bf16.msra.mxu0 %v14976_v44  ;;  %v1728_v9 = vrot.slane %v1722_v47, 2  ;;  %v1729_v44 = vrot.slane %v1722_v47, 4  ;;  %v1746_v5 = vsel %vm771_vm1, %v1722_v47, -inf  ;;  %v1701_v37 = vadd.f32 %v1692_v32, %v15215_v7 }
 0x244   : > { %v1747_v14 = vrot.slane %v1746_v5, 4  ;;  %v1712_v46 = vadd.f32 %v15252_v13, %v1700_v36 }
 0x245   : > { %2564 = vmatpush.bf16.msra.mxu2 %v15018_v54  ;;  %2349 = vmatmul.bf16.gmra.mxu3 %v2324_v18  ;;  %v1760_v63 = vsel %vm771_vm1, %v1729_v44, -inf  ;;  %v1713_v32 = vadd.f32 %v15254_v8, %v1701_v37 }
 0x246   : > { %2505 = vmatpush.bf16.msrb.mxu3 %v16664_v30  ;;  %2541 = vmatpush.bf16.msra.mxu1 %v16665_v62  ;;  %v2327_v30 = vor.u32 %v2325_v12, %v2320_v10  ;;  %v1730_v62 = vrot.slane %v1722_v47, 6  ;;  %v1753_v12 = vsel %vm771_vm1, %v1728_v9, -inf  ;;  %v1748_v39 = vmax.f32 %v1746_v5, %v1747_v14  ;;  %v16691_v5 = vld [vmem:[#allocation55_spill] sm:$0xff] }
 0x247   : > { %2528 = vmatpush.bf16.msra.mxu0 %v15013_v58  ;;  %2385 = vmatmul.bf16.gmra.mxu1 %v2324_v18  ;;  %v1754_v56 = vrot.slane %v1753_v12, 4  ;;  %v1761_v40 = vrot.slane %v1760_v63, 4  ;;  %v1718_v7 = vmax.f32 %v1712_v46, 0.0  ;;  %v1640_v44 = vpop.f32.mrf.mxu3  ;;  %v1719_v58 = vmax.f32 %v1713_v32, 0.0 }
 0x248   : > { %v1767_v10 = vsel %vm771_vm1, %v1730_v62, -inf  ;;  %10764 = vmatmul.msk.bf16.gmra.mxu2 %vm1187_vm7, %v2327_v30  ;;  %v1749_v36 = vrot.slane %v1748_v39, 2  ;;  %v1694_v54 = vpop.f32.mrf.mxu2  ;;  %v15288_v14 = vpack.c.b16 %v16691_v5, %v16691_v5 }
 0x249   : > { %10762 = vmatmul.msk.bf16.gmra.mxu0 %vm1187_vm7, %v2327_v30  ;;  %v1768_v47 = vrot.slane %v1767_v10, 4  ;;  %v1755_v62 = vmax.f32 %v1753_v12, %v1754_v56  ;;  %v1762_v18 = vmax.f32 %v1760_v63, %v1761_v40  ;;  %v1695_v30 = vadd.f32 %v1694_v54, %v1676_v33  ;;  %v16692_v63 = vld [vmem:[#allocation56_spill] sm:$0xff] }
 0x24a   : > { %2506 = vmatpush.bf16.msrb.mxu3 %v14912_v23  ;;  %2542 = vmatpush.bf16.msra.mxu1 %v14934_v19  ;;  %v1659_v23 = vadd.f32 %v1658_v38, %v1640_v44  ;;  %v1750_v19 = vmax.f32 %v1748_v39, %v1749_v36  ;;  %v1723_v46 = vmax.f32 %v1718_v7, %v1719_v58  ;;  %v1660_v58 = vpop.f32.mrf.mxu0  ;;  %v1678_v7 = vpop.f32.mrf.mxu1  ;;  %v16693_v36 = vld [vmem:[#allocation110_spill] sm:$0xff] }
 0x24b   : > { %v1769_v9 = vmax.f32 %v1767_v10, %v1768_v47  ;;  %v1763_v43 = vrot.slane %v1762_v18, 2  ;;  %v15294_v12 = vadd.f32 %v1695_v30, %v15228_v55  ;;  %v15298_v54 = vpack.c.b16 %v16692_v63, %v16692_v63 }
 0x24c   : > { %v1702_v37 = vadd.f32 %v1659_v23, %v15231_v0  ;;  %v1751_v10 = vrot.slane %v1750_v19, 1  ;;  %v1731_v56 = vrot.slane %v1723_v46, 2  ;;  %v1732_v40 = vrot.slane %v1723_v46, 4 }
 0x24d   : > { %v1764_v33 = vmax.f32 %v1762_v18, %v1763_v43  ;;  %v1733_v47 = vrot.slane %v1723_v46, 6  ;;  %v1774_v32 = vsel %vm771_vm1, %v1723_v46, -inf }
 0x24e   : > { %2507 = vmatpush.bf16.msrb.mxu3 %v14959_v29  ;;  %2543 = vmatpush.bf16.msra.mxu1 %v16666_v6  ;;  %v1756_v29 = vrot.slane %v1755_v62, 2  ;;  %v1770_v6 = vrot.slane %v1769_v9, 2  ;;  %v1752_v23 = vmax.f32 %v1750_v19, %v1751_v10  ;;  %v1788_v43 = vsel %vm771_vm1, %v1732_v40, -inf }
 0x24f   : > { %v1765_v55 = vrot.slane %v1764_v33, 1  ;;  %v1642_v18 = vpop.f32.mrf.mxu3  ;;  %v1789_v58 = vrot.slane %v1788_v43, 4 }
 0x250   : > { %v1757_v38 = vmax.f32 %v1755_v62, %v1756_v29  ;;  %v1771_v39 = vmax.f32 %v1769_v9, %v1770_v6  ;;  %v1775_v29 = vrot.slane %v1774_v32, 4  ;;  %v1781_v6 = vsel %vm771_vm1, %v1731_v56, -inf  ;;  %v1696_v46 = vpop.f32.mrf.mxu2 }
 0x251   : > { %v1795_v62 = vsel %vm771_vm1, %v1733_v47, -inf  ;;  %v1766_v30 = vmax.f32 %v1764_v33, %v1765_v55  ;;  %v1830_v19 = vpack.c.bf16 %v1752_v23, %v1752_v23  ;;  %v1782_v10 = vrot.slane %v1781_v6, 4 }
 0x252   : > { %2508 = vmatpush.bf16.msrb.mxu3 %v14988_v20  ;;  %2544 = vmatpush.bf16.msra.mxu1 %v14992_v26  ;;  %v1758_v0 = vrot.slane %v1757_v38, 1  ;;  %v1772_v44 = vrot.slane %v1771_v39, 1  ;;  %v1776_v63 = vmax.f32 %v1774_v32, %v1775_v29  ;;  %v1796_v7 = vrot.slane %v1795_v62, 4 }
 0x253   : > { %v4030_v26 = vperm.slane %v1830_v19, 0  ;;  %v1783_v40 = vmax.f32 %v1781_v6, %v1782_v10  ;;  %v1790_v47 = vmax.f32 %v1788_v43, %v1789_v58  ;;  %v1954_v43 = vpop.f32.mrf.mxu1 }
 0x254   : > { %v1759_v9 = vmax.f32 %v1757_v38, %v1758_v0  ;;  %v1773_v5 = vmax.f32 %v1771_v39, %v1772_v44  ;;  %v1777_v56 = vrot.slane %v1776_v63, 2  ;;  %v1797_v38 = vmax.f32 %v1795_v62, %v1796_v7  ;;  %v16695_v62 = vld [vmem:[#allocation24_spill] sm:$0xff] }
 0x255   : > { %2425 = vmatmul.bf16.vlgmr.msra.gmra.mxu3 %v16685_v50  ;;  %v1784_v0 = vrot.slane %v1783_v40, 2  ;;  %v1791_v55 = vrot.slane %v1790_v47, 2  ;;  %v4042_v29 = vunpack.c.l.b16 %v4030_v26 }
 0x256   : > { %2509 = vmatpush.bf16.msrb.mxu3 %v15011_v60  ;;  %2545 = vmatpush.bf16.msra.mxu1 %v16693_v36  ;;  %v1831_v60 = vpack.c.bf16 %v1759_v9, %v1759_v9  ;;  %v1832_v36 = vpack.c.bf16 %v1766_v30, %v1766_v30  ;;  %v1833_v20 = vpack.c.bf16 %v1773_v5, %v1773_v5  ;;  %v1798_v44 = vrot.slane %v1797_v38, 2 }
 0x257   : > { %2461 = vmatmul.bf16.vlgmr.msrb.gmra.mxu1 %v16685_v50  ;;  %v1778_v32 = vmax.f32 %v1776_v63, %v1777_v56  ;;  %v1785_v9 = vmax.f32 %v1783_v40, %v1784_v0  ;;  %v1792_v30 = vmax.f32 %v1790_v47, %v1791_v55  ;;  %v1918_v19 = vpop.f32.mrf.mxu3  ;;  %v16697_v0 = vld [vmem:[#allocation26_spill] sm:$0xff] }
 0x258   : > { %v4031_v33 = vperm.slane %v1831_v60, 0  ;;  %v4032_v39 = vperm.slane %v1832_v36, 0  ;;  %v4033_v23 = vperm.slane %v1833_v20, 0  ;;  %10767 = vmatmul.msk.bf16.vlgmr.msrb.gmra.mxu2 %vm1187_vm7, %v16686_v21  ;;  %v1714_v20 = vadd.f32 %v15252_v13, %v1702_v37  ;;  %v1936_v36 = vpop.f32.mrf.mxu0  ;;  %v1972_v10 = vpop.f32.mrf.mxu2 }
 0x259   : > { %10765 = vmatmul.msk.bf16.vlgmr.msrb.gmra.mxu0 %vm1187_vm7, %v16686_v21  ;;  %v1779_v18 = vrot.slane %v1778_v32, 1  ;;  %v1799_v5 = vmax.f32 %v1797_v38, %v1798_v44  ;;  %2833 = vmatpush.bf16.msrb.mxu2 %v14561_v1  ;;  %v1715_v37 = vadd.f32 %v15254_v8, %v15294_v12  ;;  %v15322_v63 = vadd.f32 %v1936_v36, %v1918_v19 }
 0x25a   : > { %2510 = vmatpush.bf16.msrb.mxu3 %v16694_v35  ;;  %2546 = vmatpush.bf16.msra.mxu1 %v15031_v27  ;;  %v4043_v6 = vunpack.c.l.b16 %v4031_v33  ;;  %v4044_v60 = vunpack.c.l.b16 %v4032_v39  ;;  %v1720_v46 = vmax.f32 %v1714_v20, 0.0  ;;  %v1786_v7 = vrot.slane %v1785_v9, 1  ;;  %v16696_v39 = vld [vmem:[#allocation25_spill] sm:$0xff] }
 0x25b   : > { %2797 = vmatpush.bf16.msrb.mxu0 %v14554_v59  ;;  %v1780_v58 = vmax.f32 %v1778_v32, %v1779_v18  ;;  %v1793_v56 = vrot.slane %v1792_v30, 1  ;;  %v1800_v47 = vrot.slane %v1799_v5, 1  ;;  %v1721_v38 = vmax.f32 %v1715_v37, 0.0  ;;  %v16699_v32 = vld [vmem:[#allocation34_spill] sm:$0xff] }
 0x25c   : > { %v4055_v26 = vsel %vm4054_vm8, %v4043_v6, %v4042_v29  ;;  %v15325_v33 = vadd.f32 %v1972_v10, %v1954_v43  ;;  %v4045_v55 = vunpack.c.l.b16 %v4033_v23  ;;  %v1787_v44 = vmax.f32 %v1785_v9, %v1786_v7  ;;  %v16698_v6 = vld [vmem:[#allocation32_spill] sm:$0xff] }
 0x25d   : > { %v4057_v40 = vsel %vm4056_vm9, %v4044_v60, %v4055_v26  ;;  %v1794_v12 = vmax.f32 %v1792_v30, %v1793_v56  ;;  %v1834_v29 = vpack.c.bf16 %v1780_v58, %v1780_v58  ;;  %2834 = vmatpush.bf16.msrb.mxu2 %v16699_v32  ;;  %v1801_v20 = vmax.f32 %v1799_v5, %v1800_v47  ;;  %v1956_v30 = vpop.f32.mrf.mxu1  ;;  %v16700_v58 = vld [vmem:[#allocation27_spill] sm:$0xff] }
 0x25e   : > { %2775 = vmatpush.bf16.msra.mxu3 %v14528_v31  ;;  %2811 = vmatpush.bf16.msrb.mxu1 %v16695_v62  ;;  %v1724_v60 = vmax.f32 %v1720_v46, %v1721_v38  ;;  %v4059_v36 = vsel %vm4058_vm10, %v4045_v55, %v4057_v40  ;;  %v1835_v43 = vpack.c.bf16 %v1787_v44, %v1787_v44 }
 0x25f   : > { %2798 = vmatpush.bf16.msrb.mxu0 %v16698_v6  ;;  %v1836_v18 = vpack.c.bf16 %v1794_v12, %v1794_v12  ;;  %v4034_v19 = vperm.slane %v1834_v29, 0  ;;  %v1837_v26 = vpack.c.bf16 %v1801_v20, %v1801_v20  ;;  %v1920_v47 = vpop.f32.mrf.mxu3 }
 0x260   : > { %v1734_v37 = vrot.slane %v1724_v60, 2  ;;  %v1735_v10 = vrot.slane %v1724_v60, 4  ;;  %v1736_v23 = vrot.slane %v1724_v60, 6  ;;  %v1938_v9 = vpop.f32.mrf.mxu0  ;;  %v4035_v7 = vperm.slane %v1835_v43, 0  ;;  %v1974_v12 = vpop.f32.mrf.mxu2 }
 0x261   : > { %v4036_v5 = vperm.slane %v1836_v18, 0  ;;  %v4046_v56 = vunpack.c.l.b16 %v4034_v19  ;;  %v1802_v46 = vsel %vm771_vm1, %v1724_v60, -inf  ;;  %2835 = vmatpush.bf16.msrb.mxu2 %v14600_v34  ;;  %v4037_v40 = vperm.slane %v1837_v26, 0 }
 0x262   : > { %2776 = vmatpush.bf16.msra.mxu3 %v16696_v39  ;;  %2812 = vmatpush.bf16.msrb.mxu1 %v16697_v0  ;;  %v1803_v38 = vrot.slane %v1802_v46, 4  ;;  %v1809_v55 = vsel %vm771_vm1, %v1734_v37, -inf  ;;  %v1816_v44 = vsel %vm771_vm1, %v1735_v10, -inf  ;;  %v4047_v29 = vunpack.c.l.b16 %v4035_v7 }
 0x263   : > { %2799 = vmatpush.bf16.msrb.mxu0 %v14586_v25  ;;  %v4048_v20 = vunpack.c.l.b16 %v4036_v5  ;;  %v4061_v43 = vsel %vm4060_vm11, %v4046_v56, %v4059_v36  ;;  %v1810_v18 = vrot.slane %v1809_v55, 4  ;;  %v4049_v19 = vunpack.c.l.b16 %v4037_v40 }
 0x264   : > { %v1817_v60 = vrot.slane %v1816_v44, 4  ;;  %v4063_v26 = vsel %vm4062_vm12, %v4047_v29, %v4061_v43  ;;  %v15344_v10 = vadd.f32 %v1938_v9, %v1920_v47  ;;  %v15349_v56 = vadd.f32 %v1974_v12, %v1956_v30  ;;  %v16701_v30 = vld [vmem:[#allocation29_spill] sm:$0xff] }
 0x265   : > { %v1811_v37 = vmax.f32 %v1809_v55, %v1810_v18  ;;  %2836 = vmatpush.bf16.msrb.mxu2 %v14613_v61  ;;  %v4065_v36 = vsel %vm4064_vm13, %v4048_v20, %v4063_v26  ;;  %2430 = vmatmul.bf16.gmra.mxu3 %v15288_v14  ;;  %v1959_v55 = vpop.f32.mrf.mxu1 }
 0x266   : > { %2777 = vmatpush.bf16.msra.mxu3 %v16700_v58  ;;  %2813 = vmatpush.bf16.msrb.mxu1 %v14542_v45  ;;  %v1804_v58 = vmax.f32 %v1802_v46, %v1803_v38  ;;  %v1823_v45 = vsel %vm771_vm1, %v1736_v23, -inf  ;;  %v1818_v5 = vmax.f32 %v1816_v44, %v1817_v60  ;;  %v4067_v23 = vsel %vm4066_vm14, %v4049_v19, %v4065_v36  ;;  %v16702_v44 = vld [vmem:[#allocation30_spill] sm:$0xff] }
 0x267   : > { %v1824_v34 = vrot.slane %v1823_v45, 4  ;;  %2800 = vmatpush.bf16.msrb.mxu0 %v14606_v48  ;;  %2466 = vmatmul.bf16.gmra.mxu1 %v15288_v14  ;;  %v1812_v46 = vrot.slane %v1811_v37, 2  ;;  %v1923_v29 = vpop.f32.mrf.mxu3 }
 0x268   : > { %v1805_v7 = vrot.slane %v1804_v58, 2  ;;  %10768 = vmatmul.msk.bf16.gmra.mxu2 %vm1187_vm7, %v15298_v54  ;;  %v1819_v47 = vrot.slane %v1818_v5, 2  ;;  %v1941_v38 = vpop.f32.mrf.mxu0 }
 0x269   : > { %v1825_v40 = vmax.f32 %v1823_v45, %v1824_v34  ;;  %10766 = vmatmul.msk.bf16.gmra.mxu0 %vm1187_vm7, %v15298_v54  ;;  %v1813_v12 = vmax.f32 %v1811_v37, %v1812_v46  ;;  %v15360_v45 = vadd.f32 %v1941_v38, %v1923_v29  ;;  %v1977_v34 = vpop.f32.mrf.mxu2 }
 0x26a   : > { %2778 = vmatpush.bf16.msra.mxu3 %v14546_v49  ;;  %2814 = vmatpush.bf16.msrb.mxu1 %v14548_v51  ;;  %v1806_v9 = vmax.f32 %v1804_v58, %v1805_v7  ;;  %v1820_v43 = vmax.f32 %v1818_v5, %v1819_v47  ;;  %v15362_v60 = vadd.f32 %v1977_v34, %v1959_v55 }
 0x26b   : > { %v1826_v14 = vrot.slane %v1825_v40, 2  ;;  %v1814_v18 = vrot.slane %v1813_v12, 1 }
 0x26c   : > { %v1807_v20 = vrot.slane %v1806_v9, 1  ;;  %v1821_v58 = vrot.slane %v1820_v43, 1 }
 0x26d   : > { %v1827_v19 = vmax.f32 %v1825_v40, %v1826_v14  ;;  %v1815_v26 = vmax.f32 %v1813_v12, %v1814_v18  ;;  %v1961_v29 = vpop.f32.mrf.mxu1  ;;  %v2490_v14 = vrot.slane %v16687_v41, 1 }
 0x26e   : > { %2779 = vmatpush.bf16.msra.mxu3 %v16701_v30  ;;  %2815 = vmatpush.bf16.msrb.mxu1 %v16702_v44  ;;  %v1808_v54 = vmax.f32 %v1806_v9, %v1807_v20  ;;  %v1822_v37 = vmax.f32 %v1820_v43, %v1821_v58  ;;  %v2493_v43 = vrot.slane %v16688_v24, 1  ;;  %v16707_v29 = vld [vmem:[#allocation40_spill] sm:$0xff] }
 0x26f   : > { %v1828_v36 = vrot.slane %v1827_v19, 1  ;;  %v1839_v30 = vpack.c.bf16 %v1815_v26, %v1815_v26  ;;  %v1925_v55 = vpop.f32.mrf.mxu3  ;;  %v2492_v26 = vrot.slane %v16686_v21, 1 }
 0x270   : > { %v1838_v7 = vpack.c.bf16 %v1808_v54, %v1808_v54  ;;  %v1840_v5 = vpack.c.bf16 %v1822_v37, %v1822_v37  ;;  %v1943_v38 = vpop.f32.mrf.mxu0  ;;  %v2489_v54 = vrot.slane %v16685_v50, 1  ;;  %v16704_v37 = vld [vmem:[#allocation39_spill] sm:$0xff]  ;;  %v16708_v55 = vld [vmem:[#allocation53_spill] sm:$0xff] }
 0x271   : > { %v1829_v46 = vmax.f32 %v1827_v19, %v1828_v36  ;;  %v4039_v9 = vperm.slane %v1839_v30, 0  ;;  %v1979_v12 = vpop.f32.mrf.mxu2  ;;  %v16703_v36 = vld [vmem:[#allocation38_spill] sm:$0xff]  ;;  %v2494_v24 = vsel %vm490_vm2, %v2492_v26, %v2493_v43  ;;  %v16706_v38 = vld [vmem:[#allocation41_spill] sm:$0xff] }
 0x272   : > { %2780 = vmatpush.bf16.msra.mxu3 %v16633_v16  ;;  %2816 = vmatpush.bf16.msrb.mxu1 %v16634_v53  ;;  %v4038_v47 = vperm.slane %v1838_v7, 0  ;;  %v4040_v20 = vperm.slane %v1840_v5, 0  ;;  %v2491_v41 = vsel %vm490_vm2, %v2489_v54, %v2490_v14  ;;  %v16711_v54 = vld [vmem:[#allocation42_spill] sm:$0xff]  ;;  %v16713_v26 = vld [vmem:[#allocation61_spill] sm:$0xff] }
 0x273   : > { %v1841_v40 = vpack.c.bf16 %v1829_v46, %v1829_v46  ;;  %v4051_v19 = vunpack.c.l.b16 %v4039_v9 }
 0x274   : > { %v4050_v18 = vunpack.c.l.b16 %v4038_v47  ;;  %v4052_v58 = vunpack.c.l.b16 %v4040_v20  ;;  %v16709_v20 = vld [vmem:[#allocation57_spill] sm:$0xff] }
 0x275   : > { %v4041_v34 = vperm.slane %v1841_v40, 0  ;;  %2511 = vmatmul.bf16.vlgmr.msrb.gmra.mxu3 %v2491_v41  ;;  %v2035_v47 = vpop.f32.mrf.mxu1 }
 0x276   : > { %2781 = vmatpush.bf16.msra.mxu3 %v16635_v3  ;;  %2817 = vmatpush.bf16.msrb.mxu1 %v16636_v15  ;;  %v4068_v7 = vsel %vm4054_vm8, %v4051_v19, %v4050_v18  ;;  %v2036_v40 = vadd.f32 %v2035_v47, %v15325_v33  ;;  %v16710_v19 = vld [vmem:[#allocation43_spill] sm:$0xff] }
 0x277   : > { %v4053_v30 = vunpack.c.l.b16 %v4041_v34  ;;  %v4069_v46 = vsel %vm4056_vm9, %v4052_v58, %v4068_v7  ;;  %2547 = vmatmul.bf16.vlgmr.msra.gmra.mxu1 %v2491_v41  ;;  %v1999_v9 = vpop.f32.mrf.mxu3  ;;  %v16712_v58 = vld [vmem:[#allocation59_spill] sm:$0xff]  ;;  %v16714_v7 = vld [vmem:[#allocation45_spill] sm:$0xff]  ;;  %v16715_v41 = vld [vmem:[#allocation44_spill] sm:$0xff] }
 0x278   : > { %10771 = vmatmul.msk.bf16.vlgmr.msra.gmra.mxu2 %vm1187_vm7, %v2494_v24  ;;  %v2017_v5 = vpop.f32.mrf.mxu0  ;;  %v2000_v12 = vadd.f32 %v1999_v9, %v15322_v63 }
 0x279   : > { %v4070_v50 = vsel %vm4058_vm10, %v4053_v30, %v4069_v46  ;;  %10769 = vmatmul.msk.bf16.vlgmr.msra.gmra.mxu0 %vm1187_vm7, %v2494_v24  ;;  %2914 = vmatpush.bf16.msra.mxu2 %v16709_v20  ;;  %v2053_v34 = vpop.f32.mrf.mxu2  ;;  %v16716_v24 = vld [vmem:[#allocation65_spill] sm:$0xff] }
 0x27a   : > { %2782 = vmatpush.bf16.msra.mxu3 %v16703_v36  ;;  %2818 = vmatpush.bf16.msrb.mxu1 %v16704_v37  ;;  %v15381_v21 = vpack.c.b16 %v4070_v50, %v4067_v23  ;;  %v15389_v18 = vadd.f32 %v2053_v34, %v2036_v40  ;;  %v15391_v23 = vadd.f32 %v2017_v5, %v2000_v12  ;;  %v16717_v50 = vld [vmem:[#allocation67_spill] sm:$0xff]  ;;  %v16719_v34 = vld [vmem:[#allocation50_spill] sm:$0xff] }
 0x27b   : > { %2878 = vmatpush.bf16.msra.mxu0 %v16708_v55  ;;  %v16718_v12 = vld [vmem:[#allocation51_spill] sm:$0xff] }
 0x27c   : > { %16705 = vst [vmem:[#allocation31_spill] sm:$0xff] %v15381_v21  ;;  %v16720_v21 = vld [vmem:[#allocation69_spill] sm:$0xff] }
 0x27d   : > { %2915 = vmatpush.bf16.msra.mxu2 %v16713_v26  ;;  %v2037_v30 = vpop.f32.mrf.mxu1 }
 0x27e   : > { %2892 = vmatpush.bf16.msra.mxu1 %v16706_v38  ;;  %2856 = vmatpush.bf16.msrb.mxu3 %v16707_v29  ;;  %v2038_v63 = vadd.f32 %v2037_v30, %v15349_v56  ;;  %v16722_v30 = vld [vmem:[#allocation54_spill] sm:$0xff] }
 0x27f   : > { %2879 = vmatpush.bf16.msra.mxu0 %v16712_v58  ;;  %v2001_v46 = vpop.f32.mrf.mxu3 }
 0x280   : > { %v2019_v33 = vpop.f32.mrf.mxu0  ;;  %v2002_v5 = vadd.f32 %v2001_v46, %v15344_v10 }
 0x281   : > { %2916 = vmatpush.bf16.msra.mxu2 %v16717_v50  ;;  %v2055_v47 = vpop.f32.mrf.mxu2  ;;  %v16726_v50 = vld [vmem:[#allocation60_spill] sm:$0xff] }
 0x282   : > { %2893 = vmatpush.bf16.msra.mxu1 %v16710_v19  ;;  %2857 = vmatpush.bf16.msrb.mxu3 %v16711_v54  ;;  %v15403_v40 = vadd.f32 %v2055_v47, %v2038_v63  ;;  %v15405_v9 = vadd.f32 %v2019_v33, %v2002_v5  ;;  %v16723_v33 = vld [vmem:[#allocation52_spill] sm:$0xff] }
 0x283   : > { %2880 = vmatpush.bf16.msra.mxu0 %v16716_v24  ;;  %v16727_v24 = vld [vmem:[#allocation58_spill] sm:$0xff] }
 0x285   : > { %2516 = vmatmul.bf16.gmra.mxu3 %v2490_v14  ;;  %v2040_v56 = vpop.f32.mrf.mxu1 }
 0x286   : > { %2894 = vmatpush.bf16.msra.mxu1 %v16714_v7  ;;  %2858 = vmatpush.bf16.msrb.mxu3 %v16715_v41  ;;  %v16721_v41 = vld [vmem:[#allocation71_spill] sm:$0xff]  ;;  %v2041_v63 = vadd.f32 %v2040_v56, %v15362_v60  ;;  %v16729_v7 = vld [vmem:[#allocation98_spill] sm:$0xff] }
 0x287   : > { %2881 = vmatpush.bf16.msra.mxu0 %v16720_v21  ;;  %2917 = vmatpush.bf16.msra.mxu2 %v16721_v41  ;;  %v16724_v41 = vld [vmem:[#allocation76_spill] sm:$0xff]  ;;  %v2757_v60 = vshll.u32 %v16729_v7, 16 }
 0x288   : > { %2552 = vmatmul.bf16.gmra.mxu1 %v2490_v14  ;;  %10772 = vmatmul.msk.bf16.gmra.mxu2 %vm1187_vm7, %v2493_v43  ;;  %v2022_v10 = vpop.f32.mrf.mxu0  ;;  %v2004_v46 = vpop.f32.mrf.mxu3  ;;  %v2740_v14 = vshll.u32 %v16724_v41, 16 }
 0x289   : > { %10770 = vmatmul.msk.bf16.gmra.mxu0 %vm1187_vm7, %v2493_v43  ;;  %v2005_v5 = vadd.f32 %v2004_v46, %v15360_v45 }
 0x28a   : > { %2895 = vmatpush.bf16.msra.mxu1 %v16718_v12  ;;  %2859 = vmatpush.bf16.msrb.mxu3 %v16719_v34  ;;  %v16725_v12 = vld [vmem:[#allocation77_spill] sm:$0xff]  ;;  %v2742_v56 = vrot.slane %v2740_v14, 1 }
 0x28b   : > { %v2058_v47 = vpop.f32.mrf.mxu2  ;;  %v15420_v34 = vadd.f32 %v2022_v10, %v2005_v5  ;;  %v2752_v43 = vshll.u32 %v16725_v12, 16 }
 0x28c   : > { %v15417_v21 = vadd.f32 %v2058_v47, %v2041_v63  ;;  %v2738_v63 = vshrl.u32 %v16724_v41, 16 }
 0x28d   : > { %v2042_v45 = vpop.f32.mrf.mxu1  ;;  %v2754_v46 = vrot.slane %v2752_v43, 1 }
 0x28e   : > { %2896 = vmatpush.bf16.msra.mxu1 %v16722_v30  ;;  %2860 = vmatpush.bf16.msrb.mxu3 %v16723_v33  ;;  %v16728_v30 = vld [vmem:[#allocation114_spill] sm:$0xff]  ;;  %v2743_v58 = vor.u32 %v2742_v56, %v2738_v63  ;;  %v16732_v63 = vld [vmem:[#allocation97_spill] sm:$0xff] }
 0x28f   : > { %v2745_v33 = vshll.u32 %v16728_v30, 16  ;;  %v16730_v45 = vld [vmem:[#allocation78_spill] sm:$0xff] }
 0x290   : > { %v2024_v26 = vpop.f32.mrf.mxu0  ;;  %v2006_v10 = vpop.f32.mrf.mxu3 }
 0x291   : > { %v2747_v5 = vrot.slane %v2745_v33, 1  ;;  %v16731_v10 = vld [vmem:[#allocation96_spill] sm:$0xff] }
 0x292   : > { %2897 = vmatpush.bf16.msra.mxu1 %v16726_v50  ;;  %2861 = vmatpush.bf16.msrb.mxu3 %v16727_v24  ;;  %v2750_v50 = vshrl.u32 %v16725_v12, 16  ;;  %v2759_v24 = vrot.slane %v2757_v60, 1 }
 0x293   : > { %v2060_v47 = vpop.f32.mrf.mxu2  ;;  %v2748_v26 = vsel %vm470_vm0, %v2743_v58, %v2747_v5 }
 0x294   : > { %v2755_v54 = vor.u32 %v2754_v46, %v2750_v50 }
 0x295   : > { %2783 = vmatmul.bf16.vlgmr.msra.gmra.mxu3 %v2748_v26  ;;  %v2121_v43 = vpop.f32.mrf.mxu1 }
 0x296   : > { %2898 = vmatpush.bf16.msra.mxu1 %v16657_v2  ;;  %2862 = vmatpush.bf16.msrb.mxu3 %v14805_v11  ;;  %v2760_v14 = vsel %vm470_vm0, %v2755_v54, %v2759_v24  ;;  %v16743_v2 = vld [vmem:[#allocation103_spill] sm:$0xff] }
 0x298   : > { %2819 = vmatmul.bf16.vlgmr.msrb.gmra.mxu1 %v2748_v26  ;;  %10775 = vmatmul.msk.bf16.vlgmr.msrb.gmra.mxu2 %vm1187_vm7, %v2760_v14  ;;  %v2103_v33 = vpop.f32.mrf.mxu0  ;;  %v2085_v50 = vpop.f32.mrf.mxu3 }
 0x299   : > { %10773 = vmatmul.msk.bf16.vlgmr.msrb.gmra.mxu0 %vm1187_vm7, %v2760_v14  ;;  %3000 = vmatpush.bf16.msrb.mxu2 %v16661_v42  ;;  %v2104_v58 = vadd.f32 %v2103_v33, %v2085_v50 }
 0x29a   : > { %2899 = vmatpush.bf16.msra.mxu1 %v16658_v22  ;;  %2863 = vmatpush.bf16.msrb.mxu3 %v14813_v57 }
 0x29b   : > { %2964 = vmatpush.bf16.msrb.mxu0 %v14914_v52  ;;  %v2139_v60 = vpop.f32.mrf.mxu2  ;;  %v2148_v54 = vadd.f32 %v2104_v58, %v15391_v23  ;;  %v16734_v23 = vld [vmem:[#allocation80_spill] sm:$0xff]  ;;  %v16737_v52 = vld [vmem:[#allocation89_spill] sm:$0xff] }
 0x29c   : > { %v2140_v56 = vadd.f32 %v2139_v60, %v2121_v43  ;;  %v16733_v43 = vld [vmem:[#allocation83_spill] sm:$0xff] }
 0x29d   : > { %3001 = vmatpush.bf16.msrb.mxu2 %v16732_v63  ;;  %v2154_v47 = vadd.f32 %v2148_v54, %v15252_v13  ;;  %v2123_v50 = vpop.f32.mrf.mxu1  ;;  %v2761_v63 = vshrl.u32 %v16728_v30, 16  ;;  %v2764_v54 = vshrl.u32 %v16729_v7, 16 }
 0x29e   : > { %2978 = vmatpush.bf16.msrb.mxu1 %v16660_v17  ;;  %2942 = vmatpush.bf16.msra.mxu3 %v16659_v4  ;;  %v2149_v46 = vadd.f32 %v2140_v56, %v15389_v18  ;;  %v16736_v18 = vld [vmem:[#allocation101_spill] sm:$0xff] }
 0x29f   : > { %2965 = vmatpush.bf16.msrb.mxu0 %v16731_v10  ;;  %v2160_v14 = vmax.f32 %v2154_v47, 0.0  ;;  %v2763_v42 = vor.u32 %v2761_v63, %v2747_v5 }
 0x2a0   : > { %v2155_v26 = vadd.f32 %v2149_v46, %v15254_v8  ;;  %v2105_v33 = vpop.f32.mrf.mxu0  ;;  %v2087_v60 = vpop.f32.mrf.mxu3 }
 0x2a1   : > { %3002 = vmatpush.bf16.msrb.mxu2 %v16736_v18  ;;  %v2106_v56 = vadd.f32 %v2105_v33, %v2087_v60  ;;  %v16739_v60 = vld [vmem:[#allocation109_spill] sm:$0xff]  ;;  %v16740_v18 = vld [vmem:[#allocation111_spill] sm:$0xff] }
 0x2a2   : > { %2979 = vmatpush.bf16.msrb.mxu1 %v16663_v28  ;;  %2943 = vmatpush.bf16.msra.mxu3 %v16730_v45  ;;  %v2161_v58 = vmax.f32 %v2155_v26, 0.0  ;;  %v16735_v45 = vld [vmem:[#allocation100_spill] sm:$0xff]  ;;  %v16738_v26 = vld [vmem:[#allocation85_spill] sm:$0xff] }
 0x2a3   : > { %2966 = vmatpush.bf16.msrb.mxu0 %v16735_v45  ;;  %v2141_v10 = vpop.f32.mrf.mxu2  ;;  %v2150_v28 = vadd.f32 %v2106_v56, %v15405_v9 }
 0x2a4   : > { %v2166_v46 = vmax.f32 %v2160_v14, %v2161_v58  ;;  %v2142_v47 = vadd.f32 %v2141_v10, %v2123_v50 }
 0x2a5   : > { %3003 = vmatpush.bf16.msrb.mxu2 %v16740_v18  ;;  %v2156_v10 = vadd.f32 %v2150_v28, %v15252_v13  ;;  %2788 = vmatmul.bf16.gmra.mxu3 %v2763_v42  ;;  %v2126_v28 = vpop.f32.mrf.mxu1 }
 0x2a6   : > { %2980 = vmatpush.bf16.msrb.mxu1 %v16733_v43  ;;  %2944 = vmatpush.bf16.msra.mxu3 %v16734_v23  ;;  %v2766_v43 = vor.u32 %v2764_v54, %v2759_v24  ;;  %v2172_v23 = vrot.slane %v2166_v46, 2  ;;  %v2173_v45 = vrot.slane %v2166_v46, 4  ;;  %v2174_v4 = vrot.slane %v2166_v46, 6 }
 0x2a7   : > { %v2190_v33 = vsel %vm771_vm1, %v2166_v46, -inf  ;;  %2967 = vmatpush.bf16.msrb.mxu0 %v16739_v60  ;;  %v2151_v9 = vadd.f32 %v2142_v47, %v15403_v40  ;;  %v16741_v46 = vld [vmem:[#allocation99_spill] sm:$0xff] }
 0x2a8   : > { %v2191_v17 = vrot.slane %v2190_v33, 4  ;;  %2824 = vmatmul.bf16.gmra.mxu1 %v2763_v42  ;;  %v2197_v24 = vsel %vm771_vm1, %v2172_v23, -inf  ;;  %v2204_v5 = vsel %vm771_vm1, %v2173_v45, -inf  ;;  %v2211_v63 = vsel %vm771_vm1, %v2174_v4, -inf  ;;  %10776 = vmatmul.msk.bf16.gmra.mxu2 %vm1187_vm7, %v2766_v43  ;;  %v2108_v54 = vpop.f32.mrf.mxu0  ;;  %v16742_v40 = vld [vmem:[#allocation95_spill] sm:$0xff]  ;;  %v2090_v45 = vpop.f32.mrf.mxu3 }
 0x2a9   : > { %10774 = vmatmul.msk.bf16.gmra.mxu0 %vm1187_vm7, %v2766_v43  ;;  %v2198_v50 = vrot.slane %v2197_v24, 4  ;;  %v2205_v58 = vrot.slane %v2204_v5, 4  ;;  %v2212_v56 = vrot.slane %v2211_v63, 4  ;;  %v2162_v42 = vmax.f32 %v2156_v10, 0.0 }
 0x2aa   : > { %2981 = vmatpush.bf16.msrb.mxu1 %v16737_v52  ;;  %2945 = vmatpush.bf16.msra.mxu3 %v16738_v26  ;;  %v2192_v14 = vmax.f32 %v2190_v33, %v2191_v17  ;;  %v2157_v23 = vadd.f32 %v2151_v9, %v15254_v8  ;;  %v2109_v17 = vadd.f32 %v2108_v54, %v2090_v45 }
 0x2ab   : > { %v2199_v4 = vmax.f32 %v2197_v24, %v2198_v50  ;;  %v2206_v18 = vmax.f32 %v2204_v5, %v2205_v58  ;;  %v2213_v60 = vmax.f32 %v2211_v63, %v2212_v56  ;;  %v2144_v26 = vpop.f32.mrf.mxu2 }
 0x2ac   : > { %v2193_v47 = vrot.slane %v2192_v14, 2  ;;  %v2163_v43 = vmax.f32 %v2157_v23, 0.0  ;;  %v2145_v33 = vadd.f32 %v2144_v26, %v2126_v28  ;;  %v2152_v9 = vadd.f32 %v2109_v17, %v15420_v34  ;;  %v16746_v34 = vld [vmem:[#allocation108_spill] sm:$0xff] }
 0x2ad   : > { %v2200_v57 = vrot.slane %v2199_v4, 2  ;;  %v2207_v22 = vrot.slane %v2206_v18, 2  ;;  %v2214_v11 = vrot.slane %v2213_v60, 2 }
 0x2ae   : > { %2982 = vmatpush.bf16.msrb.mxu1 %v16741_v46  ;;  %2946 = vmatpush.bf16.msra.mxu3 %v16742_v40  ;;  %v2194_v52 = vmax.f32 %v2192_v14, %v2193_v47  ;;  %v16744_v46 = vld [vmem:[#allocation102_spill] sm:$0xff]  ;;  %v2167_v10 = vmax.f32 %v2162_v42, %v2163_v43  ;;  %v15475_v40 = vadd.f32 %v2145_v33, %v15417_v21  ;;  %v2128_v42 = vpop.f32.mrf.mxu1 }
 0x2af   : > { %v2201_v5 = vmax.f32 %v2199_v4, %v2200_v57  ;;  %v2208_v63 = vmax.f32 %v2206_v18, %v2207_v22  ;;  %v2215_v50 = vmax.f32 %v2213_v60, %v2214_v11  ;;  %v16745_v43 = vld [vmem:[#allocation110_spill] sm:$0xff] }
 0x2b0   : > { %v2195_v24 = vrot.slane %v2194_v52, 1  ;;  %v2175_v58 = vrot.slane %v2167_v10, 2  ;;  %v2176_v26 = vrot.slane %v2167_v10, 4  ;;  %v2177_v14 = vrot.slane %v2167_v10, 6  ;;  %v2110_v47 = vpop.f32.mrf.mxu0  ;;  %v2092_v18 = vpop.f32.mrf.mxu3 }
 0x2b1   : > { %v2218_v56 = vsel %vm771_vm1, %v2167_v10, -inf  ;;  %v2202_v28 = vrot.slane %v2201_v5, 1  ;;  %v2209_v23 = vrot.slane %v2208_v63, 1  ;;  %v2216_v45 = vrot.slane %v2215_v50, 1 }
 0x2b2   : > { %2983 = vmatpush.bf16.msrb.mxu1 %v16743_v2  ;;  %2947 = vmatpush.bf16.msra.mxu3 %v16744_v46  ;;  %v2196_v54 = vmax.f32 %v2194_v52, %v2195_v24  ;;  %v2219_v21 = vrot.slane %v2218_v56, 4  ;;  %v2225_v57 = vsel %vm771_vm1, %v2175_v58, -inf  ;;  %v2232_v11 = vsel %vm771_vm1, %v2176_v26, -inf }
 0x2b3   : > { %v2239_v22 = vsel %vm771_vm1, %v2177_v14, -inf  ;;  %v2203_v60 = vmax.f32 %v2201_v5, %v2202_v28  ;;  %v2210_v4 = vmax.f32 %v2208_v63, %v2209_v23  ;;  %v2217_v52 = vmax.f32 %v2215_v50, %v2216_v45  ;;  %v2146_v33 = vpop.f32.mrf.mxu2 }
 0x2b4   : > { %v2274_v17 = vpack.c.bf16 %v2196_v54, %v2196_v54  ;;  %v2220_v10 = vmax.f32 %v2218_v56, %v2219_v21  ;;  %v2226_v24 = vrot.slane %v2225_v57, 4  ;;  %v2233_v47 = vrot.slane %v2232_v11, 4 }
 0x2b5   : > { %v2240_v42 = vrot.slane %v2239_v22, 4  ;;  %v2276_v46 = vpack.c.bf16 %v2210_v4, %v2210_v4  ;;  %2864 = vmatmul.bf16.vlgmr.msrb.gmra.mxu3 %v16724_v41 }
 0x2b6   : > { %2984 = vmatpush.bf16.msrb.mxu1 %v16745_v43  ;;  %2948 = vmatpush.bf16.msra.mxu3 %v16746_v34  ;;  %v2275_v43 = vpack.c.bf16 %v2203_v60, %v2203_v60  ;;  %v2277_v34 = vpack.c.bf16 %v2217_v52, %v2217_v52  ;;  %v4085_v2 = vperm.slane %v2274_v17, 0  ;;  %v2221_v58 = vrot.slane %v2220_v10, 2 }
 0x2b7   : > { %v2227_v26 = vmax.f32 %v2225_v57, %v2226_v24  ;;  %v2234_v14 = vmax.f32 %v2232_v11, %v2233_v47  ;;  %v2241_v5 = vmax.f32 %v2239_v22, %v2240_v42  ;;  %v4087_v50 = vperm.slane %v2276_v46, 0 }
 0x2b8   : > { %v4086_v63 = vperm.slane %v2275_v43, 0  ;;  %v4088_v54 = vperm.slane %v2277_v34, 0  ;;  %2900 = vmatmul.bf16.vlgmr.msra.gmra.mxu1 %v16724_v41  ;;  %v2222_v56 = vmax.f32 %v2220_v10, %v2221_v58  ;;  %10779 = vmatmul.msk.bf16.vlgmr.msra.gmra.mxu2 %vm1187_vm7, %v16725_v12  ;;  %v4097_v21 = vunpack.c.l.b16 %v4085_v2  ;;  %v2363_v43 = vpop.f32.mrf.mxu0  ;;  %v2381_v34 = vpop.f32.mrf.mxu1 }
 0x2b9   : > { %v2228_v28 = vrot.slane %v2227_v26, 2  ;;  %v2235_v23 = vrot.slane %v2234_v14, 2  ;;  %v2242_v45 = vrot.slane %v2241_v5, 2  ;;  %10777 = vmatmul.msk.bf16.vlgmr.msra.gmra.mxu0 %vm1187_vm7, %v16725_v12  ;;  %v4099_v11 = vunpack.c.l.b16 %v4087_v50  ;;  %v2345_v52 = vpop.f32.mrf.mxu3  ;;  %3260 = vmatpush.bf16.msra.mxu2 %v14561_v1 }
 0x2ba   : > { %2985 = vmatpush.bf16.msrb.mxu1 %v15031_v27  ;;  %2949 = vmatpush.bf16.msra.mxu3 %v16694_v35  ;;  %v4098_v57 = vunpack.c.l.b16 %v4086_v63  ;;  %v2158_v46 = vadd.f32 %v2152_v9, %v15252_v13  ;;  %v2223_v22 = vrot.slane %v2222_v56, 1  ;;  %v2159_v9 = vadd.f32 %v15475_v40, %v15254_v8 }
 0x2bb   : > { %v2229_v18 = vmax.f32 %v2227_v26, %v2228_v28  ;;  %v2236_v60 = vmax.f32 %v2234_v14, %v2235_v23  ;;  %v2243_v4 = vmax.f32 %v2241_v5, %v2242_v45  ;;  %3224 = vmatpush.bf16.msra.mxu0 %v14554_v59  ;;  %v15499_v33 = vadd.f32 %v2363_v43, %v2345_v52  ;;  %v2399_v10 = vpop.f32.mrf.mxu2  ;;  %v16747_v45 = vld [vmem:[#allocation113_spill] sm:$0xff] }
 0x2bc   : > { %v4109_v2 = vsel %vm4054_vm8, %v4098_v57, %v4097_v21  ;;  %v2164_v17 = vmax.f32 %v2158_v46, 0.0  ;;  %v2224_v24 = vmax.f32 %v2222_v56, %v2223_v22  ;;  %v2165_v14 = vmax.f32 %v2159_v9, 0.0  ;;  %v16748_v57 = vld [vmem:[#allocation92_spill] sm:$0xff] }
 0x2bd   : > { %v2230_v47 = vrot.slane %v2229_v18, 1  ;;  %v2237_v42 = vrot.slane %v2236_v60, 1  ;;  %v4110_v58 = vsel %vm4056_vm9, %v4099_v11, %v4109_v2  ;;  %v2244_v26 = vrot.slane %v2243_v4, 1  ;;  %3261 = vmatpush.bf16.msra.mxu2 %v16699_v32 }
 0x2be   : > { %3238 = vmatpush.bf16.msra.mxu1 %v16695_v62  ;;  %3202 = vmatpush.bf16.msrb.mxu3 %v14528_v31  ;;  %v15502_v5 = vadd.f32 %v2399_v10, %v2381_v34  ;;  %v4100_v63 = vunpack.c.l.b16 %v4088_v54  ;;  %v2278_v40 = vpack.c.bf16 %v2224_v24, %v2224_v24  ;;  %v2168_v23 = vmax.f32 %v2164_v17, %v2165_v14  ;;  %v16749_v10 = vld [vmem:[#allocation28_spill] sm:$0xff] }
 0x2bf   : > { %v2231_v50 = vmax.f32 %v2229_v18, %v2230_v47  ;;  %v2238_v28 = vmax.f32 %v2236_v60, %v2237_v42  ;;  %3225 = vmatpush.bf16.msra.mxu0 %v16698_v6  ;;  %v2245_v56 = vmax.f32 %v2243_v4, %v2244_v26  ;;  %v2847_v21 = vpack.c.b16 %v16747_v45, %v16747_v45  ;;  %v16750_v4 = vld [vmem:[#allocation27_spill] sm:$0xff] }
 0x2c0   : > { %v2848_v11 = vpack.c.b16 %v16748_v57, %v16748_v57  ;;  %v4111_v46 = vsel %vm4058_vm10, %v4100_v63, %v4110_v58  ;;  %v4089_v54 = vperm.slane %v2278_v40, 0  ;;  %v2178_v18 = vrot.slane %v2168_v23, 2  ;;  %v2365_v2 = vpop.f32.mrf.mxu0  ;;  %v2383_v9 = vpop.f32.mrf.mxu1  ;;  %v16751_v58 = vld [vmem:[#allocation37_spill] sm:$0xff] }
 0x2c1   : > { %v2279_v43 = vpack.c.bf16 %v2231_v50, %v2231_v50  ;;  %v2280_v34 = vpack.c.bf16 %v2238_v28, %v2238_v28  ;;  %v2281_v22 = vpack.c.bf16 %v2245_v56, %v2245_v56  ;;  %v2179_v60 = vrot.slane %v2168_v23, 4  ;;  %v2347_v26 = vpop.f32.mrf.mxu3  ;;  %3262 = vmatpush.bf16.msra.mxu2 %v16751_v58 }
 0x2c2   : > { %3239 = vmatpush.bf16.msra.mxu1 %v16697_v0  ;;  %3203 = vmatpush.bf16.msrb.mxu3 %v16696_v39  ;;  %v2180_v52 = vrot.slane %v2168_v23, 6  ;;  %v4101_v47 = vunpack.c.l.b16 %v4089_v54  ;;  %v2246_v42 = vsel %vm771_vm1, %v2168_v23, -inf  ;;  %v2253_v50 = vsel %vm771_vm1, %v2178_v18, -inf }
 0x2c3   : > { %v4090_v17 = vperm.slane %v2279_v43, 0  ;;  %v4091_v24 = vperm.slane %v2280_v34, 0  ;;  %3226 = vmatpush.bf16.msra.mxu0 %v14586_v25  ;;  %v4092_v14 = vperm.slane %v2281_v22, 0  ;;  %v2247_v63 = vrot.slane %v2246_v42, 4  ;;  %v2401_v40 = vpop.f32.mrf.mxu2 }
 0x2c4   : > { %v2260_v28 = vsel %vm771_vm1, %v2179_v60, -inf  ;;  %v4112_v57 = vsel %vm4060_vm11, %v4101_v47, %v4111_v46  ;;  %v2254_v43 = vrot.slane %v2253_v50, 4  ;;  %v15525_v60 = vadd.f32 %v2365_v2, %v2347_v26 }
 0x2c5   : > { %v4102_v56 = vunpack.c.l.b16 %v4090_v17  ;;  %v4103_v45 = vunpack.c.l.b16 %v4091_v24  ;;  %v4104_v34 = vunpack.c.l.b16 %v4092_v14  ;;  %v2248_v54 = vmax.f32 %v2246_v42, %v2247_v63  ;;  %3263 = vmatpush.bf16.msra.mxu2 %v14613_v61  ;;  %2869 = vmatmul.bf16.gmra.mxu3 %v2847_v21 }
 0x2c6   : > { %3240 = vmatpush.bf16.msra.mxu1 %v16749_v10  ;;  %3204 = vmatpush.bf16.msrb.mxu3 %v16750_v4  ;;  %v2261_v23 = vrot.slane %v2260_v28, 4  ;;  %v2267_v4 = vsel %vm771_vm1, %v2180_v52, -inf  ;;  %v2255_v18 = vmax.f32 %v2253_v50, %v2254_v43  ;;  %v15530_v47 = vadd.f32 %v2401_v40, %v2383_v9 }
 0x2c7   : > { %v4113_v22 = vsel %vm4062_vm12, %v4102_v56, %v4112_v57  ;;  %v2268_v58 = vrot.slane %v2267_v4, 4  ;;  %3227 = vmatpush.bf16.msra.mxu0 %v14606_v48  ;;  %v2249_v17 = vrot.slane %v2248_v54, 2  ;;  %v16752_v56 = vld [vmem:[#allocation29_spill] sm:$0xff] }
 0x2c8   : > { %v4114_v46 = vsel %vm4064_vm13, %v4103_v45, %v4113_v22  ;;  %v2262_v24 = vmax.f32 %v2260_v28, %v2261_v23  ;;  %2905 = vmatmul.bf16.gmra.mxu1 %v2847_v21  ;;  %v2256_v42 = vrot.slane %v2255_v18, 2  ;;  %10780 = vmatmul.msk.bf16.gmra.mxu2 %vm1187_vm7, %v2848_v11  ;;  %v2368_v63 = vpop.f32.mrf.mxu0  ;;  %v2386_v50 = vpop.f32.mrf.mxu1 }
 0x2c9   : > { %v4115_v52 = vsel %vm4066_vm14, %v4104_v34, %v4114_v46  ;;  %v2269_v14 = vmax.f32 %v2267_v4, %v2268_v58  ;;  %10778 = vmatmul.msk.bf16.gmra.mxu0 %vm1187_vm7, %v2848_v11  ;;  %v2250_v2 = vmax.f32 %v2248_v54, %v2249_v17  ;;  %v2350_v40 = vpop.f32.mrf.mxu3 }
 0x2ca   : > { %3241 = vmatpush.bf16.msra.mxu1 %v14548_v51  ;;  %3205 = vmatpush.bf16.msrb.mxu3 %v14546_v49  ;;  %v2263_v26 = vrot.slane %v2262_v24, 2  ;;  %v2257_v9 = vmax.f32 %v2255_v18, %v2256_v42  ;;  %v15537_v57 = vadd.f32 %v2368_v63, %v2350_v40 }
 0x2cb   : > { %v2270_v28 = vrot.slane %v2269_v14, 2  ;;  %v2251_v21 = vrot.slane %v2250_v2, 1  ;;  %v2404_v4 = vpop.f32.mrf.mxu2 }
 0x2cc   : > { %v2264_v45 = vmax.f32 %v2262_v24, %v2263_v26  ;;  %v2258_v58 = vrot.slane %v2257_v9, 1  ;;  %v15539_v34 = vadd.f32 %v2404_v4, %v2386_v50 }
 0x2cd   : > { %v2271_v43 = vmax.f32 %v2269_v14, %v2270_v28  ;;  %v2252_v11 = vmax.f32 %v2250_v2, %v2251_v21  ;;  %v2929_v28 = vrot.slane %v16728_v30, 1 }
 0x2ce   : > { %3242 = vmatpush.bf16.msra.mxu1 %v16702_v44  ;;  %3206 = vmatpush.bf16.msrb.mxu3 %v16752_v56  ;;  %v2265_v54 = vrot.slane %v2264_v45, 1  ;;  %v2259_v23 = vmax.f32 %v2257_v9, %v2258_v58 }
 0x2cf   : > { %v2272_v22 = vrot.slane %v2271_v43, 1  ;;  %v2282_v46 = vpack.c.bf16 %v2252_v11, %v2252_v11  ;;  %v2928_v11 = vrot.slane %v16724_v41, 1 }
 0x2d0   : > { %v2266_v18 = vmax.f32 %v2264_v45, %v2265_v54  ;;  %v2283_v42 = vpack.c.bf16 %v2259_v23, %v2259_v23  ;;  %v2370_v63 = vpop.f32.mrf.mxu0  ;;  %v2388_v40 = vpop.f32.mrf.mxu1  ;;  %v2932_v45 = vrot.slane %v16729_v7, 1  ;;  %v2931_v23 = vrot.slane %v16725_v12, 1 }
 0x2d1   : > { %v2273_v17 = vmax.f32 %v2271_v43, %v2272_v22  ;;  %v4093_v26 = vperm.slane %v2282_v46, 0  ;;  %v2352_v50 = vpop.f32.mrf.mxu3  ;;  %v2930_v30 = vsel %vm490_vm2, %v2928_v11, %v2929_v28  ;;  %v16759_v11 = vld [vmem:[#allocation65_spill] sm:$0xff] }
 0x2d2   : > { %3243 = vmatpush.bf16.msra.mxu1 %v16634_v53  ;;  %3207 = vmatpush.bf16.msrb.mxu3 %v16633_v16  ;;  %v2284_v24 = vpack.c.bf16 %v2266_v18, %v2266_v18  ;;  %v4094_v2 = vperm.slane %v2283_v42, 0  ;;  %v2933_v7 = vsel %vm490_vm2, %v2931_v23, %v2932_v45  ;;  %v16755_v50 = vld [vmem:[#allocation59_spill] sm:$0xff] }
 0x2d3   : > { %v2285_v14 = vpack.c.bf16 %v2273_v17, %v2273_v17  ;;  %v2406_v9 = vpop.f32.mrf.mxu2  ;;  %v4105_v58 = vunpack.c.l.b16 %v4093_v26 }
 0x2d4   : > { %v4095_v21 = vperm.slane %v2284_v24, 0  ;;  %v4106_v43 = vunpack.c.l.b16 %v4094_v2  ;;  %v16754_v2 = vld [vmem:[#allocation42_spill] sm:$0xff] }
 0x2d5   : > { %v4096_v4 = vperm.slane %v2285_v14, 0  ;;  %2950 = vmatmul.bf16.vlgmr.msra.gmra.mxu3 %v2930_v30 }
 0x2d6   : > { %3244 = vmatpush.bf16.msra.mxu1 %v16636_v15  ;;  %3208 = vmatpush.bf16.msrb.mxu3 %v16635_v3  ;;  %v4107_v54 = vunpack.c.l.b16 %v4095_v21  ;;  %v4116_v18 = vsel %vm4054_vm8, %v4106_v43, %v4105_v58  ;;  %v16756_v21 = vld [vmem:[#allocation61_spill] sm:$0xff]  ;;  %v16758_v58 = vld [vmem:[#allocation44_spill] sm:$0xff] }
 0x2d7   : > { %v4108_v22 = vunpack.c.l.b16 %v4096_v4  ;;  %v16757_v4 = vld [vmem:[#allocation45_spill] sm:$0xff] }
 0x2d8   : > { %v4117_v46 = vsel %vm4056_vm9, %v4107_v54, %v4116_v18  ;;  %2986 = vmatmul.bf16.vlgmr.msrb.gmra.mxu1 %v2930_v30  ;;  %10783 = vmatmul.msk.bf16.vlgmr.msrb.gmra.mxu2 %vm1187_vm7, %v2933_v7  ;;  %v2444_v17 = vpop.f32.mrf.mxu0  ;;  %v2462_v42 = vpop.f32.mrf.mxu1  ;;  %v16760_v54 = vld [vmem:[#allocation67_spill] sm:$0xff] }
 0x2d9   : > { %v4118_v41 = vsel %vm4058_vm10, %v4108_v22, %v4117_v46  ;;  %10781 = vmatmul.msk.bf16.vlgmr.msrb.gmra.mxu0 %vm1187_vm7, %v2933_v7  ;;  %v2463_v24 = vadd.f32 %v2462_v42, %v15502_v5  ;;  %v2426_v26 = vpop.f32.mrf.mxu3  ;;  %3341 = vmatpush.bf16.msrb.mxu2 %v16709_v20  ;;  %v16761_v46 = vld [vmem:[#allocation51_spill] sm:$0xff]  ;;  %v16762_v7 = vld [vmem:[#allocation50_spill] sm:$0xff] }
 0x2da   : > { %3245 = vmatpush.bf16.msra.mxu1 %v16704_v37  ;;  %3209 = vmatpush.bf16.msrb.mxu3 %v16703_v36  ;;  %v15558_v12 = vpack.c.b16 %v4118_v41, %v4115_v52  ;;  %v2427_v63 = vadd.f32 %v2426_v26, %v15499_v33  ;;  %v16763_v41 = vld [vmem:[#allocation69_spill] sm:$0xff]  ;;  %v16765_v42 = vld [vmem:[#allocation54_spill] sm:$0xff]  ;;  %v16795_v20 = vld [vmem:[#allocation103_spill] sm:$0xff] }
 0x2db   : > { %3305 = vmatpush.bf16.msrb.mxu0 %v16708_v55  ;;  %v2480_v40 = vpop.f32.mrf.mxu2 }
 0x2dc   : > { %16753 = vst [vmem:[#allocation33_spill] sm:$0xff] %v15558_v12  ;;  %v15566_v14 = vadd.f32 %v2480_v40, %v2463_v24  ;;  %v15568_v52 = vadd.f32 %v2444_v17, %v2427_v63  ;;  %v16764_v17 = vld [vmem:[#allocation71_spill] sm:$0xff]  ;;  %v16766_v24 = vld [vmem:[#allocation52_spill] sm:$0xff]  ;;  %v16770_v12 = vld [vmem:[#allocation58_spill] sm:$0xff] }
 0x2dd   : > { %3342 = vmatpush.bf16.msrb.mxu2 %v16756_v21 }
 0x2de   : > { %3319 = vmatpush.bf16.msrb.mxu1 %v16706_v38  ;;  %3283 = vmatpush.bf16.msra.mxu3 %v16707_v29 }
 0x2df   : > { %3306 = vmatpush.bf16.msrb.mxu0 %v16755_v50 }
 0x2e0   : > { %v2446_v5 = vpop.f32.mrf.mxu0  ;;  %v2464_v9 = vpop.f32.mrf.mxu1 }
 0x2e1   : > { %v2465_v33 = vadd.f32 %v2464_v9, %v15530_v47  ;;  %v2428_v43 = vpop.f32.mrf.mxu3  ;;  %3343 = vmatpush.bf16.msrb.mxu2 %v16760_v54 }
 0x2e2   : > { %3320 = vmatpush.bf16.msrb.mxu1 %v16710_v19  ;;  %3284 = vmatpush.bf16.msra.mxu3 %v16754_v2  ;;  %v2429_v23 = vadd.f32 %v2428_v43, %v15525_v60 }
 0x2e3   : > { %3307 = vmatpush.bf16.msrb.mxu0 %v16759_v11  ;;  %v2482_v22 = vpop.f32.mrf.mxu2 }
 0x2e4   : > { %v15580_v18 = vadd.f32 %v2482_v22, %v2465_v33  ;;  %v15582_v30 = vadd.f32 %v2446_v5, %v2429_v23  ;;  %v16767_v33 = vld [vmem:[#allocation72_spill] sm:$0xff]  ;;  %v16768_v23 = vld [vmem:[#allocation73_spill] sm:$0xff] }
 0x2e5   : > { %3344 = vmatpush.bf16.msrb.mxu2 %v16764_v17  ;;  %2955 = vmatmul.bf16.gmra.mxu3 %v2929_v28  ;;  %v16769_v22 = vld [vmem:[#allocation60_spill] sm:$0xff]  ;;  %v16772_v17 = vld [vmem:[#allocation93_spill] sm:$0xff] }
 0x2e6   : > { %3321 = vmatpush.bf16.msrb.mxu1 %v16757_v4  ;;  %3285 = vmatpush.bf16.msra.mxu3 %v16758_v58  ;;  %v16775_v58 = vld [vmem:[#allocation70_spill] sm:$0xff] }
 0x2e7   : > { %3308 = vmatpush.bf16.msrb.mxu0 %v16763_v41 }
 0x2e8   : > { %2991 = vmatmul.bf16.gmra.mxu1 %v2929_v28  ;;  %10784 = vmatmul.msk.bf16.gmra.mxu2 %vm1187_vm7, %v2932_v45  ;;  %v2449_v60 = vpop.f32.mrf.mxu0  ;;  %v2467_v47 = vpop.f32.mrf.mxu1  ;;  %v3167_v28 = vshll.u32 %v16767_v33, 16 }
 0x2e9   : > { %10782 = vmatmul.msk.bf16.gmra.mxu0 %vm1187_vm7, %v2932_v45  ;;  %v2468_v26 = vadd.f32 %v2467_v47, %v15539_v34  ;;  %v2431_v63 = vpop.f32.mrf.mxu3  ;;  %v3179_v45 = vshll.u32 %v16768_v23, 16  ;;  %v3184_v34 = vshll.u32 %v16772_v17, 16 }
 0x2ea   : > { %3322 = vmatpush.bf16.msrb.mxu1 %v16761_v46  ;;  %3286 = vmatpush.bf16.msra.mxu3 %v16762_v7  ;;  %v2432_v40 = vadd.f32 %v2431_v63, %v15537_v57  ;;  %v3169_v47 = vrot.slane %v3167_v28, 1  ;;  %v16776_v28 = vld [vmem:[#allocation68_spill] sm:$0xff] }
 0x2eb   : > { %v2485_v5 = vpop.f32.mrf.mxu2  ;;  %v3181_v63 = vrot.slane %v3179_v45, 1 }
 0x2ec   : > { %v15594_v9 = vadd.f32 %v2485_v5, %v2468_v26  ;;  %v15597_v43 = vadd.f32 %v2449_v60, %v2432_v40  ;;  %v16773_v26 = vld [vmem:[#allocation66_spill] sm:$0xff]  ;;  %v16774_v5 = vld [vmem:[#allocation64_spill] sm:$0xff]  ;;  %v3165_v40 = vshrl.u32 %v16767_v33, 16 }
 0x2ee   : > { %3323 = vmatpush.bf16.msrb.mxu1 %v16765_v42  ;;  %3287 = vmatpush.bf16.msra.mxu3 %v16766_v24  ;;  %v16771_v42 = vld [vmem:[#allocation91_spill] sm:$0xff]  ;;  %v3170_v54 = vor.u32 %v3169_v47, %v3165_v40  ;;  %v16779_v47 = vld [vmem:[#allocation86_spill] sm:$0xff] }
 0x2ef   : > { %v3172_v24 = vshll.u32 %v16771_v42, 16 }
 0x2f0   : > { %v2451_v41 = vpop.f32.mrf.mxu0  ;;  %v2469_v57 = vpop.f32.mrf.mxu1 }
 0x2f1   : > { %v2433_v60 = vpop.f32.mrf.mxu3  ;;  %v3174_v7 = vrot.slane %v3172_v24, 1  ;;  %v16777_v57 = vld [vmem:[#allocation75_spill] sm:$0xff] }
 0x2f2   : > { %3324 = vmatpush.bf16.msrb.mxu1 %v16769_v22  ;;  %3288 = vmatpush.bf16.msra.mxu3 %v16770_v12  ;;  %v3177_v22 = vshrl.u32 %v16768_v23, 16  ;;  %v3186_v12 = vrot.slane %v3184_v34, 1  ;;  %v16778_v34 = vld [vmem:[#allocation74_spill] sm:$0xff] }
 0x2f3   : > { %v2487_v46 = vpop.f32.mrf.mxu2  ;;  %v3175_v41 = vsel %vm470_vm0, %v3170_v54, %v3174_v7 }
 0x2f4   : > { %v3182_v11 = vor.u32 %v3181_v63, %v3177_v22  ;;  %v16780_v63 = vld [vmem:[#allocation87_spill] sm:$0xff] }
 0x2f5   : > { %3210 = vmatmul.bf16.vlgmr.msrb.gmra.mxu3 %v3175_v41 }
 0x2f6   : > { %3325 = vmatpush.bf16.msrb.mxu1 %v16773_v26  ;;  %3289 = vmatpush.bf16.msra.mxu3 %v16774_v5  ;;  %v3187_v45 = vsel %vm470_vm0, %v3182_v11, %v3186_v12  ;;  %v16789_v26 = vld [vmem:[#allocation89_spill] sm:$0xff] }
 0x2f8   : > { %3246 = vmatmul.bf16.vlgmr.msra.gmra.mxu1 %v3175_v41  ;;  %10787 = vmatmul.msk.bf16.vlgmr.msra.gmra.mxu2 %vm1187_vm7, %v3187_v45  ;;  %v2530_v46 = vpop.f32.mrf.mxu0  ;;  %v2548_v24 = vpop.f32.mrf.mxu1  ;;  %v16781_v41 = vld [vmem:[#allocation79_spill] sm:$0xff] }
 0x2f9   : > { %10785 = vmatmul.msk.bf16.vlgmr.msra.gmra.mxu0 %vm1187_vm7, %v3187_v45  ;;  %v2512_v22 = vpop.f32.mrf.mxu3  ;;  %3427 = vmatpush.bf16.msra.mxu2 %v16780_v63 }
 0x2fa   : > { %3326 = vmatpush.bf16.msrb.mxu1 %v16775_v58  ;;  %3290 = vmatpush.bf16.msra.mxu3 %v16776_v28  ;;  %v2531_v54 = vadd.f32 %v2530_v46, %v2512_v22  ;;  %v16782_v28 = vld [vmem:[#allocation78_spill] sm:$0xff]  ;;  %v16783_v58 = vld [vmem:[#allocation96_spill] sm:$0xff] }
 0x2fb   : > { %3391 = vmatpush.bf16.msra.mxu0 %v16779_v47  ;;  %v2566_v60 = vpop.f32.mrf.mxu2 }
 0x2fc   : > { %v2567_v40 = vadd.f32 %v2566_v60, %v2548_v24  ;;  %v2575_v11 = vadd.f32 %v2531_v54, %v15568_v52  ;;  %v16785_v24 = vld [vmem:[#allocation83_spill] sm:$0xff]  ;;  %v16786_v52 = vld [vmem:[#allocation80_spill] sm:$0xff] }
 0x2fe   : > { %3405 = vmatpush.bf16.msra.mxu1 %v16777_v57  ;;  %3369 = vmatpush.bf16.msrb.mxu3 %v16778_v34  ;;  %v2576_v45 = vadd.f32 %v2567_v40, %v15566_v14  ;;  %v16784_v57 = vld [vmem:[#allocation97_spill] sm:$0xff]  ;;  %v2581_v34 = vadd.f32 %v2575_v11, %v15252_v13  ;;  %v3191_v11 = vshrl.u32 %v16772_v17, 16 }
 0x2ff   : > { %3392 = vmatpush.bf16.msra.mxu0 %v16783_v58  ;;  %3428 = vmatpush.bf16.msra.mxu2 %v16784_v57  ;;  %v16788_v14 = vld [vmem:[#allocation101_spill] sm:$0xff]  ;;  %v3188_v57 = vshrl.u32 %v16771_v42, 16 }
 0x300   : > { %v2582_v47 = vadd.f32 %v2576_v45, %v15254_v8  ;;  %v2587_v63 = vmax.f32 %v2581_v34, 0.0  ;;  %v2532_v46 = vpop.f32.mrf.mxu0  ;;  %v2550_v22 = vpop.f32.mrf.mxu1 }
 0x301   : > { %v2514_v60 = vpop.f32.mrf.mxu3  ;;  %v3190_v5 = vor.u32 %v3188_v57, %v3174_v7 }
 0x302   : > { %3406 = vmatpush.bf16.msra.mxu1 %v16781_v41  ;;  %3370 = vmatpush.bf16.msrb.mxu3 %v16782_v28  ;;  %v2588_v54 = vmax.f32 %v2582_v47, 0.0  ;;  %v16787_v28 = vld [vmem:[#allocation100_spill] sm:$0xff]  ;;  %v2533_v40 = vadd.f32 %v2532_v46, %v2514_v60  ;;  %v16790_v47 = vld [vmem:[#allocation85_spill] sm:$0xff] }
 0x303   : > { %3393 = vmatpush.bf16.msra.mxu0 %v16787_v28  ;;  %3429 = vmatpush.bf16.msra.mxu2 %v16788_v14  ;;  %v2568_v58 = vpop.f32.mrf.mxu2  ;;  %v16791_v60 = vld [vmem:[#allocation109_spill] sm:$0xff]  ;;  %v16792_v14 = vld [vmem:[#allocation111_spill] sm:$0xff] }
 0x304   : > { %v2593_v45 = vmax.f32 %v2587_v63, %v2588_v54  ;;  %v2569_v34 = vadd.f32 %v2568_v58, %v2550_v22  ;;  %v2577_v41 = vadd.f32 %v2533_v40, %v15582_v30 }
 0x305   : > { %3215 = vmatmul.bf16.gmra.mxu3 %v3190_v5 }
 0x306   : > { %3407 = vmatpush.bf16.msra.mxu1 %v16785_v24  ;;  %3371 = vmatpush.bf16.msrb.mxu3 %v16786_v52  ;;  %v3193_v24 = vor.u32 %v3191_v11, %v3186_v12  ;;  %v2599_v52 = vrot.slane %v2593_v45, 2  ;;  %v2600_v28 = vrot.slane %v2593_v45, 4  ;;  %v2601_v4 = vrot.slane %v2593_v45, 6 }
 0x307   : > { %v2617_v46 = vsel %vm771_vm1, %v2593_v45, -inf  ;;  %3394 = vmatpush.bf16.msra.mxu0 %v16791_v60  ;;  %3430 = vmatpush.bf16.msra.mxu2 %v16792_v14  ;;  %v2583_v58 = vadd.f32 %v2577_v41, %v15252_v13  ;;  %v2578_v30 = vadd.f32 %v2569_v34, %v15580_v18  ;;  %v16793_v45 = vld [vmem:[#allocation99_spill] sm:$0xff] }
 0x308   : > { %v2618_v21 = vrot.slane %v2617_v46, 4  ;;  %3251 = vmatmul.bf16.gmra.mxu1 %v3190_v5  ;;  %v2624_v12 = vsel %vm771_vm1, %v2599_v52, -inf  ;;  %v2631_v7 = vsel %vm771_vm1, %v2600_v28, -inf  ;;  %v2638_v57 = vsel %vm771_vm1, %v2601_v4, -inf  ;;  %10788 = vmatmul.msk.bf16.gmra.mxu2 %vm1187_vm7, %v3193_v24  ;;  %v2535_v11 = vpop.f32.mrf.mxu0  ;;  %v2553_v41 = vpop.f32.mrf.mxu1  ;;  %v16794_v18 = vld [vmem:[#allocation95_spill] sm:$0xff] }
 0x309   : > { %10786 = vmatmul.msk.bf16.gmra.mxu0 %vm1187_vm7, %v3193_v24  ;;  %v2625_v22 = vrot.slane %v2624_v12, 4  ;;  %v2632_v54 = vrot.slane %v2631_v7, 4  ;;  %v2639_v40 = vrot.slane %v2638_v57, 4  ;;  %v2589_v5 = vmax.f32 %v2583_v58, 0.0  ;;  %v2517_v28 = vpop.f32.mrf.mxu3 }
 0x30a   : > { %3408 = vmatpush.bf16.msra.mxu1 %v16789_v26  ;;  %3372 = vmatpush.bf16.msrb.mxu3 %v16790_v47  ;;  %v2619_v63 = vmax.f32 %v2617_v46, %v2618_v21  ;;  %v2584_v52 = vadd.f32 %v2578_v30, %v15254_v8  ;;  %v2536_v21 = vadd.f32 %v2535_v11, %v2517_v28 }
 0x30b   : > { %v2626_v4 = vmax.f32 %v2624_v12, %v2625_v22  ;;  %v2633_v60 = vmax.f32 %v2631_v7, %v2632_v54  ;;  %v2640_v14 = vmax.f32 %v2638_v57, %v2639_v40  ;;  %v2571_v47 = vpop.f32.mrf.mxu2 }
 0x30c   : > { %v2620_v34 = vrot.slane %v2619_v63, 2  ;;  %v2590_v24 = vmax.f32 %v2584_v52, 0.0  ;;  %v2572_v46 = vadd.f32 %v2571_v47, %v2553_v41  ;;  %v2579_v30 = vadd.f32 %v2536_v21, %v15597_v43  ;;  %v16798_v43 = vld [vmem:[#allocation108_spill] sm:$0xff] }
 0x30d   : > { %v2627_v50 = vrot.slane %v2626_v4, 2  ;;  %v2634_v2 = vrot.slane %v2633_v60, 2  ;;  %v2641_v19 = vrot.slane %v2640_v14, 2 }
 0x30e   : > { %3409 = vmatpush.bf16.msra.mxu1 %v16793_v45  ;;  %3373 = vmatpush.bf16.msrb.mxu3 %v16794_v18  ;;  %v2621_v26 = vmax.f32 %v2619_v63, %v2620_v34  ;;  %v16796_v45 = vld [vmem:[#allocation102_spill] sm:$0xff]  ;;  %v2594_v58 = vmax.f32 %v2589_v5, %v2590_v24  ;;  %v15652_v18 = vadd.f32 %v2572_v46, %v15594_v9 }
 0x30f   : > { %v2628_v7 = vmax.f32 %v2626_v4, %v2627_v50  ;;  %v2635_v57 = vmax.f32 %v2633_v60, %v2634_v2  ;;  %v2642_v22 = vmax.f32 %v2640_v14, %v2641_v19  ;;  %v16797_v24 = vld [vmem:[#allocation110_spill] sm:$0xff] }
 0x310   : > { %v2622_v12 = vrot.slane %v2621_v26, 1  ;;  %v2602_v54 = vrot.slane %v2594_v58, 2  ;;  %v2603_v47 = vrot.slane %v2594_v58, 4  ;;  %v2604_v63 = vrot.slane %v2594_v58, 6  ;;  %v2537_v34 = vpop.f32.mrf.mxu0  ;;  %v2555_v5 = vpop.f32.mrf.mxu1 }
 0x311   : > { %v2645_v40 = vsel %vm771_vm1, %v2594_v58, -inf  ;;  %v2629_v41 = vrot.slane %v2628_v7, 1  ;;  %v2636_v52 = vrot.slane %v2635_v57, 1  ;;  %v2643_v28 = vrot.slane %v2642_v22, 1  ;;  %v2519_v14 = vpop.f32.mrf.mxu3 }
 0x312   : > { %3410 = vmatpush.bf16.msra.mxu1 %v16795_v20  ;;  %3374 = vmatpush.bf16.msrb.mxu3 %v16796_v45  ;;  %v2623_v11 = vmax.f32 %v2621_v26, %v2622_v12  ;;  %v2646_v9 = vrot.slane %v2645_v40, 4  ;;  %v2652_v50 = vsel %vm771_vm1, %v2602_v54, -inf  ;;  %v2659_v19 = vsel %vm771_vm1, %v2603_v47, -inf }
 0x313   : > { %v2666_v2 = vsel %vm771_vm1, %v2604_v63, -inf  ;;  %v2630_v60 = vmax.f32 %v2628_v7, %v2629_v41  ;;  %v2637_v4 = vmax.f32 %v2635_v57, %v2636_v52  ;;  %v2644_v26 = vmax.f32 %v2642_v22, %v2643_v28  ;;  %v2573_v46 = vpop.f32.mrf.mxu2 }
 0x314   : > { %v2701_v21 = vpack.c.bf16 %v2623_v11, %v2623_v11  ;;  %v2647_v58 = vmax.f32 %v2645_v40, %v2646_v9  ;;  %v2653_v12 = vrot.slane %v2652_v50, 4  ;;  %v2660_v34 = vrot.slane %v2659_v19, 4 }
 0x315   : > { %v2667_v5 = vrot.slane %v2666_v2, 4  ;;  %v2703_v45 = vpack.c.bf16 %v2637_v4, %v2637_v4  ;;  %3291 = vmatmul.bf16.vlgmr.msra.gmra.mxu3 %v16767_v33 }
 0x316   : > { %3411 = vmatpush.bf16.msra.mxu1 %v16797_v24  ;;  %3375 = vmatpush.bf16.msrb.mxu3 %v16798_v43  ;;  %v2702_v24 = vpack.c.bf16 %v2630_v60, %v2630_v60  ;;  %v2704_v43 = vpack.c.bf16 %v2644_v26, %v2644_v26  ;;  %v4133_v20 = vperm.slane %v2701_v21, 0  ;;  %v2648_v54 = vrot.slane %v2647_v58, 2 }
 0x317   : > { %v2654_v47 = vmax.f32 %v2652_v50, %v2653_v12  ;;  %v2661_v63 = vmax.f32 %v2659_v19, %v2660_v34  ;;  %v2668_v7 = vmax.f32 %v2666_v2, %v2667_v5  ;;  %v4135_v22 = vperm.slane %v2703_v45, 0 }
 0x318   : > { %v4134_v57 = vperm.slane %v2702_v24, 0  ;;  %v4136_v11 = vperm.slane %v2704_v43, 0  ;;  %3327 = vmatmul.bf16.vlgmr.msrb.gmra.mxu1 %v16767_v33  ;;  %v2649_v40 = vmax.f32 %v2647_v58, %v2648_v54  ;;  %10791 = vmatmul.msk.bf16.vlgmr.msrb.gmra.mxu2 %vm1187_vm7, %v16768_v23  ;;  %v4145_v9 = vunpack.c.l.b16 %v4133_v20  ;;  %v2802_v24 = vpop.f32.mrf.mxu0  ;;  %v2820_v43 = vpop.f32.mrf.mxu1 }
 0x319   : > { %v2655_v41 = vrot.slane %v2654_v47, 2  ;;  %v2662_v52 = vrot.slane %v2661_v63, 2  ;;  %v2669_v28 = vrot.slane %v2668_v7, 2  ;;  %10789 = vmatmul.msk.bf16.vlgmr.msrb.gmra.mxu0 %vm1187_vm7, %v16768_v23  ;;  %v4147_v19 = vunpack.c.l.b16 %v4135_v22  ;;  %v2784_v26 = vpop.f32.mrf.mxu3  ;;  %3699 = vmatpush.bf16.msrb.mxu2 %v14561_v1  ;;  %v16799_v22 = vld [vmem:[#allocation84_spill] sm:$0xff] }
 0x31a   : > { %3412 = vmatpush.bf16.msra.mxu1 %v15031_v27  ;;  %3376 = vmatpush.bf16.msrb.mxu3 %v16694_v35  ;;  %v4146_v50 = vunpack.c.l.b16 %v4134_v57  ;;  %v2585_v45 = vadd.f32 %v2579_v30, %v15252_v13  ;;  %v2650_v2 = vrot.slane %v2649_v40, 1  ;;  %v2586_v30 = vadd.f32 %v15652_v18, %v15254_v8 }
 0x31b   : > { %v2656_v14 = vmax.f32 %v2654_v47, %v2655_v41  ;;  %v2663_v60 = vmax.f32 %v2661_v63, %v2662_v52  ;;  %v2670_v4 = vmax.f32 %v2668_v7, %v2669_v28  ;;  %3663 = vmatpush.bf16.msrb.mxu0 %v14554_v59  ;;  %v15676_v46 = vadd.f32 %v2802_v24, %v2784_v26  ;;  %v16800_v41 = vld [vmem:[#allocation88_spill] sm:$0xff]  ;;  %v16802_v26 = vld [vmem:[#allocation37_spill] sm:$0xff] }
 0x31c   : > { %v4157_v20 = vsel %vm4054_vm8, %v4146_v50, %v4145_v9  ;;  %v2591_v21 = vmax.f32 %v2585_v45, 0.0  ;;  %v2651_v58 = vmax.f32 %v2649_v40, %v2650_v2  ;;  %v2592_v54 = vmax.f32 %v2586_v30, 0.0 }
 0x31d   : > { %v2664_v12 = vrot.slane %v2663_v60, 1  ;;  %v4158_v34 = vsel %vm4056_vm9, %v4147_v19, %v4157_v20  ;;  %v2671_v5 = vrot.slane %v2670_v4, 1  ;;  %v4148_v59 = vunpack.c.l.b16 %v4136_v11  ;;  %3700 = vmatpush.bf16.msrb.mxu2 %v16699_v32  ;;  %v16801_v32 = vld [vmem:[#allocation27_spill] sm:$0xff] }
 0x31e   : > { %3677 = vmatpush.bf16.msrb.mxu1 %v16695_v62  ;;  %3641 = vmatpush.bf16.msra.mxu3 %v14528_v31  ;;  %v2838_v62 = vpop.f32.mrf.mxu2  ;;  %v2657_v31 = vrot.slane %v2656_v14, 1  ;;  %v2705_v18 = vpack.c.bf16 %v2651_v58, %v2651_v58  ;;  %v2595_v57 = vmax.f32 %v2591_v21, %v2592_v54  ;;  %v3274_v40 = vpack.c.b16 %v16799_v22, %v16799_v22 }
 0x31f   : > { %v15679_v47 = vadd.f32 %v2838_v62, %v2820_v43  ;;  %v2665_v63 = vmax.f32 %v2663_v60, %v2664_v12  ;;  %3664 = vmatpush.bf16.msrb.mxu0 %v16698_v6  ;;  %v2672_v7 = vmax.f32 %v2670_v4, %v2671_v5  ;;  %v3275_v52 = vpack.c.b16 %v16800_v41, %v16800_v41 }
 0x320   : > { %v2658_v1 = vmax.f32 %v2656_v14, %v2657_v31  ;;  %v4137_v11 = vperm.slane %v2705_v18, 0  ;;  %v2605_v50 = vrot.slane %v2595_v57, 2  ;;  %v2606_v19 = vrot.slane %v2595_v57, 4  ;;  %v2804_v6 = vpop.f32.mrf.mxu0  ;;  %v2822_v24 = vpop.f32.mrf.mxu1 }
 0x321   : > { %v2708_v9 = vpack.c.bf16 %v2672_v7, %v2672_v7  ;;  %v2607_v45 = vrot.slane %v2595_v57, 6  ;;  %v2673_v60 = vsel %vm771_vm1, %v2595_v57, -inf  ;;  %v2786_v4 = vpop.f32.mrf.mxu3  ;;  %3701 = vmatpush.bf16.msrb.mxu2 %v16802_v26 }
 0x322   : > { %3678 = vmatpush.bf16.msrb.mxu1 %v16697_v0  ;;  %3642 = vmatpush.bf16.msra.mxu3 %v16696_v39  ;;  %v4159_v0 = vsel %vm4058_vm10, %v4148_v59, %v4158_v34  ;;  %v2706_v28 = vpack.c.bf16 %v2658_v1, %v2658_v1  ;;  %v2707_v39 = vpack.c.bf16 %v2665_v63, %v2665_v63  ;;  %v4149_v14 = vunpack.c.l.b16 %v4137_v11 }
 0x323   : > { %3665 = vmatpush.bf16.msrb.mxu0 %v14586_v25  ;;  %v4140_v20 = vperm.slane %v2708_v9, 0  ;;  %v2674_v21 = vrot.slane %v2673_v60, 4  ;;  %v2680_v30 = vsel %vm771_vm1, %v2605_v50, -inf  ;;  %v2687_v62 = vsel %vm771_vm1, %v2606_v19, -inf }
 0x324   : > { %v4138_v43 = vperm.slane %v2706_v28, 0  ;;  %v4139_v2 = vperm.slane %v2707_v39, 0  ;;  %v4160_v12 = vsel %vm4060_vm11, %v4149_v14, %v4159_v0  ;;  %v2681_v34 = vrot.slane %v2680_v30, 4 }
 0x325   : > { %v4152_v5 = vunpack.c.l.b16 %v4140_v20  ;;  %v2675_v54 = vmax.f32 %v2673_v60, %v2674_v21  ;;  %v2688_v59 = vrot.slane %v2687_v62, 4  ;;  %v2694_v1 = vsel %vm771_vm1, %v2607_v45, -inf  ;;  %3702 = vmatpush.bf16.msrb.mxu2 %v14613_v61  ;;  %3296 = vmatmul.bf16.gmra.mxu3 %v3274_v40 }
 0x326   : > { %3679 = vmatpush.bf16.msrb.mxu1 %v16749_v10  ;;  %3643 = vmatpush.bf16.msra.mxu3 %v16801_v32  ;;  %v2840_v58 = vpop.f32.mrf.mxu2  ;;  %v4150_v10 = vunpack.c.l.b16 %v4138_v43  ;;  %v4151_v31 = vunpack.c.l.b16 %v4139_v2  ;;  %v2682_v63 = vmax.f32 %v2680_v30, %v2681_v34  ;;  %v2695_v18 = vrot.slane %v2694_v1, 4 }
 0x327   : > { %v15702_v7 = vadd.f32 %v2804_v6, %v2786_v4  ;;  %3666 = vmatpush.bf16.msrb.mxu0 %v14606_v48  ;;  %v2676_v22 = vrot.slane %v2675_v54, 2  ;;  %v2689_v41 = vmax.f32 %v2687_v62, %v2688_v59  ;;  %v15707_v0 = vadd.f32 %v2840_v58, %v2822_v24 }
 0x328   : > { %v4161_v25 = vsel %vm4062_vm12, %v4150_v10, %v4160_v12  ;;  %3332 = vmatmul.bf16.gmra.mxu1 %v3274_v40  ;;  %v2696_v28 = vmax.f32 %v2694_v1, %v2695_v18  ;;  %10792 = vmatmul.msk.bf16.gmra.mxu2 %vm1187_vm7, %v3275_v52  ;;  %v2807_v11 = vpop.f32.mrf.mxu0  ;;  %v2825_v61 = vpop.f32.mrf.mxu1  ;;  %v3358_v18 = vrot.slane %v16768_v23, 1 }
 0x329   : > { %v4162_v57 = vsel %vm4064_vm13, %v4151_v31, %v4161_v25  ;;  %10790 = vmatmul.msk.bf16.gmra.mxu0 %vm1187_vm7, %v3275_v52  ;;  %v2677_v39 = vmax.f32 %v2675_v54, %v2676_v22  ;;  %v2690_v48 = vrot.slane %v2689_v41, 2  ;;  %v2789_v19 = vpop.f32.mrf.mxu3  ;;  %v3355_v25 = vrot.slane %v16767_v33, 1 }
 0x32a   : > { %3680 = vmatpush.bf16.msrb.mxu1 %v14548_v51  ;;  %3644 = vmatpush.bf16.msra.mxu3 %v14546_v49  ;;  %v4163_v49 = vsel %vm4066_vm14, %v4152_v5, %v4162_v57  ;;  %v2683_v51 = vrot.slane %v2682_v63, 2  ;;  %v2697_v50 = vrot.slane %v2696_v28, 2  ;;  %v15714_v6 = vadd.f32 %v2807_v11, %v2789_v19  ;;  %v16804_v11 = vld [vmem:[#allocation43_spill] sm:$0xff] }
 0x32b   : > { %v2678_v40 = vrot.slane %v2677_v39, 1  ;;  %v2691_v45 = vmax.f32 %v2689_v41, %v2690_v48  ;;  %v3359_v5 = vrot.slane %v16772_v17, 1 }
 0x32c   : > { %v2684_v9 = vmax.f32 %v2682_v63, %v2683_v51  ;;  %v2698_v43 = vmax.f32 %v2696_v28, %v2697_v50  ;;  %v16803_v51 = vld [vmem:[#allocation57_spill] sm:$0xff]  ;;  %v16809_v50 = vld [vmem:[#allocation44_spill] sm:$0xff] }
 0x32d   : > { %v2679_v52 = vmax.f32 %v2677_v39, %v2678_v40  ;;  %v2692_v14 = vrot.slane %v2691_v45, 1  ;;  %v3360_v17 = vsel %vm490_vm2, %v3358_v18, %v3359_v5  ;;  %v16810_v40 = vld [vmem:[#allocation65_spill] sm:$0xff] }
 0x32e   : > { %3681 = vmatpush.bf16.msrb.mxu1 %v16702_v44  ;;  %3645 = vmatpush.bf16.msra.mxu3 %v16752_v56  ;;  %v2843_v24 = vpop.f32.mrf.mxu2  ;;  %v2685_v32 = vrot.slane %v2684_v9, 1  ;;  %v2699_v56 = vrot.slane %v2698_v43, 1 }
 0x32f   : > { %v15716_v2 = vadd.f32 %v2843_v24, %v2825_v61  ;;  %v2693_v60 = vmax.f32 %v2691_v45, %v2692_v14  ;;  %v2709_v4 = vpack.c.bf16 %v2679_v52, %v2679_v52  ;;  %v16805_v61 = vld [vmem:[#allocation42_spill] sm:$0xff]  ;;  %v16811_v45 = vld [vmem:[#allocation67_spill] sm:$0xff] }
 0x330   : > { %v2686_v44 = vmax.f32 %v2684_v9, %v2685_v32  ;;  %v2700_v26 = vmax.f32 %v2698_v43, %v2699_v56  ;;  %v2809_v62 = vpop.f32.mrf.mxu0  ;;  %v2827_v58 = vpop.f32.mrf.mxu1  ;;  %v16812_v14 = vld [vmem:[#allocation51_spill] sm:$0xff]  ;;  %v16814_v56 = vld [vmem:[#allocation69_spill] sm:$0xff] }
 0x331   : > { %v2711_v21 = vpack.c.bf16 %v2693_v60, %v2693_v60  ;;  %v4141_v30 = vperm.slane %v2709_v4, 0  ;;  %v2791_v12 = vpop.f32.mrf.mxu3  ;;  %v16815_v60 = vld [vmem:[#allocation71_spill] sm:$0xff]  ;;  %v16816_v4 = vld [vmem:[#allocation54_spill] sm:$0xff] }
 0x332   : > { %3682 = vmatpush.bf16.msrb.mxu1 %v16634_v53  ;;  %3646 = vmatpush.bf16.msra.mxu3 %v16633_v16  ;;  %v2710_v20 = vpack.c.bf16 %v2686_v44, %v2686_v44  ;;  %v2712_v10 = vpack.c.bf16 %v2700_v26, %v2700_v26  ;;  %v3356_v53 = vrot.slane %v16771_v42, 1  ;;  %v16813_v44 = vld [vmem:[#allocation50_spill] sm:$0xff]  ;;  %v16817_v26 = vld [vmem:[#allocation52_spill] sm:$0xff] }
 0x333   : > { %v4143_v16 = vperm.slane %v2711_v21, 0  ;;  %v4153_v59 = vunpack.c.l.b16 %v4141_v30 }
 0x334   : > { %v4142_v31 = vperm.slane %v2710_v20, 0  ;;  %v4144_v54 = vperm.slane %v2712_v10, 0  ;;  %v3357_v42 = vsel %vm490_vm2, %v3355_v25, %v3356_v53  ;;  %v16818_v10 = vld [vmem:[#allocation81_spill] sm:$0xff] }
 0x335   : > { %v4155_v63 = vunpack.c.l.b16 %v4143_v16  ;;  %3377 = vmatmul.bf16.vlgmr.msrb.gmra.mxu3 %v3357_v42 }
 0x336   : > { %3683 = vmatpush.bf16.msrb.mxu1 %v16636_v15  ;;  %3647 = vmatpush.bf16.msra.mxu3 %v16635_v3  ;;  %v2845_v34 = vpop.f32.mrf.mxu2  ;;  %v4154_v1 = vunpack.c.l.b16 %v4142_v31  ;;  %v4156_v3 = vunpack.c.l.b16 %v4144_v54  ;;  %v3606_v31 = vshll.u32 %v16818_v10, 16  ;;  %v16822_v54 = vld [vmem:[#allocation106_spill] sm:$0xff] }
 0x337   : > { %v16820_v34 = vld [vmem:[#allocation60_spill] sm:$0xff] }
 0x338   : > { %v4164_v15 = vsel %vm4054_vm8, %v4154_v1, %v4153_v59  ;;  %3413 = vmatmul.bf16.vlgmr.msra.gmra.mxu1 %v3357_v42  ;;  %10795 = vmatmul.msk.bf16.vlgmr.msra.gmra.mxu2 %vm1187_vm7, %v3360_v17  ;;  %v2901_v23 = vpop.f32.mrf.mxu1  ;;  %v3611_v59 = vshll.u32 %v16822_v54, 16  ;;  %v16823_v1 = vld [vmem:[#allocation107_spill] sm:$0xff]  ;;  %v3608_v25 = vrot.slane %v3606_v31, 1 }
 0x339   : > { %v4165_v57 = vsel %vm4056_vm9, %v4155_v63, %v4164_v15  ;;  %10793 = vmatmul.msk.bf16.vlgmr.msra.gmra.mxu0 %vm1187_vm7, %v3360_v17  ;;  %v2902_v22 = vadd.f32 %v2901_v23, %v15679_v47  ;;  %v2865_v41 = vpop.f32.mrf.mxu3  ;;  %3780 = vmatpush.bf16.msra.mxu2 %v16803_v51  ;;  %v16825_v15 = vld [vmem:[#allocation64_spill] sm:$0xff]  ;;  %v16826_v51 = vld [vmem:[#allocation70_spill] sm:$0xff] }
 0x33a   : > { %3684 = vmatpush.bf16.msrb.mxu1 %v16704_v37  ;;  %3648 = vmatpush.bf16.msra.mxu3 %v16703_v36  ;;  %v4166_v33 = vsel %vm4058_vm10, %v4156_v3, %v4165_v57  ;;  %v2883_v36 = vpop.f32.mrf.mxu0  ;;  %v2866_v28 = vadd.f32 %v2865_v41, %v15676_v46  ;;  %v16824_v3 = vld [vmem:[#allocation66_spill] sm:$0xff]  ;;  %v3604_v57 = vshrl.u32 %v16818_v10, 16  ;;  %v3613_v17 = vrot.slane %v3611_v59, 1 }
 0x33b   : > { %v15735_v37 = vpack.c.b16 %v4166_v33, %v4163_v49  ;;  %3744 = vmatpush.bf16.msra.mxu0 %v16708_v55  ;;  %v16808_v55 = vld [vmem:[#allocation45_spill] sm:$0xff] }
 0x33c   : > { %v15745_v49 = vadd.f32 %v2883_v36, %v2866_v28  ;;  %v16827_v28 = vld [vmem:[#allocation68_spill] sm:$0xff] }
 0x33e   : > { %3758 = vmatpush.bf16.msra.mxu1 %v16706_v38  ;;  %3722 = vmatpush.bf16.msrb.mxu3 %v16707_v29  ;;  %v2919_v39 = vpop.f32.mrf.mxu2  ;;  %v16806_v38 = vld [vmem:[#allocation59_spill] sm:$0xff]  ;;  %v16807_v29 = vld [vmem:[#allocation61_spill] sm:$0xff] }
 0x33f   : > { %v15743_v48 = vadd.f32 %v2919_v39, %v2902_v22  ;;  %3745 = vmatpush.bf16.msra.mxu0 %v16806_v38  ;;  %3781 = vmatpush.bf16.msra.mxu2 %v16807_v29  ;;  %v3609_v22 = vor.u32 %v3608_v25, %v3604_v57  ;;  %v16828_v29 = vld [vmem:[#allocation75_spill] sm:$0xff] }
 0x340   : > { %v2903_v9 = vpop.f32.mrf.mxu1 }
 0x341   : > { %v2904_v46 = vadd.f32 %v2903_v9, %v15707_v0  ;;  %v2867_v19 = vpop.f32.mrf.mxu3  ;;  %v3614_v39 = vsel %vm470_vm0, %v3609_v22, %v3613_v17  ;;  %v16843_v22 = vld [vmem:[#allocation109_spill] sm:$0xff] }
 0x342   : > { %3759 = vmatpush.bf16.msra.mxu1 %v16804_v11  ;;  %3723 = vmatpush.bf16.msrb.mxu3 %v16805_v61  ;;  %v2885_v47 = vpop.f32.mrf.mxu0  ;;  %v2868_v24 = vadd.f32 %v2867_v19, %v15702_v7 }
 0x343   : > { %3746 = vmatpush.bf16.msra.mxu0 %v16810_v40  ;;  %3782 = vmatpush.bf16.msra.mxu2 %v16811_v45 }
 0x344   : > { %v15759_v52 = vadd.f32 %v2885_v47, %v2868_v24  ;;  %v16829_v47 = vld [vmem:[#allocation74_spill] sm:$0xff]  ;;  %v16832_v24 = vld [vmem:[#allocation79_spill] sm:$0xff] }
 0x345   : > { %3382 = vmatmul.bf16.gmra.mxu3 %v3356_v53 }
 0x346   : > { %3760 = vmatpush.bf16.msra.mxu1 %v16808_v55  ;;  %3724 = vmatpush.bf16.msrb.mxu3 %v16809_v50  ;;  %v2921_v32 = vpop.f32.mrf.mxu2  ;;  %v16830_v55 = vld [vmem:[#allocation87_spill] sm:$0xff]  ;;  %v16831_v50 = vld [vmem:[#allocation86_spill] sm:$0xff] }
 0x347   : > { %v15757_v43 = vadd.f32 %v2921_v32, %v2904_v46  ;;  %3747 = vmatpush.bf16.msra.mxu0 %v16814_v56  ;;  %3783 = vmatpush.bf16.msra.mxu2 %v16815_v60  ;;  %v16833_v32 = vld [vmem:[#allocation78_spill] sm:$0xff]  ;;  %v16835_v56 = vld [vmem:[#allocation96_spill] sm:$0xff] }
 0x348   : > { %3418 = vmatmul.bf16.gmra.mxu1 %v3356_v53  ;;  %10796 = vmatmul.msk.bf16.gmra.mxu2 %vm1187_vm7, %v3359_v5  ;;  %v2906_v0 = vpop.f32.mrf.mxu1  ;;  %v16819_v53 = vld [vmem:[#allocation82_spill] sm:$0xff] }
 0x349   : > { %10794 = vmatmul.msk.bf16.gmra.mxu0 %vm1187_vm7, %v3359_v5  ;;  %v2907_v20 = vadd.f32 %v2906_v0, %v15716_v2  ;;  %v2870_v21 = vpop.f32.mrf.mxu3  ;;  %v3618_v16 = vshll.u32 %v16819_v53, 16  ;;  %v16821_v5 = vld [vmem:[#allocation58_spill] sm:$0xff]  ;;  %v3623_v2 = vshll.u32 %v16823_v1, 16  ;;  %v3616_v36 = vshrl.u32 %v16819_v53, 16 }
 0x34a   : > { %3761 = vmatpush.bf16.msra.mxu1 %v16812_v14  ;;  %3725 = vmatpush.bf16.msrb.mxu3 %v16813_v44  ;;  %v2888_v7 = vpop.f32.mrf.mxu0  ;;  %v2871_v30 = vadd.f32 %v2870_v21, %v15714_v6  ;;  %v16834_v44 = vld [vmem:[#allocation97_spill] sm:$0xff] }
 0x34b   : > { %v3620_v18 = vrot.slane %v3618_v16, 1  ;;  %v3625_v23 = vrot.slane %v3623_v2, 1 }
 0x34c   : > { %v15774_v12 = vadd.f32 %v2888_v7, %v2871_v30 }
 0x34d   : > { %v3621_v41 = vor.u32 %v3620_v18, %v3616_v36  ;;  %v16840_v18 = vld [vmem:[#allocation89_spill] sm:$0xff]  ;;  %v16842_v36 = vld [vmem:[#allocation111_spill] sm:$0xff] }
 0x34e   : > { %3762 = vmatpush.bf16.msra.mxu1 %v16816_v4  ;;  %3726 = vmatpush.bf16.msrb.mxu3 %v16817_v26  ;;  %v2924_v62 = vpop.f32.mrf.mxu2 }
 0x34f   : > { %v15771_v58 = vadd.f32 %v2924_v62, %v2907_v20  ;;  %v3626_v11 = vsel %vm470_vm0, %v3621_v41, %v3625_v23  ;;  %v16836_v20 = vld [vmem:[#allocation83_spill] sm:$0xff]  ;;  %v16838_v62 = vld [vmem:[#allocation101_spill] sm:$0xff] }
 0x350   : > { %v2908_v6 = vpop.f32.mrf.mxu1 }
 0x351   : > { %v2872_v42 = vpop.f32.mrf.mxu3 }
 0x352   : > { %3763 = vmatpush.bf16.msra.mxu1 %v16820_v34  ;;  %3727 = vmatpush.bf16.msrb.mxu3 %v16821_v5  ;;  %v2890_v63 = vpop.f32.mrf.mxu0  ;;  %v3627_v34 = vshrl.u32 %v16822_v54, 16  ;;  %v3630_v5 = vshrl.u32 %v16823_v1, 16 }
 0x354   : > { %v3629_v63 = vor.u32 %v3627_v34, %v3613_v17  ;;  %v3632_v6 = vor.u32 %v3630_v5, %v3625_v23 }
 0x355   : > { %3649 = vmatmul.bf16.vlgmr.msra.gmra.mxu3 %v3614_v39 }
 0x356   : > { %3764 = vmatpush.bf16.msra.mxu1 %v16824_v3  ;;  %3728 = vmatpush.bf16.msrb.mxu3 %v16825_v15  ;;  %v2926_v33 = vpop.f32.mrf.mxu2  ;;  %v16841_v3 = vld [vmem:[#allocation85_spill] sm:$0xff] }
 0x358   : > { %3685 = vmatmul.bf16.vlgmr.msrb.gmra.mxu1 %v3614_v39  ;;  %10799 = vmatmul.msk.bf16.vlgmr.msrb.gmra.mxu2 %vm1187_vm7, %v3626_v11  ;;  %v2987_v38 = vpop.f32.mrf.mxu1 }
 0x359   : > { %10797 = vmatmul.msk.bf16.vlgmr.msrb.gmra.mxu0 %vm1187_vm7, %v3626_v11  ;;  %v2951_v9 = vpop.f32.mrf.mxu3  ;;  %3866 = vmatpush.bf16.msrb.mxu2 %v16830_v55 }
 0x35a   : > { %3765 = vmatpush.bf16.msra.mxu1 %v16826_v51  ;;  %3729 = vmatpush.bf16.msrb.mxu3 %v16827_v28  ;;  %v2969_v61 = vpop.f32.mrf.mxu0 }
 0x35b   : > { %3830 = vmatpush.bf16.msrb.mxu0 %v16831_v50  ;;  %v2970_v46 = vadd.f32 %v2969_v61, %v2951_v9  ;;  %v16844_v9 = vld [vmem:[#allocation99_spill] sm:$0xff] }
 0x35d   : > { %v3014_v45 = vadd.f32 %v2970_v46, %v15745_v49  ;;  %3867 = vmatpush.bf16.msrb.mxu2 %v16834_v44  ;;  %v16837_v49 = vld [vmem:[#allocation80_spill] sm:$0xff] }
 0x35e   : > { %3844 = vmatpush.bf16.msrb.mxu1 %v16828_v29  ;;  %3808 = vmatpush.bf16.msra.mxu3 %v16829_v47  ;;  %v3005_v19 = vpop.f32.mrf.mxu2 }
 0x35f   : > { %v3006_v40 = vadd.f32 %v3005_v19, %v2987_v38  ;;  %3831 = vmatpush.bf16.msrb.mxu0 %v16835_v56  ;;  %v3020_v60 = vadd.f32 %v3014_v45, %v15252_v13 }
 0x360   : > { %v2989_v26 = vpop.f32.mrf.mxu1 }
 0x361   : > { %v3015_v14 = vadd.f32 %v3006_v40, %v15743_v48  ;;  %v3026_v0 = vmax.f32 %v3020_v60, 0.0  ;;  %v2953_v30 = vpop.f32.mrf.mxu3  ;;  %3868 = vmatpush.bf16.msrb.mxu2 %v16838_v62  ;;  %v16839_v48 = vld [vmem:[#allocation100_spill] sm:$0xff] }
 0x362   : > { %3845 = vmatpush.bf16.msrb.mxu1 %v16832_v24  ;;  %3809 = vmatpush.bf16.msra.mxu3 %v16833_v32  ;;  %v2971_v4 = vpop.f32.mrf.mxu0 }
 0x363   : > { %v3021_v7 = vadd.f32 %v3015_v14, %v15254_v8  ;;  %3832 = vmatpush.bf16.msrb.mxu0 %v16839_v48  ;;  %v2972_v31 = vadd.f32 %v2971_v4, %v2953_v30  ;;  %v16846_v4 = vld [vmem:[#allocation103_spill] sm:$0xff] }
 0x365   : > { %v3027_v21 = vmax.f32 %v3021_v7, 0.0  ;;  %v3016_v25 = vadd.f32 %v2972_v31, %v15759_v52  ;;  %3869 = vmatpush.bf16.msrb.mxu2 %v16842_v36  ;;  %3654 = vmatmul.bf16.gmra.mxu3 %v3629_v63 }
 0x366   : > { %3846 = vmatpush.bf16.msrb.mxu1 %v16836_v20  ;;  %3810 = vmatpush.bf16.msra.mxu3 %v16837_v49  ;;  %v3007_v16 = vpop.f32.mrf.mxu2 }
 0x367   : > { %v3032_v59 = vmax.f32 %v3026_v0, %v3027_v21  ;;  %v3008_v2 = vadd.f32 %v3007_v16, %v2989_v26  ;;  %3833 = vmatpush.bf16.msrb.mxu0 %v16843_v22  ;;  %v3022_v51 = vadd.f32 %v3016_v25, %v15252_v13  ;;  %v16847_v26 = vld [vmem:[#allocation102_spill] sm:$0xff] }
 0x368   : > { %3690 = vmatmul.bf16.gmra.mxu1 %v3629_v63  ;;  %10800 = vmatmul.msk.bf16.gmra.mxu2 %vm1187_vm7, %v3632_v6  ;;  %v2992_v47 = vpop.f32.mrf.mxu1 }
 0x369   : > { %v3038_v15 = vrot.slane %v3032_v59, 2  ;;  %v3039_v42 = vrot.slane %v3032_v59, 4  ;;  %v3040_v57 = vrot.slane %v3032_v59, 6  ;;  %v3056_v33 = vsel %vm771_vm1, %v3032_v59, -inf  ;;  %10798 = vmatmul.msk.bf16.gmra.mxu0 %vm1187_vm7, %v3632_v6  ;;  %v2956_v46 = vpop.f32.mrf.mxu3 }
 0x36a   : > { %3847 = vmatpush.bf16.msrb.mxu1 %v16840_v18  ;;  %3811 = vmatpush.bf16.msra.mxu3 %v16841_v3  ;;  %v3057_v41 = vrot.slane %v3056_v33, 4  ;;  %v3017_v52 = vadd.f32 %v3008_v2, %v15757_v43  ;;  %v2974_v29 = vpop.f32.mrf.mxu0  ;;  %v16845_v43 = vld [vmem:[#allocation95_spill] sm:$0xff]  ;;  %v3028_v55 = vmax.f32 %v3022_v51, 0.0 }
 0x36b   : > { %v3063_v17 = vsel %vm771_vm1, %v3038_v15, -inf  ;;  %v3070_v23 = vsel %vm771_vm1, %v3039_v42, -inf  ;;  %v3077_v28 = vsel %vm771_vm1, %v3040_v57, -inf  ;;  %v2975_v44 = vadd.f32 %v2974_v29, %v2956_v46  ;;  %v16848_v15 = vld [vmem:[#allocation110_spill] sm:$0xff]  ;;  %v16849_v42 = vld [vmem:[#allocation108_spill] sm:$0xff] }
 0x36c   : > { %v3058_v39 = vmax.f32 %v3056_v33, %v3057_v41  ;;  %v3064_v11 = vrot.slane %v3063_v17, 4  ;;  %v3071_v61 = vrot.slane %v3070_v23, 4  ;;  %v3078_v38 = vrot.slane %v3077_v28, 4 }
 0x36d   : > { %v3023_v50 = vadd.f32 %v3017_v52, %v15254_v8  ;;  %v3018_v49 = vadd.f32 %v2975_v44, %v15774_v12 }
 0x36e   : > { %3848 = vmatpush.bf16.msrb.mxu1 %v16844_v9  ;;  %3812 = vmatpush.bf16.msra.mxu3 %v16845_v43  ;;  %v3059_v19 = vrot.slane %v3058_v39, 2  ;;  %v3065_v40 = vmax.f32 %v3063_v17, %v3064_v11  ;;  %v3072_v45 = vmax.f32 %v3070_v23, %v3071_v61  ;;  %v3079_v24 = vmax.f32 %v3077_v28, %v3078_v38  ;;  %v3010_v32 = vpop.f32.mrf.mxu2 }
 0x36f   : > { %v3029_v14 = vmax.f32 %v3023_v50, 0.0  ;;  %v3011_v21 = vadd.f32 %v3010_v32, %v2992_v47 }
 0x370   : > { %v3060_v56 = vmax.f32 %v3058_v39, %v3059_v19  ;;  %v3066_v60 = vrot.slane %v3065_v40, 2  ;;  %v3073_v7 = vrot.slane %v3072_v45, 2  ;;  %v3080_v0 = vrot.slane %v3079_v24, 2  ;;  %v2994_v3 = vpop.f32.mrf.mxu1 }
 0x371   : > { %v3033_v20 = vmax.f32 %v3028_v55, %v3029_v14  ;;  %v2958_v22 = vpop.f32.mrf.mxu3  ;;  %v13335_v3 = vld [vmem:[#allocation10 + $0x270] sm:$0xff] }
 0x372   : > { %3849 = vmatpush.bf16.msrb.mxu1 %v16846_v4  ;;  %3813 = vmatpush.bf16.msra.mxu3 %v16847_v26  ;;  %v3061_v30 = vrot.slane %v3060_v56, 1  ;;  %v3067_v62 = vmax.f32 %v3065_v40, %v3066_v60  ;;  %v3074_v48 = vmax.f32 %v3072_v45, %v3073_v7  ;;  %v3081_v31 = vmax.f32 %v3079_v24, %v3080_v0  ;;  %v2976_v18 = vpop.f32.mrf.mxu0  ;;  %v13328_v4 = vld [vmem:[#allocation10 + $0x238] sm:$0xff] }
 0x373   : > { %v3041_v16 = vrot.slane %v3033_v20, 2  ;;  %v3042_v34 = vrot.slane %v3033_v20, 4  ;;  %v3043_v5 = vrot.slane %v3033_v20, 6  ;;  %v3084_v59 = vsel %vm771_vm1, %v3033_v20, -inf }
 0x374   : > { %v3062_v2 = vmax.f32 %v3060_v56, %v3061_v30  ;;  %v3068_v25 = vrot.slane %v3067_v62, 1  ;;  %v3075_v63 = vrot.slane %v3074_v48, 1  ;;  %v3082_v6 = vrot.slane %v3081_v31, 1 }
 0x375   : > { %v3085_v12 = vrot.slane %v3084_v59, 4  ;;  %v3091_v57 = vsel %vm771_vm1, %v3041_v16, -inf  ;;  %v3098_v33 = vsel %vm771_vm1, %v3042_v34, -inf  ;;  %v3105_v36 = vsel %vm771_vm1, %v3043_v5, -inf  ;;  %3730 = vmatmul.bf16.vlgmr.msrb.gmra.mxu3 %v16818_v10 }
 0x376   : > { %3850 = vmatpush.bf16.msrb.mxu1 %v16848_v15  ;;  %3814 = vmatpush.bf16.msra.mxu3 %v16849_v42  ;;  %v3069_v41 = vmax.f32 %v3067_v62, %v3068_v25  ;;  %v3076_v51 = vmax.f32 %v3074_v48, %v3075_v63  ;;  %v3083_v52 = vmax.f32 %v3081_v31, %v3082_v6  ;;  %v3012_v23 = vpop.f32.mrf.mxu2  ;;  %v3092_v39 = vrot.slane %v3091_v57, 4  ;;  %v13336_v48 = vld [vmem:[#allocation10 + $0x278] sm:$0xff]  ;;  %v16850_v6 = vld [vmem:[#allocation104_spill] sm:$0xff] }
 0x377   : > { %v3140_v17 = vpack.c.bf16 %v3062_v2, %v3062_v2  ;;  %v3086_v28 = vmax.f32 %v3084_v59, %v3085_v12  ;;  %v3099_v11 = vrot.slane %v3098_v33, 4  ;;  %v3106_v61 = vrot.slane %v3105_v36, 4  ;;  %v13327_v2 = vld [vmem:[#allocation10 + $0x230] sm:$0xff]  ;;  %v13312_v15 = vld [vmem:[#allocation10 + $0x1b8] sm:$0xff] }
 0x378   : > { %v3141_v38 = vpack.c.bf16 %v3069_v41, %v3069_v41  ;;  %v3142_v29 = vpack.c.bf16 %v3076_v51, %v3076_v51  ;;  %v3143_v47 = vpack.c.bf16 %v3083_v52, %v3083_v52  ;;  %v3093_v55 = vmax.f32 %v3091_v57, %v3092_v39  ;;  %3766 = vmatmul.bf16.vlgmr.msra.gmra.mxu1 %v16818_v10  ;;  %v3247_v0 = vpop.f32.mrf.mxu1  ;;  %v16851_v39 = vld [vmem:[#allocation105_spill] sm:$0xff] }
 0x379   : > { %v4181_v9 = vperm.slane %v3140_v17, 0  ;;  %v3087_v43 = vrot.slane %v3086_v28, 2  ;;  %v3100_v50 = vmax.f32 %v3098_v33, %v3099_v11  ;;  %v3107_v46 = vmax.f32 %v3105_v36, %v3106_v61  ;;  %10801 = vmatmul.msk.bf16.vlgmr.msra.gmra.mxu0 %vm1187_vm7, %v16819_v53  ;;  %10803 = vmatmul.msk.bf16.vlgmr.msra.gmra.mxu2 %vm1187_vm7, %v16819_v53  ;;  %v3211_v62 = vpop.f32.mrf.mxu3  ;;  %v13320_v36 = vld [vmem:[#allocation10 + $0x1f8] sm:$0xff] }
 0x37a   : > { %3851 = vmatpush.bf16.msrb.mxu1 %v15031_v27  ;;  %3815 = vmatpush.bf16.msra.mxu3 %v16694_v35  ;;  %v4182_v19 = vperm.slane %v3141_v38, 0  ;;  %v4183_v40 = vperm.slane %v3142_v29, 0  ;;  %v4184_v45 = vperm.slane %v3143_v47, 0  ;;  %v3019_v24 = vadd.f32 %v3011_v21, %v15771_v58  ;;  %v3229_v58 = vpop.f32.mrf.mxu0 }
 0x37b   : > { %v3088_v32 = vmax.f32 %v3086_v28, %v3087_v43  ;;  %v3094_v14 = vrot.slane %v3093_v55, 2  ;;  %v3101_v44 = vrot.slane %v3100_v50, 2  ;;  %v3108_v56 = vrot.slane %v3107_v46, 2  ;;  %4857 = vmatpush.bf16.msra.mxu2 %v13336_v48  ;;  %v13326_v28 = vld [vmem:[#allocation10 + $0x228] sm:$0xff]  ;;  %4831 = vmatpush.bf16.msra.mxu0 %v13320_v36 }
 0x37c   : > { %v4193_v27 = vunpack.c.l.b16 %v4181_v9  ;;  %v4194_v35 = vunpack.c.l.b16 %v4182_v19  ;;  %v4195_v60 = vunpack.c.l.b16 %v4183_v40  ;;  %v3024_v7 = vadd.f32 %v3018_v49, %v15252_v13  ;;  %v13334_v9 = vld [vmem:[#allocation10 + $0x268] sm:$0xff] }
 0x37d   : > { %v3089_v26 = vrot.slane %v3088_v32, 1  ;;  %v3095_v20 = vmax.f32 %v3093_v55, %v3094_v14  ;;  %v3102_v21 = vmax.f32 %v3100_v50, %v3101_v44  ;;  %v3109_v30 = vmax.f32 %v3107_v46, %v3108_v56  ;;  %v13311_v56 = vld [vmem:[#allocation10 + $0x1b0] sm:$0xff] }
 0x37e   : > { %v4205_v31 = vsel %vm4054_vm8, %v4194_v35, %v4193_v27  ;;  %v3030_v16 = vmax.f32 %v3024_v7, 0.0  ;;  %v3025_v34 = vadd.f32 %v3019_v24, %v15254_v8  ;;  %v15846_v5 = vadd.f32 %v3229_v58, %v3211_v62  ;;  %v3265_v59 = vpop.f32.mrf.mxu2  ;;  %4844 = vmatpush.bf16.msra.mxu1 %v13328_v4  ;;  %4818 = vmatpush.bf16.msrb.mxu3 %v13312_v15  ;;  %v13319_v27 = vld [vmem:[#allocation10 + $0x1f0] sm:$0xff] }
 0x37f   : > { %v3090_v49 = vmax.f32 %v3088_v32, %v3089_v26  ;;  %v3096_v25 = vrot.slane %v3095_v20, 1  ;;  %v3103_v63 = vrot.slane %v3102_v21, 1  ;;  %v15850_v18 = vpack.c.b16 %v16850_v6, %v16850_v6  ;;  %4858 = vmatpush.bf16.msra.mxu2 %v13335_v3  ;;  %4832 = vmatpush.bf16.msra.mxu0 %v13319_v27  ;;  %v13318_v6 = vld [vmem:[#allocation10 + $0x1e8] sm:$0xff] }
 0x380   : > { %v4206_v42 = vsel %vm4056_vm9, %v4195_v60, %v4205_v31  ;;  %v3110_v12 = vrot.slane %v3109_v30, 1  ;;  %v3031_v57 = vmax.f32 %v3025_v34, 0.0  ;;  %v15853_v33 = vadd.f32 %v3265_v59, %v3247_v0  ;;  %v3249_v40 = vpop.f32.mrf.mxu1  ;;  %v13333_v34 = vld [vmem:[#allocation10 + $0x260] sm:$0xff] }
 0x381   : > { %v4196_v22 = vunpack.c.l.b16 %v4184_v45  ;;  %v3097_v41 = vmax.f32 %v3095_v20, %v3096_v25  ;;  %v3104_v51 = vmax.f32 %v3102_v21, %v3103_v63  ;;  %v3144_v52 = vpack.c.bf16 %v3090_v49, %v3090_v49  ;;  %v3213_v44 = vpop.f32.mrf.mxu3  ;;  %v13310_v63 = vld [vmem:[#allocation10 + $0x1a8] sm:$0xff] }
 0x382   : > { %v3111_v17 = vmax.f32 %v3109_v30, %v3110_v12  ;;  %v3034_v23 = vmax.f32 %v3030_v16, %v3031_v57  ;;  %4845 = vmatpush.bf16.msra.mxu1 %v13327_v2  ;;  %v3714_v11 = vpack.c.b16 %v16851_v39, %v16851_v39  ;;  %v3231_v19 = vpop.f32.mrf.mxu0  ;;  %4819 = vmatpush.bf16.msrb.mxu3 %v13311_v56  ;;  %v13325_v16 = vld [vmem:[#allocation10 + $0x220] sm:$0xff]  ;;  %v13316_v56 = vld [vmem:[#allocation10 + $0x1d8] sm:$0xff] }
 0x383   : > { %v4207_v61 = vsel %vm4058_vm10, %v4196_v22, %v4206_v42  ;;  %v3145_v38 = vpack.c.bf16 %v3097_v41, %v3097_v41  ;;  %v3146_v29 = vpack.c.bf16 %v3104_v51, %v3104_v51  ;;  %v4185_v47 = vperm.slane %v3144_v52, 0  ;;  %4859 = vmatpush.bf16.msra.mxu2 %v13334_v9  ;;  %4833 = vmatpush.bf16.msra.mxu0 %v13318_v6 }
 0x384   : > { %v3147_v43 = vpack.c.bf16 %v3111_v17, %v3111_v17  ;;  %v3044_v55 = vrot.slane %v3034_v23, 2  ;;  %v3045_v50 = vrot.slane %v3034_v23, 4  ;;  %v3046_v46 = vrot.slane %v3034_v23, 6 }
 0x385   : > { %v4186_v45 = vperm.slane %v3145_v38, 0  ;;  %v4187_v24 = vperm.slane %v3146_v29, 0  ;;  %v4197_v32 = vunpack.c.l.b16 %v4185_v47  ;;  %v3112_v14 = vsel %vm771_vm1, %v3034_v23, -inf  ;;  %3735 = vmatmul.bf16.gmra.mxu3 %v15850_v18  ;;  %v13324_v23 = vld [vmem:[#allocation10 + $0x218] sm:$0xff]  ;;  %v13309_v38 = vld [vmem:[#allocation10 + $0x1a0] sm:$0xff] }
 0x386   : > { %v4188_v35 = vperm.slane %v3147_v43, 0  ;;  %v3113_v60 = vrot.slane %v3112_v14, 4  ;;  %v3119_v7 = vsel %vm771_vm1, %v3044_v55, -inf  ;;  %v3126_v58 = vsel %vm771_vm1, %v3045_v50, -inf  ;;  %v3267_v0 = vpop.f32.mrf.mxu2  ;;  %4846 = vmatpush.bf16.msra.mxu1 %v13326_v28  ;;  %v13332_v28 = vld [vmem:[#allocation10 + $0x258] sm:$0xff]  ;;  %4820 = vmatpush.bf16.msrb.mxu3 %v13310_v63  ;;  %v13317_v29 = vld [vmem:[#allocation10 + $0x1e0] sm:$0xff] }
 0x387   : > { %v4198_v4 = vunpack.c.l.b16 %v4186_v45  ;;  %v4199_v26 = vunpack.c.l.b16 %v4187_v24  ;;  %v4208_v20 = vsel %vm4060_vm11, %v4197_v32, %v4207_v61  ;;  %v3120_v21 = vrot.slane %v3119_v7, 4  ;;  %4860 = vmatpush.bf16.msra.mxu2 %v13333_v34  ;;  %v13323_v45 = vld [vmem:[#allocation10 + $0x210] sm:$0xff]  ;;  %4834 = vmatpush.bf16.msra.mxu0 %v13317_v29 }
 0x388   : > { %v4200_v30 = vunpack.c.l.b16 %v4188_v35  ;;  %v3114_v62 = vmax.f32 %v3112_v14, %v3113_v60  ;;  %v3127_v48 = vrot.slane %v3126_v58, 4  ;;  %v3133_v31 = vsel %vm771_vm1, %v3046_v46, -inf  ;;  %3771 = vmatmul.bf16.gmra.mxu1 %v15850_v18  ;;  %v3252_v17 = vpop.f32.mrf.mxu1  ;;  %v13331_v24 = vld [vmem:[#allocation10 + $0x250] sm:$0xff] }
 0x389   : > { %v4209_v59 = vsel %vm4062_vm12, %v4198_v4, %v4208_v20  ;;  %v3121_v2 = vmax.f32 %v3119_v7, %v3120_v21  ;;  %v3134_v49 = vrot.slane %v3133_v31, 4  ;;  %v15864_v25 = vadd.f32 %v3231_v19, %v3213_v44  ;;  %10802 = vmatmul.msk.bf16.gmra.mxu0 %vm1187_vm7, %v3714_v11  ;;  %10804 = vmatmul.msk.bf16.gmra.mxu2 %vm1187_vm7, %v3714_v11  ;;  %v3216_v18 = vpop.f32.mrf.mxu3  ;;  %v13308_v44 = vld [vmem:[#allocation10 + $0x198] sm:$0xff]  ;;  %v13322_v20 = vld [vmem:[#allocation10 + $0x208] sm:$0xff]  ;;  %v13315_v34 = vld [vmem:[#allocation10 + $0x1d0] sm:$0xff] }
 0x38a   : > { %v4210_v3 = vsel %vm4064_vm13, %v4199_v26, %v4209_v59  ;;  %v3115_v15 = vrot.slane %v3114_v62, 2  ;;  %v3128_v42 = vmax.f32 %v3126_v58, %v3127_v48  ;;  %v15867_v12 = vadd.f32 %v3267_v0, %v3249_v40  ;;  %v3234_v52 = vpop.f32.mrf.mxu0  ;;  %4847 = vmatpush.bf16.msra.mxu1 %v13325_v16  ;;  %4821 = vmatpush.bf16.msrb.mxu3 %v13309_v38  ;;  %v13330_v21 = vld [vmem:[#allocation10 + $0x248] sm:$0xff]  ;;  %v13307_v16 = vld [vmem:[#allocation10 + $0x190] sm:$0xff] }
 0x38b   : > { %v15872_v57 = vsel %vm4066_vm14, %v4200_v30, %v4210_v3  ;;  %v3122_v36 = vrot.slane %v3121_v2, 2  ;;  %v3135_v22 = vmax.f32 %v3133_v31, %v3134_v49  ;;  %v15876_v43 = vadd.f32 %v3234_v52, %v3216_v18  ;;  %4861 = vmatpush.bf16.msra.mxu2 %v13332_v28  ;;  %4835 = vmatpush.bf16.msra.mxu0 %v13316_v56  ;;  %v13314_v28 = vld [vmem:[#allocation10 + $0x1c8] sm:$0xff] }
 0x38c   : > { %v3116_v41 = vmax.f32 %v3114_v62, %v3115_v15  ;;  %v3129_v51 = vrot.slane %v3128_v42, 2  ;;  %v15881_v31 = vrot.slane %v16822_v54, 1  ;;  %v15884_v49 = vrot.slane %v16823_v1, 1  ;;  %v13321_v54 = vld [vmem:[#allocation10 + $0x200] sm:$0xff]  ;;  %v13264_v1 = vld [vmem:[#allocation10 + $0x38] sm:$0xff] }
 0x38d   : > { %v3123_v39 = vmax.f32 %v3121_v2, %v3122_v36  ;;  %v3136_v61 = vrot.slane %v3135_v22, 2  ;;  %v3794_v15 = vrot.slane %v16818_v10, 1  ;;  %v3797_v36 = vrot.slane %v16819_v53, 1  ;;  %v13306_v53 = vld [vmem:[#allocation10 + $0x188] sm:$0xff] }
 0x38e   : > { %v3117_v47 = vrot.slane %v3116_v41, 1  ;;  %v3130_v9 = vmax.f32 %v3128_v42, %v3129_v51  ;;  %v3270_v11 = vpop.f32.mrf.mxu2  ;;  %4848 = vmatpush.bf16.msra.mxu1 %v13324_v23  ;;  %4822 = vmatpush.bf16.msrb.mxu3 %v13308_v44  ;;  %v13269_v44 = vld [vmem:[#allocation10 + $0x60] sm:$0xff] }
 0x38f   : > { %v3124_v55 = vrot.slane %v3123_v39, 1  ;;  %v3137_v50 = vmax.f32 %v3135_v22, %v3136_v61  ;;  %v15878_v46 = vadd.f32 %v3270_v11, %v3252_v17  ;;  %4862 = vmatpush.bf16.msra.mxu2 %v13331_v24  ;;  %v13329_v22 = vld [vmem:[#allocation10 + $0x240] sm:$0xff]  ;;  %v3796_v52 = vsel %vm490_vm2, %v3794_v15, %v15881_v31  ;;  %v13272_v17 = vld [vmem:[#allocation10 + $0x78] sm:$0xff]  ;;  %4836 = vmatpush.bf16.msra.mxu0 %v13315_v34 }
 0x390   : > { %v3118_v19 = vmax.f32 %v3116_v41, %v3117_v47  ;;  %v3131_v40 = vrot.slane %v3130_v9, 1  ;;  %v3254_v26 = vpop.f32.mrf.mxu1  ;;  %v3799_v10 = vsel %vm490_vm2, %v3797_v36, %v15884_v49  ;;  %v13263_v47 = vld [vmem:[#allocation10 + $0x30] sm:$0xff]  ;;  %v15930_v34 = vshrl.u32 %v15735_v37, 16 }
 0x391   : > { %v3125_v32 = vmax.f32 %v3123_v39, %v3124_v55  ;;  %v3138_v14 = vrot.slane %v3137_v50, 1  ;;  %v3218_v48 = vpop.f32.mrf.mxu3  ;;  %v13305_v55 = vld [vmem:[#allocation10 + $0x180] sm:$0xff]  ;;  %v13258_v26 = vld [vmem:[#allocation10 + $0x8] sm:$0xff] }
 0x392   : > { %v3132_v27 = vmax.f32 %v3130_v9, %v3131_v40  ;;  %v3148_v35 = vpack.c.bf16 %v3118_v19, %v3118_v19  ;;  %v3236_v4 = vpop.f32.mrf.mxu0  ;;  %4849 = vmatpush.bf16.msra.mxu1 %v13323_v45  ;;  %4823 = vmatpush.bf16.msrb.mxu3 %v13307_v16  ;;  %v13271_v9 = vld [vmem:[#allocation10 + $0x70] sm:$0xff]  ;;  %v13344_v19 = vld [vmem:[#allocation10 + $0x2b8] sm:$0xff]  ;;  %v13270_v40 = vld [vmem:[#allocation10 + $0x68] sm:$0xff] }
 0x393   : > { %v3139_v60 = vmax.f32 %v3137_v50, %v3138_v14  ;;  %v3149_v7 = vpack.c.bf16 %v3125_v32, %v3125_v32  ;;  %4863 = vmatpush.bf16.msra.mxu2 %v13330_v21  ;;  %4837 = vmatpush.bf16.msra.mxu0 %v13314_v28  ;;  %v13313_v50 = vld [vmem:[#allocation10 + $0x1c0] sm:$0xff] }
 0x394   : > { %v3150_v58 = vpack.c.bf16 %v3132_v27, %v3132_v27  ;;  %v4189_v0 = vperm.slane %v3148_v35, 0  ;;  %v13261_v14 = vld [vmem:[#allocation10 + $0x20] sm:$0xff]  ;;  %v13260_v27 = vld [vmem:[#allocation10 + $0x18] sm:$0xff] }
 0x395   : > { %v3151_v30 = vpack.c.bf16 %v3139_v60, %v3139_v60  ;;  %v4190_v62 = vperm.slane %v3149_v7, 0  ;;  %3816 = vmatmul.bf16.vlgmr.msra.gmra.mxu3 %v3796_v52  ;;  %v13268_v35 = vld [vmem:[#allocation10 + $0x58] sm:$0xff] }
 0x396   : > { %v4191_v59 = vperm.slane %v3150_v58, 0  ;;  %v3272_v2 = vpop.f32.mrf.mxu2  ;;  %v4201_v6 = vunpack.c.l.b16 %v4189_v0  ;;  %4850 = vmatpush.bf16.msra.mxu1 %v13322_v20  ;;  %4824 = vmatpush.bf16.msrb.mxu3 %v13306_v53  ;;  %v13259_v0 = vld [vmem:[#allocation10 + $0x10] sm:$0xff] }
 0x397   : > { %v4192_v63 = vperm.slane %v3151_v30, 0  ;;  %v4202_v3 = vunpack.c.l.b16 %v4190_v62  ;;  %4864 = vmatpush.bf16.msra.mxu2 %v13329_v22  ;;  %4838 = vmatpush.bf16.msra.mxu0 %v13313_v50  ;;  %v13257_v62 = vld [vmem:[#allocation10] sm:$0xff]  ;;  %v16853_v2 = vld [vmem:[#allocation33_spill] sm:$0xff] }
 0x398   : > { %v4203_v42 = vunpack.c.l.b16 %v4191_v59  ;;  %3852 = vmatmul.bf16.vlgmr.msrb.gmra.mxu1 %v3796_v52  ;;  %v15902_v38 = vpop.f32.mrf.mxu1  ;;  %v13296_v59 = vld [vmem:[#allocation10 + $0x138] sm:$0xff] }
 0x399   : > { %v4204_v41 = vunpack.c.l.b16 %v4192_v63  ;;  %v4212_v51 = vsel %vm4054_vm8, %v4202_v3, %v4201_v6  ;;  %10805 = vmatmul.msk.bf16.vlgmr.msrb.gmra.mxu0 %vm1187_vm7, %v3799_v10  ;;  %10807 = vmatmul.msk.bf16.vlgmr.msrb.gmra.mxu2 %vm1187_vm7, %v3799_v10  ;;  %v3292_v29 = vpop.f32.mrf.mxu3 }
 0x39a   : > { %v4213_v23 = vsel %vm4056_vm9, %v4203_v42, %v4212_v51  ;;  %v15900_v18 = vpop.f32.mrf.mxu0  ;;  %4851 = vmatpush.bf16.msra.mxu1 %v13321_v54  ;;  %4825 = vmatpush.bf16.msrb.mxu3 %v13305_v55  ;;  %v3293_v6 = vadd.f32 %v3292_v29, %v15846_v5  ;;  %v3329_v42 = vadd.f32 %v15902_v38, %v15853_v33  ;;  %v13342_v33 = vld [vmem:[#allocation10 + $0x2a8] sm:$0xff] }
 0x39b   : > { %v4214_v39 = vsel %vm4058_vm10, %v4204_v41, %v4213_v23  ;;  %5197 = vmatpush.bf16.msrb.mxu2 %v13272_v17  ;;  %v13295_v17 = vld [vmem:[#allocation10 + $0x130] sm:$0xff]  ;;  %v13266_v38 = vld [vmem:[#allocation10 + $0x48] sm:$0xff] }
 0x39c   : > { %v15898_v61 = vpack.c.b16 %v4214_v39, %v15872_v57  ;;  %v13262_v57 = vld [vmem:[#allocation10 + $0x28] sm:$0xff]  ;;  %v3311_v54 = vadd.f32 %v15900_v18, %v3293_v6  ;;  %v13267_v23 = vld [vmem:[#allocation10 + $0x50] sm:$0xff]  ;;  %v13340_v6 = vld [vmem:[#allocation10 + $0x298] sm:$0xff] }
 0x39d   : > { %v13294_v39 = vld [vmem:[#allocation10 + $0x128] sm:$0xff] }
 0x39e   : > { %5184 = vmatpush.bf16.msrb.mxu1 %v13264_v1  ;;  %v15904_v11 = vpop.f32.mrf.mxu2  ;;  %4870 = vmatpush.bf16.msra.mxu3 %v13344_v19  ;;  %v15936_v63 = vshrl.u32 %v15898_v61, 16  ;;  %v13343_v1 = vld [vmem:[#allocation10 + $0x2b0] sm:$0xff] }
 0x39f   : > { %5198 = vmatpush.bf16.msrb.mxu2 %v13271_v9  ;;  %v3347_v5 = vadd.f32 %v15904_v11, %v3329_v42 }
 0x3a0   : > { %v15908_v24 = vpop.f32.mrf.mxu1 }
 0x3a1   : > { %v3294_v32 = vpop.f32.mrf.mxu3  ;;  %v3331_v50 = vadd.f32 %v15908_v24, %v15867_v12 }
 0x3a2   : > { %5185 = vmatpush.bf16.msrb.mxu1 %v13263_v47  ;;  %v15906_v45 = vpop.f32.mrf.mxu0  ;;  %v3295_v53 = vadd.f32 %v3294_v32, %v15864_v25  ;;  %4871 = vmatpush.bf16.msra.mxu3 %v13343_v1 }
 0x3a3   : > { %5199 = vmatpush.bf16.msrb.mxu2 %v13270_v40 }
 0x3a4   : > { %v3313_v25 = vadd.f32 %v15906_v45, %v3295_v53 }
 0x3a5   : > { %3821 = vmatmul.bf16.gmra.mxu3 %v15881_v31 }
 0x3a6   : > { %5186 = vmatpush.bf16.msrb.mxu1 %v13262_v57  ;;  %v15910_v56 = vpop.f32.mrf.mxu2  ;;  %4872 = vmatpush.bf16.msra.mxu3 %v13342_v33 }
 0x3a7   : > { %5200 = vmatpush.bf16.msrb.mxu2 %v13269_v44 }
 0x3a8   : > { %3857 = vmatmul.bf16.gmra.mxu1 %v15881_v31  ;;  %v15920_v7 = vpop.f32.mrf.mxu1  ;;  %v16852_v31 = vld [vmem:[#allocation31_spill] sm:$0xff] }
 0x3a9   : > { %10806 = vmatmul.msk.bf16.gmra.mxu0 %vm1187_vm7, %v15884_v49  ;;  %10808 = vmatmul.msk.bf16.gmra.mxu2 %vm1187_vm7, %v15884_v49  ;;  %v15922_v58 = vpop.f32.mrf.mxu3  ;;  %v15927_v16 = vshrl.u32 %v16852_v31, 16  ;;  %v15933_v49 = vshrl.u32 %v16853_v2, 16 }
 0x3aa   : > { %5187 = vmatpush.bf16.msrb.mxu1 %v13261_v14  ;;  %v15918_v60 = vpop.f32.mrf.mxu0  ;;  %v3349_v14 = vadd.f32 %v15910_v56, %v3331_v50 }
 0x3ab   : > { %5201 = vmatpush.bf16.msrb.mxu2 %v13268_v35 }
 0x3ae   : > { %5188 = vmatpush.bf16.msrb.mxu1 %v13260_v27  ;;  %v15924_v4 = vpop.f32.mrf.mxu2 }
 0x3af   : > { %5202 = vmatpush.bf16.msrb.mxu2 %v13267_v23 }
 0x3b0   : > { %v3335_v21 = vpop.f32.mrf.mxu1 }
 0x3b1   : > { %v3299_v30 = vpop.f32.mrf.mxu3  ;;  %v13293_v21 = vld [vmem:[#allocation10 + $0x120] sm:$0xff] }
 0x3b2   : > { %5189 = vmatpush.bf16.msrb.mxu1 %v13259_v0  ;;  %v3317_v20 = vpop.f32.mrf.mxu0  ;;  %v13265_v30 = vld [vmem:[#allocation10 + $0x40] sm:$0xff] }
 0x3b3   : > { %5203 = vmatpush.bf16.msrb.mxu2 %v13266_v38  ;;  %v13341_v20 = vld [vmem:[#allocation10 + $0x2a0] sm:$0xff] }
 0x3b4   : > { %4873 = vmatpush.bf16.msra.mxu3 %v13341_v20 }
 0x3b5   : > { %4826 = vmatmul.bf16.vlgmr.msrb.gmra.mxu3 %v15927_v16 }
 0x3b6   : > { %5190 = vmatpush.bf16.msrb.mxu1 %v13258_v26  ;;  %v3353_v48 = vpop.f32.mrf.mxu2 }
 0x3b7   : > { %5204 = vmatpush.bf16.msrb.mxu2 %v13265_v30 }
 0x3b8   : > { %4852 = vmatmul.bf16.vlgmr.msra.gmra.mxu1 %v15930_v34  ;;  %v3414_v15 = vpop.f32.mrf.mxu1  ;;  %4874 = vmatpush.bf16.msra.mxu3 %v13340_v6 }
 0x3b9   : > { %4839 = vmatmul.bf16.vlgmr.msra.gmra.mxu0 %v15933_v49  ;;  %4865 = vmatmul.bf16.vlgmr.msra.gmra.mxu2 %v15936_v63  ;;  %v3378_v36 = vpop.f32.mrf.mxu3 }
 0x3ba   : > { %5191 = vmatpush.bf16.msrb.mxu1 %v13257_v62  ;;  %v3396_v3 = vpop.f32.mrf.mxu0  ;;  %v3298_v62 = vadd.f32 %v15922_v58, %v15876_v43 }
 0x3bb   : > { %v3397_v22 = vadd.f32 %v3396_v3, %v3378_v36 }
 0x3bc   : > { %v3316_v53 = vadd.f32 %v15918_v60, %v3298_v62 }
 0x3bd   : > { %v3441_v52 = vadd.f32 %v3397_v22, %v3311_v54 }
 0x3be   : > { %5236 = vmatpush.bf16.msra.mxu1 %v13296_v59  ;;  %v3432_v41 = vpop.f32.mrf.mxu2 }
 0x3bf   : > { %v3433_v51 = vadd.f32 %v3432_v41, %v3414_v15  ;;  %v3447_v28 = vadd.f32 %v3441_v52, %v15252_v13  ;;  %v13292_v41 = vld [vmem:[#allocation10 + $0x118] sm:$0xff] }
 0x3c0   : > { %v3416_v9 = vpop.f32.mrf.mxu1 }
 0x3c1   : > { %v3442_v10 = vadd.f32 %v3433_v51, %v3347_v5  ;;  %v3453_v29 = vmax.f32 %v3447_v28, 0.0  ;;  %v3380_v55 = vpop.f32.mrf.mxu3 }
 0x3c2   : > { %5237 = vmatpush.bf16.msra.mxu1 %v13295_v17  ;;  %v3398_v47 = vpop.f32.mrf.mxu0 }
 0x3c3   : > { %v3448_v18 = vadd.f32 %v3442_v10, %v15254_v8  ;;  %v3399_v19 = vadd.f32 %v3398_v47, %v3380_v55  ;;  %v3334_v10 = vadd.f32 %v15920_v7, %v15878_v46 }
 0x3c5   : > { %v3454_v11 = vmax.f32 %v3448_v18, 0.0  ;;  %v3443_v44 = vadd.f32 %v3399_v19, %v3313_v25  ;;  %v3352_v47 = vadd.f32 %v15924_v4, %v3334_v10 }
 0x3c6   : > { %5238 = vmatpush.bf16.msra.mxu1 %v13294_v39  ;;  %v3434_v57 = vpop.f32.mrf.mxu2 }
 0x3c7   : > { %v3459_v40 = vmax.f32 %v3453_v29, %v3454_v11  ;;  %v3435_v32 = vadd.f32 %v3434_v57, %v3416_v9  ;;  %v3449_v45 = vadd.f32 %v3443_v44, %v15252_v13 }
 0x3c8   : > { %5192 = vmatmul.bf16.vlgmr.msrb.gmra.mxu1 %v16852_v31  ;;  %v3419_v22 = vpop.f32.mrf.mxu1 }
 0x3c9   : > { %v3465_v27 = vrot.slane %v3459_v40, 2  ;;  %v3466_v35 = vrot.slane %v3459_v40, 4  ;;  %v3467_v0 = vrot.slane %v3459_v40, 6  ;;  %v3483_v26 = vsel %vm771_vm1, %v3459_v40, -inf  ;;  %v3383_v58 = vpop.f32.mrf.mxu3  ;;  %5205 = vmatmul.bf16.vlgmr.msrb.gmra.mxu2 %v16853_v2 }
 0x3ca   : > { %v3484_v12 = vrot.slane %v3483_v26, 4  ;;  %v3444_v24 = vadd.f32 %v3435_v32, %v3349_v14  ;;  %5239 = vmatpush.bf16.msra.mxu1 %v13293_v21  ;;  %v3401_v54 = vpop.f32.mrf.mxu0  ;;  %v3455_v5 = vmax.f32 %v3449_v45, 0.0 }
 0x3cb   : > { %v3490_v56 = vsel %vm771_vm1, %v3465_v27, -inf  ;;  %v3497_v48 = vsel %vm771_vm1, %v3466_v35, -inf  ;;  %v3504_v59 = vsel %vm771_vm1, %v3467_v0, -inf  ;;  %v3402_v33 = vadd.f32 %v3401_v54, %v3383_v58  ;;  %v13339_v58 = vld [vmem:[#allocation10 + $0x290] sm:$0xff] }
 0x3cc   : > { %v3485_v3 = vmax.f32 %v3483_v26, %v3484_v12  ;;  %v3491_v15 = vrot.slane %v3490_v56, 4  ;;  %v3498_v42 = vrot.slane %v3497_v48, 4  ;;  %v3505_v36 = vrot.slane %v3504_v59, 4  ;;  %4875 = vmatpush.bf16.msra.mxu3 %v13339_v58  ;;  %v13375_v58 = vld [vmem:[#allocation10 + $0x3b0] sm:$0xff] }
 0x3cd   : > { %v3450_v43 = vadd.f32 %v3444_v24, %v15254_v8  ;;  %v3445_v11 = vadd.f32 %v3402_v33, %v3316_v53 }
 0x3ce   : > { %v3486_v51 = vrot.slane %v3485_v3, 2  ;;  %v3492_v52 = vmax.f32 %v3490_v56, %v3491_v15  ;;  %v3499_v1 = vmax.f32 %v3497_v48, %v3498_v42  ;;  %v3506_v17 = vmax.f32 %v3504_v59, %v3505_v36  ;;  %v3437_v23 = vpop.f32.mrf.mxu2  ;;  %5240 = vmatpush.bf16.msra.mxu1 %v13292_v41 }
 0x3cf   : > { %v3456_v28 = vmax.f32 %v3450_v43, 0.0  ;;  %v3438_v55 = vadd.f32 %v3437_v23, %v3419_v22 }
 0x3d0   : > { %v3487_v39 = vmax.f32 %v3485_v3, %v3486_v51  ;;  %v3493_v18 = vrot.slane %v3492_v52, 2  ;;  %v3500_v38 = vrot.slane %v3499_v1, 2  ;;  %v3507_v29 = vrot.slane %v3506_v17, 2  ;;  %v3421_v0 = vpop.f32.mrf.mxu1  ;;  %v13291_v51 = vld [vmem:[#allocation10 + $0x110] sm:$0xff] }
 0x3d1   : > { %v3460_v9 = vmax.f32 %v3455_v5, %v3456_v28  ;;  %v3385_v12 = vpop.f32.mrf.mxu3  ;;  %v3446_v23 = vadd.f32 %v3438_v55, %v3352_v47 }
 0x3d2   : > { %v3488_v50 = vrot.slane %v3487_v39, 1  ;;  %v3494_v25 = vmax.f32 %v3492_v52, %v3493_v18  ;;  %v3501_v46 = vmax.f32 %v3499_v1, %v3500_v38  ;;  %v3508_v7 = vmax.f32 %v3506_v17, %v3507_v29  ;;  %v3403_v35 = vpop.f32.mrf.mxu0  ;;  %5241 = vmatpush.bf16.msra.mxu1 %v13291_v51  ;;  %v13290_v18 = vld [vmem:[#allocation10 + $0x108] sm:$0xff]  ;;  %v13280_v12 = vld [vmem:[#allocation10 + $0xb8] sm:$0xff] }
 0x3d3   : > { %v3468_v60 = vrot.slane %v3460_v9, 2  ;;  %v3469_v19 = vrot.slane %v3460_v9, 4  ;;  %v3470_v57 = vrot.slane %v3460_v9, 6  ;;  %v3511_v40 = vsel %vm771_vm1, %v3460_v9, -inf }
 0x3d4   : > { %v3489_v32 = vmax.f32 %v3487_v39, %v3488_v50  ;;  %v3495_v14 = vrot.slane %v3494_v25, 1  ;;  %v3502_v44 = vrot.slane %v3501_v46, 1  ;;  %v3509_v27 = vrot.slane %v3508_v7, 1  ;;  %v13338_v39 = vld [vmem:[#allocation10 + $0x288] sm:$0xff] }
 0x3d5   : > { %v3512_v26 = vrot.slane %v3511_v40, 4  ;;  %v3518_v4 = vsel %vm771_vm1, %v3468_v60, -inf  ;;  %v3525_v20 = vsel %vm771_vm1, %v3469_v19, -inf  ;;  %v3532_v21 = vsel %vm771_vm1, %v3470_v57, -inf  ;;  %4876 = vmatpush.bf16.msra.mxu3 %v13338_v39 }
 0x3d6   : > { %v3496_v45 = vmax.f32 %v3494_v25, %v3495_v14  ;;  %v3503_v24 = vmax.f32 %v3501_v46, %v3502_v44  ;;  %v3510_v30 = vmax.f32 %v3508_v7, %v3509_v27  ;;  %v3567_v62 = vpack.c.bf16 %v3489_v32, %v3489_v32  ;;  %v3439_v56 = vpop.f32.mrf.mxu2  ;;  %5242 = vmatpush.bf16.msra.mxu1 %v13290_v18 }
 0x3d7   : > { %v3513_v48 = vmax.f32 %v3511_v40, %v3512_v26  ;;  %v3519_v59 = vrot.slane %v3518_v4, 4  ;;  %v3526_v6 = vrot.slane %v3525_v20, 4  ;;  %v3533_v3 = vrot.slane %v3532_v21, 4  ;;  %v13289_v26 = vld [vmem:[#allocation10 + $0x100] sm:$0xff] }
 0x3d8   : > { %v3568_v15 = vpack.c.bf16 %v3496_v45, %v3496_v45  ;;  %v3569_v42 = vpack.c.bf16 %v3503_v24, %v3503_v24  ;;  %v3570_v36 = vpack.c.bf16 %v3510_v30, %v3510_v30  ;;  %v4229_v54 = vperm.slane %v3567_v62, 0  ;;  %v3686_v46 = vpop.f32.mrf.mxu1  ;;  %v13376_v45 = vld [vmem:[#allocation10 + $0x3b8] sm:$0xff] }
 0x3d9   : > { %v3514_v22 = vrot.slane %v3513_v48, 2  ;;  %v3520_v41 = vmax.f32 %v3518_v4, %v3519_v59  ;;  %v3527_v5 = vmax.f32 %v3525_v20, %v3526_v6  ;;  %v3534_v43 = vmax.f32 %v3532_v21, %v3533_v3  ;;  %v3650_v47 = vpop.f32.mrf.mxu3 }
 0x3da   : > { %v4230_v52 = vperm.slane %v3568_v15, 0  ;;  %v4231_v1 = vperm.slane %v3569_v42, 0  ;;  %v4232_v17 = vperm.slane %v3570_v36, 0  ;;  %v4241_v38 = vunpack.c.l.b16 %v4229_v54  ;;  %v3668_v25 = vpop.f32.mrf.mxu0  ;;  %5243 = vmatpush.bf16.msra.mxu1 %v13289_v26 }
 0x3db   : > { %v3515_v10 = vmax.f32 %v3513_v48, %v3514_v22  ;;  %v3521_v53 = vrot.slane %v3520_v41, 2  ;;  %v3528_v28 = vrot.slane %v3527_v5, 2  ;;  %v3535_v33 = vrot.slane %v3534_v43, 2 }
 0x3dc   : > { %v4242_v29 = vunpack.c.l.b16 %v4230_v52  ;;  %v4243_v9 = vunpack.c.l.b16 %v4231_v1  ;;  %v3451_v50 = vadd.f32 %v3445_v11, %v15252_v13  ;;  %v3452_v32 = vadd.f32 %v3446_v23, %v15254_v8  ;;  %v13337_v11 = vld [vmem:[#allocation10 + $0x280] sm:$0xff] }
 0x3dd   : > { %v3516_v7 = vrot.slane %v3515_v10, 1  ;;  %v3522_v60 = vmax.f32 %v3520_v41, %v3521_v53  ;;  %v3529_v19 = vmax.f32 %v3527_v5, %v3528_v28  ;;  %v3536_v57 = vmax.f32 %v3534_v43, %v3535_v33  ;;  %4877 = vmatpush.bf16.msra.mxu3 %v13337_v11  ;;  %v13279_v43 = vld [vmem:[#allocation10 + $0xb0] sm:$0xff] }
 0x3de   : > { %v4253_v55 = vsel %vm4054_vm8, %v4242_v29, %v4241_v38  ;;  %v3457_v40 = vmax.f32 %v3451_v50, 0.0  ;;  %v15975_v14 = vadd.f32 %v3668_v25, %v3650_v47  ;;  %v3704_v44 = vpop.f32.mrf.mxu2  ;;  %v3458_v21 = vmax.f32 %v3452_v32, 0.0  ;;  %5685 = vmatpush.bf16.msrb.mxu1 %v13376_v45 }
 0x3df   : > { %v3517_v27 = vmax.f32 %v3515_v10, %v3516_v7  ;;  %v3523_v35 = vrot.slane %v3522_v60, 1  ;;  %v3530_v0 = vrot.slane %v3529_v19, 1  ;;  %v4254_v4 = vsel %vm4056_vm9, %v4243_v9, %v4253_v55 }
 0x3e0   : > { %v3537_v20 = vrot.slane %v3536_v57, 1  ;;  %v15978_v24 = vadd.f32 %v3704_v44, %v3686_v46  ;;  %v4244_v30 = vunpack.c.l.b16 %v4232_v17  ;;  %v3461_v6 = vmax.f32 %v3457_v40, %v3458_v21  ;;  %v15983_v52 = vpop.f32.mrf.mxu1  ;;  %v13277_v21 = vld [vmem:[#allocation10 + $0xa0] sm:$0xff] }
 0x3e1   : > { %v3524_v62 = vmax.f32 %v3522_v60, %v3523_v35  ;;  %v3531_v56 = vmax.f32 %v3529_v19, %v3530_v0  ;;  %v3571_v48 = vpack.c.bf16 %v3517_v27, %v3517_v27  ;;  %5210 = vmatpush.bf16.msrb.mxu3 %v13280_v12  ;;  %v15986_v53 = vpop.f32.mrf.mxu3  ;;  %v13278_v19 = vld [vmem:[#allocation10 + $0xa8] sm:$0xff]  ;;  %v13373_v12 = vld [vmem:[#allocation10 + $0x3a0] sm:$0xff] }
 0x3e2   : > { %v3538_v59 = vmax.f32 %v3536_v57, %v3537_v20  ;;  %v4255_v3 = vsel %vm4058_vm10, %v4244_v30, %v4254_v4  ;;  %v3471_v22 = vrot.slane %v3461_v6, 2  ;;  %v3472_v41 = vrot.slane %v3461_v6, 4  ;;  %v15981_v51 = vpop.f32.mrf.mxu0  ;;  %5686 = vmatpush.bf16.msrb.mxu1 %v13375_v58  ;;  %v13374_v57 = vld [vmem:[#allocation10 + $0x3a8] sm:$0xff] }
 0x3e3   : > { %v3572_v15 = vpack.c.bf16 %v3524_v62, %v3524_v62  ;;  %v3573_v42 = vpack.c.bf16 %v3531_v56, %v3531_v56  ;;  %v4233_v36 = vperm.slane %v3571_v48, 0  ;;  %v3473_v5 = vrot.slane %v3461_v6, 6 }
 0x3e4   : > { %v3574_v54 = vpack.c.bf16 %v3538_v59, %v3538_v59  ;;  %v3539_v10 = vsel %vm771_vm1, %v3461_v6, -inf  ;;  %v3546_v39 = vsel %vm771_vm1, %v3471_v22, -inf  ;;  %v3553_v18 = vsel %vm771_vm1, %v3472_v41, -inf }
 0x3e5   : > { %v4234_v1 = vperm.slane %v3572_v15, 0  ;;  %v4235_v17 = vperm.slane %v3573_v42, 0  ;;  %v4245_v23 = vunpack.c.l.b16 %v4233_v36  ;;  %v3540_v33 = vrot.slane %v3539_v10, 4  ;;  %5211 = vmatpush.bf16.msrb.mxu3 %v13279_v43  ;;  %v13372_v43 = vld [vmem:[#allocation10 + $0x398] sm:$0xff] }
 0x3e6   : > { %v4236_v28 = vperm.slane %v3574_v54, 0  ;;  %v15990_v38 = vpop.f32.mrf.mxu2  ;;  %v3547_v25 = vrot.slane %v3546_v39, 4  ;;  %v3554_v7 = vrot.slane %v3553_v18, 4  ;;  %v3560_v60 = vsel %vm771_vm1, %v3473_v5, -inf  ;;  %5687 = vmatpush.bf16.msrb.mxu1 %v13374_v57  ;;  %v13276_v5 = vld [vmem:[#allocation10 + $0x98] sm:$0xff] }
 0x3e7   : > { %v4246_v29 = vunpack.c.l.b16 %v4234_v1  ;;  %v4247_v9 = vunpack.c.l.b16 %v4235_v17  ;;  %v4256_v50 = vsel %vm4060_vm11, %v4245_v23, %v4255_v3  ;;  %v3541_v46 = vmax.f32 %v3539_v10, %v3540_v33 }
 0x3e8   : > { %v4248_v47 = vunpack.c.l.b16 %v4236_v28  ;;  %v3548_v40 = vmax.f32 %v3546_v39, %v3547_v25  ;;  %v3561_v32 = vrot.slane %v3560_v60, 4  ;;  %v3555_v27 = vmax.f32 %v3553_v18, %v3554_v7  ;;  %v3691_v30 = vpop.f32.mrf.mxu1  ;;  %v13275_v18 = vld [vmem:[#allocation10 + $0x90] sm:$0xff] }
 0x3e9   : > { %v4257_v55 = vsel %vm4062_vm12, %v4246_v29, %v4256_v50  ;;  %v3542_v44 = vrot.slane %v3541_v46, 2  ;;  %5212 = vmatpush.bf16.msrb.mxu3 %v13278_v19  ;;  %v3655_v48 = vpop.f32.mrf.mxu3  ;;  %v13371_v29 = vld [vmem:[#allocation10 + $0x390] sm:$0xff] }
 0x3ea   : > { %v4258_v35 = vsel %vm4064_vm13, %v4247_v9, %v4257_v55  ;;  %v3549_v0 = vrot.slane %v3548_v40, 2  ;;  %v3562_v11 = vmax.f32 %v3560_v60, %v3561_v32  ;;  %v3556_v20 = vrot.slane %v3555_v27, 2  ;;  %v3673_v45 = vpop.f32.mrf.mxu0  ;;  %5688 = vmatpush.bf16.msrb.mxu1 %v13373_v12  ;;  %v13274_v32 = vld [vmem:[#allocation10 + $0x88] sm:$0xff] }
 0x3eb   : > { %v4259_v26 = vsel %vm4066_vm14, %v4248_v47, %v4258_v35  ;;  %v3543_v4 = vmax.f32 %v3541_v46, %v3542_v44  ;;  %v15997_v3 = vadd.f32 %v3673_v45, %v3655_v48  ;;  %v13370_v44 = vld [vmem:[#allocation10 + $0x388] sm:$0xff]  ;;  %v13360_v48 = vld [vmem:[#allocation10 + $0x338] sm:$0xff] }
 0x3ec   : > { %v3550_v62 = vmax.f32 %v3548_v40, %v3549_v0  ;;  %v3563_v56 = vrot.slane %v3562_v11, 2  ;;  %v3557_v6 = vmax.f32 %v3555_v27, %v3556_v20  ;;  %v13273_v20 = vld [vmem:[#allocation10 + $0x80] sm:$0xff] }
 0x3ed   : > { %v3544_v59 = vrot.slane %v3543_v4, 1  ;;  %5213 = vmatpush.bf16.msrb.mxu3 %v13277_v21  ;;  %v13369_v21 = vld [vmem:[#allocation10 + $0x380] sm:$0xff] }
 0x3ee   : > { %v3709_v15 = vpop.f32.mrf.mxu2  ;;  %v3551_v42 = vrot.slane %v3550_v62, 1  ;;  %v3564_v36 = vmax.f32 %v3562_v11, %v3563_v56  ;;  %v3558_v41 = vrot.slane %v3557_v6, 1  ;;  %5689 = vmatpush.bf16.msrb.mxu1 %v13372_v43 }
 0x3ef   : > { %v15999_v54 = vadd.f32 %v3709_v15, %v3691_v30  ;;  %v3545_v22 = vmax.f32 %v3543_v4, %v3544_v59  ;;  %v13408_v30 = vld [vmem:[#allocation10 + $0x4b8] sm:$0xff] }
 0x3f0   : > { %v3552_v58 = vmax.f32 %v3550_v62, %v3551_v42  ;;  %v3565_v1 = vrot.slane %v3564_v36, 1  ;;  %v3559_v17 = vmax.f32 %v3557_v6, %v3558_v41  ;;  %v3693_v50 = vpop.f32.mrf.mxu1  ;;  %v13359_v6 = vld [vmem:[#allocation10 + $0x330] sm:$0xff]  ;;  %v13304_v15 = vld [vmem:[#allocation10 + $0x178] sm:$0xff] }
 0x3f1   : > { %v3575_v23 = vpack.c.bf16 %v3545_v22, %v3545_v22  ;;  %5214 = vmatpush.bf16.msrb.mxu3 %v13276_v5  ;;  %v3657_v7 = vpop.f32.mrf.mxu3  ;;  %v13406_v22 = vld [vmem:[#allocation10 + $0x4a8] sm:$0xff]  ;;  %5249 = vmatpush.bf16.msra.mxu2 %v13304_v15  ;;  %v13403_v50 = vld [vmem:[#allocation10 + $0x490] sm:$0xff] }
 0x3f2   : > { %v3566_v10 = vmax.f32 %v3564_v36, %v3565_v1  ;;  %v3576_v28 = vpack.c.bf16 %v3552_v58, %v3552_v58  ;;  %v3577_v33 = vpack.c.bf16 %v3559_v17, %v3559_v17  ;;  %v3675_v9 = vpop.f32.mrf.mxu0  ;;  %5690 = vmatpush.bf16.msrb.mxu1 %v13371_v29  ;;  %v13358_v5 = vld [vmem:[#allocation10 + $0x328] sm:$0xff]  ;;  %v13352_v58 = vld [vmem:[#allocation10 + $0x2f8] sm:$0xff]  ;;  %v13303_v1 = vld [vmem:[#allocation10 + $0x170] sm:$0xff] }
 0x3f3   : > { %v4237_v39 = vperm.slane %v3575_v23, 0  ;;  %v13405_v17 = vld [vmem:[#allocation10 + $0x4a0] sm:$0xff]  ;;  %4883 = vmatpush.bf16.msrb.mxu0 %v13352_v58  ;;  %v13356_v29 = vld [vmem:[#allocation10 + $0x318] sm:$0xff]  ;;  %v13391_v15 = vld [vmem:[#allocation10 + $0x430] sm:$0xff] }
 0x3f4   : > { %v3578_v25 = vpack.c.bf16 %v3566_v10, %v3566_v10  ;;  %v4238_v46 = vperm.slane %v3576_v28, 0  ;;  %v4239_v60 = vperm.slane %v3577_v33, 0  ;;  %v13357_v23 = vld [vmem:[#allocation10 + $0x320] sm:$0xff]  ;;  %v5361_v10 = vrot.slane %v15735_v37, 1  ;;  %v13302_v58 = vld [vmem:[#allocation10 + $0x168] sm:$0xff] }
 0x3f5   : > { %v4249_v47 = vunpack.c.l.b16 %v4237_v39  ;;  %5215 = vmatpush.bf16.msrb.mxu3 %v13275_v18  ;;  %5250 = vmatpush.bf16.msra.mxu2 %v13303_v1  ;;  %v13404_v39 = vld [vmem:[#allocation10 + $0x498] sm:$0xff] }
 0x3f6   : > { %v3711_v19 = vpop.f32.mrf.mxu2  ;;  %v4240_v57 = vperm.slane %v3578_v25, 0  ;;  %v4250_v55 = vunpack.c.l.b16 %v4238_v46  ;;  %v4251_v40 = vunpack.c.l.b16 %v4239_v60  ;;  %5691 = vmatpush.bf16.msrb.mxu1 %v13370_v44  ;;  %v13355_v25 = vld [vmem:[#allocation10 + $0x310] sm:$0xff]  ;;  %v13402_v60 = vld [vmem:[#allocation10 + $0x488] sm:$0xff]  ;;  %v13440_v44 = vld [vmem:[#allocation10 + $0x5b8] sm:$0xff] }
 0x3f8   : > { %v4252_v27 = vunpack.c.l.b16 %v4240_v57  ;;  %v4260_v35 = vsel %vm4054_vm8, %v4250_v55, %v4249_v47  ;;  %v16008_v45 = vpop.f32.mrf.mxu1  ;;  %v13354_v57 = vld [vmem:[#allocation10 + $0x308] sm:$0xff]  ;;  %v13401_v55 = vld [vmem:[#allocation10 + $0x480] sm:$0xff] }
 0x3f9   : > { %v4261_v0 = vsel %vm4056_vm9, %v4251_v40, %v4260_v35  ;;  %5216 = vmatpush.bf16.msrb.mxu3 %v13274_v32  ;;  %v3731_v62 = vpop.f32.mrf.mxu3  ;;  %v13353_v32 = vld [vmem:[#allocation10 + $0x300] sm:$0xff]  ;;  %5251 = vmatpush.bf16.msra.mxu2 %v13302_v58 }
 0x3fa   : > { %v4262_v11 = vsel %vm4058_vm10, %v4252_v27, %v4261_v0  ;;  %v16006_v12 = vpop.f32.mrf.mxu0  ;;  %5692 = vmatpush.bf16.msrb.mxu1 %v13369_v21  ;;  %v3732_v40 = vadd.f32 %v3731_v62, %v15975_v14  ;;  %v13392_v27 = vld [vmem:[#allocation10 + $0x438] sm:$0xff] }
 0x3fb   : > { %v16004_v4 = vpack.c.b16 %v4262_v11, %v4259_v26  ;;  %v13407_v26 = vld [vmem:[#allocation10 + $0x4b0] sm:$0xff]  ;;  %v3768_v11 = vadd.f32 %v16008_v45, %v15978_v24  ;;  %v3671_v24 = vadd.f32 %v15981_v51, %v15986_v53  ;;  %v13301_v51 = vld [vmem:[#allocation10 + $0x160] sm:$0xff]  ;;  %v3707_v53 = vadd.f32 %v15990_v38, %v15983_v52 }
 0x3fc   : > { %v3750_v21 = vadd.f32 %v16006_v12, %v3732_v40  ;;  %v13351_v12 = vld [vmem:[#allocation10 + $0x2f0] sm:$0xff]  ;;  %v13389_v40 = vld [vmem:[#allocation10 + $0x420] sm:$0xff] }
 0x3fd   : > { %5244 = vmatmul.bf16.vlgmr.msra.gmra.mxu1 %v16004_v4  ;;  %v16012_v56 = vshrl.u32 %v16004_v4, 16  ;;  %5217 = vmatpush.bf16.msrb.mxu3 %v13273_v20 }
 0x3fe   : > { %v16014_v59 = vpop.f32.mrf.mxu2  ;;  %6135 = vmatpush.bf16.msra.mxu1 %v13408_v30  ;;  %v5835_v30 = vrot.slane %v15927_v16, 1  ;;  %4884 = vmatpush.bf16.msrb.mxu0 %v13351_v12  ;;  %v13348_v12 = vld [vmem:[#allocation10 + $0x2d8] sm:$0xff] }
 0x3ff   : > { %4878 = vmatmul.bf16.vlgmr.msra.gmra.mxu3 %v16012_v56  ;;  %v3786_v62 = vadd.f32 %v16014_v59, %v3768_v11  ;;  %5252 = vmatpush.bf16.msra.mxu2 %v13301_v51  ;;  %v13435_v51 = vld [vmem:[#allocation10 + $0x590] sm:$0xff] }
 0x400   : > { %v16019_v36 = vpop.f32.mrf.mxu1 }
 0x401   : > { %5659 = vmatpush.bf16.msra.mxu3 %v13360_v48  ;;  %v16021_v41 = vpop.f32.mrf.mxu3  ;;  %v13439_v48 = vld [vmem:[#allocation10 + $0x5b0] sm:$0xff] }
 0x402   : > { %v16017_v42 = vpop.f32.mrf.mxu0  ;;  %6136 = vmatpush.bf16.msra.mxu1 %v13407_v26  ;;  %v3734_v1 = vadd.f32 %v16021_v41, %v3671_v24 }
 0x405   : > { %5660 = vmatpush.bf16.msra.mxu3 %v13359_v6  ;;  %v5359_v6 = vrot.slane %v16852_v31, 1 }
 0x406   : > { %v16023_v43 = vpop.f32.mrf.mxu2  ;;  %6137 = vmatpush.bf16.msra.mxu1 %v13406_v22 }
 0x408   : > { %v16028_v33 = vpop.f32.mrf.mxu1 }
 0x409   : > { %5661 = vmatpush.bf16.msra.mxu3 %v13358_v5  ;;  %v16030_v18 = vpop.f32.mrf.mxu3 }
 0x40a   : > { %v16026_v28 = vpop.f32.mrf.mxu0  ;;  %6138 = vmatpush.bf16.msra.mxu1 %v13405_v17  ;;  %v13438_v17 = vld [vmem:[#allocation10 + $0x5a8] sm:$0xff] }
 0x40d   : > { %5662 = vmatpush.bf16.msra.mxu3 %v13357_v23  ;;  %5693 = vmatmul.bf16.vlgmr.msrb.gmra.mxu1 %v5361_v10  ;;  %v13350_v23 = vld [vmem:[#allocation10 + $0x2e8] sm:$0xff] }
 0x40e   : > { %v16032_v9 = vpop.f32.mrf.mxu2  ;;  %6139 = vmatpush.bf16.msra.mxu1 %v13404_v39  ;;  %v13390_v10 = vld [vmem:[#allocation10 + $0x428] sm:$0xff]  ;;  %4885 = vmatpush.bf16.msrb.mxu0 %v13350_v23 }
 0x40f   : > { %5218 = vmatmul.bf16.vlgmr.msrb.gmra.mxu3 %v15735_v37 }
 0x410   : > { %v3774_v7 = vpop.f32.mrf.mxu1 }
 0x411   : > { %5663 = vmatpush.bf16.msra.mxu3 %v13356_v29  ;;  %v3738_v19 = vpop.f32.mrf.mxu3  ;;  %v3770_v7 = vadd.f32 %v16019_v36, %v3707_v53 }
 0x412   : > { %v3756_v46 = vpop.f32.mrf.mxu0  ;;  %6140 = vmatpush.bf16.msra.mxu1 %v13403_v50  ;;  %v13437_v19 = vld [vmem:[#allocation10 + $0x5a0] sm:$0xff] }
 0x413   : > { %v3788_v52 = vadd.f32 %v16023_v43, %v3770_v7  ;;  %v3737_v7 = vadd.f32 %v16030_v18, %v15997_v3 }
 0x415   : > { %5664 = vmatpush.bf16.msra.mxu3 %v13355_v25 }
 0x416   : > { %v3792_v47 = vpop.f32.mrf.mxu2  ;;  %6141 = vmatpush.bf16.msra.mxu1 %v13402_v60  ;;  %v3752_v60 = vadd.f32 %v16017_v42, %v3734_v1  ;;  %v13436_v42 = vld [vmem:[#allocation10 + $0x598] sm:$0xff] }
 0x418   : > { %v3853_v0 = vpop.f32.mrf.mxu1 }
 0x419   : > { %5665 = vmatpush.bf16.msra.mxu3 %v13354_v57  ;;  %v3817_v20 = vpop.f32.mrf.mxu3 }
 0x41a   : > { %v3835_v35 = vpop.f32.mrf.mxu0  ;;  %6142 = vmatpush.bf16.msra.mxu1 %v13401_v55 }
 0x41b   : > { %v3836_v26 = vadd.f32 %v3835_v35, %v3817_v20 }
 0x41d   : > { %5666 = vmatpush.bf16.msra.mxu3 %v13353_v32  ;;  %6143 = vmatmul.bf16.vlgmr.msra.gmra.mxu1 %v5835_v30  ;;  %v3880_v45 = vadd.f32 %v3836_v26, %v3750_v21  ;;  %v13349_v21 = vld [vmem:[#allocation10 + $0x2e0] sm:$0xff]  ;;  %v13300_v30 = vld [vmem:[#allocation10 + $0x158] sm:$0xff] }
 0x41e   : > { %6187 = vmatpush.bf16.msrb.mxu1 %v13440_v44  ;;  %v3871_v14 = vpop.f32.mrf.mxu2  ;;  %4886 = vmatpush.bf16.msrb.mxu0 %v13349_v21 }
 0x41f   : > { %v3872_v22 = vadd.f32 %v3871_v14, %v3853_v0  ;;  %v3886_v59 = vadd.f32 %v3880_v45, %v15252_v13  ;;  %v13388_v14 = vld [vmem:[#allocation10 + $0x418] sm:$0xff]  ;;  %5253 = vmatpush.bf16.msra.mxu2 %v13300_v30 }
 0x420   : > { %5667 = vmatmul.bf16.vlgmr.msra.gmra.mxu3 %v5359_v6  ;;  %v3855_v25 = vpop.f32.mrf.mxu1 }
 0x421   : > { %5711 = vmatpush.bf16.msrb.mxu3 %v13392_v27  ;;  %v3881_v5 = vadd.f32 %v3872_v22, %v3786_v62  ;;  %v3892_v29 = vmax.f32 %v3886_v59, 0.0  ;;  %v3819_v41 = vpop.f32.mrf.mxu3 }
 0x422   : > { %6188 = vmatpush.bf16.msrb.mxu1 %v13439_v48  ;;  %v3837_v50 = vpop.f32.mrf.mxu0  ;;  %4887 = vmatpush.bf16.msrb.mxu0 %v13348_v12 }
 0x423   : > { %v3887_v39 = vadd.f32 %v3881_v5, %v15254_v8  ;;  %v3838_v57 = vadd.f32 %v3837_v50, %v3819_v41  ;;  %v13299_v5 = vld [vmem:[#allocation10 + $0x150] sm:$0xff] }
 0x424   : > { %v13387_v50 = vld [vmem:[#allocation10 + $0x410] sm:$0xff]  ;;  %5254 = vmatpush.bf16.msra.mxu2 %v13299_v5 }
 0x425   : > { %5712 = vmatpush.bf16.msrb.mxu3 %v13391_v15  ;;  %v3893_v46 = vmax.f32 %v3887_v39, 0.0  ;;  %v3882_v38 = vadd.f32 %v3838_v57, %v3752_v60 }
 0x426   : > { %6189 = vmatpush.bf16.msrb.mxu1 %v13438_v17  ;;  %v3873_v47 = vpop.f32.mrf.mxu2 }
 0x427   : > { %v3898_v55 = vmax.f32 %v3892_v29, %v3893_v46  ;;  %v3874_v32 = vadd.f32 %v3873_v47, %v3855_v25  ;;  %v3888_v11 = vadd.f32 %v3882_v38, %v15252_v13 }
 0x428   : > { %v3858_v45 = vpop.f32.mrf.mxu1 }
 0x429   : > { %5713 = vmatpush.bf16.msrb.mxu3 %v13390_v10  ;;  %v3904_v44 = vrot.slane %v3898_v55, 2  ;;  %v3905_v27 = vrot.slane %v3898_v55, 4  ;;  %v3906_v35 = vrot.slane %v3898_v55, 6  ;;  %v3922_v36 = vsel %vm771_vm1, %v3898_v55, -inf  ;;  %v3822_v17 = vpop.f32.mrf.mxu3  ;;  %v13434_v55 = vld [vmem:[#allocation10 + $0x588] sm:$0xff] }
 0x42a   : > { %v3923_v0 = vrot.slane %v3922_v36, 4  ;;  %6190 = vmatpush.bf16.msrb.mxu1 %v13437_v19  ;;  %v3883_v20 = vadd.f32 %v3874_v32, %v3788_v52  ;;  %v3840_v24 = vpop.f32.mrf.mxu0  ;;  %v3894_v58 = vmax.f32 %v3888_v11, 0.0 }
 0x42b   : > { %v3929_v48 = vsel %vm771_vm1, %v3904_v44, -inf  ;;  %v3936_v26 = vsel %vm771_vm1, %v3905_v27, -inf  ;;  %v3943_v43 = vsel %vm771_vm1, %v3906_v35, -inf  ;;  %v13386_v44 = vld [vmem:[#allocation10 + $0x408] sm:$0xff]  ;;  %v3773_v27 = vadd.f32 %v16028_v33, %v15999_v54 }
 0x42c   : > { %v3924_v62 = vmax.f32 %v3922_v36, %v3923_v0  ;;  %v3930_v6 = vrot.slane %v3929_v48, 4  ;;  %v3937_v15 = vrot.slane %v3936_v26, 4  ;;  %v3944_v22 = vrot.slane %v3943_v43, 4 }
 0x42d   : > { %5714 = vmatpush.bf16.msrb.mxu3 %v13389_v40  ;;  %v3889_v1 = vadd.f32 %v3883_v20, %v15254_v8  ;;  %v3841_v0 = vadd.f32 %v3840_v24, %v3822_v17  ;;  %v13385_v17 = vld [vmem:[#allocation10 + $0x400] sm:$0xff] }
 0x42e   : > { %v3925_v59 = vrot.slane %v3924_v62, 2  ;;  %v3931_v23 = vmax.f32 %v3929_v48, %v3930_v6  ;;  %v3938_v10 = vmax.f32 %v3936_v26, %v3937_v15  ;;  %v3945_v39 = vmax.f32 %v3943_v43, %v3944_v22  ;;  %6191 = vmatpush.bf16.msrb.mxu1 %v13436_v42  ;;  %v3876_v53 = vpop.f32.mrf.mxu2 }
 0x42f   : > { %v3895_v29 = vmax.f32 %v3889_v1, 0.0  ;;  %v3755_v42 = vadd.f32 %v16026_v28, %v3737_v7  ;;  %v3791_v28 = vadd.f32 %v16032_v9, %v3773_v27  ;;  %v5363_v7 = vrot.slane %v16004_v4, 1 }
 0x430   : > { %v3926_v25 = vmax.f32 %v3924_v62, %v3925_v59  ;;  %v3932_v46 = vrot.slane %v3931_v23, 2  ;;  %v3939_v41 = vrot.slane %v3938_v10, 2  ;;  %v3946_v47 = vrot.slane %v3945_v39, 2  ;;  %v3860_v18 = vpop.f32.mrf.mxu1  ;;  %v13433_v59 = vld [vmem:[#allocation10 + $0x580] sm:$0xff] }
 0x431   : > { %5715 = vmatpush.bf16.msrb.mxu3 %v13388_v14  ;;  %v3899_v60 = vmax.f32 %v3894_v58, %v3895_v29  ;;  %v3824_v30 = vpop.f32.mrf.mxu3  ;;  %v3877_v14 = vadd.f32 %v3876_v53, %v3858_v45  ;;  %v3884_v24 = vadd.f32 %v3841_v0, %v3755_v42  ;;  %v13424_v45 = vld [vmem:[#allocation10 + $0x538] sm:$0xff]  ;;  %v13298_v53 = vld [vmem:[#allocation10 + $0x148] sm:$0xff] }
 0x432   : > { %v3933_v19 = vmax.f32 %v3931_v23, %v3932_v46  ;;  %v3940_v57 = vmax.f32 %v3938_v10, %v3939_v41  ;;  %6192 = vmatpush.bf16.msrb.mxu1 %v13435_v51  ;;  %v3927_v35 = vrot.slane %v3926_v25, 1  ;;  %v3842_v3 = vpop.f32.mrf.mxu0  ;;  %v3947_v26 = vmax.f32 %v3945_v39, %v3946_v47  ;;  %v13347_v23 = vld [vmem:[#allocation10 + $0x2d0] sm:$0xff]  ;;  %v13472_v51 = vld [vmem:[#allocation10 + $0x6b8] sm:$0xff]  ;;  %5255 = vmatpush.bf16.msra.mxu2 %v13298_v53 }
 0x433   : > { %v3907_v40 = vrot.slane %v3899_v60, 2  ;;  %v3908_v32 = vrot.slane %v3899_v60, 4  ;;  %v3909_v52 = vrot.slane %v3899_v60, 6  ;;  %v3950_v38 = vsel %vm771_vm1, %v3899_v60, -inf  ;;  %4888 = vmatpush.bf16.msrb.mxu0 %v13347_v23  ;;  %v13423_v47 = vld [vmem:[#allocation10 + $0x530] sm:$0xff]  ;;  %v13384_v0 = vld [vmem:[#allocation10 + $0x3f8] sm:$0xff] }
 0x434   : > { %v3934_v36 = vrot.slane %v3933_v19, 1  ;;  %v3951_v11 = vrot.slane %v3950_v38, 4  ;;  %v3941_v48 = vrot.slane %v3940_v57, 1  ;;  %v3928_v22 = vmax.f32 %v3926_v25, %v3927_v35  ;;  %v13421_v23 = vld [vmem:[#allocation10 + $0x520] sm:$0xff] }
 0x435   : > { %5716 = vmatpush.bf16.msrb.mxu3 %v13387_v50  ;;  %v3957_v20 = vsel %vm771_vm1, %v3907_v40, -inf  ;;  %v3964_v21 = vsel %vm771_vm1, %v3908_v32, -inf  ;;  %v3971_v43 = vsel %vm771_vm1, %v3909_v52, -inf  ;;  %v3948_v10 = vrot.slane %v3947_v26, 1 }
 0x436   : > { %6193 = vmatpush.bf16.msrb.mxu1 %v13434_v55  ;;  %v3878_v54 = vpop.f32.mrf.mxu2  ;;  %v3935_v33 = vmax.f32 %v3933_v19, %v3934_v36  ;;  %v3952_v62 = vmax.f32 %v3950_v38, %v3951_v11  ;;  %v3958_v6 = vrot.slane %v3957_v20, 4  ;;  %v3965_v15 = vrot.slane %v3964_v21, 4  ;;  %v13346_v19 = vld [vmem:[#allocation10 + $0x2c8] sm:$0xff]  ;;  %v13471_v38 = vld [vmem:[#allocation10 + $0x6b0] sm:$0xff] }
 0x437   : > { %v3972_v1 = vrot.slane %v3971_v43, 4  ;;  %v3885_v39 = vadd.f32 %v3877_v14, %v3791_v28  ;;  %v3942_v29 = vmax.f32 %v3940_v57, %v3941_v48  ;;  %v3890_v25 = vadd.f32 %v3884_v24, %v15252_v13  ;;  %4889 = vmatpush.bf16.msrb.mxu0 %v13346_v19  ;;  %v13345_v48 = vld [vmem:[#allocation10 + $0x2c0] sm:$0xff]  ;;  %v13382_v19 = vld [vmem:[#allocation10 + $0x3e8] sm:$0xff] }
 0x438   : > { %v3953_v12 = vrot.slane %v3952_v62, 2  ;;  %v3959_v5 = vmax.f32 %v3957_v20, %v3958_v6  ;;  %v3966_v58 = vmax.f32 %v3964_v21, %v3965_v15  ;;  %v4007_v50 = vpack.c.bf16 %v3935_v33, %v3935_v33  ;;  %v4853_v40 = vpop.f32.mrf.mxu1  ;;  %v13288_v6 = vld [vmem:[#allocation10 + $0xf8] sm:$0xff] }
 0x439   : > { %5717 = vmatpush.bf16.msrb.mxu3 %v13386_v44  ;;  %v5839_v60 = vrot.slane %v16012_v56, 1  ;;  %v4006_v32 = vpack.c.bf16 %v3928_v22, %v3928_v22  ;;  %v3973_v52 = vmax.f32 %v3971_v43, %v3972_v1  ;;  %v13297_v44 = vld [vmem:[#allocation10 + $0x140] sm:$0xff]  ;;  %v4827_v27 = vpop.f32.mrf.mxu3  ;;  %v3896_v13 = vmax.f32 %v3890_v25, 0.0  ;;  %v13422_v43 = vld [vmem:[#allocation10 + $0x528] sm:$0xff] }
 0x43a   : > { %v3954_v46 = vmax.f32 %v3952_v62, %v3953_v12  ;;  %v3960_v41 = vrot.slane %v3959_v5, 2  ;;  %6194 = vmatpush.bf16.msrb.mxu1 %v13433_v59  ;;  %v3967_v9 = vrot.slane %v3966_v58, 2  ;;  %v4840_v55 = vpop.f32.mrf.mxu0  ;;  %v3891_v36 = vadd.f32 %v3885_v39, %v15254_v8  ;;  %5256 = vmatpush.bf16.msra.mxu2 %v13297_v44  ;;  %v13470_v8 = vld [vmem:[#allocation10 + $0x6a8] sm:$0xff] }
 0x43b   : > { %v4841_v3 = vadd.f32 %v4840_v55, %v4827_v27  ;;  %v16072_v42 = vmax.f32 %v3947_v26, %v3948_v10  ;;  %v4008_v11 = vpack.c.bf16 %v3942_v29, %v3942_v29  ;;  %v4278_v20 = vperm.slane %v4007_v50, 0  ;;  %v13383_v26 = vld [vmem:[#allocation10 + $0x3f0] sm:$0xff]  ;;  %4890 = vmatpush.bf16.msrb.mxu0 %v13345_v48  ;;  %v13469_v50 = vld [vmem:[#allocation10 + $0x6a0] sm:$0xff]  ;;  %v13420_v27 = vld [vmem:[#allocation10 + $0x518] sm:$0xff] }
 0x43c   : > { %v3961_v57 = vmax.f32 %v3959_v5, %v3960_v41  ;;  %v3955_v35 = vrot.slane %v3954_v46, 1  ;;  %v3968_v21 = vmax.f32 %v3966_v58, %v3967_v9  ;;  %v3897_v30 = vmax.f32 %v3891_v36, 0.0 }
 0x43d   : > { %5718 = vmatpush.bf16.msrb.mxu3 %v13385_v17  ;;  %6195 = vmatmul.bf16.vlgmr.msrb.gmra.mxu1 %v5839_v60  ;;  %v4854_v14 = vadd.f32 %v4853_v40, %v4841_v3  ;;  %v4277_v54 = vperm.slane %v4006_v32, 0  ;;  %v3974_v62 = vrot.slane %v3973_v52, 2  ;;  %v4009_v24 = vpack.c.bf16 %v16072_v42, %v16072_v42  ;;  %v13468_v3 = vld [vmem:[#allocation10 + $0x698] sm:$0xff] }
 0x43e   : > { %6637 = vmatpush.bf16.msra.mxu1 %v13472_v51  ;;  %v4866_v18 = vpop.f32.mrf.mxu2  ;;  %v3962_v33 = vrot.slane %v3961_v57, 1  ;;  %v3956_v15 = vmax.f32 %v3954_v46, %v3955_v35  ;;  %v3900_v28 = vmax.f32 %v3896_v13, %v3897_v30  ;;  %5698 = vmatpush.bf16.msrb.mxu2 %v13384_v0  ;;  %v4279_v12 = vperm.slane %v4008_v11, 0  ;;  %v13287_v46 = vld [vmem:[#allocation10 + $0xf0] sm:$0xff] }
 0x43f   : > { %v16074_v22 = vadd.f32 %v4866_v18, %v4854_v14  ;;  %v4290_v5 = vunpack.c.l.b16 %v4278_v20  ;;  %v3969_v58 = vrot.slane %v3968_v21, 1  ;;  %v3975_v53 = vmax.f32 %v3973_v52, %v3974_v62  ;;  %5223 = vmatpush.bf16.msra.mxu0 %v13288_v6  ;;  %v13286_v18 = vld [vmem:[#allocation10 + $0xe8] sm:$0xff] }
 0x440   : > { %5719 = vmatmul.bf16.vlgmr.msrb.gmra.mxu3 %v5363_v7  ;;  %v3910_v1 = vrot.slane %v3900_v28, 2  ;;  %v3911_v17 = vrot.slane %v3900_v28, 4  ;;  %v3912_v59 = vrot.slane %v3900_v28, 6  ;;  %v4855_v39 = vpop.f32.mrf.mxu1  ;;  %v3963_v51 = vmax.f32 %v3961_v57, %v3962_v33 }
 0x441   : > { %6161 = vmatpush.bf16.msra.mxu3 %v13424_v45  ;;  %v4289_v45 = vunpack.c.l.b16 %v4277_v54  ;;  %v3978_v29 = vsel %vm771_vm1, %v3900_v28, -inf  ;;  %v4829_v41 = vpop.f32.mrf.mxu3  ;;  %v4010_v9 = vpack.c.bf16 %v3956_v15, %v3956_v15  ;;  %v4291_v55 = vunpack.c.l.b16 %v4279_v12  ;;  %v13467_v12 = vld [vmem:[#allocation10 + $0x690] sm:$0xff] }
 0x442   : > { %6638 = vmatpush.bf16.msra.mxu1 %v13471_v38  ;;  %v4842_v10 = vpop.f32.mrf.mxu0  ;;  %v3979_v25 = vrot.slane %v3978_v29, 4  ;;  %v3985_v7 = vsel %vm771_vm1, %v3910_v1, -inf  ;;  %v3992_v60 = vsel %vm771_vm1, %v3911_v17, -inf  ;;  %5699 = vmatpush.bf16.msrb.mxu2 %v13383_v26  ;;  %v3970_v57 = vmax.f32 %v3968_v21, %v3969_v58  ;;  %v13381_v21 = vld [vmem:[#allocation10 + $0x3e0] sm:$0xff] }
 0x443   : > { %v4301_v40 = vsel %vm4054_vm8, %v4290_v5, %v4289_v45  ;;  %v3986_v32 = vrot.slane %v3985_v7, 4  ;;  %v3993_v38 = vrot.slane %v3992_v60, 4  ;;  %v3999_v44 = vsel %vm771_vm1, %v3912_v59, -inf  ;;  %5224 = vmatpush.bf16.msra.mxu0 %v13287_v46  ;;  %v13285_v5 = vld [vmem:[#allocation10 + $0xe0] sm:$0xff] }
 0x444   : > { %v3980_v52 = vmax.f32 %v3978_v29, %v3979_v25  ;;  %v3976_v35 = vrot.slane %v3975_v53, 1  ;;  %v4011_v13 = vpack.c.bf16 %v3963_v51, %v3963_v51  ;;  %v4000_v0 = vrot.slane %v3999_v44, 4 }
 0x445   : > { %6162 = vmatpush.bf16.msra.mxu3 %v13423_v47  ;;  %v3987_v36 = vmax.f32 %v3985_v7, %v3986_v32  ;;  %v4280_v42 = vperm.slane %v4009_v24, 0  ;;  %v4281_v11 = vperm.slane %v4010_v9, 0  ;;  %v3994_v30 = vmax.f32 %v3992_v60, %v3993_v38  ;;  %v13466_v7 = vld [vmem:[#allocation10 + $0x688] sm:$0xff]  ;;  %v13284_v60 = vld [vmem:[#allocation10 + $0xd8] sm:$0xff] }
 0x446   : > { %6639 = vmatpush.bf16.msra.mxu1 %v13470_v8  ;;  %v4868_v47 = vpop.f32.mrf.mxu2  ;;  %v3981_v20 = vrot.slane %v3980_v52, 2  ;;  %5700 = vmatpush.bf16.msrb.mxu2 %v13382_v19  ;;  %v4302_v14 = vsel %vm4056_vm9, %v4291_v55, %v4301_v40  ;;  %v4012_v54 = vpack.c.bf16 %v3970_v57, %v3970_v57  ;;  %v13419_v8 = vld [vmem:[#allocation10 + $0x510] sm:$0xff]  ;;  %v3977_v15 = vmax.f32 %v3975_v53, %v3976_v35  ;;  %v13417_v35 = vld [vmem:[#allocation10 + $0x500] sm:$0xff] }
 0x447   : > { %v3988_v48 = vrot.slane %v3987_v36, 2  ;;  %v3995_v62 = vrot.slane %v3994_v30, 2  ;;  %v4282_v28 = vperm.slane %v4011_v13, 0  ;;  %5225 = vmatpush.bf16.msra.mxu0 %v13286_v18  ;;  %v4292_v58 = vunpack.c.l.b16 %v4280_v42  ;;  %v13379_v40 = vld [vmem:[#allocation10 + $0x3d0] sm:$0xff]  ;;  %v13465_v42 = vld [vmem:[#allocation10 + $0x680] sm:$0xff] }
 0x448   : > { %v3982_v33 = vmax.f32 %v3980_v52, %v3981_v20  ;;  %v16084_v6 = vpop.f32.mrf.mxu1  ;;  %v4293_v1 = vunpack.c.l.b16 %v4281_v11  ;;  %v4283_v51 = vperm.slane %v4012_v54, 0  ;;  %v4013_v46 = vpack.c.bf16 %v3977_v15, %v3977_v15  ;;  %v13283_v11 = vld [vmem:[#allocation10 + $0xd0] sm:$0xff]  ;;  %v13378_v54 = vld [vmem:[#allocation10 + $0x3c8] sm:$0xff] }
 0x449   : > { %6163 = vmatpush.bf16.msra.mxu3 %v13422_v43  ;;  %v4001_v43 = vmax.f32 %v3999_v44, %v4000_v0  ;;  %v3989_v26 = vmax.f32 %v3987_v36, %v3988_v48  ;;  %v3996_v59 = vmax.f32 %v3994_v30, %v3995_v62  ;;  %v4303_v45 = vsel %vm4058_vm10, %v4292_v58, %v4302_v14  ;;  %v13456_v30 = vld [vmem:[#allocation10 + $0x638] sm:$0xff]  ;;  %v13503_v58 = vld [vmem:[#allocation10 + $0x7b0] sm:$0xff] }
 0x44a   : > { %6640 = vmatpush.bf16.msra.mxu1 %v13469_v50  ;;  %v3983_v17 = vrot.slane %v3982_v33, 1  ;;  %5701 = vmatpush.bf16.msrb.mxu2 %v13381_v21  ;;  %v13418_v50 = vld [vmem:[#allocation10 + $0x508] sm:$0xff]  ;;  %v4294_v41 = vunpack.c.l.b16 %v4282_v28  ;;  %v4304_v19 = vsel %vm4060_vm11, %v4293_v1, %v4303_v45  ;;  %v4295_v38 = vunpack.c.l.b16 %v4283_v51  ;;  %v13504_v21 = vld [vmem:[#allocation10 + $0x7b8] sm:$0xff]  ;;  %v13281_v51 = vld [vmem:[#allocation10 + $0xc0] sm:$0xff] }
 0x44b   : > { %v4002_v24 = vrot.slane %v4001_v43, 2  ;;  %v3990_v10 = vrot.slane %v3989_v26, 1  ;;  %v3997_v53 = vrot.slane %v3996_v59, 1  ;;  %5226 = vmatpush.bf16.msra.mxu0 %v13285_v5  ;;  %v4284_v36 = vperm.slane %v4013_v46, 0  ;;  %v13455_v5 = vld [vmem:[#allocation10 + $0x630] sm:$0xff]  ;;  %v13416_v45 = vld [vmem:[#allocation10 + $0x4f8] sm:$0xff] }
 0x44c   : > { %v3984_v29 = vmax.f32 %v3982_v33, %v3983_v17  ;;  %v4305_v0 = vsel %vm4062_vm12, %v4294_v41, %v4304_v19  ;;  %v13368_v46 = vld [vmem:[#allocation10 + $0x378] sm:$0xff]  ;;  %v13415_v41 = vld [vmem:[#allocation10 + $0x4f0] sm:$0xff] }
 0x44d   : > { %6164 = vmatpush.bf16.msra.mxu3 %v13421_v23  ;;  %v13380_v23 = vld [vmem:[#allocation10 + $0x3d8] sm:$0xff]  ;;  %v4003_v39 = vmax.f32 %v4001_v43, %v4002_v24  ;;  %v3991_v9 = vmax.f32 %v3989_v26, %v3990_v10  ;;  %v3998_v47 = vmax.f32 %v3996_v59, %v3997_v53  ;;  %v4306_v62 = vsel %vm4064_vm13, %v4295_v38, %v4305_v0  ;;  %v13282_v24 = vld [vmem:[#allocation10 + $0xc8] sm:$0xff]  ;;  %v13377_v59 = vld [vmem:[#allocation10 + $0x3c0] sm:$0xff] }
 0x44e   : > { %6641 = vmatpush.bf16.msra.mxu1 %v13468_v3  ;;  %v4014_v55 = vpack.c.bf16 %v3984_v29, %v3984_v29  ;;  %5702 = vmatpush.bf16.msrb.mxu2 %v13380_v23  ;;  %v16088_v32 = vpop.f32.mrf.mxu2  ;;  %v5837_v26 = vrot.slane %v15930_v34, 1  ;;  %v13454_v29 = vld [vmem:[#allocation10 + $0x628] sm:$0xff]  ;;  %v13452_v19 = vld [vmem:[#allocation10 + $0x618] sm:$0xff]  ;;  %v13365_v38 = vld [vmem:[#allocation10 + $0x360] sm:$0xff] }
 0x44f   : > { %v4004_v25 = vrot.slane %v4003_v39, 1  ;;  %v4015_v52 = vpack.c.bf16 %v3991_v9, %v3991_v9  ;;  %v4016_v44 = vpack.c.bf16 %v3998_v47, %v3998_v47  ;;  %5227 = vmatpush.bf16.msra.mxu0 %v13284_v60  ;;  %v13502_v53 = vld [vmem:[#allocation10 + $0x7a8] sm:$0xff]  ;;  %v13453_v9 = vld [vmem:[#allocation10 + $0x620] sm:$0xff]  ;;  %v13500_v47 = vld [vmem:[#allocation10 + $0x798] sm:$0xff] }
 0x450   : > { %v5195_v13 = vpop.f32.mrf.mxu1  ;;  %v13414_v60 = vld [vmem:[#allocation10 + $0x4e8] sm:$0xff]  ;;  %v13411_v0 = vld [vmem:[#allocation10 + $0x4d0] sm:$0xff] }
 0x451   : > { %6165 = vmatpush.bf16.msra.mxu3 %v13420_v27  ;;  %v4005_v57 = vmax.f32 %v4003_v39, %v4004_v25  ;;  %v4285_v27 = vperm.slane %v4014_v55, 0  ;;  %v4286_v18 = vperm.slane %v4015_v52, 0  ;;  %v4287_v20 = vperm.slane %v4016_v44, 0  ;;  %v13501_v25 = vld [vmem:[#allocation10 + $0x7a0] sm:$0xff]  ;;  %v13366_v55 = vld [vmem:[#allocation10 + $0x368] sm:$0xff]  ;;  %v13499_v52 = vld [vmem:[#allocation10 + $0x790] sm:$0xff] }
 0x452   : > { %6642 = vmatpush.bf16.msra.mxu1 %v13467_v12  ;;  %5703 = vmatpush.bf16.msrb.mxu2 %v13379_v40  ;;  %v6313_v12 = vrot.slane %v15735_v37, 2  ;;  %v13413_v40 = vld [vmem:[#allocation10 + $0x4e0] sm:$0xff]  ;;  %v13412_v44 = vld [vmem:[#allocation10 + $0x4d8] sm:$0xff]  ;;  %v13498_v13 = vld [vmem:[#allocation10 + $0x788] sm:$0xff] }
 0x453   : > { %v4017_v3 = vpack.c.bf16 %v4005_v57, %v4005_v57  ;;  %v4297_v43 = vunpack.c.l.b16 %v4285_v27  ;;  %v4298_v14 = vunpack.c.l.b16 %v4286_v18  ;;  %v4299_v33 = vunpack.c.l.b16 %v4287_v20  ;;  %5228 = vmatpush.bf16.msra.mxu0 %v13283_v11  ;;  %v13451_v57 = vld [vmem:[#allocation10 + $0x610] sm:$0xff]  ;;  %v13497_v18 = vld [vmem:[#allocation10 + $0x780] sm:$0xff]  ;;  %v13488_v11 = vld [vmem:[#allocation10 + $0x738] sm:$0xff] }
 0x454   : > { %v5362_v27 = vrot.slane %v15898_v61, 1  ;;  %v13536_v20 = vld [vmem:[#allocation10 + $0x8b8] sm:$0xff] }
 0x455   : > { %6166 = vmatpush.bf16.msra.mxu3 %v13419_v8  ;;  %v4288_v48 = vperm.slane %v4017_v3, 0  ;;  %v4296_v8 = vunpack.c.l.b16 %v4284_v36  ;;  %v4308_v28 = vsel %vm4054_vm8, %v4298_v14, %v4297_v43  ;;  %v13364_v36 = vld [vmem:[#allocation10 + $0x358] sm:$0xff]  ;;  %v13449_v3 = vld [vmem:[#allocation10 + $0x600] sm:$0xff]  ;;  %v13487_v43 = vld [vmem:[#allocation10 + $0x730] sm:$0xff]  ;;  %v6787_v14 = vrot.slane %v15927_v16, 2 }
 0x456   : > { %6643 = vmatpush.bf16.msra.mxu1 %v13466_v7  ;;  %v4309_v1 = vsel %vm4056_vm9, %v4299_v33, %v4308_v28  ;;  %v5208_v17 = vpop.f32.mrf.mxu2  ;;  %5704 = vmatpush.bf16.msrb.mxu2 %v13378_v54  ;;  %v13367_v7 = vld [vmem:[#allocation10 + $0x370] sm:$0xff]  ;;  %v13409_v33 = vld [vmem:[#allocation10 + $0x4c0] sm:$0xff]  ;;  %v13486_v28 = vld [vmem:[#allocation10 + $0x728] sm:$0xff] }
 0x457   : > { %v4300_v15 = vunpack.c.l.b16 %v4288_v48  ;;  %v4307_v23 = vsel %vm4066_vm14, %v4296_v8, %v4306_v62  ;;  %5229 = vmatpush.bf16.msra.mxu0 %v13282_v24  ;;  %v13362_v48 = vld [vmem:[#allocation10 + $0x348] sm:$0xff]  ;;  %v13535_v54 = vld [vmem:[#allocation10 + $0x8b0] sm:$0xff]  ;;  %v13448_v62 = vld [vmem:[#allocation10 + $0x5f8] sm:$0xff] }
 0x458   : > { %v13400_v24 = vld [vmem:[#allocation10 + $0x478] sm:$0xff]  ;;  %v13533_v17 = vld [vmem:[#allocation10 + $0x8a0] sm:$0xff] }
 0x459   : > { %6167 = vmatpush.bf16.msra.mxu3 %v13418_v50  ;;  %v4310_v10 = vsel %vm4058_vm10, %v4300_v15, %v4309_v1  ;;  %v13361_v15 = vld [vmem:[#allocation10 + $0x340] sm:$0xff]  ;;  %v5360_v1 = vrot.slane %v16853_v2, 1 }
 0x45a   : > { %6644 = vmatpush.bf16.msra.mxu1 %v13465_v42  ;;  %v16098_v39 = vpack.c.b16 %v4310_v10, %v4307_v23  ;;  %5705 = vmatpush.bf16.msrb.mxu2 %v13377_v59  ;;  %v13363_v42 = vld [vmem:[#allocation10 + $0x350] sm:$0xff]  ;;  %v13446_v23 = vld [vmem:[#allocation10 + $0x5e8] sm:$0xff] }
 0x45b   : > { %5230 = vmatpush.bf16.msra.mxu0 %v13281_v51  ;;  %v13399_v59 = vld [vmem:[#allocation10 + $0x470] sm:$0xff] }
 0x45c   : > { %v16101_v50 = vshrl.u32 %v16098_v39, 16  ;;  %5257 = vmatmul.bf16.vlgmr.msra.gmra.mxu2 %v16098_v39 }
 0x45d   : > { %6168 = vmatpush.bf16.msra.mxu3 %v13417_v35  ;;  %6645 = vmatmul.bf16.vlgmr.msra.gmra.mxu1 %v6313_v12  ;;  %v13450_v35 = vld [vmem:[#allocation10 + $0x608] sm:$0xff]  ;;  %v13447_v12 = vld [vmem:[#allocation10 + $0x5f0] sm:$0xff] }
 0x45e   : > { %7087 = vmatpush.bf16.msrb.mxu1 %v13504_v21  ;;  %4891 = vmatmul.bf16.vlgmr.msrb.gmra.mxu0 %v16101_v50  ;;  %v6311_v21 = vrot.slane %v16852_v31, 2 }
 0x45f   : > { %6148 = vmatpush.bf16.msra.mxu2 %v13416_v45  ;;  %5672 = vmatpush.bf16.msrb.mxu0 %v13368_v46  ;;  %v13484_v45 = vld [vmem:[#allocation10 + $0x718] sm:$0xff] }
 0x460   : > { %6169 = vmatmul.bf16.vlgmr.msra.gmra.mxu3 %v5837_v26  ;;  %v13534_v26 = vld [vmem:[#allocation10 + $0x8a8] sm:$0xff] }
 0x461   : > { %6611 = vmatpush.bf16.msrb.mxu3 %v13456_v30  ;;  %v13410_v30 = vld [vmem:[#allocation10 + $0x4c8] sm:$0xff] }
 0x462   : > { %7088 = vmatpush.bf16.msrb.mxu1 %v13503_v58  ;;  %v13485_v58 = vld [vmem:[#allocation10 + $0x720] sm:$0xff] }
 0x463   : > { %6149 = vmatpush.bf16.msra.mxu2 %v13415_v41  ;;  %5673 = vmatpush.bf16.msrb.mxu0 %v13367_v7  ;;  %v13445_v41 = vld [vmem:[#allocation10 + $0x5e0] sm:$0xff] }
 0x464   : > { %v13397_v7 = vld [vmem:[#allocation10 + $0x460] sm:$0xff] }
 0x465   : > { %6612 = vmatpush.bf16.msrb.mxu3 %v13455_v5  ;;  %v5836_v5 = vrot.slane %v15933_v49, 1 }
 0x466   : > { %7089 = vmatpush.bf16.msrb.mxu1 %v13502_v53  ;;  %v13398_v53 = vld [vmem:[#allocation10 + $0x468] sm:$0xff] }
 0x467   : > { %6150 = vmatpush.bf16.msra.mxu2 %v13414_v60  ;;  %5674 = vmatpush.bf16.msrb.mxu0 %v13366_v55  ;;  %v13444_v60 = vld [vmem:[#allocation10 + $0x5d8] sm:$0xff] }
 0x469   : > { %6613 = vmatpush.bf16.msrb.mxu3 %v13454_v29  ;;  %v13532_v29 = vld [vmem:[#allocation10 + $0x898] sm:$0xff] }
 0x46a   : > { %7090 = vmatpush.bf16.msrb.mxu1 %v13501_v25  ;;  %v13531_v25 = vld [vmem:[#allocation10 + $0x890] sm:$0xff] }
 0x46b   : > { %6151 = vmatpush.bf16.msra.mxu2 %v13413_v40  ;;  %5675 = vmatpush.bf16.msrb.mxu0 %v13365_v38  ;;  %v13530_v40 = vld [vmem:[#allocation10 + $0x888] sm:$0xff]  ;;  %v13529_v38 = vld [vmem:[#allocation10 + $0x880] sm:$0xff] }
 0x46c   : > { %5706 = vmatmul.bf16.vlgmr.msrb.gmra.mxu2 %v5362_v27  ;;  %v13520_v27 = vld [vmem:[#allocation10 + $0x838] sm:$0xff] }
 0x46d   : > { %6614 = vmatpush.bf16.msrb.mxu3 %v13453_v9  ;;  %v13483_v9 = vld [vmem:[#allocation10 + $0x710] sm:$0xff] }
 0x46e   : > { %7091 = vmatpush.bf16.msrb.mxu1 %v13500_v47  ;;  %5231 = vmatmul.bf16.vlgmr.msra.gmra.mxu0 %v15898_v61  ;;  %v13482_v47 = vld [vmem:[#allocation10 + $0x708] sm:$0xff] }
 0x46f   : > { %6152 = vmatpush.bf16.msra.mxu2 %v13412_v44  ;;  %5676 = vmatpush.bf16.msrb.mxu0 %v13364_v36  ;;  %v13395_v44 = vld [vmem:[#allocation10 + $0x450] sm:$0xff] }
 0x471   : > { %6615 = vmatpush.bf16.msrb.mxu3 %v13452_v19 }
 0x472   : > { %7092 = vmatpush.bf16.msrb.mxu1 %v13499_v52  ;;  %v13481_v52 = vld [vmem:[#allocation10 + $0x700] sm:$0xff] }
 0x473   : > { %6153 = vmatpush.bf16.msra.mxu2 %v13411_v0  ;;  %5677 = vmatpush.bf16.msrb.mxu0 %v13363_v42  ;;  %v6791_v42 = vrot.slane %v16012_v56, 2 }
 0x475   : > { %6616 = vmatpush.bf16.msrb.mxu3 %v13451_v57  ;;  %v13443_v57 = vld [vmem:[#allocation10 + $0x5d0] sm:$0xff] }
 0x476   : > { %7093 = vmatpush.bf16.msrb.mxu1 %v13498_v13  ;;  %v13442_v13 = vld [vmem:[#allocation10 + $0x5c8] sm:$0xff] }
 0x477   : > { %6154 = vmatpush.bf16.msra.mxu2 %v13410_v30  ;;  %5678 = vmatpush.bf16.msrb.mxu0 %v13362_v48  ;;  %v13441_v30 = vld [vmem:[#allocation10 + $0x5c0] sm:$0xff] }
 0x478   : > { %v13393_v48 = vld [vmem:[#allocation10 + $0x440] sm:$0xff] }
 0x479   : > { %6617 = vmatpush.bf16.msrb.mxu3 %v13450_v35  ;;  %v13568_v35 = vld [vmem:[#allocation10 + $0x9b8] sm:$0xff] }
 0x47a   : > { %7094 = vmatpush.bf16.msrb.mxu1 %v13497_v18  ;;  %v16109_v8 = vpop.f32.mrf.mxu1  ;;  %v13394_v18 = vld [vmem:[#allocation10 + $0x448] sm:$0xff] }
 0x47b   : > { %6155 = vmatpush.bf16.msra.mxu2 %v13409_v33  ;;  %5679 = vmatpush.bf16.msrb.mxu0 %v13361_v15  ;;  %v13479_v33 = vld [vmem:[#allocation10 + $0x6f0] sm:$0xff] }
 0x47d   : > { %6618 = vmatpush.bf16.msrb.mxu3 %v13449_v3  ;;  %7095 = vmatmul.bf16.vlgmr.msrb.gmra.mxu1 %v6787_v14  ;;  %v6315_v3 = vrot.slane %v16004_v4, 2  ;;  %v13566_v14 = vld [vmem:[#allocation10 + $0x9a8] sm:$0xff] }
 0x47e   : > { %7139 = vmatpush.bf16.msra.mxu1 %v13536_v20  ;;  %6156 = vmatmul.bf16.vlgmr.msra.gmra.mxu2 %v5836_v5  ;;  %v13567_v20 = vld [vmem:[#allocation10 + $0x9b0] sm:$0xff] }
 0x47f   : > { %6200 = vmatpush.bf16.msrb.mxu2 %v13448_v62  ;;  %5724 = vmatpush.bf16.msra.mxu0 %v13400_v24  ;;  %v5840_v62 = vrot.slane %v16101_v50, 1  ;;  %v13517_v24 = vld [vmem:[#allocation10 + $0x820] sm:$0xff]  ;;  %v13431_v5 = vld [vmem:[#allocation10 + $0x570] sm:$0xff] }
 0x480   : > { %6619 = vmatmul.bf16.vlgmr.msrb.gmra.mxu3 %v6311_v21  ;;  %5680 = vmatmul.bf16.vlgmr.msrb.gmra.mxu0 %v5360_v1  ;;  %v13480_v21 = vld [vmem:[#allocation10 + $0x6f8] sm:$0xff] }
 0x481   : > { %6663 = vmatpush.bf16.msra.mxu3 %v13488_v11  ;;  %v13519_v11 = vld [vmem:[#allocation10 + $0x830] sm:$0xff]  ;;  %v13516_v1 = vld [vmem:[#allocation10 + $0x818] sm:$0xff] }
 0x482   : > { %7140 = vmatpush.bf16.msra.mxu1 %v13535_v54  ;;  %v5247_v10 = vpop.f32.mrf.mxu1  ;;  %v4879_v51 = vpop.f32.mrf.mxu3  ;;  %v13432_v54 = vld [vmem:[#allocation10 + $0x578] sm:$0xff] }
 0x483   : > { %6201 = vmatpush.bf16.msrb.mxu2 %v13447_v12  ;;  %5725 = vmatpush.bf16.msra.mxu0 %v13399_v59  ;;  %v16114_v46 = vadd.f32 %v4879_v51, %v16074_v22  ;;  %v13396_v22 = vld [vmem:[#allocation10 + $0x458] sm:$0xff]  ;;  %v13565_v12 = vld [vmem:[#allocation10 + $0x9a0] sm:$0xff]  ;;  %v13430_v59 = vld [vmem:[#allocation10 + $0x568] sm:$0xff] }
 0x484   : > { %v13515_v51 = vld [vmem:[#allocation10 + $0x810] sm:$0xff] }
 0x485   : > { %6664 = vmatpush.bf16.msra.mxu3 %v13487_v43  ;;  %v13518_v43 = vld [vmem:[#allocation10 + $0x828] sm:$0xff] }
 0x486   : > { %7141 = vmatpush.bf16.msra.mxu1 %v13534_v26 }
 0x487   : > { %6202 = vmatpush.bf16.msrb.mxu2 %v13446_v23  ;;  %5726 = vmatpush.bf16.msra.mxu0 %v13398_v53  ;;  %v13477_v23 = vld [vmem:[#allocation10 + $0x6e0] sm:$0xff] }
 0x488   : > { %v13429_v53 = vld [vmem:[#allocation10 + $0x560] sm:$0xff] }
 0x489   : > { %6665 = vmatpush.bf16.msra.mxu3 %v13486_v28  ;;  %v5364_v28 = vrot.slane %v16098_v39, 1 }
 0x48a   : > { %7142 = vmatpush.bf16.msra.mxu1 %v13533_v17  ;;  %v16116_v19 = vpop.f32.mrf.mxu1  ;;  %v4881_v55 = vpop.f32.mrf.mxu3  ;;  %v13564_v17 = vld [vmem:[#allocation10 + $0x998] sm:$0xff] }
 0x48b   : > { %6203 = vmatpush.bf16.msrb.mxu2 %v13445_v41  ;;  %5727 = vmatpush.bf16.msra.mxu0 %v13397_v7  ;;  %v13476_v41 = vld [vmem:[#allocation10 + $0x6d8] sm:$0xff]  ;;  %v13513_v55 = vld [vmem:[#allocation10 + $0x800] sm:$0xff] }
 0x48c   : > { %v13428_v7 = vld [vmem:[#allocation10 + $0x558] sm:$0xff] }
 0x48d   : > { %6666 = vmatpush.bf16.msra.mxu3 %v13485_v58  ;;  %v13478_v58 = vld [vmem:[#allocation10 + $0x6e8] sm:$0xff] }
 0x48e   : > { %7143 = vmatpush.bf16.msra.mxu1 %v13532_v29  ;;  %v13563_v29 = vld [vmem:[#allocation10 + $0x990] sm:$0xff] }
 0x48f   : > { %6204 = vmatpush.bf16.msrb.mxu2 %v13444_v60  ;;  %5728 = vmatpush.bf16.msra.mxu0 %v13396_v22  ;;  %v13475_v60 = vld [vmem:[#allocation10 + $0x6d0] sm:$0xff] }
 0x490   : > { %v13427_v22 = vld [vmem:[#allocation10 + $0x550] sm:$0xff] }
 0x491   : > { %6667 = vmatpush.bf16.msra.mxu3 %v13484_v45 }
 0x492   : > { %7144 = vmatpush.bf16.msra.mxu1 %v13531_v25  ;;  %v5696_v36 = vpop.f32.mrf.mxu1  ;;  %v16118_v0 = vpop.f32.mrf.mxu3  ;;  %v13562_v25 = vld [vmem:[#allocation10 + $0x988] sm:$0xff] }
 0x493   : > { %6205 = vmatpush.bf16.msrb.mxu2 %v13443_v57  ;;  %5729 = vmatpush.bf16.msra.mxu0 %v13395_v44  ;;  %v13552_v57 = vld [vmem:[#allocation10 + $0x938] sm:$0xff]  ;;  %v6789_v44 = vrot.slane %v15930_v34, 2  ;;  %v13599_v36 = vld [vmem:[#allocation10 + $0xab0] sm:$0xff] }
 0x495   : > { %6668 = vmatpush.bf16.msra.mxu3 %v13483_v9  ;;  %v13514_v9 = vld [vmem:[#allocation10 + $0x808] sm:$0xff] }
 0x496   : > { %7145 = vmatpush.bf16.msra.mxu1 %v13530_v40  ;;  %v13561_v40 = vld [vmem:[#allocation10 + $0x980] sm:$0xff] }
 0x497   : > { %6206 = vmatpush.bf16.msrb.mxu2 %v13442_v13  ;;  %5730 = vmatpush.bf16.msra.mxu0 %v13394_v18  ;;  %v13551_v13 = vld [vmem:[#allocation10 + $0x930] sm:$0xff]  ;;  %v13512_v18 = vld [vmem:[#allocation10 + $0x7f8] sm:$0xff] }
 0x499   : > { %6669 = vmatpush.bf16.msra.mxu3 %v13482_v47 }
 0x49a   : > { %7146 = vmatpush.bf16.msra.mxu1 %v13529_v38  ;;  %v5221_v15 = vpop.f32.mrf.mxu3  ;;  %v16124_v26 = vpop.f32.mrf.mxu1  ;;  %v13474_v38 = vld [vmem:[#allocation10 + $0x6c8] sm:$0xff] }
 0x49b   : > { %6207 = vmatpush.bf16.msrb.mxu2 %v13441_v30  ;;  %5731 = vmatpush.bf16.msra.mxu0 %v13393_v48  ;;  %v13464_v30 = vld [vmem:[#allocation10 + $0x678] sm:$0xff]  ;;  %v6314_v48 = vrot.slane %v15898_v61, 2  ;;  %v13510_v15 = vld [vmem:[#allocation10 + $0x7e8] sm:$0xff] }
 0x49d   : > { %6670 = vmatpush.bf16.msra.mxu3 %v13481_v52  ;;  %7147 = vmatmul.bf16.vlgmr.msra.gmra.mxu1 %v6791_v42  ;;  %v13600_v52 = vld [vmem:[#allocation10 + $0xab8] sm:$0xff]  ;;  %v13425_v42 = vld [vmem:[#allocation10 + $0x540] sm:$0xff] }
 0x49e   : > { %7589 = vmatpush.bf16.msrb.mxu1 %v13568_v35  ;;  %6208 = vmatmul.bf16.vlgmr.msrb.gmra.mxu2 %v5840_v62  ;;  %v13426_v35 = vld [vmem:[#allocation10 + $0x548] sm:$0xff]  ;;  %v13463_v62 = vld [vmem:[#allocation10 + $0x670] sm:$0xff] }
 0x49f   : > { %6650 = vmatpush.bf16.msra.mxu2 %v13480_v21  ;;  %6174 = vmatpush.bf16.msrb.mxu0 %v13432_v54  ;;  %v13511_v21 = vld [vmem:[#allocation10 + $0x7f0] sm:$0xff] }
 0x4a0   : > { %6671 = vmatmul.bf16.vlgmr.msra.gmra.mxu3 %v6315_v3  ;;  %5732 = vmatmul.bf16.vlgmr.msra.gmra.mxu0 %v5364_v28  ;;  %v13473_v3 = vld [vmem:[#allocation10 + $0x6c0] sm:$0xff]  ;;  %v13548_v28 = vld [vmem:[#allocation10 + $0x918] sm:$0xff] }
 0x4a1   : > { %7113 = vmatpush.bf16.msrb.mxu3 %v13520_v27  ;;  %v7265_v27 = vrot.slane %v15735_v37, 3 }
 0x4a2   : > { %7590 = vmatpush.bf16.msrb.mxu1 %v13567_v20  ;;  %v6146_v45 = vpop.f32.mrf.mxu1  ;;  %v13598_v20 = vld [vmem:[#allocation10 + $0xaa8] sm:$0xff] }
 0x4a3   : > { %6651 = vmatpush.bf16.msra.mxu2 %v13479_v33  ;;  %6175 = vmatpush.bf16.msrb.mxu0 %v13431_v5  ;;  %v16126_v10 = vpop.f32.mrf.mxu3  ;;  %v13597_v33 = vld [vmem:[#allocation10 + $0xaa0] sm:$0xff]  ;;  %v13508_v45 = vld [vmem:[#allocation10 + $0x7d8] sm:$0xff] }
 0x4a5   : > { %7114 = vmatpush.bf16.msrb.mxu3 %v13519_v11  ;;  %v13550_v11 = vld [vmem:[#allocation10 + $0x928] sm:$0xff] }
 0x4a6   : > { %7591 = vmatpush.bf16.msrb.mxu1 %v13566_v14  ;;  %v5838_v14 = vrot.slane %v15936_v63, 1 }
 0x4a7   : > { %6652 = vmatpush.bf16.msra.mxu2 %v13478_v58  ;;  %6176 = vmatpush.bf16.msrb.mxu0 %v13430_v59  ;;  %v13509_v58 = vld [vmem:[#allocation10 + $0x7e0] sm:$0xff]  ;;  %v13595_v59 = vld [vmem:[#allocation10 + $0xa90] sm:$0xff] }
 0x4a9   : > { %7115 = vmatpush.bf16.msrb.mxu3 %v13518_v43  ;;  %v13549_v43 = vld [vmem:[#allocation10 + $0x920] sm:$0xff] }
 0x4aa   : > { %7592 = vmatpush.bf16.msrb.mxu1 %v13565_v12  ;;  %v13462_v12 = vld [vmem:[#allocation10 + $0x668] sm:$0xff] }
 0x4ab   : > { %6653 = vmatpush.bf16.msra.mxu2 %v13477_v23  ;;  %6177 = vmatpush.bf16.msrb.mxu0 %v13429_v53  ;;  %v5670_v47 = vpop.f32.mrf.mxu3  ;;  %v13461_v23 = vld [vmem:[#allocation10 + $0x660] sm:$0xff]  ;;  %v13460_v53 = vld [vmem:[#allocation10 + $0x658] sm:$0xff] }
 0x4ac   : > { %v13584_v47 = vld [vmem:[#allocation10 + $0xa38] sm:$0xff] }
 0x4ad   : > { %7116 = vmatpush.bf16.msrb.mxu3 %v13517_v24  ;;  %v13596_v24 = vld [vmem:[#allocation10 + $0xa98] sm:$0xff] }
 0x4ae   : > { %7593 = vmatpush.bf16.msrb.mxu1 %v13564_v17 }
 0x4af   : > { %6654 = vmatpush.bf16.msra.mxu2 %v13476_v41  ;;  %6178 = vmatpush.bf16.msrb.mxu0 %v13428_v7  ;;  %v13593_v7 = vld [vmem:[#allocation10 + $0xa80] sm:$0xff] }
 0x4b1   : > { %7117 = vmatpush.bf16.msrb.mxu3 %v13516_v1  ;;  %v13547_v1 = vld [vmem:[#allocation10 + $0x910] sm:$0xff] }
 0x4b2   : > { %7594 = vmatpush.bf16.msrb.mxu1 %v13563_v29  ;;  %v13594_v29 = vld [vmem:[#allocation10 + $0xa88] sm:$0xff] }
 0x4b3   : > { %6655 = vmatpush.bf16.msra.mxu2 %v13475_v60  ;;  %6179 = vmatpush.bf16.msrb.mxu0 %v13427_v22  ;;  %v13459_v60 = vld [vmem:[#allocation10 + $0x650] sm:$0xff]  ;;  %v7263_v22 = vrot.slane %v16852_v31, 3 }
 0x4b5   : > { %7118 = vmatpush.bf16.msrb.mxu3 %v13515_v51  ;;  %v13546_v51 = vld [vmem:[#allocation10 + $0x908] sm:$0xff] }
 0x4b6   : > { %7595 = vmatpush.bf16.msrb.mxu1 %v13562_v25  ;;  %v13545_v25 = vld [vmem:[#allocation10 + $0x900] sm:$0xff] }
 0x4b7   : > { %6656 = vmatpush.bf16.msra.mxu2 %v13474_v38  ;;  %6180 = vmatpush.bf16.msrb.mxu0 %v13426_v35  ;;  %v13583_v38 = vld [vmem:[#allocation10 + $0xa30] sm:$0xff]  ;;  %v13544_v35 = vld [vmem:[#allocation10 + $0x8f8] sm:$0xff] }
 0x4b9   : > { %7119 = vmatpush.bf16.msrb.mxu3 %v13514_v9  ;;  %v13507_v9 = vld [vmem:[#allocation10 + $0x7d0] sm:$0xff] }
 0x4ba   : > { %7596 = vmatpush.bf16.msrb.mxu1 %v13561_v40  ;;  %v16132_v54 = vpop.f32.mrf.mxu1  ;;  %v13506_v40 = vld [vmem:[#allocation10 + $0x7c8] sm:$0xff] }
 0x4bb   : > { %6657 = vmatpush.bf16.msra.mxu2 %v13473_v3  ;;  %6181 = vmatpush.bf16.msrb.mxu0 %v13425_v42  ;;  %v13630_v3 = vld [vmem:[#allocation10 + $0xba8] sm:$0xff]  ;;  %v13543_v42 = vld [vmem:[#allocation10 + $0x8f0] sm:$0xff] }
 0x4bd   : > { %7120 = vmatpush.bf16.msrb.mxu3 %v13513_v55  ;;  %7597 = vmatmul.bf16.vlgmr.msrb.gmra.mxu1 %v7265_v27  ;;  %v13632_v55 = vld [vmem:[#allocation10 + $0xbb8] sm:$0xff]  ;;  %v13505_v27 = vld [vmem:[#allocation10 + $0x7c0] sm:$0xff] }
 0x4be   : > { %8039 = vmatpush.bf16.msra.mxu1 %v13600_v52  ;;  %6658 = vmatmul.bf16.vlgmr.msra.gmra.mxu2 %v6314_v48  ;;  %v7739_v52 = vrot.slane %v15927_v16, 3 }
 0x4bf   : > { %7100 = vmatpush.bf16.msrb.mxu2 %v13512_v18  ;;  %6624 = vmatpush.bf16.msra.mxu0 %v13464_v30  ;;  %v13496_v18 = vld [vmem:[#allocation10 + $0x778] sm:$0xff]  ;;  %v13581_v30 = vld [vmem:[#allocation10 + $0xa20] sm:$0xff] }
 0x4c0   : > { %7121 = vmatmul.bf16.vlgmr.msrb.gmra.mxu3 %v6789_v44  ;;  %6182 = vmatmul.bf16.vlgmr.msrb.gmra.mxu0 %v5838_v14  ;;  %v13631_v44 = vld [vmem:[#allocation10 + $0xbb0] sm:$0xff]  ;;  %v13542_v14 = vld [vmem:[#allocation10 + $0x8e8] sm:$0xff] }
 0x4c1   : > { %7563 = vmatpush.bf16.msra.mxu3 %v13552_v57  ;;  %v13458_v57 = vld [vmem:[#allocation10 + $0x648] sm:$0xff] }
 0x4c2   : > { %8040 = vmatpush.bf16.msra.mxu1 %v13599_v36  ;;  %v6198_v17 = vpop.f32.mrf.mxu1  ;;  %v13582_v36 = vld [vmem:[#allocation10 + $0xa28] sm:$0xff] }
 0x4c3   : > { %7101 = vmatpush.bf16.msrb.mxu2 %v13511_v21  ;;  %6625 = vmatpush.bf16.msra.mxu0 %v13463_v62  ;;  %v16134_v5 = vpop.f32.mrf.mxu3  ;;  %v13629_v21 = vld [vmem:[#allocation10 + $0xba0] sm:$0xff]  ;;  %v13628_v62 = vld [vmem:[#allocation10 + $0xb98] sm:$0xff]  ;;  %v13627_v17 = vld [vmem:[#allocation10 + $0xb90] sm:$0xff] }
 0x4c5   : > { %7564 = vmatpush.bf16.msra.mxu3 %v13551_v13  ;;  %v13457_v13 = vld [vmem:[#allocation10 + $0x640] sm:$0xff] }
 0x4c6   : > { %8041 = vmatpush.bf16.msra.mxu1 %v13598_v20  ;;  %v6312_v20 = vrot.slane %v16853_v2, 2 }
 0x4c7   : > { %7102 = vmatpush.bf16.msrb.mxu2 %v13510_v15  ;;  %6626 = vmatpush.bf16.msra.mxu0 %v13462_v12  ;;  %v13494_v15 = vld [vmem:[#allocation10 + $0x768] sm:$0xff] }
 0x4c9   : > { %7565 = vmatpush.bf16.msra.mxu3 %v13550_v11  ;;  %v6788_v11 = vrot.slane %v15933_v49, 2 }
 0x4ca   : > { %8042 = vmatpush.bf16.msra.mxu1 %v13597_v33  ;;  %v13580_v33 = vld [vmem:[#allocation10 + $0xa18] sm:$0xff] }
 0x4cb   : > { %7103 = vmatpush.bf16.msrb.mxu2 %v13509_v58  ;;  %6627 = vmatpush.bf16.msra.mxu0 %v13461_v23  ;;  %v5722_v41 = vpop.f32.mrf.mxu3  ;;  %v13541_v58 = vld [vmem:[#allocation10 + $0x8e0] sm:$0xff] }
 0x4cc   : > { %v13493_v23 = vld [vmem:[#allocation10 + $0x760] sm:$0xff]  ;;  %v13626_v41 = vld [vmem:[#allocation10 + $0xb88] sm:$0xff] }
 0x4cd   : > { %7566 = vmatpush.bf16.msra.mxu3 %v13549_v43  ;;  %v13495_v43 = vld [vmem:[#allocation10 + $0x770] sm:$0xff] }
 0x4ce   : > { %8043 = vmatpush.bf16.msra.mxu1 %v13596_v24 }
 0x4cf   : > { %7104 = vmatpush.bf16.msrb.mxu2 %v13508_v45  ;;  %6628 = vmatpush.bf16.msra.mxu0 %v13460_v53  ;;  %v13540_v45 = vld [vmem:[#allocation10 + $0x8d8] sm:$0xff]  ;;  %v13578_v53 = vld [vmem:[#allocation10 + $0xa08] sm:$0xff] }
 0x4d1   : > { %7567 = vmatpush.bf16.msra.mxu3 %v13548_v28 }
 0x4d2   : > { %8044 = vmatpush.bf16.msra.mxu1 %v13595_v59 }
 0x4d3   : > { %7105 = vmatpush.bf16.msrb.mxu2 %v13507_v9  ;;  %6629 = vmatpush.bf16.msra.mxu0 %v13459_v60  ;;  %v13577_v60 = vld [vmem:[#allocation10 + $0xa00] sm:$0xff] }
 0x4d5   : > { %7568 = vmatpush.bf16.msra.mxu3 %v13547_v1  ;;  %v13579_v1 = vld [vmem:[#allocation10 + $0xa10] sm:$0xff] }
 0x4d6   : > { %8045 = vmatpush.bf16.msra.mxu1 %v13594_v29 }
 0x4d7   : > { %7106 = vmatpush.bf16.msrb.mxu2 %v13506_v40  ;;  %6630 = vmatpush.bf16.msra.mxu0 %v13458_v57  ;;  %v13491_v40 = vld [vmem:[#allocation10 + $0x750] sm:$0xff]  ;;  %v13538_v57 = vld [vmem:[#allocation10 + $0x8c8] sm:$0xff] }
 0x4d9   : > { %7569 = vmatpush.bf16.msra.mxu3 %v13546_v51 }
 0x4da   : > { %8046 = vmatpush.bf16.msra.mxu1 %v13593_v7  ;;  %v16140_v48 = vpop.f32.mrf.mxu1  ;;  %v13539_v7 = vld [vmem:[#allocation10 + $0x8d0] sm:$0xff] }
 0x4db   : > { %7107 = vmatpush.bf16.msrb.mxu2 %v13505_v27  ;;  %6631 = vmatpush.bf16.msra.mxu0 %v13457_v13  ;;  %v4892_v28 = vpop.f32.mrf.mxu0  ;;  %v7743_v27 = vrot.slane %v16012_v56, 3  ;;  %v13615_v13 = vld [vmem:[#allocation10 + $0xb30] sm:$0xff] }
 0x4dc   : > { %v4893_v12 = vadd.f32 %v4892_v28, %v16114_v46  ;;  %v13492_v46 = vld [vmem:[#allocation10 + $0x758] sm:$0xff]  ;;  %v13661_v28 = vld [vmem:[#allocation10 + $0xca0] sm:$0xff] }
 0x4dd   : > { %7570 = vmatpush.bf16.msra.mxu3 %v13545_v25  ;;  %8047 = vmatmul.bf16.vlgmr.msra.gmra.mxu1 %v7739_v52 }
 0x4de   : > { %8091 = vmatpush.bf16.msrb.mxu1 %v13632_v55  ;;  %7108 = vmatmul.bf16.vlgmr.msrb.gmra.mxu2 %v6788_v11  ;;  %v5194_v29 = vadd.f32 %v16084_v6, %v4893_v12  ;;  %v13664_v6 = vld [vmem:[#allocation10 + $0xcb8] sm:$0xff]  ;;  %v13614_v11 = vld [vmem:[#allocation10 + $0xb28] sm:$0xff]  ;;  %v13527_v12 = vld [vmem:[#allocation10 + $0x870] sm:$0xff] }
 0x4df   : > { %7152 = vmatpush.bf16.msra.mxu2 %v13544_v35  ;;  %6676 = vmatpush.bf16.msrb.mxu0 %v13496_v18  ;;  %v16145_v51 = vpop.f32.mrf.mxu2  ;;  %v13490_v35 = vld [vmem:[#allocation10 + $0x748] sm:$0xff]  ;;  %v13537_v18 = vld [vmem:[#allocation10 + $0x8c0] sm:$0xff] }
 0x4e0   : > { %7571 = vmatmul.bf16.vlgmr.msra.gmra.mxu3 %v7263_v22  ;;  %6632 = vmatmul.bf16.vlgmr.msra.gmra.mxu0 %v6312_v20  ;;  %v5207_v55 = vadd.f32 %v16088_v32, %v5194_v29  ;;  %v13616_v22 = vld [vmem:[#allocation10 + $0xb38] sm:$0xff]  ;;  %v13662_v20 = vld [vmem:[#allocation10 + $0xca8] sm:$0xff] }
 0x4e1   : > { %7615 = vmatpush.bf16.msrb.mxu3 %v13584_v47  ;;  %v13625_v47 = vld [vmem:[#allocation10 + $0xb80] sm:$0xff] }
 0x4e2   : > { %8092 = vmatpush.bf16.msrb.mxu1 %v13631_v44  ;;  %v6648_v59 = vpop.f32.mrf.mxu1  ;;  %v7267_v44 = vrot.slane %v16004_v4, 3 }
 0x4e3   : > { %7153 = vmatpush.bf16.msra.mxu2 %v13543_v42  ;;  %6677 = vmatpush.bf16.msrb.mxu0 %v13495_v43  ;;  %v16142_v24 = vpop.f32.mrf.mxu3  ;;  %v4894_v9 = vpop.f32.mrf.mxu0  ;;  %v13576_v42 = vld [vmem:[#allocation10 + $0x9f8] sm:$0xff]  ;;  %v13575_v43 = vld [vmem:[#allocation10 + $0x9f0] sm:$0xff] }
 0x4e4   : > { %v13612_v59 = vld [vmem:[#allocation10 + $0xb18] sm:$0xff]  ;;  %v13659_v9 = vld [vmem:[#allocation10 + $0xc90] sm:$0xff] }
 0x4e5   : > { %7616 = vmatpush.bf16.msrb.mxu3 %v13583_v38  ;;  %v5220_v38 = vadd.f32 %v16118_v0, %v5207_v55  ;;  %v13489_v0 = vld [vmem:[#allocation10 + $0x740] sm:$0xff]  ;;  %v13572_v55 = vld [vmem:[#allocation10 + $0x9d8] sm:$0xff] }
 0x4e6   : > { %8093 = vmatpush.bf16.msrb.mxu1 %v13630_v3 }
 0x4e7   : > { %7154 = vmatpush.bf16.msra.mxu2 %v13542_v14  ;;  %6678 = vmatpush.bf16.msrb.mxu0 %v13494_v15  ;;  %v5260_v52 = vpop.f32.mrf.mxu2  ;;  %v6792_v14 = vrot.slane %v16101_v50, 2  ;;  %v6316_v15 = vrot.slane %v16098_v39, 2 }
 0x4e9   : > { %7617 = vmatpush.bf16.msrb.mxu3 %v13582_v36  ;;  %v13663_v36 = vld [vmem:[#allocation10 + $0xcb0] sm:$0xff] }
 0x4ea   : > { %8094 = vmatpush.bf16.msrb.mxu1 %v13629_v21 }
 0x4eb   : > { %7155 = vmatpush.bf16.msra.mxu2 %v13541_v58  ;;  %6679 = vmatpush.bf16.msrb.mxu0 %v13493_v23  ;;  %v6172_v25 = vpop.f32.mrf.mxu3  ;;  %v5232_v32 = vpop.f32.mrf.mxu0  ;;  %v13660_v23 = vld [vmem:[#allocation10 + $0xc98] sm:$0xff] }
 0x4ec   : > { %v5233_v3 = vadd.f32 %v5232_v32, %v5220_v38  ;;  %v13525_v25 = vld [vmem:[#allocation10 + $0x860] sm:$0xff]  ;;  %v13571_v38 = vld [vmem:[#allocation10 + $0x9d0] sm:$0xff] }
 0x4ed   : > { %7618 = vmatpush.bf16.msrb.mxu3 %v13581_v30  ;;  %v13528_v30 = vld [vmem:[#allocation10 + $0x878] sm:$0xff] }
 0x4ee   : > { %8095 = vmatpush.bf16.msrb.mxu1 %v13628_v62  ;;  %v5246_v58 = vadd.f32 %v16109_v8, %v5233_v3  ;;  %v13573_v8 = vld [vmem:[#allocation10 + $0x9e0] sm:$0xff]  ;;  %v13570_v3 = vld [vmem:[#allocation10 + $0x9c8] sm:$0xff] }
 0x4ef   : > { %7156 = vmatpush.bf16.msra.mxu2 %v13540_v45  ;;  %6680 = vmatpush.bf16.msrb.mxu0 %v13492_v46  ;;  %v5707_v21 = vpop.f32.mrf.mxu2  ;;  %v13526_v45 = vld [vmem:[#allocation10 + $0x868] sm:$0xff]  ;;  %v13611_v46 = vld [vmem:[#allocation10 + $0xb10] sm:$0xff] }
 0x4f1   : > { %7619 = vmatpush.bf16.msrb.mxu3 %v13580_v33  ;;  %v13613_v33 = vld [vmem:[#allocation10 + $0xb20] sm:$0xff] }
 0x4f2   : > { %8096 = vmatpush.bf16.msrb.mxu1 %v13627_v17  ;;  %v13574_v17 = vld [vmem:[#allocation10 + $0x9e8] sm:$0xff] }
 0x4f3   : > { %7157 = vmatpush.bf16.msra.mxu2 %v13539_v7  ;;  %6681 = vmatpush.bf16.msrb.mxu0 %v13491_v40  ;;  %v5234_v62 = vpop.f32.mrf.mxu0  ;;  %v13610_v40 = vld [vmem:[#allocation10 + $0xb08] sm:$0xff] }
 0x4f4   : > { %v13694_v62 = vld [vmem:[#allocation10 + $0xda8] sm:$0xff] }
 0x4f5   : > { %7620 = vmatpush.bf16.msrb.mxu3 %v13579_v1 }
 0x4f6   : > { %8097 = vmatpush.bf16.msrb.mxu1 %v13626_v41 }
 0x4f7   : > { %7158 = vmatpush.bf16.msra.mxu2 %v13538_v57  ;;  %6682 = vmatpush.bf16.msrb.mxu0 %v13490_v35  ;;  %v5709_v29 = vpop.f32.mrf.mxu2  ;;  %v13657_v35 = vld [vmem:[#allocation10 + $0xc80] sm:$0xff] }
 0x4f8   : > { %v13644_v29 = vld [vmem:[#allocation10 + $0xc18] sm:$0xff] }
 0x4f9   : > { %7621 = vmatpush.bf16.msrb.mxu3 %v13578_v53  ;;  %v16158_v53 = vadd.f32 %v16145_v51, %v5246_v58  ;;  %v6790_v58 = vrot.slane %v15936_v63, 2 }
 0x4fa   : > { %8098 = vmatpush.bf16.msrb.mxu1 %v13625_v47  ;;  %v16155_v1 = vpop.f32.mrf.mxu1 }
 0x4fb   : > { %7159 = vmatpush.bf16.msra.mxu2 %v13537_v18  ;;  %6683 = vmatpush.bf16.msrb.mxu0 %v13489_v0  ;;  %v13522_v0 = vld [vmem:[#allocation10 + $0x848] sm:$0xff] }
 0x4fd   : > { %7622 = vmatpush.bf16.msrb.mxu3 %v13577_v60  ;;  %8099 = vmatmul.bf16.vlgmr.msrb.gmra.mxu1 %v7743_v27  ;;  %v5681_v60 = vpop.f32.mrf.mxu0  ;;  %v13609_v27 = vld [vmem:[#allocation10 + $0xb00] sm:$0xff] }
 0x4fe   : > { %8541 = vmatpush.bf16.msra.mxu1 %v13664_v6  ;;  %7160 = vmatmul.bf16.vlgmr.msra.gmra.mxu2 %v6792_v14  ;;  %v5682_v47 = vadd.f32 %v5681_v60, %v16126_v10  ;;  %v13524_v6 = vld [vmem:[#allocation10 + $0x858] sm:$0xff]  ;;  %v13523_v10 = vld [vmem:[#allocation10 + $0x850] sm:$0xff]  ;;  %v13521_v14 = vld [vmem:[#allocation10 + $0x840] sm:$0xff] }
 0x4ff   : > { %7602 = vmatpush.bf16.msrb.mxu2 %v13576_v42  ;;  %7126 = vmatpush.bf16.msra.mxu0 %v13528_v30  ;;  %v7741_v42 = vrot.slane %v15930_v34, 3  ;;  %v13691_v60 = vld [vmem:[#allocation10 + $0xd90] sm:$0xff] }
 0x500   : > { %7623 = vmatmul.bf16.vlgmr.msrb.gmra.mxu3 %v7267_v44  ;;  %6684 = vmatmul.bf16.vlgmr.msrb.gmra.mxu0 %v6316_v15  ;;  %v5695_v51 = vadd.f32 %v16116_v19, %v5682_v47  ;;  %v13696_v19 = vld [vmem:[#allocation10 + $0xdb8] sm:$0xff] }
 0x501   : > { %8065 = vmatpush.bf16.msra.mxu3 %v13616_v22  ;;  %v13658_v22 = vld [vmem:[#allocation10 + $0xc88] sm:$0xff]  ;;  %v6157_v57 = vpop.f32.mrf.mxu2  ;;  %v13560_v15 = vld [vmem:[#allocation10 + $0x978] sm:$0xff] }
 0x502   : > { %8542 = vmatpush.bf16.msra.mxu1 %v13663_v36  ;;  %v7098_v7 = vpop.f32.mrf.mxu1  ;;  %v5708_v44 = vadd.f32 %v5707_v21, %v5695_v51  ;;  %v13648_v36 = vld [vmem:[#allocation10 + $0xc38] sm:$0xff]  ;;  %v6158_v18 = vadd.f32 %v6157_v57, %v16124_v26  ;;  %v13569_v21 = vld [vmem:[#allocation10 + $0x9c0] sm:$0xff]  ;;  %v13642_v57 = vld [vmem:[#allocation10 + $0xc08] sm:$0xff] }
 0x503   : > { %7603 = vmatpush.bf16.msrb.mxu2 %v13575_v43  ;;  %7127 = vmatpush.bf16.msra.mxu0 %v13527_v12  ;;  %v16160_v41 = vpop.f32.mrf.mxu3  ;;  %v13608_v43 = vld [vmem:[#allocation10 + $0xaf8] sm:$0xff]  ;;  %v7266_v12 = vrot.slane %v15898_v61, 3  ;;  %v13643_v7 = vld [vmem:[#allocation10 + $0xc10] sm:$0xff] }
 0x504   : > { %v16171_v26 = vadd.f32 %v16142_v24, %v6158_v18  ;;  %v13693_v24 = vld [vmem:[#allocation10 + $0xda0] sm:$0xff]  ;;  %v8215_v18 = vrot.slane %v16852_v31, 4 }
 0x505   : > { %8066 = vmatpush.bf16.msra.mxu3 %v13615_v13  ;;  %v16165_v13 = vadd.f32 %v16134_v5, %v5708_v44  ;;  %v5683_v32 = vpop.f32.mrf.mxu0  ;;  %v13695_v5 = vld [vmem:[#allocation10 + $0xdb0] sm:$0xff] }
 0x506   : > { %8543 = vmatpush.bf16.msra.mxu1 %v13662_v20  ;;  %v13647_v20 = vld [vmem:[#allocation10 + $0xc30] sm:$0xff]  ;;  %v13689_v32 = vld [vmem:[#allocation10 + $0xd80] sm:$0xff] }
 0x507   : > { %7604 = vmatpush.bf16.msrb.mxu2 %v13574_v17  ;;  %7128 = vmatpush.bf16.msra.mxu0 %v13526_v45  ;;  %v13645_v17 = vld [vmem:[#allocation10 + $0xc20] sm:$0xff]  ;;  %v13606_v45 = vld [vmem:[#allocation10 + $0xae8] sm:$0xff] }
 0x509   : > { %8067 = vmatpush.bf16.msra.mxu3 %v13614_v11  ;;  %v8217_v11 = vrot.slane %v15735_v37, 4  ;;  %v6159_v30 = vpop.f32.mrf.mxu2 }
 0x50a   : > { %8544 = vmatpush.bf16.msra.mxu1 %v13661_v28  ;;  %v13607_v28 = vld [vmem:[#allocation10 + $0xaf0] sm:$0xff]  ;;  %v13601_v30 = vld [vmem:[#allocation10 + $0xac0] sm:$0xff] }
 0x50b   : > { %7605 = vmatpush.bf16.msrb.mxu2 %v13573_v8  ;;  %7129 = vmatpush.bf16.msra.mxu0 %v13525_v25  ;;  %v6622_v52 = vpop.f32.mrf.mxu3  ;;  %v13692_v8 = vld [vmem:[#allocation10 + $0xd98] sm:$0xff]  ;;  %v13605_v25 = vld [vmem:[#allocation10 + $0xae0] sm:$0xff] }
 0x50c   : > { %v13690_v52 = vld [vmem:[#allocation10 + $0xd88] sm:$0xff] }
 0x50d   : > { %8068 = vmatpush.bf16.msra.mxu3 %v13613_v33  ;;  %v13646_v33 = vld [vmem:[#allocation10 + $0xc28] sm:$0xff] }
 0x50e   : > { %8545 = vmatpush.bf16.msra.mxu1 %v13660_v23  ;;  %v13559_v23 = vld [vmem:[#allocation10 + $0x970] sm:$0xff] }
 0x50f   : > { %7606 = vmatpush.bf16.msrb.mxu2 %v13572_v55  ;;  %7130 = vmatpush.bf16.msra.mxu0 %v13524_v6 }
 0x511   : > { %8069 = vmatpush.bf16.msra.mxu3 %v13612_v59 }
 0x512   : > { %8546 = vmatpush.bf16.msra.mxu1 %v13659_v9 }
 0x513   : > { %7607 = vmatpush.bf16.msrb.mxu2 %v13571_v38  ;;  %7131 = vmatpush.bf16.msra.mxu0 %v13523_v10  ;;  %v13556_v38 = vld [vmem:[#allocation10 + $0x958] sm:$0xff]  ;;  %v13641_v10 = vld [vmem:[#allocation10 + $0xc00] sm:$0xff] }
 0x515   : > { %8070 = vmatpush.bf16.msra.mxu3 %v13611_v46  ;;  %v13558_v46 = vld [vmem:[#allocation10 + $0x968] sm:$0xff] }
 0x516   : > { %8547 = vmatpush.bf16.msra.mxu1 %v13658_v22  ;;  %v13604_v22 = vld [vmem:[#allocation10 + $0xad8] sm:$0xff] }
 0x517   : > { %7608 = vmatpush.bf16.msrb.mxu2 %v13570_v3  ;;  %7132 = vmatpush.bf16.msra.mxu0 %v13522_v0  ;;  %v13602_v3 = vld [vmem:[#allocation10 + $0xac8] sm:$0xff] }
 0x518   : > { %v13554_v0 = vld [vmem:[#allocation10 + $0x948] sm:$0xff] }
 0x519   : > { %8071 = vmatpush.bf16.msra.mxu3 %v13610_v40  ;;  %v13557_v40 = vld [vmem:[#allocation10 + $0x960] sm:$0xff] }
 0x51a   : > { %8548 = vmatpush.bf16.msra.mxu1 %v13657_v35  ;;  %v16175_v59 = vpop.f32.mrf.mxu1  ;;  %v13603_v35 = vld [vmem:[#allocation10 + $0xad0] sm:$0xff] }
 0x51b   : > { %7609 = vmatpush.bf16.msrb.mxu2 %v13569_v21  ;;  %7133 = vmatpush.bf16.msra.mxu0 %v13521_v14  ;;  %v13640_v21 = vld [vmem:[#allocation10 + $0xbf8] sm:$0xff]  ;;  %v13678_v14 = vld [vmem:[#allocation10 + $0xd28] sm:$0xff] }
 0x51d   : > { %8072 = vmatpush.bf16.msra.mxu3 %v13609_v27  ;;  %8549 = vmatmul.bf16.vlgmr.msra.gmra.mxu1 %v8217_v11  ;;  %v5733_v55 = vpop.f32.mrf.mxu0  ;;  %v13679_v11 = vld [vmem:[#allocation10 + $0xd30] sm:$0xff] }
 0x51e   : > { %8991 = vmatpush.bf16.msrb.mxu1 %v13696_v19  ;;  %7610 = vmatmul.bf16.vlgmr.msrb.gmra.mxu2 %v7266_v12  ;;  %v5734_v51 = vadd.f32 %v5733_v55, %v16165_v13  ;;  %v13728_v19 = vld [vmem:[#allocation10 + $0xeb8] sm:$0xff]  ;;  %v13677_v12 = vld [vmem:[#allocation10 + $0xd20] sm:$0xff]  ;;  %v13723_v55 = vld [vmem:[#allocation10 + $0xe90] sm:$0xff] }
 0x51f   : > { %8052 = vmatpush.bf16.msra.mxu2 %v13608_v43  ;;  %7576 = vmatpush.bf16.msrb.mxu0 %v13560_v15  ;;  %v13553_v43 = vld [vmem:[#allocation10 + $0x940] sm:$0xff]  ;;  %v13639_v15 = vld [vmem:[#allocation10 + $0xbf0] sm:$0xff] }
 0x520   : > { %8073 = vmatmul.bf16.vlgmr.msra.gmra.mxu3 %v7741_v42  ;;  %7134 = vmatmul.bf16.vlgmr.msra.gmra.mxu0 %v6790_v58  ;;  %v16181_v6 = vadd.f32 %v5734_v51, %v16158_v53  ;;  %v13680_v53 = vld [vmem:[#allocation10 + $0xd38] sm:$0xff]  ;;  %v8691_v42 = vrot.slane %v15927_v16, 4  ;;  %v7264_v58 = vrot.slane %v16853_v2, 3 }
 0x521   : > { %8515 = vmatpush.bf16.msrb.mxu3 %v13648_v36  ;;  %v16183_v44 = vpop.f32.mrf.mxu2  ;;  %v13555_v36 = vld [vmem:[#allocation10 + $0x950] sm:$0xff] }
 0x522   : > { %8992 = vmatpush.bf16.msrb.mxu1 %v13695_v5  ;;  %v7150_v47 = vpop.f32.mrf.mxu1  ;;  %v13727_v5 = vld [vmem:[#allocation10 + $0xeb0] sm:$0xff] }
 0x523   : > { %8053 = vmatpush.bf16.msra.mxu2 %v13607_v28  ;;  %7577 = vmatpush.bf16.msrb.mxu0 %v13559_v23  ;;  %v16177_v9 = vpop.f32.mrf.mxu3  ;;  %v7740_v28 = vrot.slane %v15933_v49, 3  ;;  %v13591_v23 = vld [vmem:[#allocation10 + $0xa70] sm:$0xff] }
 0x525   : > { %8516 = vmatpush.bf16.msrb.mxu3 %v13647_v20  ;;  %v5735_v13 = vpop.f32.mrf.mxu0 }
 0x526   : > { %8993 = vmatpush.bf16.msrb.mxu1 %v13694_v62  ;;  %v13592_v62 = vld [vmem:[#allocation10 + $0xa78] sm:$0xff] }
 0x527   : > { %8054 = vmatpush.bf16.msra.mxu2 %v13606_v45  ;;  %7578 = vmatpush.bf16.msrb.mxu0 %v13558_v46  ;;  %v13638_v45 = vld [vmem:[#allocation10 + $0xbe8] sm:$0xff] }
 0x528   : > { %v13590_v46 = vld [vmem:[#allocation10 + $0xa68] sm:$0xff] }
 0x529   : > { %8517 = vmatpush.bf16.msrb.mxu3 %v13646_v33  ;;  %v6211_v20 = vpop.f32.mrf.mxu2  ;;  %v13726_v33 = vld [vmem:[#allocation10 + $0xea8] sm:$0xff] }
 0x52a   : > { %8994 = vmatpush.bf16.msrb.mxu1 %v13693_v24  ;;  %v13725_v24 = vld [vmem:[#allocation10 + $0xea0] sm:$0xff]  ;;  %v13711_v20 = vld [vmem:[#allocation10 + $0xe30] sm:$0xff] }
 0x52b   : > { %8055 = vmatpush.bf16.msra.mxu2 %v13605_v25  ;;  %7579 = vmatpush.bf16.msrb.mxu0 %v13557_v40  ;;  %v6674_v27 = vpop.f32.mrf.mxu3  ;;  %v13589_v40 = vld [vmem:[#allocation10 + $0xa60] sm:$0xff] }
 0x52c   : > { %v13722_v27 = vld [vmem:[#allocation10 + $0xe88] sm:$0xff] }
 0x52d   : > { %8518 = vmatpush.bf16.msrb.mxu3 %v13645_v17 }
 0x52e   : > { %8995 = vmatpush.bf16.msrb.mxu1 %v13692_v8  ;;  %v13724_v8 = vld [vmem:[#allocation10 + $0xe98] sm:$0xff] }
 0x52f   : > { %8056 = vmatpush.bf16.msra.mxu2 %v13604_v22  ;;  %7580 = vmatpush.bf16.msrb.mxu0 %v13556_v38 }
 0x531   : > { %8519 = vmatpush.bf16.msrb.mxu3 %v13644_v29  ;;  %v13676_v29 = vld [vmem:[#allocation10 + $0xd18] sm:$0xff] }
 0x532   : > { %8996 = vmatpush.bf16.msrb.mxu1 %v13691_v60  ;;  %v13675_v60 = vld [vmem:[#allocation10 + $0xd10] sm:$0xff] }
 0x533   : > { %8057 = vmatpush.bf16.msra.mxu2 %v13603_v35  ;;  %7581 = vmatpush.bf16.msrb.mxu0 %v13555_v36  ;;  %v13588_v35 = vld [vmem:[#allocation10 + $0xa58] sm:$0xff]  ;;  %v13635_v36 = vld [vmem:[#allocation10 + $0xbd0] sm:$0xff] }
 0x535   : > { %8520 = vmatpush.bf16.msrb.mxu3 %v13643_v7  ;;  %v13637_v7 = vld [vmem:[#allocation10 + $0xbe0] sm:$0xff] }
 0x536   : > { %8997 = vmatpush.bf16.msrb.mxu1 %v13690_v52  ;;  %v13674_v52 = vld [vmem:[#allocation10 + $0xd08] sm:$0xff] }
 0x537   : > { %8058 = vmatpush.bf16.msra.mxu2 %v13602_v3  ;;  %7582 = vmatpush.bf16.msrb.mxu0 %v13554_v0  ;;  %v13586_v0 = vld [vmem:[#allocation10 + $0xa48] sm:$0xff] }
 0x539   : > { %8521 = vmatpush.bf16.msrb.mxu3 %v13642_v57  ;;  %v13636_v57 = vld [vmem:[#allocation10 + $0xbd8] sm:$0xff] }
 0x53a   : > { %8998 = vmatpush.bf16.msrb.mxu1 %v13689_v32  ;;  %v16189_v17 = vpop.f32.mrf.mxu1 }
 0x53b   : > { %8059 = vmatpush.bf16.msra.mxu2 %v13601_v30  ;;  %7583 = vmatpush.bf16.msrb.mxu0 %v13553_v43  ;;  %v13633_v43 = vld [vmem:[#allocation10 + $0xbc0] sm:$0xff] }
 0x53d   : > { %8522 = vmatpush.bf16.msrb.mxu3 %v13641_v10  ;;  %8999 = vmatmul.bf16.vlgmr.msrb.gmra.mxu1 %v8691_v42  ;;  %v6183_v51 = vpop.f32.mrf.mxu0  ;;  %v13634_v42 = vld [vmem:[#allocation10 + $0xbc8] sm:$0xff] }
 0x53e   : > { %9043 = vmatpush.bf16.msra.mxu1 %v13728_v19  ;;  %8060 = vmatmul.bf16.vlgmr.msra.gmra.mxu2 %v7740_v28  ;;  %v6184_v22 = vadd.f32 %v6183_v51, %v16171_v26  ;;  %v13721_v26 = vld [vmem:[#allocation10 + $0xe80] sm:$0xff]  ;;  %v13587_v19 = vld [vmem:[#allocation10 + $0xa50] sm:$0xff]  ;;  %v13624_v28 = vld [vmem:[#allocation10 + $0xb78] sm:$0xff] }
 0x53f   : > { %8104 = vmatpush.bf16.msrb.mxu2 %v13640_v21  ;;  %7628 = vmatpush.bf16.msra.mxu0 %v13592_v62  ;;  %v13710_v62 = vld [vmem:[#allocation10 + $0xe28] sm:$0xff]  ;;  %v13755_v51 = vld [vmem:[#allocation10 + $0xf90] sm:$0xff] }
 0x540   : > { %8523 = vmatmul.bf16.vlgmr.msrb.gmra.mxu3 %v8215_v18  ;;  %7584 = vmatmul.bf16.vlgmr.msrb.gmra.mxu0 %v7264_v58  ;;  %v6197_v38 = vadd.f32 %v16132_v54, %v6184_v22  ;;  %v13712_v18 = vld [vmem:[#allocation10 + $0xe38] sm:$0xff]  ;;  %v7268_v58 = vrot.slane %v16098_v39, 3 }
 0x541   : > { %8567 = vmatpush.bf16.msra.mxu3 %v13680_v53  ;;  %v16196_v32 = vpop.f32.mrf.mxu2  ;;  %v13673_v53 = vld [vmem:[#allocation10 + $0xd00] sm:$0xff]  ;;  %v13760_v54 = vld [vmem:[#allocation10 + $0xfb8] sm:$0xff] }
 0x542   : > { %9044 = vmatpush.bf16.msra.mxu1 %v13727_v5  ;;  %v7600_v47 = vpop.f32.mrf.mxu1  ;;  %v6210_v10 = vadd.f32 %v16183_v44, %v6197_v38  ;;  %v8219_v44 = vrot.slane %v16004_v4, 4  ;;  %v13759_v5 = vld [vmem:[#allocation10 + $0xfb0] sm:$0xff] }
 0x543   : > { %8105 = vmatpush.bf16.msrb.mxu2 %v13639_v15  ;;  %7629 = vmatpush.bf16.msra.mxu0 %v13591_v23  ;;  %v16191_v25 = vpop.f32.mrf.mxu3  ;;  %v13758_v15 = vld [vmem:[#allocation10 + $0xfa8] sm:$0xff]  ;;  %v13757_v23 = vld [vmem:[#allocation10 + $0xfa0] sm:$0xff] }
 0x544   : > { %v16201_v30 = vadd.f32 %v6210_v10, %v16181_v6  ;;  %v7744_v6 = vrot.slane %v16101_v50, 3  ;;  %v13706_v10 = vld [vmem:[#allocation10 + $0xe08] sm:$0xff] }
 0x545   : > { %8568 = vmatpush.bf16.msra.mxu3 %v13679_v11  ;;  %v6185_v3 = vpop.f32.mrf.mxu0  ;;  %v8695_v11 = vrot.slane %v16012_v56, 4 }
 0x546   : > { %9045 = vmatpush.bf16.msra.mxu1 %v13726_v33  ;;  %v13585_v33 = vld [vmem:[#allocation10 + $0xa40] sm:$0xff] }
 0x547   : > { %8106 = vmatpush.bf16.msrb.mxu2 %v13638_v45  ;;  %7630 = vmatpush.bf16.msra.mxu0 %v13590_v46  ;;  %v13708_v46 = vld [vmem:[#allocation10 + $0xe18] sm:$0xff] }
 0x549   : > { %8569 = vmatpush.bf16.msra.mxu3 %v13678_v14  ;;  %v6661_v21 = vpop.f32.mrf.mxu2  ;;  %v13672_v14 = vld [vmem:[#allocation10 + $0xcf8] sm:$0xff] }
 0x54a   : > { %9046 = vmatpush.bf16.msra.mxu1 %v13725_v24  ;;  %v13709_v24 = vld [vmem:[#allocation10 + $0xe20] sm:$0xff]  ;;  %v13618_v21 = vld [vmem:[#allocation10 + $0xb48] sm:$0xff] }
 0x54b   : > { %8107 = vmatpush.bf16.msrb.mxu2 %v13637_v7  ;;  %7631 = vmatpush.bf16.msra.mxu0 %v13589_v40  ;;  %v7124_v13 = vpop.f32.mrf.mxu3  ;;  %v13756_v7 = vld [vmem:[#allocation10 + $0xf98] sm:$0xff]  ;;  %v13707_v40 = vld [vmem:[#allocation10 + $0xe10] sm:$0xff] }
 0x54c   : > { %v13754_v13 = vld [vmem:[#allocation10 + $0xf88] sm:$0xff] }
 0x54d   : > { %8570 = vmatpush.bf16.msra.mxu3 %v13677_v12  ;;  %v13671_v12 = vld [vmem:[#allocation10 + $0xcf0] sm:$0xff] }
 0x54e   : > { %9047 = vmatpush.bf16.msra.mxu1 %v13724_v8  ;;  %v13670_v8 = vld [vmem:[#allocation10 + $0xce8] sm:$0xff] }
 0x54f   : > { %8108 = vmatpush.bf16.msrb.mxu2 %v13636_v57  ;;  %7632 = vmatpush.bf16.msra.mxu0 %v13588_v35 }
 0x551   : > { %8571 = vmatpush.bf16.msra.mxu3 %v13676_v29  ;;  %v13623_v29 = vld [vmem:[#allocation10 + $0xb70] sm:$0xff] }
 0x552   : > { %9048 = vmatpush.bf16.msra.mxu1 %v13723_v55  ;;  %v13669_v55 = vld [vmem:[#allocation10 + $0xce0] sm:$0xff] }
 0x553   : > { %8109 = vmatpush.bf16.msrb.mxu2 %v13635_v36  ;;  %7633 = vmatpush.bf16.msra.mxu0 %v13587_v19  ;;  %v13620_v36 = vld [vmem:[#allocation10 + $0xb58] sm:$0xff]  ;;  %v13667_v19 = vld [vmem:[#allocation10 + $0xcd0] sm:$0xff] }
 0x555   : > { %8572 = vmatpush.bf16.msra.mxu3 %v13675_v60  ;;  %v13622_v60 = vld [vmem:[#allocation10 + $0xb68] sm:$0xff] }
 0x556   : > { %9049 = vmatpush.bf16.msra.mxu1 %v13722_v27  ;;  %v13668_v27 = vld [vmem:[#allocation10 + $0xcd8] sm:$0xff] }
 0x557   : > { %8110 = vmatpush.bf16.msrb.mxu2 %v13634_v42  ;;  %7634 = vmatpush.bf16.msra.mxu0 %v13586_v0  ;;  %v13744_v0 = vld [vmem:[#allocation10 + $0xf38] sm:$0xff] }
 0x559   : > { %8573 = vmatpush.bf16.msra.mxu3 %v13674_v52  ;;  %v13621_v52 = vld [vmem:[#allocation10 + $0xb60] sm:$0xff] }
 0x55a   : > { %9050 = vmatpush.bf16.msra.mxu1 %v13721_v26  ;;  %v16205_v45 = vpop.f32.mrf.mxu1 }
 0x55b   : > { %8111 = vmatpush.bf16.msrb.mxu2 %v13633_v43  ;;  %7635 = vmatpush.bf16.msra.mxu0 %v13585_v33  ;;  %v13665_v33 = vld [vmem:[#allocation10 + $0xcc0] sm:$0xff] }
 0x55d   : > { %8574 = vmatpush.bf16.msra.mxu3 %v13673_v53  ;;  %9051 = vmatmul.bf16.vlgmr.msra.gmra.mxu1 %v8695_v11  ;;  %v6633_v57 = vpop.f32.mrf.mxu0  ;;  %v13792_v11 = vld [vmem:[#allocation10 + $0x10b8] sm:$0xff] }
 0x55e   : > { %9493 = vmatpush.bf16.msrb.mxu1 %v13760_v54  ;;  %8112 = vmatmul.bf16.vlgmr.msrb.gmra.mxu2 %v7744_v6  ;;  %v6634_v38 = vadd.f32 %v6633_v57, %v16160_v41  ;;  %v13753_v54 = vld [vmem:[#allocation10 + $0xf80] sm:$0xff]  ;;  %v13703_v6 = vld [vmem:[#allocation10 + $0xdf0] sm:$0xff] }
 0x55f   : > { %8554 = vmatpush.bf16.msra.mxu2 %v13672_v14  ;;  %8078 = vmatpush.bf16.msrb.mxu0 %v13624_v28  ;;  %v13791_v14 = vld [vmem:[#allocation10 + $0x10b0] sm:$0xff]  ;;  %v13742_v28 = vld [vmem:[#allocation10 + $0xf28] sm:$0xff] }
 0x560   : > { %8575 = vmatmul.bf16.vlgmr.msra.gmra.mxu3 %v8219_v44  ;;  %7636 = vmatmul.bf16.vlgmr.msra.gmra.mxu0 %v7268_v58  ;;  %v6647_v35 = vadd.f32 %v16140_v48, %v6634_v38  ;;  %v13619_v44 = vld [vmem:[#allocation10 + $0xb50] sm:$0xff]  ;;  %v13741_v58 = vld [vmem:[#allocation10 + $0xf20] sm:$0xff] }
 0x561   : > { %9017 = vmatpush.bf16.msrb.mxu3 %v13712_v18  ;;  %v7109_v53 = vpop.f32.mrf.mxu2  ;;  %v13705_v18 = vld [vmem:[#allocation10 + $0xe00] sm:$0xff] }
 0x562   : > { %9494 = vmatpush.bf16.msrb.mxu1 %v13759_v5  ;;  %v8050_v22 = vpop.f32.mrf.mxu1  ;;  %v6660_v3 = vadd.f32 %v16196_v32, %v6647_v35  ;;  %v7110_v48 = vadd.f32 %v7109_v53, %v16155_v1  ;;  %v8693_v32 = vrot.slane %v15930_v34, 4  ;;  %v9169_v5 = vrot.slane %v15735_v37, 5  ;;  %v13790_v37 = vld [vmem:[#allocation10 + $0x10a8] sm:$0xff]  ;;  %v13653_v38 = vld [vmem:[#allocation10 + $0xc60] sm:$0xff] }
 0x563   : > { %8555 = vmatpush.bf16.msra.mxu2 %v13671_v12  ;;  %8079 = vmatpush.bf16.msrb.mxu0 %v13623_v29  ;;  %v16207_v47 = vpop.f32.mrf.mxu3  ;;  %v13656_v12 = vld [vmem:[#allocation10 + $0xc78] sm:$0xff]  ;;  %v13789_v29 = vld [vmem:[#allocation10 + $0x10a0] sm:$0xff]  ;;  %v13739_v22 = vld [vmem:[#allocation10 + $0xf10] sm:$0xff] }
 0x564   : > { %v16213_v41 = vadd.f32 %v16177_v9, %v6660_v3  ;;  %v13743_v9 = vld [vmem:[#allocation10 + $0xf30] sm:$0xff]  ;;  %v16219_v43 = vadd.f32 %v16191_v25, %v7110_v48  ;;  %v8218_v25 = vrot.slane %v15898_v61, 4  ;;  %v13786_v53 = vld [vmem:[#allocation10 + $0x1088] sm:$0xff] }
 0x565   : > { %9018 = vmatpush.bf16.msrb.mxu3 %v13711_v20  ;;  %v6635_v42 = vpop.f32.mrf.mxu0  ;;  %v13666_v20 = vld [vmem:[#allocation10 + $0xcc8] sm:$0xff]  ;;  %v13651_v48 = vld [vmem:[#allocation10 + $0xc50] sm:$0xff] }
 0x566   : > { %9495 = vmatpush.bf16.msrb.mxu1 %v13758_v15  ;;  %v13617_v15 = vld [vmem:[#allocation10 + $0xb40] sm:$0xff] }
 0x567   : > { %8556 = vmatpush.bf16.msra.mxu2 %v13670_v8  ;;  %8080 = vmatpush.bf16.msrb.mxu0 %v13622_v60  ;;  %v13655_v8 = vld [vmem:[#allocation10 + $0xc70] sm:$0xff]  ;;  %v13788_v60 = vld [vmem:[#allocation10 + $0x1098] sm:$0xff] }
 0x569   : > { %9019 = vmatpush.bf16.msrb.mxu3 %v13710_v62  ;;  %v7111_v1 = vpop.f32.mrf.mxu2  ;;  %v13704_v62 = vld [vmem:[#allocation10 + $0xdf8] sm:$0xff] }
 0x56a   : > { %9496 = vmatpush.bf16.msrb.mxu1 %v13757_v23  ;;  %v13697_v1 = vld [vmem:[#allocation10 + $0xdc0] sm:$0xff] }
 0x56b   : > { %8557 = vmatpush.bf16.msra.mxu2 %v13669_v55  ;;  %8081 = vmatpush.bf16.msrb.mxu0 %v13621_v52  ;;  %v7574_v26 = vpop.f32.mrf.mxu3  ;;  %v13654_v55 = vld [vmem:[#allocation10 + $0xc68] sm:$0xff]  ;;  %v13787_v52 = vld [vmem:[#allocation10 + $0x1090] sm:$0xff] }
 0x56c   : > { %v13652_v26 = vld [vmem:[#allocation10 + $0xc58] sm:$0xff] }
 0x56d   : > { %9020 = vmatpush.bf16.msrb.mxu3 %v13709_v24  ;;  %v7742_v24 = vrot.slane %v15936_v63, 3 }
 0x56e   : > { %9497 = vmatpush.bf16.msrb.mxu1 %v13756_v7  ;;  %v13740_v7 = vld [vmem:[#allocation10 + $0xf18] sm:$0xff] }
 0x56f   : > { %8558 = vmatpush.bf16.msra.mxu2 %v13668_v27  ;;  %8082 = vmatpush.bf16.msrb.mxu0 %v13620_v36 }
 0x571   : > { %9021 = vmatpush.bf16.msrb.mxu3 %v13708_v46  ;;  %v13702_v46 = vld [vmem:[#allocation10 + $0xde8] sm:$0xff] }
 0x572   : > { %9498 = vmatpush.bf16.msrb.mxu1 %v13755_v51  ;;  %v13701_v51 = vld [vmem:[#allocation10 + $0xde0] sm:$0xff] }
 0x573   : > { %8559 = vmatpush.bf16.msra.mxu2 %v13667_v19  ;;  %8083 = vmatpush.bf16.msrb.mxu0 %v13619_v44  ;;  %v13776_v44 = vld [vmem:[#allocation10 + $0x1038] sm:$0xff] }
 0x575   : > { %9022 = vmatpush.bf16.msrb.mxu3 %v13707_v40 }
 0x576   : > { %9499 = vmatpush.bf16.msrb.mxu1 %v13754_v13  ;;  %v13738_v13 = vld [vmem:[#allocation10 + $0xf08] sm:$0xff] }
 0x577   : > { %8560 = vmatpush.bf16.msra.mxu2 %v13666_v20  ;;  %8084 = vmatpush.bf16.msrb.mxu0 %v13618_v21  ;;  %v13650_v20 = vld [vmem:[#allocation10 + $0xc48] sm:$0xff]  ;;  %v13823_v21 = vld [vmem:[#allocation10 + $0x11b0] sm:$0xff] }
 0x579   : > { %9023 = vmatpush.bf16.msrb.mxu3 %v13706_v10  ;;  %v13700_v10 = vld [vmem:[#allocation10 + $0xdd8] sm:$0xff] }
 0x57a   : > { %9500 = vmatpush.bf16.msrb.mxu1 %v13753_v54  ;;  %v16223_v23 = vpop.f32.mrf.mxu1  ;;  %v13737_v54 = vld [vmem:[#allocation10 + $0xf00] sm:$0xff] }
 0x57b   : > { %8561 = vmatpush.bf16.msra.mxu2 %v13665_v33  ;;  %8085 = vmatpush.bf16.msrb.mxu0 %v13617_v15  ;;  %v13649_v33 = vld [vmem:[#allocation10 + $0xc40] sm:$0xff]  ;;  %v13822_v15 = vld [vmem:[#allocation10 + $0x11a8] sm:$0xff] }
 0x57d   : > { %9024 = vmatpush.bf16.msrb.mxu3 %v13705_v18  ;;  %9501 = vmatmul.bf16.vlgmr.msrb.gmra.mxu1 %v9169_v5  ;;  %v6685_v27 = vpop.f32.mrf.mxu0  ;;  %v13699_v18 = vld [vmem:[#allocation10 + $0xdd0] sm:$0xff] }
 0x57e   : > { %9943 = vmatpush.bf16.msra.mxu1 %v13792_v11  ;;  %8562 = vmatmul.bf16.vlgmr.msra.gmra.mxu2 %v8218_v25  ;;  %v6686_v35 = vadd.f32 %v6685_v27, %v16213_v41  ;;  %v13785_v41 = vld [vmem:[#allocation10 + $0x1080] sm:$0xff]  ;;  %v9167_v11 = vrot.slane %v16852_v31, 5  ;;  %v13775_v5 = vld [vmem:[#allocation10 + $0x1030] sm:$0xff]  ;;  %v13688_v31 = vld [vmem:[#allocation10 + $0xd78] sm:$0xff] }
 0x57f   : > { %9004 = vmatpush.bf16.msrb.mxu2 %v13704_v62  ;;  %8528 = vmatpush.bf16.msra.mxu0 %v13656_v12  ;;  %v13774_v62 = vld [vmem:[#allocation10 + $0x1028] sm:$0xff]  ;;  %v13773_v12 = vld [vmem:[#allocation10 + $0x1020] sm:$0xff]  ;;  %v13732_v27 = vld [vmem:[#allocation10 + $0xed8] sm:$0xff] }
 0x580   : > { %9025 = vmatmul.bf16.vlgmr.msrb.gmra.mxu3 %v8693_v32  ;;  %8086 = vmatmul.bf16.vlgmr.msrb.gmra.mxu0 %v7742_v24  ;;  %v16229_v36 = vadd.f32 %v6686_v35, %v16201_v30  ;;  %v13698_v30 = vld [vmem:[#allocation10 + $0xdc8] sm:$0xff]  ;;  %v9643_v32 = vrot.slane %v15927_v16, 5  ;;  %v8692_v16 = vrot.slane %v15933_v49, 4 }
 0x581   : > { %9467 = vmatpush.bf16.msra.mxu3 %v13744_v0  ;;  %v16231_v19 = vpop.f32.mrf.mxu2  ;;  %v13824_v0 = vld [vmem:[#allocation10 + $0x11b8] sm:$0xff]  ;;  %v13734_v24 = vld [vmem:[#allocation10 + $0xee8] sm:$0xff] }
 0x582   : > { %9944 = vmatpush.bf16.msra.mxu1 %v13791_v14  ;;  %v8102_v57 = vpop.f32.mrf.mxu1  ;;  %v13736_v14 = vld [vmem:[#allocation10 + $0xef8] sm:$0xff] }
 0x583   : > { %9005 = vmatpush.bf16.msrb.mxu2 %v13703_v6  ;;  %8529 = vmatpush.bf16.msra.mxu0 %v13655_v8  ;;  %v16225_v40 = vpop.f32.mrf.mxu3  ;;  %v13821_v6 = vld [vmem:[#allocation10 + $0x11a0] sm:$0xff]  ;;  %v13820_v8 = vld [vmem:[#allocation10 + $0x1198] sm:$0xff] }
 0x585   : > { %9468 = vmatpush.bf16.msra.mxu3 %v13743_v9  ;;  %v6687_v42 = vpop.f32.mrf.mxu0 }
 0x586   : > { %9945 = vmatpush.bf16.msra.mxu1 %v13790_v37  ;;  %v8216_v37 = vrot.slane %v16853_v2, 4  ;;  %v13808_v42 = vld [vmem:[#allocation10 + $0x1138] sm:$0xff] }
 0x587   : > { %9006 = vmatpush.bf16.msrb.mxu2 %v13702_v46  ;;  %8530 = vmatpush.bf16.msra.mxu0 %v13654_v55  ;;  %v13686_v46 = vld [vmem:[#allocation10 + $0xd68] sm:$0xff]  ;;  %v13771_v55 = vld [vmem:[#allocation10 + $0x1010] sm:$0xff] }
 0x589   : > { %9469 = vmatpush.bf16.msra.mxu3 %v13742_v28  ;;  %v7163_v9 = vpop.f32.mrf.mxu2  ;;  %v13735_v28 = vld [vmem:[#allocation10 + $0xef0] sm:$0xff] }
 0x58a   : > { %9946 = vmatpush.bf16.msra.mxu1 %v13789_v29  ;;  %v13772_v29 = vld [vmem:[#allocation10 + $0x1018] sm:$0xff]  ;;  %v13681_v9 = vld [vmem:[#allocation10 + $0xd40] sm:$0xff] }
 0x58b   : > { %9007 = vmatpush.bf16.msrb.mxu2 %v13701_v51  ;;  %8531 = vmatpush.bf16.msra.mxu0 %v13653_v38  ;;  %v7626_v3 = vpop.f32.mrf.mxu3  ;;  %v13819_v51 = vld [vmem:[#allocation10 + $0x1190] sm:$0xff] }
 0x58d   : > { %9470 = vmatpush.bf16.msra.mxu3 %v13741_v58  ;;  %v13687_v58 = vld [vmem:[#allocation10 + $0xd70] sm:$0xff] }
 0x58e   : > { %9947 = vmatpush.bf16.msra.mxu1 %v13788_v60  ;;  %v13733_v60 = vld [vmem:[#allocation10 + $0xee0] sm:$0xff] }
 0x58f   : > { %9008 = vmatpush.bf16.msrb.mxu2 %v13700_v10  ;;  %8532 = vmatpush.bf16.msra.mxu0 %v13652_v26  ;;  %v13770_v10 = vld [vmem:[#allocation10 + $0x1008] sm:$0xff] }
 0x591   : > { %9471 = vmatpush.bf16.msra.mxu3 %v13740_v7 }
 0x592   : > { %9948 = vmatpush.bf16.msra.mxu1 %v13787_v52  ;;  %v13685_v52 = vld [vmem:[#allocation10 + $0xd60] sm:$0xff] }
 0x593   : > { %9009 = vmatpush.bf16.msrb.mxu2 %v13699_v18  ;;  %8533 = vmatpush.bf16.msra.mxu0 %v13651_v48 }
 0x595   : > { %9472 = vmatpush.bf16.msra.mxu3 %v13739_v22 }
 0x596   : > { %9949 = vmatpush.bf16.msra.mxu1 %v13786_v53  ;;  %v13684_v53 = vld [vmem:[#allocation10 + $0xd58] sm:$0xff] }
 0x597   : > { %9010 = vmatpush.bf16.msrb.mxu2 %v13698_v30  ;;  %8534 = vmatpush.bf16.msra.mxu0 %v13650_v20  ;;  %v9647_v30 = vrot.slane %v16012_v56, 5  ;;  %v13807_v20 = vld [vmem:[#allocation10 + $0x1130] sm:$0xff]  ;;  %v13805_v56 = vld [vmem:[#allocation10 + $0x1120] sm:$0xff] }
 0x599   : > { %9473 = vmatpush.bf16.msra.mxu3 %v13738_v13  ;;  %v13818_v13 = vld [vmem:[#allocation10 + $0x1188] sm:$0xff] }
 0x59a   : > { %9950 = vmatpush.bf16.msra.mxu1 %v13785_v41  ;;  %v16237_v25 = vpop.f32.mrf.mxu1  ;;  %v13769_v41 = vld [vmem:[#allocation10 + $0x1000] sm:$0xff] }
 0x59b   : > { %9011 = vmatpush.bf16.msrb.mxu2 %v13697_v1  ;;  %8535 = vmatpush.bf16.msra.mxu0 %v13649_v33  ;;  %v13806_v1 = vld [vmem:[#allocation10 + $0x1128] sm:$0xff]  ;;  %v8220_v33 = vrot.slane %v16098_v39, 4 }
 0x59d   : > { %9474 = vmatpush.bf16.msra.mxu3 %v13737_v54  ;;  %9951 = vmatmul.bf16.vlgmr.msra.gmra.mxu1 %v9643_v32  ;;  %v7135_v57 = vpop.f32.mrf.mxu0  ;;  %v13731_v54 = vld [vmem:[#allocation10 + $0xed0] sm:$0xff] }
 0x59e   : > { %9995 = vmatpush.bf16.msrb.mxu1 %v13824_v0  ;;  %9012 = vmatmul.bf16.vlgmr.msrb.gmra.mxu2 %v8692_v16  ;;  %v7136_v38 = vadd.f32 %v7135_v57, %v16219_v43  ;;  %v13817_v43 = vld [vmem:[#allocation10 + $0x1180] sm:$0xff]  ;;  %v13718_v16 = vld [vmem:[#allocation10 + $0xe68] sm:$0xff] }
 0x59f   : > { %9056 = vmatpush.bf16.msra.mxu2 %v13736_v14  ;;  %8580 = vmatpush.bf16.msrb.mxu0 %v13688_v31  ;;  %v13767_v14 = vld [vmem:[#allocation10 + $0xff0] sm:$0xff]  ;;  %v13766_v31 = vld [vmem:[#allocation10 + $0xfe8] sm:$0xff] }
 0x5a0   : > { %9475 = vmatmul.bf16.vlgmr.msra.gmra.mxu3 %v9167_v11  ;;  %8536 = vmatmul.bf16.vlgmr.msra.gmra.mxu0 %v8216_v37  ;;  %v7149_v35 = vadd.f32 %v16175_v59, %v7136_v38  ;;  %v13683_v59 = vld [vmem:[#allocation10 + $0xd50] sm:$0xff]  ;;  %v13682_v11 = vld [vmem:[#allocation10 + $0xd48] sm:$0xff]  ;;  %v13765_v37 = vld [vmem:[#allocation10 + $0xfe0] sm:$0xff] }
 0x5a1   : > { %9519 = vmatpush.bf16.msrb.mxu3 %v13776_v44  ;;  %v16244_v3 = vpop.f32.mrf.mxu2  ;;  %v13730_v44 = vld [vmem:[#allocation10 + $0xec8] sm:$0xff] }
 0x5a2   : > { %9996 = vmatpush.bf16.msrb.mxu1 %v13823_v21  ;;  %v8552_v22 = vpop.f32.mrf.mxu1  ;;  %v7162_v26 = vadd.f32 %v16231_v19, %v7149_v35  ;;  %v9171_v19 = vrot.slane %v16004_v4, 5  ;;  %v13768_v21 = vld [vmem:[#allocation10 + $0xff8] sm:$0xff]  ;;  %v8696_v4 = vrot.slane %v16101_v50, 4  ;;  %v13801_v35 = vld [vmem:[#allocation10 + $0x1100] sm:$0xff] }
 0x5a3   : > { %9057 = vmatpush.bf16.msra.mxu2 %v13735_v28  ;;  %8581 = vmatpush.bf16.msrb.mxu0 %v13687_v58  ;;  %v16239_v7 = vpop.f32.mrf.mxu3  ;;  %v13804_v28 = vld [vmem:[#allocation10 + $0x1118] sm:$0xff]  ;;  %v13763_v22 = vld [vmem:[#allocation10 + $0xfd0] sm:$0xff] }
 0x5a4   : > { %v16247_v0 = vadd.f32 %v7162_v26, %v16229_v36  ;;  %v13720_v36 = vld [vmem:[#allocation10 + $0xe78] sm:$0xff]  ;;  %v9645_v26 = vrot.slane %v15930_v34, 5  ;;  %v13751_v34 = vld [vmem:[#allocation10 + $0xf70] sm:$0xff] }
 0x5a5   : > { %9520 = vmatpush.bf16.msrb.mxu3 %v13775_v5  ;;  %v7137_v48 = vpop.f32.mrf.mxu0  ;;  %v13729_v5 = vld [vmem:[#allocation10 + $0xec0] sm:$0xff] }
 0x5a6   : > { %9997 = vmatpush.bf16.msrb.mxu1 %v13822_v15  ;;  %v13719_v15 = vld [vmem:[#allocation10 + $0xe70] sm:$0xff] }
 0x5a7   : > { %9058 = vmatpush.bf16.msra.mxu2 %v13734_v24  ;;  %8582 = vmatpush.bf16.msrb.mxu0 %v13686_v46  ;;  %v13717_v24 = vld [vmem:[#allocation10 + $0xe60] sm:$0xff]  ;;  %v13799_v48 = vld [vmem:[#allocation10 + $0x10f0] sm:$0xff] }
 0x5a9   : > { %9521 = vmatpush.bf16.msrb.mxu3 %v13774_v62  ;;  %v7613_v32 = vpop.f32.mrf.mxu2 }
 0x5aa   : > { %9998 = vmatpush.bf16.msrb.mxu1 %v13821_v6  ;;  %v13803_v6 = vld [vmem:[#allocation10 + $0x1110] sm:$0xff]  ;;  %v13796_v32 = vld [vmem:[#allocation10 + $0x10d8] sm:$0xff] }
 0x5ab   : > { %9059 = vmatpush.bf16.msra.mxu2 %v13733_v60  ;;  %8583 = vmatpush.bf16.msrb.mxu0 %v13685_v52  ;;  %v8076_v18 = vpop.f32.mrf.mxu3  ;;  %v13802_v60 = vld [vmem:[#allocation10 + $0x1108] sm:$0xff] }
 0x5ac   : > { %v13714_v18 = vld [vmem:[#allocation10 + $0xe48] sm:$0xff] }
 0x5ad   : > { %9522 = vmatpush.bf16.msrb.mxu3 %v13773_v12 }
 0x5ae   : > { %9999 = vmatpush.bf16.msrb.mxu1 %v13820_v8  ;;  %v13764_v8 = vld [vmem:[#allocation10 + $0xfd8] sm:$0xff] }
 0x5af   : > { %9060 = vmatpush.bf16.msra.mxu2 %v13732_v27  ;;  %8584 = vmatpush.bf16.msrb.mxu0 %v13684_v53  ;;  %v13762_v53 = vld [vmem:[#allocation10 + $0xfc8] sm:$0xff] }
 0x5b1   : > { %9523 = vmatpush.bf16.msrb.mxu3 %v13772_v29 }
 0x5b2   : > { %10000 = vmatpush.bf16.msrb.mxu1 %v13819_v51  ;;  %v13716_v51 = vld [vmem:[#allocation10 + $0xe58] sm:$0xff] }
 0x5b3   : > { %9061 = vmatpush.bf16.msra.mxu2 %v13731_v54  ;;  %8585 = vmatpush.bf16.msrb.mxu0 %v13683_v59  ;;  %v13800_v54 = vld [vmem:[#allocation10 + $0x10f8] sm:$0xff] }
 0x5b5   : > { %9524 = vmatpush.bf16.msrb.mxu3 %v13771_v55 }
 0x5b6   : > { %10001 = vmatpush.bf16.msrb.mxu1 %v13818_v13 }
 0x5b7   : > { %9062 = vmatpush.bf16.msra.mxu2 %v13730_v44  ;;  %8586 = vmatpush.bf16.msrb.mxu0 %v13682_v11  ;;  %v13750_v44 = vld [vmem:[#allocation10 + $0xf68] sm:$0xff] }
 0x5b9   : > { %9525 = vmatpush.bf16.msrb.mxu3 %v13770_v10  ;;  %v13715_v10 = vld [vmem:[#allocation10 + $0xe50] sm:$0xff] }
 0x5ba   : > { %10002 = vmatpush.bf16.msrb.mxu1 %v13817_v43  ;;  %v16253_v62 = vpop.f32.mrf.mxu1  ;;  %v9170_v43 = vrot.slane %v15898_v61, 5  ;;  %v13749_v61 = vld [vmem:[#allocation10 + $0xf60] sm:$0xff] }
 0x5bb   : > { %9063 = vmatpush.bf16.msra.mxu2 %v13729_v5  ;;  %8587 = vmatpush.bf16.msrb.mxu0 %v13681_v9  ;;  %v13748_v9 = vld [vmem:[#allocation10 + $0xf58] sm:$0xff] }
 0x5bd   : > { %9526 = vmatpush.bf16.msrb.mxu3 %v13769_v41  ;;  %10003 = vmatmul.bf16.vlgmr.msrb.gmra.mxu1 %v9647_v30  ;;  %v7585_v29 = vpop.f32.mrf.mxu0  ;;  %v13713_v41 = vld [vmem:[#allocation10 + $0xe40] sm:$0xff] }
 0x5be   : > { %9064 = vmatmul.bf16.vlgmr.msra.gmra.mxu2 %v8696_v4  ;;  %8588 = vmatmul.bf16.vlgmr.msrb.gmra.mxu0 %v8220_v33  ;;  %v7586_v46 = vadd.f32 %v7585_v29, %v16207_v47  ;;  %v13747_v4 = vld [vmem:[#allocation10 + $0xf50] sm:$0xff]  ;;  %v13794_v33 = vld [vmem:[#allocation10 + $0x10c8] sm:$0xff] }
 0x5bf   : > { %9506 = vmatpush.bf16.msrb.mxu2 %v13768_v21  ;;  %9030 = vmatpush.bf16.msra.mxu0 %v13720_v36  ;;  %v13783_v29 = vld [vmem:[#allocation10 + $0x1070] sm:$0xff] }
 0x5c0   : > { %9527 = vmatmul.bf16.vlgmr.msrb.gmra.mxu3 %v9171_v19  ;;  %v7599_v55 = vadd.f32 %v16189_v17, %v7586_v46  ;;  %v13797_v19 = vld [vmem:[#allocation10 + $0x10e0] sm:$0xff]  ;;  %v13830_v46 = vld [vmem:[#allocation10 + $0x11e8] sm:$0xff] }
 0x5c1   : > { %9969 = vmatpush.bf16.msra.mxu3 %v13808_v42  ;;  %v8061_v57 = vpop.f32.mrf.mxu2  ;;  %v13798_v42 = vld [vmem:[#allocation10 + $0x10e8] sm:$0xff] }
 0x5c2   : > { %v9002_v58 = vpop.f32.mrf.mxu1  ;;  %v7612_v38 = vadd.f32 %v16244_v3, %v7599_v55  ;;  %v8062_v27 = vadd.f32 %v8061_v57, %v16205_v45  ;;  %v13761_v3 = vld [vmem:[#allocation10 + $0xfc0] sm:$0xff]  ;;  %v13828_v57 = vld [vmem:[#allocation10 + $0x11d8] sm:$0xff] }
 0x5c3   : > { %9507 = vmatpush.bf16.msrb.mxu2 %v13767_v14  ;;  %9031 = vmatpush.bf16.msra.mxu0 %v13719_v15  ;;  %v16255_v12 = vpop.f32.mrf.mxu3  ;;  %v13746_v15 = vld [vmem:[#allocation10 + $0xf48] sm:$0xff]  ;;  %v13831_v58 = vld [vmem:[#allocation10 + $0x11f0] sm:$0xff]  ;;  %v13829_v55 = vld [vmem:[#allocation10 + $0x11e0] sm:$0xff] }
 0x5c4   : > { %v7625_v47 = vadd.f32 %v16225_v40, %v7612_v38  ;;  %v16263_v17 = vadd.f32 %v16239_v7, %v8062_v27  ;;  %v13752_v40 = vld [vmem:[#allocation10 + $0xf78] sm:$0xff]  ;;  %v8694_v7 = vrot.slane %v15936_v63, 4 }
 0x5c5   : > { %9970 = vmatpush.bf16.msra.mxu3 %v13807_v20  ;;  %v7587_v13 = vpop.f32.mrf.mxu0 }
 0x5c7   : > { %9508 = vmatpush.bf16.msrb.mxu2 %v13766_v31  ;;  %9032 = vmatpush.bf16.msra.mxu0 %v13718_v16  ;;  %v13793_v31 = vld [vmem:[#allocation10 + $0x10c0] sm:$0xff]  ;;  %v13832_v16 = vld [vmem:[#allocation10 + $0x11f8] sm:$0xff] }
 0x5c9   : > { %9971 = vmatpush.bf16.msra.mxu3 %v13806_v1  ;;  %v8063_v45 = vpop.f32.mrf.mxu2  ;;  %v13795_v1 = vld [vmem:[#allocation10 + $0x10d0] sm:$0xff] }
 0x5ca   : > { %v13778_v45 = vld [vmem:[#allocation10 + $0x1048] sm:$0xff] }
 0x5cb   : > { %9509 = vmatpush.bf16.msrb.mxu2 %v13765_v37  ;;  %9033 = vmatpush.bf16.msra.mxu0 %v13717_v24  ;;  %v8526_v52 = vpop.f32.mrf.mxu3  ;;  %v13745_v37 = vld [vmem:[#allocation10 + $0xf40] sm:$0xff]  ;;  %v9168_v24 = vrot.slane %v16853_v2, 5  ;;  %v13780_v2 = vld [vmem:[#allocation10 + $0x1058] sm:$0xff] }
 0x5cd   : > { %9972 = vmatpush.bf16.msra.mxu3 %v13805_v56 }
 0x5cf   : > { %9510 = vmatpush.bf16.msrb.mxu2 %v13764_v8  ;;  %9034 = vmatpush.bf16.msra.mxu0 %v13716_v51 }
 0x5d1   : > { %9973 = vmatpush.bf16.msra.mxu3 %v13804_v28 }
 0x5d3   : > { %9511 = vmatpush.bf16.msrb.mxu2 %v13763_v22  ;;  %9035 = vmatpush.bf16.msra.mxu0 %v13715_v10  ;;  %v13781_v22 = vld [vmem:[#allocation10 + $0x1060] sm:$0xff] }
 0x5d5   : > { %9974 = vmatpush.bf16.msra.mxu3 %v13803_v6  ;;  %v9644_v6 = vrot.slane %v15933_v49, 5 }
 0x5d7   : > { %9512 = vmatpush.bf16.msrb.mxu2 %v13762_v53  ;;  %9036 = vmatpush.bf16.msra.mxu0 %v13714_v18  ;;  %v13779_v53 = vld [vmem:[#allocation10 + $0x1050] sm:$0xff] }
 0x5d9   : > { %9975 = vmatpush.bf16.msra.mxu3 %v13802_v60  ;;  %v13782_v60 = vld [vmem:[#allocation10 + $0x1068] sm:$0xff] }
 0x5da   : > { %v16268_v59 = vpop.f32.mrf.mxu1 }
 0x5db   : > { %9513 = vmatpush.bf16.msrb.mxu2 %v13761_v3  ;;  %9037 = vmatpush.bf16.msra.mxu0 %v13713_v41  ;;  %v13777_v41 = vld [vmem:[#allocation10 + $0x1040] sm:$0xff] }
 0x5dd   : > { %9976 = vmatpush.bf16.msra.mxu3 %v13801_v35  ;;  %v7637_v20 = vpop.f32.mrf.mxu0  ;;  %v13827_v35 = vld [vmem:[#allocation10 + $0x11d0] sm:$0xff] }
 0x5de   : > { %9514 = vmatmul.bf16.vlgmr.msrb.gmra.mxu2 %v9170_v43  ;;  %9038 = vmatmul.bf16.vlgmr.msra.gmra.mxu0 %v8694_v7  ;;  %v7638_v5 = vadd.f32 %v7637_v20, %v7625_v47  ;;  %v9172_v43 = vrot.slane %v16098_v39, 5 }
 0x5df   : > { %9956 = vmatpush.bf16.msra.mxu2 %v13800_v54  ;;  %9480 = vmatpush.bf16.msrb.mxu0 %v13752_v40  ;;  %v13825_v54 = vld [vmem:[#allocation10 + $0x11c0] sm:$0xff]  ;;  %v9648_v40 = vrot.slane %v16101_v50, 5  ;;  %v13812_v50 = vld [vmem:[#allocation10 + $0x1158] sm:$0xff] }
 0x5e0   : > { %9977 = vmatmul.bf16.vlgmr.msra.gmra.mxu3 %v9645_v26  ;;  %v7641_v21 = vadd.f32 %v7638_v5, %v16247_v0  ;;  %v13784_v0 = vld [vmem:[#allocation10 + $0x1078] sm:$0xff]  ;;  %v13826_v26 = vld [vmem:[#allocation10 + $0x11c8] sm:$0xff] }
 0x5e1   : > { %v8113_v36 = vpop.f32.mrf.mxu2 }
 0x5e2   : > { %v9054_v11 = vpop.f32.mrf.mxu1 }
 0x5e3   : > { %9957 = vmatpush.bf16.msra.mxu2 %v13799_v48  ;;  %9481 = vmatpush.bf16.msrb.mxu0 %v13751_v34  ;;  %v16270_v30 = vpop.f32.mrf.mxu3  ;;  %v13815_v48 = vld [vmem:[#allocation10 + $0x1170] sm:$0xff]  ;;  %v13814_v34 = vld [vmem:[#allocation10 + $0x1168] sm:$0xff] }
 0x5e5   : > { %v7639_v56 = vpop.f32.mrf.mxu0 }
 0x5e7   : > { %9958 = vmatpush.bf16.msra.mxu2 %v13798_v42  ;;  %9482 = vmatpush.bf16.msrb.mxu0 %v13750_v44  ;;  %v13813_v44 = vld [vmem:[#allocation10 + $0x1160] sm:$0xff] }
 0x5e9   : > { %v8115_v28 = vpop.f32.mrf.mxu2 }
 0x5eb   : > { %9959 = vmatpush.bf16.msra.mxu2 %v13797_v19  ;;  %9483 = vmatpush.bf16.msrb.mxu0 %v13749_v61  ;;  %v8578_v14 = vpop.f32.mrf.mxu3 }
 0x5ef   : > { %9960 = vmatpush.bf16.msra.mxu2 %v13796_v32  ;;  %9484 = vmatpush.bf16.msrb.mxu0 %v13748_v9  ;;  %v13811_v9 = vld [vmem:[#allocation10 + $0x1150] sm:$0xff] }
 0x5f3   : > { %9961 = vmatpush.bf16.msra.mxu2 %v13795_v1  ;;  %9485 = vmatpush.bf16.msrb.mxu0 %v13747_v4  ;;  %v13810_v4 = vld [vmem:[#allocation10 + $0x1148] sm:$0xff] }
 0x5f7   : > { %9962 = vmatpush.bf16.msra.mxu2 %v13794_v33  ;;  %9486 = vmatpush.bf16.msrb.mxu0 %v13746_v15  ;;  %v9646_v33 = vrot.slane %v15936_v63, 5 }
 0x5fa   : > { %v16275_v8 = vpop.f32.mrf.mxu1 }
 0x5fb   : > { %9963 = vmatpush.bf16.msra.mxu2 %v13793_v31  ;;  %9487 = vmatpush.bf16.msrb.mxu0 %v13745_v37 }
 0x5fd   : > { %v8087_v52 = vpop.f32.mrf.mxu0 }
 0x5fe   : > { %9964 = vmatmul.bf16.vlgmr.msra.gmra.mxu2 %v9644_v6  ;;  %9488 = vmatmul.bf16.vlgmr.msrb.gmra.mxu0 %v9168_v24  ;;  %v8088_v38 = vadd.f32 %v8087_v52, %v16263_v17 }
 0x5ff   : > { %10008 = vmatpush.bf16.msrb.mxu2 %v13832_v16  ;;  %9532 = vmatpush.bf16.msra.mxu0 %v13784_v0 }
 0x600   : > { %v8101_v27 = vadd.f32 %v16223_v23, %v8088_v38  ;;  %v13816_v23 = vld [vmem:[#allocation10 + $0x1178] sm:$0xff] }
 0x601   : > { %v8563_v47 = vpop.f32.mrf.mxu2 }
 0x602   : > { %v9504_v49 = vpop.f32.mrf.mxu1  ;;  %v8114_v10 = vadd.f32 %v8113_v36, %v8101_v27 }
 0x603   : > { %10009 = vmatpush.bf16.msrb.mxu2 %v13831_v58  ;;  %9533 = vmatpush.bf16.msra.mxu0 %v13783_v29  ;;  %v9026_v51 = vpop.f32.mrf.mxu3 }
 0x604   : > { %v8117_v3 = vadd.f32 %v8114_v10, %v7641_v21 }
 0x605   : > { %v8089_v18 = vpop.f32.mrf.mxu0 }
 0x607   : > { %10010 = vmatpush.bf16.msrb.mxu2 %v13830_v46  ;;  %9534 = vmatpush.bf16.msra.mxu0 %v13782_v60 }
 0x609   : > { %v8565_v17 = vpop.f32.mrf.mxu2 }
 0x60b   : > { %10011 = vmatpush.bf16.msrb.mxu2 %v13829_v55  ;;  %9535 = vmatpush.bf16.msra.mxu0 %v13781_v22  ;;  %v9028_v13 = vpop.f32.mrf.mxu3 }
 0x60c   : > { %v13839_v13 = vld [vmem:[#allocation13 + $0x30] sm:$0xff] }
 0x60f   : > { %10012 = vmatpush.bf16.msrb.mxu2 %v13828_v57  ;;  %9536 = vmatpush.bf16.msra.mxu0 %v13780_v2 }
 0x613   : > { %10013 = vmatpush.bf16.msrb.mxu2 %v13827_v35  ;;  %9537 = vmatpush.bf16.msra.mxu0 %v13779_v53 }
 0x617   : > { %10014 = vmatpush.bf16.msrb.mxu2 %v13826_v26  ;;  %9538 = vmatpush.bf16.msra.mxu0 %v13778_v45  ;;  %v13837_v26 = vld [vmem:[#allocation13 + $0x20] sm:$0xff] }
 0x61a   : > { %v16281_v7 = vpop.f32.mrf.mxu1 }
 0x61b   : > { %10015 = vmatpush.bf16.msrb.mxu2 %v13825_v54  ;;  %9539 = vmatpush.bf16.msra.mxu0 %v13777_v41  ;;  %v13836_v41 = vld [vmem:[#allocation13 + $0x18] sm:$0xff] }
 0x61d   : > { %v8537_v61 = vpop.f32.mrf.mxu0 }
 0x61e   : > { %10016 = vmatmul.bf16.vlgmr.msrb.gmra.mxu2 %v9648_v40  ;;  %9540 = vmatmul.bf16.vlgmr.msra.gmra.mxu0 %v9172_v43  ;;  %v8538_v11 = vadd.f32 %v8537_v61, %v16255_v12  ;;  %v13809_v12 = vld [vmem:[#allocation10 + $0x1140] sm:$0xff]  ;;  %v13834_v40 = vld [vmem:[#allocation13 + $0x8] sm:$0xff] }
 0x61f   : > { %9982 = vmatpush.bf16.msrb.mxu0 %v13816_v23  ;;  %v13835_v23 = vld [vmem:[#allocation13 + $0x10] sm:$0xff]  ;;  %v13833_v43 = vld [vmem:[#allocation13] sm:$0xff] }
 0x620   : > { %v8551_v20 = vadd.f32 %v16237_v25, %v8538_v11  ;;  %v10022_v11 = vld [vmem:[#allocation11] sm:$0x1] }
 0x621   : > { %v9013_v32 = vpop.f32.mrf.mxu2 }
 0x622   : > { %v9954_v19 = vpop.f32.mrf.mxu1  ;;  %v8564_v39 = vadd.f32 %v8563_v47, %v8551_v20  ;;  %v9014_v21 = vadd.f32 %v9013_v32, %v16253_v62  ;;  %v13840_v47 = vld [vmem:[#allocation13 + $0x38] sm:$0xff] }
 0x623   : > { %9983 = vmatpush.bf16.msrb.mxu0 %v13815_v48  ;;  %v9476_v42 = vpop.f32.mrf.mxu3  ;;  %10091 = vmatpush.bf16.msrb.mxu3 %v13840_v47 }
 0x624   : > { %v8577_v1 = vadd.f32 %v16270_v30, %v8564_v39  ;;  %v9027_v14 = vadd.f32 %v9026_v51, %v9014_v21  ;;  %v10042_v21 = vld [vmem:[#allocation14] sm:$0x1] }
 0x625   : > { %v8539_v36 = vpop.f32.mrf.mxu0 }
 0x627   : > { %9984 = vmatpush.bf16.msrb.mxu0 %v13814_v34  ;;  %10092 = vmatpush.bf16.msrb.mxu3 %v13839_v13 }
 0x629   : > { %v9015_v56 = vpop.f32.mrf.mxu2 }
 0x62b   : > { %9985 = vmatpush.bf16.msrb.mxu0 %v13813_v44  ;;  %v9478_v5 = vpop.f32.mrf.mxu3 }
 0x62f   : > { %9986 = vmatpush.bf16.msrb.mxu0 %v13812_v50 }
 0x633   : > { %9987 = vmatpush.bf16.msrb.mxu0 %v13811_v9 }
 0x637   : > { %9988 = vmatpush.bf16.msrb.mxu0 %v13810_v4 }
 0x63a   : > { %v10004_v25 = vpop.f32.mrf.mxu1 }
 0x63b   : > { %9989 = vmatpush.bf16.msrb.mxu0 %v13809_v12  ;;  %v8589_v28 = vpop.f32.mrf.mxu0 }
 0x63c   : > { %v8590_v62 = vadd.f32 %v8589_v28, %v8577_v1 }
 0x63e   : > { %9990 = vmatmul.bf16.vlgmr.msrb.gmra.mxu0 %v9646_v33  ;;  %v8593_v16 = vadd.f32 %v8590_v62, %v8117_v3 }
 0x641   : > { %v9065_v37 = vpop.f32.mrf.mxu2 }
 0x642   : > { %v10006_v31 = vpop.f32.mrf.mxu1 }
 0x643   : > { %v9528_v15 = vpop.f32.mrf.mxu3  ;;  %v8591_v30 = vpop.f32.mrf.mxu0 }
 0x649   : > { %v9067_v6 = vpop.f32.mrf.mxu2 }
 0x64b   : > { %v9530_v0 = vpop.f32.mrf.mxu3 }
 0x65b   : > { %v9039_v24 = vpop.f32.mrf.mxu0 }
 0x65c   : > { %v9040_v29 = vadd.f32 %v9039_v24, %v9027_v14 }
 0x65e   : > { %v9053_v46 = vadd.f32 %v16268_v59, %v9040_v29  ;;  %v13838_v59 = vld [vmem:[#allocation13 + $0x28] sm:$0xff] }
 0x65f   : > { %10093 = vmatpush.bf16.msrb.mxu3 %v13838_v59 }
 0x660   : > { %v9066_v55 = vadd.f32 %v9065_v37, %v9053_v46 }
 0x661   : > { %v9515_v60 = vpop.f32.mrf.mxu2 }
 0x662   : > { %v9069_v22 = vadd.f32 %v9066_v55, %v8593_v16 }
 0x663   : > { %v9978_v58 = vpop.f32.mrf.mxu3  ;;  %v9041_v63 = vpop.f32.mrf.mxu0  ;;  %10094 = vmatpush.bf16.msrb.mxu3 %v13837_v26 }
 0x667   : > { %10095 = vmatpush.bf16.msrb.mxu3 %v13836_v41 }
 0x669   : > { %v9517_v49 = vpop.f32.mrf.mxu2 }
 0x66b   : > { %v9980_v51 = vpop.f32.mrf.mxu3  ;;  %10096 = vmatpush.bf16.msrb.mxu3 %v13835_v23 }
 0x66f   : > { %10097 = vmatpush.bf16.msrb.mxu3 %v13834_v40 }
 0x673   : > { %10098 = vmatpush.bf16.msrb.mxu3 %v13833_v43 }
 0x67b   : > { %v9489_v57 = vpop.f32.mrf.mxu0 }
 0x67c   : > { %v9490_v52 = vadd.f32 %v9489_v57, %v9476_v42 }
 0x67e   : > { %v9503_v38 = vadd.f32 %v16275_v8, %v9490_v52 }
 0x680   : > { %v9516_v27 = vadd.f32 %v9515_v60, %v9503_v38 }
 0x681   : > { %v9965_v2 = vpop.f32.mrf.mxu2 }
 0x682   : > { %v9529_v35 = vadd.f32 %v9528_v15, %v9516_v27  ;;  %v9966_v48 = vadd.f32 %v9965_v2, %v16281_v7 }
 0x683   : > { %v9491_v10 = vpop.f32.mrf.mxu0 }
 0x684   : > { %v9979_v34 = vadd.f32 %v9978_v58, %v9966_v48 }
 0x689   : > { %v9967_v53 = vpop.f32.mrf.mxu2 }
 0x69b   : > { %v9541_v18 = vpop.f32.mrf.mxu0 }
 0x69c   : > { %v9542_v3 = vadd.f32 %v9541_v18, %v9529_v35 }
 0x69e   : > { %v9545_v45 = vadd.f32 %v9542_v3, %v9069_v22 }
 0x6a1   : > { %v10017_v54 = vpop.f32.mrf.mxu2 }
 0x6a3   : > { %v9543_v17 = vpop.f32.mrf.mxu0 }
 0x6a9   : > { %v10019_v8 = vpop.f32.mrf.mxu2 }
 0x6bb   : > { %v9991_v42 = vpop.f32.mrf.mxu0 }
 0x6bc   : > { %v9992_v44 = vadd.f32 %v9991_v42, %v9979_v34 }
 0x6be   : > { %v10005_v19 = vadd.f32 %v10004_v25, %v9992_v44 }
 0x6c0   : > { %v10018_v61 = vadd.f32 %v10017_v54, %v10005_v19 }
 0x6c2   : > { %v10021_v50 = vadd.f32 %v10018_v61, %v9545_v45 }
 0x6c3   : > { %v9993_v20 = vpop.f32.mrf.mxu0 }
 0x6c4   : > { %v10023_v32 = vadd.f32 %v10022_v11, %v10021_v50 }
 0x6c6   : > { %v10024_v5 = vmax.f32 %v10023_v32, 0.0 }
 0x6c8   : > { %v10025_v39 = vpack.c.bf16 %v10024_v5, %v10024_v5 }
 0x6ca   : > { %10099 = vmatmul.bf16.vlgmr.msrb.gmra.mxu3 %v10025_v39 }
 0x74d   : > { %v10100_v9 = vpop.f32.mrf.mxu3 }
 0x74e   : > { %v10101_v1 = vadd.f32 %v10100_v9, %v10042_v21 }
 0x750   : > { %v10105_v7 = vsel %vm10104_vm15, %v10101_v1, -inf }
 0x751   : > { %10106 = vmax.xlane.f32.xlu2 %v10105_v7 }
 0x755   : > { %v10102_v36 = vpop.f32.mrf.mxu3 }
 0x7c4   : > { %v10107_v14 = vpop.xlane.xlu2 %10106 }
 0x7c5   : > { %v10108_v4 = vsub.f32 %v10101_v1, %v10107_v14 }
 0x7c7   : > { %v10109_v56 = vmul.f32 1.442695, %v10108_v4 }
 0x7c9   : > { %13969 = vpow2.f32 %v10109_v56 }
 0x7cf   : > { %v13970_v12 = vpop.eup %13969 }
 0x7d0   : > { %v10111_v33 = vsel %vm10104_vm15, %v13970_v12, 0.0 }
 0x7d1   : > { %10112 = vadd.xlane.f32.xlu2 %v10111_v33 }
 0x844   : > { %v10113_v25 = vpop.xlane.xlu2 %10112 }
 0x845   : > { %13971 = vlog2.f32 %v10113_v25 }
 0x84b   : > { %v13972_v15 = vpop.eup %13971 }
 0x84c   : > { %v10115_v31 = vmul.f32 0.6931472, %v13972_v15 }
 0x84e   : > { %v10116_v28 = vsub.f32 %v10108_v4, %v10115_v31 }
 0x850   : > { %10117 = vst [vmem:[%s449_s29] sm:$0x1] %v10116_v28 }
 0x851   : > { %14240 = shalt.err (!%p14237_p8)
}
 0x852   : > { %13873 = dma.vmem_to_hbm [thread:$0]  (%p14401_p5), %s10130_s27, 16, %s10132_s1, %s10119_s28  }
 0x853 PF: > { %p13920_p9 = scmp.ge.s32.totalorder %s14295_s12, 2  ;;  %s10143_s14 = sand.u32 1, %s14283_s30  }
 0x854   : > { %s10144_s18 = scalar_lea.sflag [#allocation4], %s10143_s14 }
 0x855   : > { %p13901_p10 = pnand %p13920_p9, %p14405_p6 }
 0x857   : > { %p13902_p11 = pneg %p13901_p10 }
 0x859   : > { %14278 = dma.done.wait (%p13902_p11), %s10144_s18, 16  }
 0x85a   : > { %14280 = vsyncadd (%p13902_p11), %s10144_s18, 4294967280  ;;  %s16854_s16 = sld [smem:[#allocation23_spill]]  ;;  %p24_p12 = scmp.ge.s32.totalorder %s14388_s15, 4  }
 0x85b   : > { %s16855_s30 = smov %s14287_s10  ;;  %s16856_s10 = smov %s14291_s11 }
 0x85c   : > { %s16858_s12 = smov %s14388_s15  ;;  %26 = sbr.rel (!%p24_p12) target bundleno = 14 (0xe), region = 137 }
 0x860   : > { %s16857_s11 = smov %s16854_s16 }
 0x861   :  { %10149 = vsyncpa [#allocation3], 1 }
 0x862   :  { %10151 = vsyncpa [#allocation3 + $0x1], 1 }
 0x863   :  { %10152 = vsyncpa [#allocation6], 1 }
 0x864   :  { %10153 = vsyncpa [#allocation9], 1 }
 0x865   :  { %10154 = vsyncpa [#allocation12], 1 }
 0x866   :  { %10155 = vsyncpa [#allocation15], 1 }
 0x867   :  { %10156 = vsyncpa [#allocation4], 1 }
 0x868   :  { %10158 = vsyncpa [#allocation4 + $0x1], 1 }

</bundles_post_ra>
